<compile_context>
chip_gen: v6e
topology: v6e:2x2x1
jax: 0.10.0
libtpu: 0.0.40
codegen_flags: <defaults>
</compile_context>

<pallas_src>
import jax
import jax.numpy as jnp
from jax.experimental import pallas as pl
from jax.experimental.pallas import tpu as pltpu

WORD_NUM = 50     # vocabulary size (`word_num` in the original script)
EMB = 64          # embedding dim (LSTMCell input size)
HID = 10          # LSTMCell hidden size
SEQ = 200         # forward does output.view(-1, 2000) => SEQ * HID == 2000
BATCH = 2
L1_OUT = 1024
L2_OUT = 10
CHUNK = 25        # LSTM steps per grid iteration (SEQ % CHUNK == 0)
N_CHUNKS = SEQ // CHUNK


def lstm_fused_kernel(pre_ref, whh_ref, w1_ref, b1_ref, w2_ref, b2_ref,
                      out_ref, h_ref, c_ref, acc_ref):
    """One grid step = CHUNK serial LSTMCell steps + their Linear1 partial sums.

    pre_ref: (CHUNK, 4, B, HID)    f32  x_t @ W_ih^T + (b_ih + b_hh), gate-split
    whh_ref: (4, HID, HID)         f32  per-gate W_hh^T, order (i, f, g, o)
    w1_ref : (CHUNK, HID, L1_OUT)  bf16 Linear1 weight, per-seq-step slabs
    b1_ref : (1, L1_OUT)           f32
    w2_ref : (L1_OUT, L2_OUT)      bf16 Linear2 weight^T
    b2_ref : (1, L2_OUT)           f32
    out_ref: (B, L2_OUT)           f32  final logits (written on last grid step)
    h_ref, c_ref : (B, HID)    f32 scratch -- recurrent state across grid steps
    acc_ref      : (B, L1_OUT) f32 scratch -- Linear1 accumulator (off the carry)
    """
    B = pre_ref.shape[2]
    tt = pl.program_id(0)

    @pl.when(tt == 0)
    def _init():
        h_ref[...] = jnp.zeros_like(h_ref)
        c_ref[...] = jnp.zeros_like(c_ref)
        acc_ref[...] = jnp.zeros_like(acc_ref)

    # Per-gate hidden->gate weights: every gate result lands at lanes 0..HID-1,
    # so no cross-lane slicing sits on the serial h/c chain.
    whh_i = whh_ref[0]
    whh_f = whh_ref[1]
    whh_g = whh_ref[2]
    whh_o = whh_ref[3]

    h = h_ref[...]
    c = c_ref[...]
    acc = jnp.zeros((B, L1_OUT), jnp.float32)
    for u in range(CHUNK):                       # fully unrolled for the scheduler
        i_g = jax.nn.sigmoid(pre_ref[u, 0] + jnp.dot(
            h, whh_i, preferred_element_type=jnp.float32))
        f_g = jax.nn.sigmoid(pre_ref[u, 1] + jnp.dot(
            h, whh_f, preferred_element_type=jnp.float32))
        g_g = jnp.tanh(pre_ref[u, 2] + jnp.dot(
            h, whh_g, preferred_element_type=jnp.float32))
        o_g = jax.nn.sigmoid(pre_ref[u, 3] + jnp.dot(
            h, whh_o, preferred_element_type=jnp.float32))
        c = f_g * c + i_g * g_g
        h = o_g * jnp.tanh(c)
        # Fused Linear1 partial sum: off the h/c critical chain, free MXU filler.
        acc = acc + jnp.dot(h.astype(jnp.bfloat16), w1_ref[u],
                            preferred_element_type=jnp.float32)

    h_ref[...] = h
    c_ref[...] = c
    acc_ref[...] += acc

    @pl.when(tt == pl.num_programs(0) - 1)
    def _epilogue():
        x1 = acc_ref[...] + b1_ref[...]                       # (B, L1_OUT) f32
        out_ref[...] = (jnp.dot(x1.astype(jnp.bfloat16), w2_ref[...],
                                preferred_element_type=jnp.float32)
                        + b2_ref[...])


def init_params(key):
    ks = jax.random.split(key, 9)
    u = lambda k, shape, bound: jax.random.uniform(
        k, shape, jnp.float32, minval=-bound, maxval=bound)
    emb_tbl = jax.random.normal(ks[0], (WORD_NUM, EMB), jnp.float32)
    s_lstm = 1.0 / jnp.sqrt(HID)
    w_ih = u(ks[1], (4 * HID, EMB), s_lstm)       # PyTorch LSTMCell layout (i,f,g,o)
    w_hh = u(ks[2], (4 * HID, HID), s_lstm)
    b_ih = u(ks[3], (4 * HID,), s_lstm)
    b_hh = u(ks[4], (4 * HID,), s_lstm)
    s1 = 1.0 / jnp.sqrt(SEQ * HID)
    w1 = u(ks[5], (L1_OUT, SEQ * HID), s1)        # Linear(2000, 1024)
    b1 = u(ks[6], (L1_OUT,), s1)
    s2 = 1.0 / jnp.sqrt(L1_OUT)
    w2 = u(ks[7], (L2_OUT, L1_OUT), s2)           # Linear(1024, 10)
    b2 = u(ks[8], (L2_OUT,), s2)
    return dict(emb=emb_tbl, w_ih=w_ih, w_hh=w_hh, b_ih=b_ih, b_hh=b_hh,
                w1=w1, b1=b1, w2=w2, b2=b2)


def model_forward(tokens, p):
    B = tokens.shape[0]

    # ---- XLA glue: embedding gather + hoisted input projection (one GEMM) ----
    x_emb = p["emb"][tokens].astype(jnp.float32)              # (B, SEQ, EMB)
    x_t = jnp.transpose(x_emb, (1, 0, 2))                     # (SEQ, B, EMB)
    bg = (p["b_ih"] + p["b_hh"]).astype(jnp.float32)          # (4*HID,)
    pre = x_t.reshape(SEQ * B, EMB) @ p["w_ih"].T + bg        # (SEQ*B, 4*HID)
    # gate-split layout (SEQ, 4, B, HID): gates i/f/g/o all live at lanes 0..HID-1
    pre = pre.reshape(SEQ, B, 4, HID).transpose(0, 2, 1, 3).astype(jnp.float32)

    # per-gate W_hh^T: whh[g] is (HID_in, HID_gate)
    whh = p["w_hh"].reshape(4, HID, HID).transpose(0, 2, 1).astype(jnp.float32)
    # Linear1 weight as per-seq-step slabs: w1_seq[t, d, o] = W1[o, t*HID + d]
    w1_seq = (p["w1"].reshape(L1_OUT, SEQ, HID)
              .transpose(1, 2, 0).astype(jnp.bfloat16))        # (SEQ, HID, L1_OUT)
    b1 = p["b1"].reshape(1, L1_OUT).astype(jnp.float32)
    w2 = p["w2"].T.astype(jnp.bfloat16)                        # (L1_OUT, L2_OUT)
    b2 = p["b2"].reshape(1, L2_OUT).astype(jnp.float32)

    grid_spec = pltpu.PrefetchScalarGridSpec(
        num_scalar_prefetch=0,
        grid=(N_CHUNKS,),
        in_specs=[
            pl.BlockSpec((CHUNK, 4, B, HID), lambda i: (i, 0, 0, 0)),   # pre
            pl.BlockSpec((4, HID, HID), lambda i: (0, 0, 0)),           # W_hh (resident)
            pl.BlockSpec((CHUNK, HID, L1_OUT), lambda i: (i, 0, 0)),    # W1 chunk (pipelined)
            pl.BlockSpec((1, L1_OUT), lambda i: (0, 0)),                # b1
            pl.BlockSpec((L1_OUT, L2_OUT), lambda i: (0, 0)),           # W2^T
            pl.BlockSpec((1, L2_OUT), lambda i: (0, 0)),                # b2
        ],
        out_specs=pl.BlockSpec((B, L2_OUT), lambda i: (0, 0)),
        scratch_shapes=[
            pltpu.VMEM((B, HID), jnp.float32),      # h
            pltpu.VMEM((B, HID), jnp.float32),      # c
            pltpu.VMEM((B, L1_OUT), jnp.float32),   # Linear1 accumulator
        ],
    )

    return pl.pallas_call(
        lstm_fused_kernel,
        out_shape=jax.ShapeDtypeStruct((B, L2_OUT), jnp.float32),
        grid_spec=grid_spec,
        compiler_params=pltpu.CompilerParams(
            dimension_semantics=("arbitrary",)),    # serial recurrence over chunks
    )(pre, whh, w1_seq, b1, w2, b2)


if __name__ == "__main__":
    key = jax.random.PRNGKey(0)
    pkey, xkey = jax.random.split(key)
    params = init_params(pkey)
    tokens = jax.random.randint(xkey, (BATCH, SEQ), 0, WORD_NUM, dtype=jnp.int32)

    fwd = jax.jit(model_forward)
    out = jax.block_until_ready(fwd(tokens, params))
    assert out.shape == (BATCH, L2_OUT) and out.dtype == jnp.float32
    print("KERNEL_OK")
</pallas_src>

<mosaic_0001>
module attributes {stable_mosaic.version = 11 : i64} {
  func.func @lstm_fused_kernel(%arg0: i32, %arg1: memref<25x4x2x10xf32, #tpu.memory_space<vmem>>, %arg2: memref<4x10x10xf32, #tpu.memory_space<vmem>>, %arg3: memref<25x10x1024xbf16, #tpu.memory_space<vmem>>, %arg4: memref<1x1024xf32, #tpu.memory_space<vmem>>, %arg5: memref<1024x10xbf16, #tpu.memory_space<vmem>>, %arg6: memref<1x10xf32, #tpu.memory_space<vmem>>, %arg7: memref<2x10xf32, #tpu.memory_space<vmem>>, %arg8: memref<2x10xf32, #tpu.memory_space<vmem>>, %arg9: memref<2x10xf32, #tpu.memory_space<vmem>>, %arg10: memref<2x1024xf32, #tpu.memory_space<vmem>>) attributes {dimension_semantics = [#tpu.dimension_semantics<arbitrary>], iteration_bounds = array<i64: 8>, scalar_prefetch = 0 : i64, scratch_operands = 3 : i64, tpu.core_type = #tpu.core_type<tc>, window_params = [{transform_indices = @transform_0, window_bounds = array<i64: 25, 4, 2, 10>}, {pipeline_mode = #tpu.pipeline_mode<synchronous>, transform_indices = @transform_1, window_bounds = array<i64: 4, 10, 10>}, {transform_indices = @transform_2, window_bounds = array<i64: 25, 10, 1024>}, {pipeline_mode = #tpu.pipeline_mode<synchronous>, transform_indices = @transform_3, window_bounds = array<i64: 1, 1024>}, {pipeline_mode = #tpu.pipeline_mode<synchronous>, transform_indices = @transform_4, window_bounds = array<i64: 1024, 10>}, {pipeline_mode = #tpu.pipeline_mode<synchronous>, transform_indices = @transform_5, window_bounds = array<i64: 1, 10>}, {pipeline_mode = #tpu.pipeline_mode<synchronous>, transform_indices = @transform_6, window_bounds = array<i64: 2, 10>}]} {
    %c0_i32 = arith.constant 0 : i32
    %0 = arith.cmpi eq, %arg0, %c0_i32 : i32
    %1 = arith.extui %0 : i1 to i32
    %c0_i32_0 = arith.constant 0 : i32
    %2 = arith.cmpi ne, %1, %c0_i32_0 : i32
    scf.if %2 {
      %cst_676 = arith.constant 0.000000e+00 : f32
      %1072 = vector.broadcast %cst_676 : f32 to vector<2x10xf32>
      %c0_677 = arith.constant 0 : index
      %c0_678 = arith.constant 0 : index
      %1073 = vector.load %arg8[%c0_677, %c0_678] : memref<2x10xf32, #tpu.memory_space<vmem>>, vector<2x10xf32>
      tpu.vector_store %arg8[%c0_677, %c0_678], %1072 {strides = array<i32>} : memref<2x10xf32, #tpu.memory_space<vmem>>, vector<2x10xf32>,
      %cst_679 = arith.constant 0.000000e+00 : f32
      %1074 = vector.broadcast %cst_679 : f32 to vector<2x10xf32>
      %c0_680 = arith.constant 0 : index
      %c0_681 = arith.constant 0 : index
      %1075 = vector.load %arg9[%c0_680, %c0_681] : memref<2x10xf32, #tpu.memory_space<vmem>>, vector<2x10xf32>
      tpu.vector_store %arg9[%c0_680, %c0_681], %1074 {strides = array<i32>} : memref<2x10xf32, #tpu.memory_space<vmem>>, vector<2x10xf32>,
      %cst_682 = arith.constant 0.000000e+00 : f32
      %1076 = vector.broadcast %cst_682 : f32 to vector<2x1024xf32>
      %c0_683 = arith.constant 0 : index
      %c0_684 = arith.constant 0 : index
      %1077 = vector.load %arg10[%c0_683, %c0_684] : memref<2x1024xf32, #tpu.memory_space<vmem>>, vector<2x1024xf32>
      tpu.vector_store %arg10[%c0_683, %c0_684], %1076 {strides = array<i32>} : memref<2x1024xf32, #tpu.memory_space<vmem>>, vector<2x1024xf32>,
    } else {
    }
    %c0 = arith.constant 0 : index
    %c0_1 = arith.constant 0 : index
    %c0_2 = arith.constant 0 : index
    %3 = vector.load %arg2[%c0, %c0_1, %c0_2] : memref<4x10x10xf32, #tpu.memory_space<vmem>>, vector<1x10x10xf32>
    %4 = vector.shape_cast %3 : vector<1x10x10xf32> to vector<10x10xf32>
    %c1 = arith.constant 1 : index
    %c0_3 = arith.constant 0 : index
    %c0_4 = arith.constant 0 : index
    %5 = vector.load %arg2[%c1, %c0_3, %c0_4] : memref<4x10x10xf32, #tpu.memory_space<vmem>>, vector<1x10x10xf32>
    %6 = vector.shape_cast %5 : vector<1x10x10xf32> to vector<10x10xf32>
    %c2 = arith.constant 2 : index
    %c0_5 = arith.constant 0 : index
    %c0_6 = arith.constant 0 : index
    %7 = vector.load %arg2[%c2, %c0_5, %c0_6] : memref<4x10x10xf32, #tpu.memory_space<vmem>>, vector<1x10x10xf32>
    %8 = vector.shape_cast %7 : vector<1x10x10xf32> to vector<10x10xf32>
    %c3 = arith.constant 3 : index
    %c0_7 = arith.constant 0 : index
    %c0_8 = arith.constant 0 : index
    %9 = vector.load %arg2[%c3, %c0_7, %c0_8] : memref<4x10x10xf32, #tpu.memory_space<vmem>>, vector<1x10x10xf32>
    %10 = vector.shape_cast %9 : vector<1x10x10xf32> to vector<10x10xf32>
    %c0_9 = arith.constant 0 : index
    %c0_10 = arith.constant 0 : index
    %11 = vector.load %arg8[%c0_9, %c0_10] : memref<2x10xf32, #tpu.memory_space<vmem>>, vector<2x10xf32>
    %c0_11 = arith.constant 0 : index
    %c0_12 = arith.constant 0 : index
    %12 = vector.load %arg9[%c0_11, %c0_12] : memref<2x10xf32, #tpu.memory_space<vmem>>, vector<2x10xf32>
    %cst = arith.constant 0.000000e+00 : f32
    %13 = vector.broadcast %cst : f32 to vector<2x1024xf32>
    %c0_13 = arith.constant 0 : index
    %c0_14 = arith.constant 0 : index
    %c0_15 = arith.constant 0 : index
    %c0_16 = arith.constant 0 : index
    %14 = vector.load %arg1[%c0_13, %c0_14, %c0_15, %c0_16] : memref<25x4x2x10xf32, #tpu.memory_space<vmem>>, vector<1x1x2x10xf32>
    %15 = vector.shape_cast %14 : vector<1x1x2x10xf32> to vector<2x10xf32>
    %cst_17 = arith.constant dense<0.000000e+00> : vector<2x10xf32>
    %16 = tpu.matmul %11, %4, %cst_17 {dimension_numbers = #tpu.dot_dimension_numbers<[1], [0], [0], [1], [0, 0, 1, 1], [], []>} : vector<2x10xf32>, vector<10x10xf32>, vector<2x10xf32> -> vector<2x10xf32>
    %17 = arith.addf %15, %16 : vector<2x10xf32>
    %18 = arith.negf %17 : vector<2x10xf32>
    %19 = math.exp %18 : vector<2x10xf32>
    %cst_18 = arith.constant 1.000000e+00 : f32
    %20 = vector.broadcast %cst_18 : f32 to vector<2x10xf32>
    %21 = arith.addf %20, %19 : vector<2x10xf32>
    %22 = arith.divf %20, %21 : vector<2x10xf32>
    %c0_19 = arith.constant 0 : index
    %c1_20 = arith.constant 1 : index
    %c0_21 = arith.constant 0 : index
    %c0_22 = arith.constant 0 : index
    %23 = vector.load %arg1[%c0_19, %c1_20, %c0_21, %c0_22] : memref<25x4x2x10xf32, #tpu.memory_space<vmem>>, vector<1x1x2x10xf32>
    %24 = vector.shape_cast %23 : vector<1x1x2x10xf32> to vector<2x10xf32>
    %cst_23 = arith.constant dense<0.000000e+00> : vector<2x10xf32>
    %25 = tpu.matmul %11, %6, %cst_23 {dimension_numbers = #tpu.dot_dimension_numbers<[1], [0], [0], [1], [0, 0, 1, 1], [], []>} : vector<2x10xf32>, vector<10x10xf32>, vector<2x10xf32> -> vector<2x10xf32>
    %26 = arith.addf %24, %25 : vector<2x10xf32>
    %27 = arith.negf %26 : vector<2x10xf32>
    %28 = math.exp %27 : vector<2x10xf32>
    %cst_24 = arith.constant 1.000000e+00 : f32
    %29 = vector.broadcast %cst_24 : f32 to vector<2x10xf32>
    %30 = arith.addf %29, %28 : vector<2x10xf32>
    %31 = arith.divf %29, %30 : vector<2x10xf32>
    %c0_25 = arith.constant 0 : index
    %c2_26 = arith.constant 2 : index
    %c0_27 = arith.constant 0 : index
    %c0_28 = arith.constant 0 : index
    %32 = vector.load %arg1[%c0_25, %c2_26, %c0_27, %c0_28] : memref<25x4x2x10xf32, #tpu.memory_space<vmem>>, vector<1x1x2x10xf32>
    %33 = vector.shape_cast %32 : vector<1x1x2x10xf32> to vector<2x10xf32>
    %cst_29 = arith.constant dense<0.000000e+00> : vector<2x10xf32>
    %34 = tpu.matmul %11, %8, %cst_29 {dimension_numbers = #tpu.dot_dimension_numbers<[1], [0], [0], [1], [0, 0, 1, 1], [], []>} : vector<2x10xf32>, vector<10x10xf32>, vector<2x10xf32> -> vector<2x10xf32>
    %35 = arith.addf %33, %34 : vector<2x10xf32>
    %36 = math.tanh %35 : vector<2x10xf32>
    %c0_30 = arith.constant 0 : index
    %c3_31 = arith.constant 3 : index
    %c0_32 = arith.constant 0 : index
    %c0_33 = arith.constant 0 : index
    %37 = vector.load %arg1[%c0_30, %c3_31, %c0_32, %c0_33] : memref<25x4x2x10xf32, #tpu.memory_space<vmem>>, vector<1x1x2x10xf32>
    %38 = vector.shape_cast %37 : vector<1x1x2x10xf32> to vector<2x10xf32>
    %cst_34 = arith.constant dense<0.000000e+00> : vector<2x10xf32>
    %39 = tpu.matmul %11, %10, %cst_34 {dimension_numbers = #tpu.dot_dimension_numbers<[1], [0], [0], [1], [0, 0, 1, 1], [], []>} : vector<2x10xf32>, vector<10x10xf32>, vector<2x10xf32> -> vector<2x10xf32>
    %40 = arith.addf %38, %39 : vector<2x10xf32>
    %41 = arith.negf %40 : vector<2x10xf32>
    %42 = math.exp %41 : vector<2x10xf32>
    %cst_35 = arith.constant 1.000000e+00 : f32
    %43 = vector.broadcast %cst_35 : f32 to vector<2x10xf32>
    %44 = arith.addf %43, %42 : vector<2x10xf32>
    %45 = arith.divf %43, %44 : vector<2x10xf32>
    %46 = arith.mulf %31, %12 : vector<2x10xf32>
    %47 = arith.mulf %22, %36 : vector<2x10xf32>
    %48 = arith.addf %46, %47 : vector<2x10xf32>
    %49 = math.tanh %48 : vector<2x10xf32>
    %50 = arith.mulf %45, %49 : vector<2x10xf32>
    %51 = arith.truncf %50 : vector<2x10xf32> to vector<2x10xbf16>
    %c0_36 = arith.constant 0 : index
    %c0_37 = arith.constant 0 : index
    %c0_38 = arith.constant 0 : index
    %52 = vector.load %arg3[%c0_36, %c0_37, %c0_38] : memref<25x10x1024xbf16, #tpu.memory_space<vmem>>, vector<1x10x1024xbf16>
    %53 = vector.shape_cast %52 : vector<1x10x1024xbf16> to vector<10x1024xbf16>
    %cst_39 = arith.constant dense<0.000000e+00> : vector<2x1024xf32>
    %54 = tpu.matmul %51, %53, %cst_39 {dimension_numbers = #tpu.dot_dimension_numbers<[1], [0], [0], [1], [0, 0, 1, 1], [], []>} : vector<2x10xbf16>, vector<10x1024xbf16>, vector<2x1024xf32> -> vector<2x1024xf32>
    %55 = arith.addf %13, %54 : vector<2x1024xf32>
    %c1_40 = arith.constant 1 : index
    %c0_41 = arith.constant 0 : index
    %c0_42 = arith.constant 0 : index
    %c0_43 = arith.constant 0 : index
    %56 = vector.load %arg1[%c1_40, %c0_41, %c0_42, %c0_43] : memref<25x4x2x10xf32, #tpu.memory_space<vmem>>, vector<1x1x2x10xf32>
    %57 = vector.shape_cast %56 : vector<1x1x2x10xf32> to vector<2x10xf32>
    %cst_44 = arith.constant dense<0.000000e+00> : vector<2x10xf32>
    %58 = tpu.matmul %50, %4, %cst_44 {dimension_numbers = #tpu.dot_dimension_numbers<[1], [0], [0], [1], [0, 0, 1, 1], [], []>} : vector<2x10xf32>, vector<10x10xf32>, vector<2x10xf32> -> vector<2x10xf32>
    %59 = arith.addf %57, %58 : vector<2x10xf32>
    %60 = arith.negf %59 : vector<2x10xf32>
    %61 = math.exp %60 : vector<2x10xf32>
    %cst_45 = arith.constant 1.000000e+00 : f32
    %62 = vector.broadcast %cst_45 : f32 to vector<2x10xf32>
    %63 = arith.addf %62, %61 : vector<2x10xf32>
    %64 = arith.divf %62, %63 : vector<2x10xf32>
    %c1_46 = arith.constant 1 : index
    %c1_47 = arith.constant 1 : index
    %c0_48 = arith.constant 0 : index
    %c0_49 = arith.constant 0 : index
    %65 = vector.load %arg1[%c1_46, %c1_47, %c0_48, %c0_49] : memref<25x4x2x10xf32, #tpu.memory_space<vmem>>, vector<1x1x2x10xf32>
    %66 = vector.shape_cast %65 : vector<1x1x2x10xf32> to vector<2x10xf32>
    %cst_50 = arith.constant dense<0.000000e+00> : vector<2x10xf32>
    %67 = tpu.matmul %50, %6, %cst_50 {dimension_numbers = #tpu.dot_dimension_numbers<[1], [0], [0], [1], [0, 0, 1, 1], [], []>} : vector<2x10xf32>, vector<10x10xf32>, vector<2x10xf32> -> vector<2x10xf32>
    %68 = arith.addf %66, %67 : vector<2x10xf32>
    %69 = arith.negf %68 : vector<2x10xf32>
    %70 = math.exp %69 : vector<2x10xf32>
    %cst_51 = arith.constant 1.000000e+00 : f32
    %71 = vector.broadcast %cst_51 : f32 to vector<2x10xf32>
    %72 = arith.addf %71, %70 : vector<2x10xf32>
    %73 = arith.divf %71, %72 : vector<2x10xf32>
    %c1_52 = arith.constant 1 : index
    %c2_53 = arith.constant 2 : index
    %c0_54 = arith.constant 0 : index
    %c0_55 = arith.constant 0 : index
    %74 = vector.load %arg1[%c1_52, %c2_53, %c0_54, %c0_55] : memref<25x4x2x10xf32, #tpu.memory_space<vmem>>, vector<1x1x2x10xf32>
    %75 = vector.shape_cast %74 : vector<1x1x2x10xf32> to vector<2x10xf32>
    %cst_56 = arith.constant dense<0.000000e+00> : vector<2x10xf32>
    %76 = tpu.matmul %50, %8, %cst_56 {dimension_numbers = #tpu.dot_dimension_numbers<[1], [0], [0], [1], [0, 0, 1, 1], [], []>} : vector<2x10xf32>, vector<10x10xf32>, vector<2x10xf32> -> vector<2x10xf32>
    %77 = arith.addf %75, %76 : vector<2x10xf32>
    %78 = math.tanh %77 : vector<2x10xf32>
    %c1_57 = arith.constant 1 : index
    %c3_58 = arith.constant 3 : index
    %c0_59 = arith.constant 0 : index
    %c0_60 = arith.constant 0 : index
    %79 = vector.load %arg1[%c1_57, %c3_58, %c0_59, %c0_60] : memref<25x4x2x10xf32, #tpu.memory_space<vmem>>, vector<1x1x2x10xf32>
    %80 = vector.shape_cast %79 : vector<1x1x2x10xf32> to vector<2x10xf32>
    %cst_61 = arith.constant dense<0.000000e+00> : vector<2x10xf32>
    %81 = tpu.matmul %50, %10, %cst_61 {dimension_numbers = #tpu.dot_dimension_numbers<[1], [0], [0], [1], [0, 0, 1, 1], [], []>} : vector<2x10xf32>, vector<10x10xf32>, vector<2x10xf32> -> vector<2x10xf32>
    %82 = arith.addf %80, %81 : vector<2x10xf32>
    %83 = arith.negf %82 : vector<2x10xf32>
    %84 = math.exp %83 : vector<2x10xf32>
    %cst_62 = arith.constant 1.000000e+00 : f32
    %85 = vector.broadcast %cst_62 : f32 to vector<2x10xf32>
    %86 = arith.addf %85, %84 : vector<2x10xf32>
    %87 = arith.divf %85, %86 : vector<2x10xf32>
    %88 = arith.mulf %73, %48 : vector<2x10xf32>
    %89 = arith.mulf %64, %78 : vector<2x10xf32>
    %90 = arith.addf %88, %89 : vector<2x10xf32>
    %91 = math.tanh %90 : vector<2x10xf32>
    %92 = arith.mulf %87, %91 : vector<2x10xf32>
    %93 = arith.truncf %92 : vector<2x10xf32> to vector<2x10xbf16>
    %c1_63 = arith.constant 1 : index
    %c0_64 = arith.constant 0 : index
    %c0_65 = arith.constant 0 : index
    %94 = vector.load %arg3[%c1_63, %c0_64, %c0_65] : memref<25x10x1024xbf16, #tpu.memory_space<vmem>>, vector<1x10x1024xbf16>
    %95 = vector.shape_cast %94 : vector<1x10x1024xbf16> to vector<10x1024xbf16>
    %cst_66 = arith.constant dense<0.000000e+00> : vector<2x1024xf32>
    %96 = tpu.matmul %93, %95, %cst_66 {dimension_numbers = #tpu.dot_dimension_numbers<[1], [0], [0], [1], [0, 0, 1, 1], [], []>} : vector<2x10xbf16>, vector<10x1024xbf16>, vector<2x1024xf32> -> vector<2x1024xf32>
    %97 = arith.addf %55, %96 : vector<2x1024xf32>
    %c2_67 = arith.constant 2 : index
    %c0_68 = arith.constant 0 : index
    %c0_69 = arith.constant 0 : index
    %c0_70 = arith.constant 0 : index
    %98 = vector.load %arg1[%c2_67, %c0_68, %c0_69, %c0_70] : memref<25x4x2x10xf32, #tpu.memory_space<vmem>>, vector<1x1x2x10xf32>
    %99 = vector.shape_cast %98 : vector<1x1x2x10xf32> to vector<2x10xf32>
    %cst_71 = arith.constant dense<0.000000e+00> : vector<2x10xf32>
    %100 = tpu.matmul %92, %4, %cst_71 {dimension_numbers = #tpu.dot_dimension_numbers<[1], [0], [0], [1], [0, 0, 1, 1], [], []>} : vector<2x10xf32>, vector<10x10xf32>, vector<2x10xf32> -> vector<2x10xf32>
    %101 = arith.addf %99, %100 : vector<2x10xf32>
    %102 = arith.negf %101 : vector<2x10xf32>
    %103 = math.exp %102 : vector<2x10xf32>
    %cst_72 = arith.constant 1.000000e+00 : f32
    %104 = vector.broadcast %cst_72 : f32 to vector<2x10xf32>
    %105 = arith.addf %104, %103 : vector<2x10xf32>
    %106 = arith.divf %104, %105 : vector<2x10xf32>
    %c2_73 = arith.constant 2 : index
    %c1_74 = arith.constant 1 : index
    %c0_75 = arith.constant 0 : index
    %c0_76 = arith.constant 0 : index
    %107 = vector.load %arg1[%c2_73, %c1_74, %c0_75, %c0_76] : memref<25x4x2x10xf32, #tpu.memory_space<vmem>>, vector<1x1x2x10xf32>
    %108 = vector.shape_cast %107 : vector<1x1x2x10xf32> to vector<2x10xf32>
    %cst_77 = arith.constant dense<0.000000e+00> : vector<2x10xf32>
    %109 = tpu.matmul %92, %6, %cst_77 {dimension_numbers = #tpu.dot_dimension_numbers<[1], [0], [0], [1], [0, 0, 1, 1], [], []>} : vector<2x10xf32>, vector<10x10xf32>, vector<2x10xf32> -> vector<2x10xf32>
    %110 = arith.addf %108, %109 : vector<2x10xf32>
    %111 = arith.negf %110 : vector<2x10xf32>
    %112 = math.exp %111 : vector<2x10xf32>
    %cst_78 = arith.constant 1.000000e+00 : f32
    %113 = vector.broadcast %cst_78 : f32 to vector<2x10xf32>
    %114 = arith.addf %113, %112 : vector<2x10xf32>
    %115 = arith.divf %113, %114 : vector<2x10xf32>
    %c2_79 = arith.constant 2 : index
    %c2_80 = arith.constant 2 : index
    %c0_81 = arith.constant 0 : index
    %c0_82 = arith.constant 0 : index
    %116 = vector.load %arg1[%c2_79, %c2_80, %c0_81, %c0_82] : memref<25x4x2x10xf32, #tpu.memory_space<vmem>>, vector<1x1x2x10xf32>
    %117 = vector.shape_cast %116 : vector<1x1x2x10xf32> to vector<2x10xf32>
    %cst_83 = arith.constant dense<0.000000e+00> : vector<2x10xf32>
    %118 = tpu.matmul %92, %8, %cst_83 {dimension_numbers = #tpu.dot_dimension_numbers<[1], [0], [0], [1], [0, 0, 1, 1], [], []>} : vector<2x10xf32>, vector<10x10xf32>, vector<2x10xf32> -> vector<2x10xf32>
    %119 = arith.addf %117, %118 : vector<2x10xf32>
    %120 = math.tanh %119 : vector<2x10xf32>
    %c2_84 = arith.constant 2 : index
    %c3_85 = arith.constant 3 : index
    %c0_86 = arith.constant 0 : index
    %c0_87 = arith.constant 0 : index
    %121 = vector.load %arg1[%c2_84, %c3_85, %c0_86, %c0_87] : memref<25x4x2x10xf32, #tpu.memory_space<vmem>>, vector<1x1x2x10xf32>
    %122 = vector.shape_cast %121 : vector<1x1x2x10xf32> to vector<2x10xf32>
    %cst_88 = arith.constant dense<0.000000e+00> : vector<2x10xf32>
    %123 = tpu.matmul %92, %10, %cst_88 {dimension_numbers = #tpu.dot_dimension_numbers<[1], [0], [0], [1], [0, 0, 1, 1], [], []>} : vector<2x10xf32>, vector<10x10xf32>, vector<2x10xf32> -> vector<2x10xf32>
    %124 = arith.addf %122, %123 : vector<2x10xf32>
    %125 = arith.negf %124 : vector<2x10xf32>
    %126 = math.exp %125 : vector<2x10xf32>
    %cst_89 = arith.constant 1.000000e+00 : f32
    %127 = vector.broadcast %cst_89 : f32 to vector<2x10xf32>
    %128 = arith.addf %127, %126 : vector<2x10xf32>
    %129 = arith.divf %127, %128 : vector<2x10xf32>
    %130 = arith.mulf %115, %90 : vector<2x10xf32>
    %131 = arith.mulf %106, %120 : vector<2x10xf32>
    %132 = arith.addf %130, %131 : vector<2x10xf32>
    %133 = math.tanh %132 : vector<2x10xf32>
    %134 = arith.mulf %129, %133 : vector<2x10xf32>
    %135 = arith.truncf %134 : vector<2x10xf32> to vector<2x10xbf16>
    %c2_90 = arith.constant 2 : index
    %c0_91 = arith.constant 0 : index
    %c0_92 = arith.constant 0 : index
    %136 = vector.load %arg3[%c2_90, %c0_91, %c0_92] : memref<25x10x1024xbf16, #tpu.memory_space<vmem>>, vector<1x10x1024xbf16>
    %137 = vector.shape_cast %136 : vector<1x10x1024xbf16> to vector<10x1024xbf16>
    %cst_93 = arith.constant dense<0.000000e+00> : vector<2x1024xf32>
    %138 = tpu.matmul %135, %137, %cst_93 {dimension_numbers = #tpu.dot_dimension_numbers<[1], [0], [0], [1], [0, 0, 1, 1], [], []>} : vector<2x10xbf16>, vector<10x1024xbf16>, vector<2x1024xf32> -> vector<2x1024xf32>
    %139 = arith.addf %97, %138 : vector<2x1024xf32>
    %c3_94 = arith.constant 3 : index
    %c0_95 = arith.constant 0 : index
    %c0_96 = arith.constant 0 : index
    %c0_97 = arith.constant 0 : index
    %140 = vector.load %arg1[%c3_94, %c0_95, %c0_96, %c0_97] : memref<25x4x2x10xf32, #tpu.memory_space<vmem>>, vector<1x1x2x10xf32>
    %141 = vector.shape_cast %140 : vector<1x1x2x10xf32> to vector<2x10xf32>
    %cst_98 = arith.constant dense<0.000000e+00> : vector<2x10xf32>
    %142 = tpu.matmul %134, %4, %cst_98 {dimension_numbers = #tpu.dot_dimension_numbers<[1], [0], [0], [1], [0, 0, 1, 1], [], []>} : vector<2x10xf32>, vector<10x10xf32>, vector<2x10xf32> -> vector<2x10xf32>
    %143 = arith.addf %141, %142 : vector<2x10xf32>
    %144 = arith.negf %143 : vector<2x10xf32>
    %145 = math.exp %144 : vector<2x10xf32>
    %cst_99 = arith.constant 1.000000e+00 : f32
    %146 = vector.broadcast %cst_99 : f32 to vector<2x10xf32>
    %147 = arith.addf %146, %145 : vector<2x10xf32>
    %148 = arith.divf %146, %147 : vector<2x10xf32>
    %c3_100 = arith.constant 3 : index
    %c1_101 = arith.constant 1 : index
    %c0_102 = arith.constant 0 : index
    %c0_103 = arith.constant 0 : index
    %149 = vector.load %arg1[%c3_100, %c1_101, %c0_102, %c0_103] : memref<25x4x2x10xf32, #tpu.memory_space<vmem>>, vector<1x1x2x10xf32>
    %150 = vector.shape_cast %149 : vector<1x1x2x10xf32> to vector<2x10xf32>
    %cst_104 = arith.constant dense<0.000000e+00> : vector<2x10xf32>
    %151 = tpu.matmul %134, %6, %cst_104 {dimension_numbers = #tpu.dot_dimension_numbers<[1], [0], [0], [1], [0, 0, 1, 1], [], []>} : vector<2x10xf32>, vector<10x10xf32>, vector<2x10xf32> -> vector<2x10xf32>
    %152 = arith.addf %150, %151 : vector<2x10xf32>
    %153 = arith.negf %152 : vector<2x10xf32>
    %154 = math.exp %153 : vector<2x10xf32>
    %cst_105 = arith.constant 1.000000e+00 : f32
    %155 = vector.broadcast %cst_105 : f32 to vector<2x10xf32>
    %156 = arith.addf %155, %154 : vector<2x10xf32>
    %157 = arith.divf %155, %156 : vector<2x10xf32>
    %c3_106 = arith.constant 3 : index
    %c2_107 = arith.constant 2 : index
    %c0_108 = arith.constant 0 : index
    %c0_109 = arith.constant 0 : index
    %158 = vector.load %arg1[%c3_106, %c2_107, %c0_108, %c0_109] : memref<25x4x2x10xf32, #tpu.memory_space<vmem>>, vector<1x1x2x10xf32>
    %159 = vector.shape_cast %158 : vector<1x1x2x10xf32> to vector<2x10xf32>
    %cst_110 = arith.constant dense<0.000000e+00> : vector<2x10xf32>
    %160 = tpu.matmul %134, %8, %cst_110 {dimension_numbers = #tpu.dot_dimension_numbers<[1], [0], [0], [1], [0, 0, 1, 1], [], []>} : vector<2x10xf32>, vector<10x10xf32>, vector<2x10xf32> -> vector<2x10xf32>
    %161 = arith.addf %159, %160 : vector<2x10xf32>
    %162 = math.tanh %161 : vector<2x10xf32>
    %c3_111 = arith.constant 3 : index
    %c3_112 = arith.constant 3 : index
    %c0_113 = arith.constant 0 : index
    %c0_114 = arith.constant 0 : index
    %163 = vector.load %arg1[%c3_111, %c3_112, %c0_113, %c0_114] : memref<25x4x2x10xf32, #tpu.memory_space<vmem>>, vector<1x1x2x10xf32>
    %164 = vector.shape_cast %163 : vector<1x1x2x10xf32> to vector<2x10xf32>
    %cst_115 = arith.constant dense<0.000000e+00> : vector<2x10xf32>
    %165 = tpu.matmul %134, %10, %cst_115 {dimension_numbers = #tpu.dot_dimension_numbers<[1], [0], [0], [1], [0, 0, 1, 1], [], []>} : vector<2x10xf32>, vector<10x10xf32>, vector<2x10xf32> -> vector<2x10xf32>
    %166 = arith.addf %164, %165 : vector<2x10xf32>
    %167 = arith.negf %166 : vector<2x10xf32>
    %168 = math.exp %167 : vector<2x10xf32>
    %cst_116 = arith.constant 1.000000e+00 : f32
    %169 = vector.broadcast %cst_116 : f32 to vector<2x10xf32>
    %170 = arith.addf %169, %168 : vector<2x10xf32>
    %171 = arith.divf %169, %170 : vector<2x10xf32>
    %172 = arith.mulf %157, %132 : vector<2x10xf32>
    %173 = arith.mulf %148, %162 : vector<2x10xf32>
    %174 = arith.addf %172, %173 : vector<2x10xf32>
    %175 = math.tanh %174 : vector<2x10xf32>
    %176 = arith.mulf %171, %175 : vector<2x10xf32>
    %177 = arith.truncf %176 : vector<2x10xf32> to vector<2x10xbf16>
    %c3_117 = arith.constant 3 : index
    %c0_118 = arith.constant 0 : index
    %c0_119 = arith.constant 0 : index
    %178 = vector.load %arg3[%c3_117, %c0_118, %c0_119] : memref<25x10x1024xbf16, #tpu.memory_space<vmem>>, vector<1x10x1024xbf16>
    %179 = vector.shape_cast %178 : vector<1x10x1024xbf16> to vector<10x1024xbf16>
    %cst_120 = arith.constant dense<0.000000e+00> : vector<2x1024xf32>
    %180 = tpu.matmul %177, %179, %cst_120 {dimension_numbers = #tpu.dot_dimension_numbers<[1], [0], [0], [1], [0, 0, 1, 1], [], []>} : vector<2x10xbf16>, vector<10x1024xbf16>, vector<2x1024xf32> -> vector<2x1024xf32>
    %181 = arith.addf %139, %180 : vector<2x1024xf32>
    %c4 = arith.constant 4 : index
    %c0_121 = arith.constant 0 : index
    %c0_122 = arith.constant 0 : index
    %c0_123 = arith.constant 0 : index
    %182 = vector.load %arg1[%c4, %c0_121, %c0_122, %c0_123] : memref<25x4x2x10xf32, #tpu.memory_space<vmem>>, vector<1x1x2x10xf32>
    %183 = vector.shape_cast %182 : vector<1x1x2x10xf32> to vector<2x10xf32>
    %cst_124 = arith.constant dense<0.000000e+00> : vector<2x10xf32>
    %184 = tpu.matmul %176, %4, %cst_124 {dimension_numbers = #tpu.dot_dimension_numbers<[1], [0], [0], [1], [0, 0, 1, 1], [], []>} : vector<2x10xf32>, vector<10x10xf32>, vector<2x10xf32> -> vector<2x10xf32>
    %185 = arith.addf %183, %184 : vector<2x10xf32>
    %186 = arith.negf %185 : vector<2x10xf32>
    %187 = math.exp %186 : vector<2x10xf32>
    %cst_125 = arith.constant 1.000000e+00 : f32
    %188 = vector.broadcast %cst_125 : f32 to vector<2x10xf32>
    %189 = arith.addf %188, %187 : vector<2x10xf32>
    %190 = arith.divf %188, %189 : vector<2x10xf32>
    %c4_126 = arith.constant 4 : index
    %c1_127 = arith.constant 1 : index
    %c0_128 = arith.constant 0 : index
    %c0_129 = arith.constant 0 : index
    %191 = vector.load %arg1[%c4_126, %c1_127, %c0_128, %c0_129] : memref<25x4x2x10xf32, #tpu.memory_space<vmem>>, vector<1x1x2x10xf32>
    %192 = vector.shape_cast %191 : vector<1x1x2x10xf32> to vector<2x10xf32>
    %cst_130 = arith.constant dense<0.000000e+00> : vector<2x10xf32>
    %193 = tpu.matmul %176, %6, %cst_130 {dimension_numbers = #tpu.dot_dimension_numbers<[1], [0], [0], [1], [0, 0, 1, 1], [], []>} : vector<2x10xf32>, vector<10x10xf32>, vector<2x10xf32> -> vector<2x10xf32>
    %194 = arith.addf %192, %193 : vector<2x10xf32>
    %195 = arith.negf %194 : vector<2x10xf32>
    %196 = math.exp %195 : vector<2x10xf32>
    %cst_131 = arith.constant 1.000000e+00 : f32
    %197 = vector.broadcast %cst_131 : f32 to vector<2x10xf32>
    %198 = arith.addf %197, %196 : vector<2x10xf32>
    %199 = arith.divf %197, %198 : vector<2x10xf32>
    %c4_132 = arith.constant 4 : index
    %c2_133 = arith.constant 2 : index
    %c0_134 = arith.constant 0 : index
    %c0_135 = arith.constant 0 : index
    %200 = vector.load %arg1[%c4_132, %c2_133, %c0_134, %c0_135] : memref<25x4x2x10xf32, #tpu.memory_space<vmem>>, vector<1x1x2x10xf32>
    %201 = vector.shape_cast %200 : vector<1x1x2x10xf32> to vector<2x10xf32>
    %cst_136 = arith.constant dense<0.000000e+00> : vector<2x10xf32>
    %202 = tpu.matmul %176, %8, %cst_136 {dimension_numbers = #tpu.dot_dimension_numbers<[1], [0], [0], [1], [0, 0, 1, 1], [], []>} : vector<2x10xf32>, vector<10x10xf32>, vector<2x10xf32> -> vector<2x10xf32>
    %203 = arith.addf %201, %202 : vector<2x10xf32>
    %204 = math.tanh %203 : vector<2x10xf32>
    %c4_137 = arith.constant 4 : index
    %c3_138 = arith.constant 3 : index
    %c0_139 = arith.constant 0 : index
    %c0_140 = arith.constant 0 : index
    %205 = vector.load %arg1[%c4_137, %c3_138, %c0_139, %c0_140] : memref<25x4x2x10xf32, #tpu.memory_space<vmem>>, vector<1x1x2x10xf32>
    %206 = vector.shape_cast %205 : vector<1x1x2x10xf32> to vector<2x10xf32>
    %cst_141 = arith.constant dense<0.000000e+00> : vector<2x10xf32>
    %207 = tpu.matmul %176, %10, %cst_141 {dimension_numbers = #tpu.dot_dimension_numbers<[1], [0], [0], [1], [0, 0, 1, 1], [], []>} : vector<2x10xf32>, vector<10x10xf32>, vector<2x10xf32> -> vector<2x10xf32>
    %208 = arith.addf %206, %207 : vector<2x10xf32>
    %209 = arith.negf %208 : vector<2x10xf32>
    %210 = math.exp %209 : vector<2x10xf32>
    %cst_142 = arith.constant 1.000000e+00 : f32
    %211 = vector.broadcast %cst_142 : f32 to vector<2x10xf32>
    %212 = arith.addf %211, %210 : vector<2x10xf32>
    %213 = arith.divf %211, %212 : vector<2x10xf32>
    %214 = arith.mulf %199, %174 : vector<2x10xf32>
    %215 = arith.mulf %190, %204 : vector<2x10xf32>
    %216 = arith.addf %214, %215 : vector<2x10xf32>
    %217 = math.tanh %216 : vector<2x10xf32>
    %218 = arith.mulf %213, %217 : vector<2x10xf32>
    %219 = arith.truncf %218 : vector<2x10xf32> to vector<2x10xbf16>
    %c4_143 = arith.constant 4 : index
    %c0_144 = arith.constant 0 : index
    %c0_145 = arith.constant 0 : index
    %220 = vector.load %arg3[%c4_143, %c0_144, %c0_145] : memref<25x10x1024xbf16, #tpu.memory_space<vmem>>, vector<1x10x1024xbf16>
    %221 = vector.shape_cast %220 : vector<1x10x1024xbf16> to vector<10x1024xbf16>
    %cst_146 = arith.constant dense<0.000000e+00> : vector<2x1024xf32>
    %222 = tpu.matmul %219, %221, %cst_146 {dimension_numbers = #tpu.dot_dimension_numbers<[1], [0], [0], [1], [0, 0, 1, 1], [], []>} : vector<2x10xbf16>, vector<10x1024xbf16>, vector<2x1024xf32> -> vector<2x1024xf32>
    %223 = arith.addf %181, %222 : vector<2x1024xf32>
    %c5 = arith.constant 5 : index
    %c0_147 = arith.constant 0 : index
    %c0_148 = arith.constant 0 : index
    %c0_149 = arith.constant 0 : index
    %224 = vector.load %arg1[%c5, %c0_147, %c0_148, %c0_149] : memref<25x4x2x10xf32, #tpu.memory_space<vmem>>, vector<1x1x2x10xf32>
    %225 = vector.shape_cast %224 : vector<1x1x2x10xf32> to vector<2x10xf32>
    %cst_150 = arith.constant dense<0.000000e+00> : vector<2x10xf32>
    %226 = tpu.matmul %218, %4, %cst_150 {dimension_numbers = #tpu.dot_dimension_numbers<[1], [0], [0], [1], [0, 0, 1, 1], [], []>} : vector<2x10xf32>, vector<10x10xf32>, vector<2x10xf32> -> vector<2x10xf32>
    %227 = arith.addf %225, %226 : vector<2x10xf32>
    %228 = arith.negf %227 : vector<2x10xf32>
    %229 = math.exp %228 : vector<2x10xf32>
    %cst_151 = arith.constant 1.000000e+00 : f32
    %230 = vector.broadcast %cst_151 : f32 to vector<2x10xf32>
    %231 = arith.addf %230, %229 : vector<2x10xf32>
    %232 = arith.divf %230, %231 : vector<2x10xf32>
    %c5_152 = arith.constant 5 : index
    %c1_153 = arith.constant 1 : index
    %c0_154 = arith.constant 0 : index
    %c0_155 = arith.constant 0 : index
    %233 = vector.load %arg1[%c5_152, %c1_153, %c0_154, %c0_155] : memref<25x4x2x10xf32, #tpu.memory_space<vmem>>, vector<1x1x2x10xf32>
    %234 = vector.shape_cast %233 : vector<1x1x2x10xf32> to vector<2x10xf32>
    %cst_156 = arith.constant dense<0.000000e+00> : vector<2x10xf32>
    %235 = tpu.matmul %218, %6, %cst_156 {dimension_numbers = #tpu.dot_dimension_numbers<[1], [0], [0], [1], [0, 0, 1, 1], [], []>} : vector<2x10xf32>, vector<10x10xf32>, vector<2x10xf32> -> vector<2x10xf32>
    %236 = arith.addf %234, %235 : vector<2x10xf32>
    %237 = arith.negf %236 : vector<2x10xf32>
    %238 = math.exp %237 : vector<2x10xf32>
    %cst_157 = arith.constant 1.000000e+00 : f32
    %239 = vector.broadcast %cst_157 : f32 to vector<2x10xf32>
    %240 = arith.addf %239, %238 : vector<2x10xf32>
    %241 = arith.divf %239, %240 : vector<2x10xf32>
    %c5_158 = arith.constant 5 : index
    %c2_159 = arith.constant 2 : index
    %c0_160 = arith.constant 0 : index
    %c0_161 = arith.constant 0 : index
    %242 = vector.load %arg1[%c5_158, %c2_159, %c0_160, %c0_161] : memref<25x4x2x10xf32, #tpu.memory_space<vmem>>, vector<1x1x2x10xf32>
    %243 = vector.shape_cast %242 : vector<1x1x2x10xf32> to vector<2x10xf32>
    %cst_162 = arith.constant dense<0.000000e+00> : vector<2x10xf32>
    %244 = tpu.matmul %218, %8, %cst_162 {dimension_numbers = #tpu.dot_dimension_numbers<[1], [0], [0], [1], [0, 0, 1, 1], [], []>} : vector<2x10xf32>, vector<10x10xf32>, vector<2x10xf32> -> vector<2x10xf32>
    %245 = arith.addf %243, %244 : vector<2x10xf32>
    %246 = math.tanh %245 : vector<2x10xf32>
    %c5_163 = arith.constant 5 : index
    %c3_164 = arith.constant 3 : index
    %c0_165 = arith.constant 0 : index
    %c0_166 = arith.constant 0 : index
    %247 = vector.load %arg1[%c5_163, %c3_164, %c0_165, %c0_166] : memref<25x4x2x10xf32, #tpu.memory_space<vmem>>, vector<1x1x2x10xf32>
    %248 = vector.shape_cast %247 : vector<1x1x2x10xf32> to vector<2x10xf32>
    %cst_167 = arith.constant dense<0.000000e+00> : vector<2x10xf32>
    %249 = tpu.matmul %218, %10, %cst_167 {dimension_numbers = #tpu.dot_dimension_numbers<[1], [0], [0], [1], [0, 0, 1, 1], [], []>} : vector<2x10xf32>, vector<10x10xf32>, vector<2x10xf32> -> vector<2x10xf32>
    %250 = arith.addf %248, %249 : vector<2x10xf32>
    %251 = arith.negf %250 : vector<2x10xf32>
    %252 = math.exp %251 : vector<2x10xf32>
    %cst_168 = arith.constant 1.000000e+00 : f32
    %253 = vector.broadcast %cst_168 : f32 to vector<2x10xf32>
    %254 = arith.addf %253, %252 : vector<2x10xf32>
    %255 = arith.divf %253, %254 : vector<2x10xf32>
    %256 = arith.mulf %241, %216 : vector<2x10xf32>
    %257 = arith.mulf %232, %246 : vector<2x10xf32>
    %258 = arith.addf %256, %257 : vector<2x10xf32>
    %259 = math.tanh %258 : vector<2x10xf32>
    %260 = arith.mulf %255, %259 : vector<2x10xf32>
    %261 = arith.truncf %260 : vector<2x10xf32> to vector<2x10xbf16>
    %c5_169 = arith.constant 5 : index
    %c0_170 = arith.constant 0 : index
    %c0_171 = arith.constant 0 : index
    %262 = vector.load %arg3[%c5_169, %c0_170, %c0_171] : memref<25x10x1024xbf16, #tpu.memory_space<vmem>>, vector<1x10x1024xbf16>
    %263 = vector.shape_cast %262 : vector<1x10x1024xbf16> to vector<10x1024xbf16>
    %cst_172 = arith.constant dense<0.000000e+00> : vector<2x1024xf32>
    %264 = tpu.matmul %261, %263, %cst_172 {dimension_numbers = #tpu.dot_dimension_numbers<[1], [0], [0], [1], [0, 0, 1, 1], [], []>} : vector<2x10xbf16>, vector<10x1024xbf16>, vector<2x1024xf32> -> vector<2x1024xf32>
    %265 = arith.addf %223, %264 : vector<2x1024xf32>
    %c6 = arith.constant 6 : index
    %c0_173 = arith.constant 0 : index
    %c0_174 = arith.constant 0 : index
    %c0_175 = arith.constant 0 : index
    %266 = vector.load %arg1[%c6, %c0_173, %c0_174, %c0_175] : memref<25x4x2x10xf32, #tpu.memory_space<vmem>>, vector<1x1x2x10xf32>
    %267 = vector.shape_cast %266 : vector<1x1x2x10xf32> to vector<2x10xf32>
    %cst_176 = arith.constant dense<0.000000e+00> : vector<2x10xf32>
    %268 = tpu.matmul %260, %4, %cst_176 {dimension_numbers = #tpu.dot_dimension_numbers<[1], [0], [0], [1], [0, 0, 1, 1], [], []>} : vector<2x10xf32>, vector<10x10xf32>, vector<2x10xf32> -> vector<2x10xf32>
    %269 = arith.addf %267, %268 : vector<2x10xf32>
    %270 = arith.negf %269 : vector<2x10xf32>
    %271 = math.exp %270 : vector<2x10xf32>
    %cst_177 = arith.constant 1.000000e+00 : f32
    %272 = vector.broadcast %cst_177 : f32 to vector<2x10xf32>
    %273 = arith.addf %272, %271 : vector<2x10xf32>
    %274 = arith.divf %272, %273 : vector<2x10xf32>
    %c6_178 = arith.constant 6 : index
    %c1_179 = arith.constant 1 : index
    %c0_180 = arith.constant 0 : index
    %c0_181 = arith.constant 0 : index
    %275 = vector.load %arg1[%c6_178, %c1_179, %c0_180, %c0_181] : memref<25x4x2x10xf32, #tpu.memory_space<vmem>>, vector<1x1x2x10xf32>
    %276 = vector.shape_cast %275 : vector<1x1x2x10xf32> to vector<2x10xf32>
    %cst_182 = arith.constant dense<0.000000e+00> : vector<2x10xf32>
    %277 = tpu.matmul %260, %6, %cst_182 {dimension_numbers = #tpu.dot_dimension_numbers<[1], [0], [0], [1], [0, 0, 1, 1], [], []>} : vector<2x10xf32>, vector<10x10xf32>, vector<2x10xf32> -> vector<2x10xf32>
    %278 = arith.addf %276, %277 : vector<2x10xf32>
    %279 = arith.negf %278 : vector<2x10xf32>
    %280 = math.exp %279 : vector<2x10xf32>
    %cst_183 = arith.constant 1.000000e+00 : f32
    %281 = vector.broadcast %cst_183 : f32 to vector<2x10xf32>
    %282 = arith.addf %281, %280 : vector<2x10xf32>
    %283 = arith.divf %281, %282 : vector<2x10xf32>
    %c6_184 = arith.constant 6 : index
    %c2_185 = arith.constant 2 : index
    %c0_186 = arith.constant 0 : index
    %c0_187 = arith.constant 0 : index
    %284 = vector.load %arg1[%c6_184, %c2_185, %c0_186, %c0_187] : memref<25x4x2x10xf32, #tpu.memory_space<vmem>>, vector<1x1x2x10xf32>
    %285 = vector.shape_cast %284 : vector<1x1x2x10xf32> to vector<2x10xf32>
    %cst_188 = arith.constant dense<0.000000e+00> : vector<2x10xf32>
    %286 = tpu.matmul %260, %8, %cst_188 {dimension_numbers = #tpu.dot_dimension_numbers<[1], [0], [0], [1], [0, 0, 1, 1], [], []>} : vector<2x10xf32>, vector<10x10xf32>, vector<2x10xf32> -> vector<2x10xf32>
    %287 = arith.addf %285, %286 : vector<2x10xf32>
    %288 = math.tanh %287 : vector<2x10xf32>
    %c6_189 = arith.constant 6 : index
    %c3_190 = arith.constant 3 : index
    %c0_191 = arith.constant 0 : index
    %c0_192 = arith.constant 0 : index
    %289 = vector.load %arg1[%c6_189, %c3_190, %c0_191, %c0_192] : memref<25x4x2x10xf32, #tpu.memory_space<vmem>>, vector<1x1x2x10xf32>
    %290 = vector.shape_cast %289 : vector<1x1x2x10xf32> to vector<2x10xf32>
    %cst_193 = arith.constant dense<0.000000e+00> : vector<2x10xf32>
    %291 = tpu.matmul %260, %10, %cst_193 {dimension_numbers = #tpu.dot_dimension_numbers<[1], [0], [0], [1], [0, 0, 1, 1], [], []>} : vector<2x10xf32>, vector<10x10xf32>, vector<2x10xf32> -> vector<2x10xf32>
    %292 = arith.addf %290, %291 : vector<2x10xf32>
    %293 = arith.negf %292 : vector<2x10xf32>
    %294 = math.exp %293 : vector<2x10xf32>
    %cst_194 = arith.constant 1.000000e+00 : f32
    %295 = vector.broadcast %cst_194 : f32 to vector<2x10xf32>
    %296 = arith.addf %295, %294 : vector<2x10xf32>
    %297 = arith.divf %295, %296 : vector<2x10xf32>
    %298 = arith.mulf %283, %258 : vector<2x10xf32>
    %299 = arith.mulf %274, %288 : vector<2x10xf32>
    %300 = arith.addf %298, %299 : vector<2x10xf32>
    %301 = math.tanh %300 : vector<2x10xf32>
    %302 = arith.mulf %297, %301 : vector<2x10xf32>
    %303 = arith.truncf %302 : vector<2x10xf32> to vector<2x10xbf16>
    %c6_195 = arith.constant 6 : index
    %c0_196 = arith.constant 0 : index
    %c0_197 = arith.constant 0 : index
    %304 = vector.load %arg3[%c6_195, %c0_196, %c0_197] : memref<25x10x1024xbf16, #tpu.memory_space<vmem>>, vector<1x10x1024xbf16>
    %305 = vector.shape_cast %304 : vector<1x10x1024xbf16> to vector<10x1024xbf16>
    %cst_198 = arith.constant dense<0.000000e+00> : vector<2x1024xf32>
    %306 = tpu.matmul %303, %305, %cst_198 {dimension_numbers = #tpu.dot_dimension_numbers<[1], [0], [0], [1], [0, 0, 1, 1], [], []>} : vector<2x10xbf16>, vector<10x1024xbf16>, vector<2x1024xf32> -> vector<2x1024xf32>
    %307 = arith.addf %265, %306 : vector<2x1024xf32>
    %c7 = arith.constant 7 : index
    %c0_199 = arith.constant 0 : index
    %c0_200 = arith.constant 0 : index
    %c0_201 = arith.constant 0 : index
    %308 = vector.load %arg1[%c7, %c0_199, %c0_200, %c0_201] : memref<25x4x2x10xf32, #tpu.memory_space<vmem>>, vector<1x1x2x10xf32>
    %309 = vector.shape_cast %308 : vector<1x1x2x10xf32> to vector<2x10xf32>
    %cst_202 = arith.constant dense<0.000000e+00> : vector<2x10xf32>
    %310 = tpu.matmul %302, %4, %cst_202 {dimension_numbers = #tpu.dot_dimension_numbers<[1], [0], [0], [1], [0, 0, 1, 1], [], []>} : vector<2x10xf32>, vector<10x10xf32>, vector<2x10xf32> -> vector<2x10xf32>
    %311 = arith.addf %309, %310 : vector<2x10xf32>
    %312 = arith.negf %311 : vector<2x10xf32>
    %313 = math.exp %312 : vector<2x10xf32>
    %cst_203 = arith.constant 1.000000e+00 : f32
    %314 = vector.broadcast %cst_203 : f32 to vector<2x10xf32>
    %315 = arith.addf %314, %313 : vector<2x10xf32>
    %316 = arith.divf %314, %315 : vector<2x10xf32>
    %c7_204 = arith.constant 7 : index
    %c1_205 = arith.constant 1 : index
    %c0_206 = arith.constant 0 : index
    %c0_207 = arith.constant 0 : index
    %317 = vector.load %arg1[%c7_204, %c1_205, %c0_206, %c0_207] : memref<25x4x2x10xf32, #tpu.memory_space<vmem>>, vector<1x1x2x10xf32>
    %318 = vector.shape_cast %317 : vector<1x1x2x10xf32> to vector<2x10xf32>
    %cst_208 = arith.constant dense<0.000000e+00> : vector<2x10xf32>
    %319 = tpu.matmul %302, %6, %cst_208 {dimension_numbers = #tpu.dot_dimension_numbers<[1], [0], [0], [1], [0, 0, 1, 1], [], []>} : vector<2x10xf32>, vector<10x10xf32>, vector<2x10xf32> -> vector<2x10xf32>
    %320 = arith.addf %318, %319 : vector<2x10xf32>
    %321 = arith.negf %320 : vector<2x10xf32>
    %322 = math.exp %321 : vector<2x10xf32>
    %cst_209 = arith.constant 1.000000e+00 : f32
    %323 = vector.broadcast %cst_209 : f32 to vector<2x10xf32>
    %324 = arith.addf %323, %322 : vector<2x10xf32>
    %325 = arith.divf %323, %324 : vector<2x10xf32>
    %c7_210 = arith.constant 7 : index
    %c2_211 = arith.constant 2 : index
    %c0_212 = arith.constant 0 : index
    %c0_213 = arith.constant 0 : index
    %326 = vector.load %arg1[%c7_210, %c2_211, %c0_212, %c0_213] : memref<25x4x2x10xf32, #tpu.memory_space<vmem>>, vector<1x1x2x10xf32>
    %327 = vector.shape_cast %326 : vector<1x1x2x10xf32> to vector<2x10xf32>
    %cst_214 = arith.constant dense<0.000000e+00> : vector<2x10xf32>
    %328 = tpu.matmul %302, %8, %cst_214 {dimension_numbers = #tpu.dot_dimension_numbers<[1], [0], [0], [1], [0, 0, 1, 1], [], []>} : vector<2x10xf32>, vector<10x10xf32>, vector<2x10xf32> -> vector<2x10xf32>
    %329 = arith.addf %327, %328 : vector<2x10xf32>
    %330 = math.tanh %329 : vector<2x10xf32>
    %c7_215 = arith.constant 7 : index
    %c3_216 = arith.constant 3 : index
    %c0_217 = arith.constant 0 : index
    %c0_218 = arith.constant 0 : index
    %331 = vector.load %arg1[%c7_215, %c3_216, %c0_217, %c0_218] : memref<25x4x2x10xf32, #tpu.memory_space<vmem>>, vector<1x1x2x10xf32>
    %332 = vector.shape_cast %331 : vector<1x1x2x10xf32> to vector<2x10xf32>
    %cst_219 = arith.constant dense<0.000000e+00> : vector<2x10xf32>
    %333 = tpu.matmul %302, %10, %cst_219 {dimension_numbers = #tpu.dot_dimension_numbers<[1], [0], [0], [1], [0, 0, 1, 1], [], []>} : vector<2x10xf32>, vector<10x10xf32>, vector<2x10xf32> -> vector<2x10xf32>
    %334 = arith.addf %332, %333 : vector<2x10xf32>
    %335 = arith.negf %334 : vector<2x10xf32>
    %336 = math.exp %335 : vector<2x10xf32>
    %cst_220 = arith.constant 1.000000e+00 : f32
    %337 = vector.broadcast %cst_220 : f32 to vector<2x10xf32>
    %338 = arith.addf %337, %336 : vector<2x10xf32>
    %339 = arith.divf %337, %338 : vector<2x10xf32>
    %340 = arith.mulf %325, %300 : vector<2x10xf32>
    %341 = arith.mulf %316, %330 : vector<2x10xf32>
    %342 = arith.addf %340, %341 : vector<2x10xf32>
    %343 = math.tanh %342 : vector<2x10xf32>
    %344 = arith.mulf %339, %343 : vector<2x10xf32>
    %345 = arith.truncf %344 : vector<2x10xf32> to vector<2x10xbf16>
    %c7_221 = arith.constant 7 : index
    %c0_222 = arith.constant 0 : index
    %c0_223 = arith.constant 0 : index
    %346 = vector.load %arg3[%c7_221, %c0_222, %c0_223] : memref<25x10x1024xbf16, #tpu.memory_space<vmem>>, vector<1x10x1024xbf16>
    %347 = vector.shape_cast %346 : vector<1x10x1024xbf16> to vector<10x1024xbf16>
    %cst_224 = arith.constant dense<0.000000e+00> : vector<2x1024xf32>
    %348 = tpu.matmul %345, %347, %cst_224 {dimension_numbers = #tpu.dot_dimension_numbers<[1], [0], [0], [1], [0, 0, 1, 1], [], []>} : vector<2x10xbf16>, vector<10x1024xbf16>, vector<2x1024xf32> -> vector<2x1024xf32>
    %349 = arith.addf %307, %348 : vector<2x1024xf32>
    %c8 = arith.constant 8 : index
    %c0_225 = arith.constant 0 : index
    %c0_226 = arith.constant 0 : index
    %c0_227 = arith.constant 0 : index
    %350 = vector.load %arg1[%c8, %c0_225, %c0_226, %c0_227] : memref<25x4x2x10xf32, #tpu.memory_space<vmem>>, vector<1x1x2x10xf32>
    %351 = vector.shape_cast %350 : vector<1x1x2x10xf32> to vector<2x10xf32>
    %cst_228 = arith.constant dense<0.000000e+00> : vector<2x10xf32>
    %352 = tpu.matmul %344, %4, %cst_228 {dimension_numbers = #tpu.dot_dimension_numbers<[1], [0], [0], [1], [0, 0, 1, 1], [], []>} : vector<2x10xf32>, vector<10x10xf32>, vector<2x10xf32> -> vector<2x10xf32>
    %353 = arith.addf %351, %352 : vector<2x10xf32>
    %354 = arith.negf %353 : vector<2x10xf32>
    %355 = math.exp %354 : vector<2x10xf32>
    %cst_229 = arith.constant 1.000000e+00 : f32
    %356 = vector.broadcast %cst_229 : f32 to vector<2x10xf32>
    %357 = arith.addf %356, %355 : vector<2x10xf32>
    %358 = arith.divf %356, %357 : vector<2x10xf32>
    %c8_230 = arith.constant 8 : index
    %c1_231 = arith.constant 1 : index
    %c0_232 = arith.constant 0 : index
    %c0_233 = arith.constant 0 : index
    %359 = vector.load %arg1[%c8_230, %c1_231, %c0_232, %c0_233] : memref<25x4x2x10xf32, #tpu.memory_space<vmem>>, vector<1x1x2x10xf32>
    %360 = vector.shape_cast %359 : vector<1x1x2x10xf32> to vector<2x10xf32>
    %cst_234 = arith.constant dense<0.000000e+00> : vector<2x10xf32>
    %361 = tpu.matmul %344, %6, %cst_234 {dimension_numbers = #tpu.dot_dimension_numbers<[1], [0], [0], [1], [0, 0, 1, 1], [], []>} : vector<2x10xf32>, vector<10x10xf32>, vector<2x10xf32> -> vector<2x10xf32>
    %362 = arith.addf %360, %361 : vector<2x10xf32>
    %363 = arith.negf %362 : vector<2x10xf32>
    %364 = math.exp %363 : vector<2x10xf32>
    %cst_235 = arith.constant 1.000000e+00 : f32
    %365 = vector.broadcast %cst_235 : f32 to vector<2x10xf32>
    %366 = arith.addf %365, %364 : vector<2x10xf32>
    %367 = arith.divf %365, %366 : vector<2x10xf32>
    %c8_236 = arith.constant 8 : index
    %c2_237 = arith.constant 2 : index
    %c0_238 = arith.constant 0 : index
    %c0_239 = arith.constant 0 : index
    %368 = vector.load %arg1[%c8_236, %c2_237, %c0_238, %c0_239] : memref<25x4x2x10xf32, #tpu.memory_space<vmem>>, vector<1x1x2x10xf32>
    %369 = vector.shape_cast %368 : vector<1x1x2x10xf32> to vector<2x10xf32>
    %cst_240 = arith.constant dense<0.000000e+00> : vector<2x10xf32>
    %370 = tpu.matmul %344, %8, %cst_240 {dimension_numbers = #tpu.dot_dimension_numbers<[1], [0], [0], [1], [0, 0, 1, 1], [], []>} : vector<2x10xf32>, vector<10x10xf32>, vector<2x10xf32> -> vector<2x10xf32>
    %371 = arith.addf %369, %370 : vector<2x10xf32>
    %372 = math.tanh %371 : vector<2x10xf32>
    %c8_241 = arith.constant 8 : index
    %c3_242 = arith.constant 3 : index
    %c0_243 = arith.constant 0 : index
    %c0_244 = arith.constant 0 : index
    %373 = vector.load %arg1[%c8_241, %c3_242, %c0_243, %c0_244] : memref<25x4x2x10xf32, #tpu.memory_space<vmem>>, vector<1x1x2x10xf32>
    %374 = vector.shape_cast %373 : vector<1x1x2x10xf32> to vector<2x10xf32>
    %cst_245 = arith.constant dense<0.000000e+00> : vector<2x10xf32>
    %375 = tpu.matmul %344, %10, %cst_245 {dimension_numbers = #tpu.dot_dimension_numbers<[1], [0], [0], [1], [0, 0, 1, 1], [], []>} : vector<2x10xf32>, vector<10x10xf32>, vector<2x10xf32> -> vector<2x10xf32>
    %376 = arith.addf %374, %375 : vector<2x10xf32>
    %377 = arith.negf %376 : vector<2x10xf32>
    %378 = math.exp %377 : vector<2x10xf32>
    %cst_246 = arith.constant 1.000000e+00 : f32
    %379 = vector.broadcast %cst_246 : f32 to vector<2x10xf32>
    %380 = arith.addf %379, %378 : vector<2x10xf32>
    %381 = arith.divf %379, %380 : vector<2x10xf32>
    %382 = arith.mulf %367, %342 : vector<2x10xf32>
    %383 = arith.mulf %358, %372 : vector<2x10xf32>
    %384 = arith.addf %382, %383 : vector<2x10xf32>
    %385 = math.tanh %384 : vector<2x10xf32>
    %386 = arith.mulf %381, %385 : vector<2x10xf32>
    %387 = arith.truncf %386 : vector<2x10xf32> to vector<2x10xbf16>
    %c8_247 = arith.constant 8 : index
    %c0_248 = arith.constant 0 : index
    %c0_249 = arith.constant 0 : index
    %388 = vector.load %arg3[%c8_247, %c0_248, %c0_249] : memref<25x10x1024xbf16, #tpu.memory_space<vmem>>, vector<1x10x1024xbf16>
    %389 = vector.shape_cast %388 : vector<1x10x1024xbf16> to vector<10x1024xbf16>
    %cst_250 = arith.constant dense<0.000000e+00> : vector<2x1024xf32>
    %390 = tpu.matmul %387, %389, %cst_250 {dimension_numbers = #tpu.dot_dimension_numbers<[1], [0], [0], [1], [0, 0, 1, 1], [], []>} : vector<2x10xbf16>, vector<10x1024xbf16>, vector<2x1024xf32> -> vector<2x1024xf32>
    %391 = arith.addf %349, %390 : vector<2x1024xf32>
    %c9 = arith.constant 9 : index
    %c0_251 = arith.constant 0 : index
    %c0_252 = arith.constant 0 : index
    %c0_253 = arith.constant 0 : index
    %392 = vector.load %arg1[%c9, %c0_251, %c0_252, %c0_253] : memref<25x4x2x10xf32, #tpu.memory_space<vmem>>, vector<1x1x2x10xf32>
    %393 = vector.shape_cast %392 : vector<1x1x2x10xf32> to vector<2x10xf32>
    %cst_254 = arith.constant dense<0.000000e+00> : vector<2x10xf32>
    %394 = tpu.matmul %386, %4, %cst_254 {dimension_numbers = #tpu.dot_dimension_numbers<[1], [0], [0], [1], [0, 0, 1, 1], [], []>} : vector<2x10xf32>, vector<10x10xf32>, vector<2x10xf32> -> vector<2x10xf32>
    %395 = arith.addf %393, %394 : vector<2x10xf32>
    %396 = arith.negf %395 : vector<2x10xf32>
    %397 = math.exp %396 : vector<2x10xf32>
    %cst_255 = arith.constant 1.000000e+00 : f32
    %398 = vector.broadcast %cst_255 : f32 to vector<2x10xf32>
    %399 = arith.addf %398, %397 : vector<2x10xf32>
    %400 = arith.divf %398, %399 : vector<2x10xf32>
    %c9_256 = arith.constant 9 : index
    %c1_257 = arith.constant 1 : index
    %c0_258 = arith.constant 0 : index
    %c0_259 = arith.constant 0 : index
    %401 = vector.load %arg1[%c9_256, %c1_257, %c0_258, %c0_259] : memref<25x4x2x10xf32, #tpu.memory_space<vmem>>, vector<1x1x2x10xf32>
    %402 = vector.shape_cast %401 : vector<1x1x2x10xf32> to vector<2x10xf32>
    %cst_260 = arith.constant dense<0.000000e+00> : vector<2x10xf32>
    %403 = tpu.matmul %386, %6, %cst_260 {dimension_numbers = #tpu.dot_dimension_numbers<[1], [0], [0], [1], [0, 0, 1, 1], [], []>} : vector<2x10xf32>, vector<10x10xf32>, vector<2x10xf32> -> vector<2x10xf32>
    %404 = arith.addf %402, %403 : vector<2x10xf32>
    %405 = arith.negf %404 : vector<2x10xf32>
    %406 = math.exp %405 : vector<2x10xf32>
    %cst_261 = arith.constant 1.000000e+00 : f32
    %407 = vector.broadcast %cst_261 : f32 to vector<2x10xf32>
    %408 = arith.addf %407, %406 : vector<2x10xf32>
    %409 = arith.divf %407, %408 : vector<2x10xf32>
    %c9_262 = arith.constant 9 : index
    %c2_263 = arith.constant 2 : index
    %c0_264 = arith.constant 0 : index
    %c0_265 = arith.constant 0 : index
    %410 = vector.load %arg1[%c9_262, %c2_263, %c0_264, %c0_265] : memref<25x4x2x10xf32, #tpu.memory_space<vmem>>, vector<1x1x2x10xf32>
    %411 = vector.shape_cast %410 : vector<1x1x2x10xf32> to vector<2x10xf32>
    %cst_266 = arith.constant dense<0.000000e+00> : vector<2x10xf32>
    %412 = tpu.matmul %386, %8, %cst_266 {dimension_numbers = #tpu.dot_dimension_numbers<[1], [0], [0], [1], [0, 0, 1, 1], [], []>} : vector<2x10xf32>, vector<10x10xf32>, vector<2x10xf32> -> vector<2x10xf32>
    %413 = arith.addf %411, %412 : vector<2x10xf32>
    %414 = math.tanh %413 : vector<2x10xf32>
    %c9_267 = arith.constant 9 : index
    %c3_268 = arith.constant 3 : index
    %c0_269 = arith.constant 0 : index
    %c0_270 = arith.constant 0 : index
    %415 = vector.load %arg1[%c9_267, %c3_268, %c0_269, %c0_270] : memref<25x4x2x10xf32, #tpu.memory_space<vmem>>, vector<1x1x2x10xf32>
    %416 = vector.shape_cast %415 : vector<1x1x2x10xf32> to vector<2x10xf32>
    %cst_271 = arith.constant dense<0.000000e+00> : vector<2x10xf32>
    %417 = tpu.matmul %386, %10, %cst_271 {dimension_numbers = #tpu.dot_dimension_numbers<[1], [0], [0], [1], [0, 0, 1, 1], [], []>} : vector<2x10xf32>, vector<10x10xf32>, vector<2x10xf32> -> vector<2x10xf32>
    %418 = arith.addf %416, %417 : vector<2x10xf32>
    %419 = arith.negf %418 : vector<2x10xf32>
    %420 = math.exp %419 : vector<2x10xf32>
    %cst_272 = arith.constant 1.000000e+00 : f32
    %421 = vector.broadcast %cst_272 : f32 to vector<2x10xf32>
    %422 = arith.addf %421, %420 : vector<2x10xf32>
    %423 = arith.divf %421, %422 : vector<2x10xf32>
    %424 = arith.mulf %409, %384 : vector<2x10xf32>
    %425 = arith.mulf %400, %414 : vector<2x10xf32>
    %426 = arith.addf %424, %425 : vector<2x10xf32>
    %427 = math.tanh %426 : vector<2x10xf32>
    %428 = arith.mulf %423, %427 : vector<2x10xf32>
    %429 = arith.truncf %428 : vector<2x10xf32> to vector<2x10xbf16>
    %c9_273 = arith.constant 9 : index
    %c0_274 = arith.constant 0 : index
    %c0_275 = arith.constant 0 : index
    %430 = vector.load %arg3[%c9_273, %c0_274, %c0_275] : memref<25x10x1024xbf16, #tpu.memory_space<vmem>>, vector<1x10x1024xbf16>
    %431 = vector.shape_cast %430 : vector<1x10x1024xbf16> to vector<10x1024xbf16>
    %cst_276 = arith.constant dense<0.000000e+00> : vector<2x1024xf32>
    %432 = tpu.matmul %429, %431, %cst_276 {dimension_numbers = #tpu.dot_dimension_numbers<[1], [0], [0], [1], [0, 0, 1, 1], [], []>} : vector<2x10xbf16>, vector<10x1024xbf16>, vector<2x1024xf32> -> vector<2x1024xf32>
    %433 = arith.addf %391, %432 : vector<2x1024xf32>
    %c10 = arith.constant 10 : index
    %c0_277 = arith.constant 0 : index
    %c0_278 = arith.constant 0 : index
    %c0_279 = arith.constant 0 : index
    %434 = vector.load %arg1[%c10, %c0_277, %c0_278, %c0_279] : memref<25x4x2x10xf32, #tpu.memory_space<vmem>>, vector<1x1x2x10xf32>
    %435 = vector.shape_cast %434 : vector<1x1x2x10xf32> to vector<2x10xf32>
    %cst_280 = arith.constant dense<0.000000e+00> : vector<2x10xf32>
    %436 = tpu.matmul %428, %4, %cst_280 {dimension_numbers = #tpu.dot_dimension_numbers<[1], [0], [0], [1], [0, 0, 1, 1], [], []>} : vector<2x10xf32>, vector<10x10xf32>, vector<2x10xf32> -> vector<2x10xf32>
    %437 = arith.addf %435, %436 : vector<2x10xf32>
    %438 = arith.negf %437 : vector<2x10xf32>
    %439 = math.exp %438 : vector<2x10xf32>
    %cst_281 = arith.constant 1.000000e+00 : f32
    %440 = vector.broadcast %cst_281 : f32 to vector<2x10xf32>
    %441 = arith.addf %440, %439 : vector<2x10xf32>
    %442 = arith.divf %440, %441 : vector<2x10xf32>
    %c10_282 = arith.constant 10 : index
    %c1_283 = arith.constant 1 : index
    %c0_284 = arith.constant 0 : index
    %c0_285 = arith.constant 0 : index
    %443 = vector.load %arg1[%c10_282, %c1_283, %c0_284, %c0_285] : memref<25x4x2x10xf32, #tpu.memory_space<vmem>>, vector<1x1x2x10xf32>
    %444 = vector.shape_cast %443 : vector<1x1x2x10xf32> to vector<2x10xf32>
    %cst_286 = arith.constant dense<0.000000e+00> : vector<2x10xf32>
    %445 = tpu.matmul %428, %6, %cst_286 {dimension_numbers = #tpu.dot_dimension_numbers<[1], [0], [0], [1], [0, 0, 1, 1], [], []>} : vector<2x10xf32>, vector<10x10xf32>, vector<2x10xf32> -> vector<2x10xf32>
    %446 = arith.addf %444, %445 : vector<2x10xf32>
    %447 = arith.negf %446 : vector<2x10xf32>
    %448 = math.exp %447 : vector<2x10xf32>
    %cst_287 = arith.constant 1.000000e+00 : f32
    %449 = vector.broadcast %cst_287 : f32 to vector<2x10xf32>
    %450 = arith.addf %449, %448 : vector<2x10xf32>
    %451 = arith.divf %449, %450 : vector<2x10xf32>
    %c10_288 = arith.constant 10 : index
    %c2_289 = arith.constant 2 : index
    %c0_290 = arith.constant 0 : index
    %c0_291 = arith.constant 0 : index
    %452 = vector.load %arg1[%c10_288, %c2_289, %c0_290, %c0_291] : memref<25x4x2x10xf32, #tpu.memory_space<vmem>>, vector<1x1x2x10xf32>
    %453 = vector.shape_cast %452 : vector<1x1x2x10xf32> to vector<2x10xf32>
    %cst_292 = arith.constant dense<0.000000e+00> : vector<2x10xf32>
    %454 = tpu.matmul %428, %8, %cst_292 {dimension_numbers = #tpu.dot_dimension_numbers<[1], [0], [0], [1], [0, 0, 1, 1], [], []>} : vector<2x10xf32>, vector<10x10xf32>, vector<2x10xf32> -> vector<2x10xf32>
    %455 = arith.addf %453, %454 : vector<2x10xf32>
    %456 = math.tanh %455 : vector<2x10xf32>
    %c10_293 = arith.constant 10 : index
    %c3_294 = arith.constant 3 : index
    %c0_295 = arith.constant 0 : index
    %c0_296 = arith.constant 0 : index
    %457 = vector.load %arg1[%c10_293, %c3_294, %c0_295, %c0_296] : memref<25x4x2x10xf32, #tpu.memory_space<vmem>>, vector<1x1x2x10xf32>
    %458 = vector.shape_cast %457 : vector<1x1x2x10xf32> to vector<2x10xf32>
    %cst_297 = arith.constant dense<0.000000e+00> : vector<2x10xf32>
    %459 = tpu.matmul %428, %10, %cst_297 {dimension_numbers = #tpu.dot_dimension_numbers<[1], [0], [0], [1], [0, 0, 1, 1], [], []>} : vector<2x10xf32>, vector<10x10xf32>, vector<2x10xf32> -> vector<2x10xf32>
    %460 = arith.addf %458, %459 : vector<2x10xf32>
    %461 = arith.negf %460 : vector<2x10xf32>
    %462 = math.exp %461 : vector<2x10xf32>
    %cst_298 = arith.constant 1.000000e+00 : f32
    %463 = vector.broadcast %cst_298 : f32 to vector<2x10xf32>
    %464 = arith.addf %463, %462 : vector<2x10xf32>
    %465 = arith.divf %463, %464 : vector<2x10xf32>
    %466 = arith.mulf %451, %426 : vector<2x10xf32>
    %467 = arith.mulf %442, %456 : vector<2x10xf32>
    %468 = arith.addf %466, %467 : vector<2x10xf32>
    %469 = math.tanh %468 : vector<2x10xf32>
    %470 = arith.mulf %465, %469 : vector<2x10xf32>
    %471 = arith.truncf %470 : vector<2x10xf32> to vector<2x10xbf16>
    %c10_299 = arith.constant 10 : index
    %c0_300 = arith.constant 0 : index
    %c0_301 = arith.constant 0 : index
    %472 = vector.load %arg3[%c10_299, %c0_300, %c0_301] : memref<25x10x1024xbf16, #tpu.memory_space<vmem>>, vector<1x10x1024xbf16>
    %473 = vector.shape_cast %472 : vector<1x10x1024xbf16> to vector<10x1024xbf16>
    %cst_302 = arith.constant dense<0.000000e+00> : vector<2x1024xf32>
    %474 = tpu.matmul %471, %473, %cst_302 {dimension_numbers = #tpu.dot_dimension_numbers<[1], [0], [0], [1], [0, 0, 1, 1], [], []>} : vector<2x10xbf16>, vector<10x1024xbf16>, vector<2x1024xf32> -> vector<2x1024xf32>
    %475 = arith.addf %433, %474 : vector<2x1024xf32>
    %c11 = arith.constant 11 : index
    %c0_303 = arith.constant 0 : index
    %c0_304 = arith.constant 0 : index
    %c0_305 = arith.constant 0 : index
    %476 = vector.load %arg1[%c11, %c0_303, %c0_304, %c0_305] : memref<25x4x2x10xf32, #tpu.memory_space<vmem>>, vector<1x1x2x10xf32>
    %477 = vector.shape_cast %476 : vector<1x1x2x10xf32> to vector<2x10xf32>
    %cst_306 = arith.constant dense<0.000000e+00> : vector<2x10xf32>
    %478 = tpu.matmul %470, %4, %cst_306 {dimension_numbers = #tpu.dot_dimension_numbers<[1], [0], [0], [1], [0, 0, 1, 1], [], []>} : vector<2x10xf32>, vector<10x10xf32>, vector<2x10xf32> -> vector<2x10xf32>
    %479 = arith.addf %477, %478 : vector<2x10xf32>
    %480 = arith.negf %479 : vector<2x10xf32>
    %481 = math.exp %480 : vector<2x10xf32>
    %cst_307 = arith.constant 1.000000e+00 : f32
    %482 = vector.broadcast %cst_307 : f32 to vector<2x10xf32>
    %483 = arith.addf %482, %481 : vector<2x10xf32>
    %484 = arith.divf %482, %483 : vector<2x10xf32>
    %c11_308 = arith.constant 11 : index
    %c1_309 = arith.constant 1 : index
    %c0_310 = arith.constant 0 : index
    %c0_311 = arith.constant 0 : index
    %485 = vector.load %arg1[%c11_308, %c1_309, %c0_310, %c0_311] : memref<25x4x2x10xf32, #tpu.memory_space<vmem>>, vector<1x1x2x10xf32>
    %486 = vector.shape_cast %485 : vector<1x1x2x10xf32> to vector<2x10xf32>
    %cst_312 = arith.constant dense<0.000000e+00> : vector<2x10xf32>
    %487 = tpu.matmul %470, %6, %cst_312 {dimension_numbers = #tpu.dot_dimension_numbers<[1], [0], [0], [1], [0, 0, 1, 1], [], []>} : vector<2x10xf32>, vector<10x10xf32>, vector<2x10xf32> -> vector<2x10xf32>
    %488 = arith.addf %486, %487 : vector<2x10xf32>
    %489 = arith.negf %488 : vector<2x10xf32>
    %490 = math.exp %489 : vector<2x10xf32>
    %cst_313 = arith.constant 1.000000e+00 : f32
    %491 = vector.broadcast %cst_313 : f32 to vector<2x10xf32>
    %492 = arith.addf %491, %490 : vector<2x10xf32>
    %493 = arith.divf %491, %492 : vector<2x10xf32>
    %c11_314 = arith.constant 11 : index
    %c2_315 = arith.constant 2 : index
    %c0_316 = arith.constant 0 : index
    %c0_317 = arith.constant 0 : index
    %494 = vector.load %arg1[%c11_314, %c2_315, %c0_316, %c0_317] : memref<25x4x2x10xf32, #tpu.memory_space<vmem>>, vector<1x1x2x10xf32>
    %495 = vector.shape_cast %494 : vector<1x1x2x10xf32> to vector<2x10xf32>
    %cst_318 = arith.constant dense<0.000000e+00> : vector<2x10xf32>
    %496 = tpu.matmul %470, %8, %cst_318 {dimension_numbers = #tpu.dot_dimension_numbers<[1], [0], [0], [1], [0, 0, 1, 1], [], []>} : vector<2x10xf32>, vector<10x10xf32>, vector<2x10xf32> -> vector<2x10xf32>
    %497 = arith.addf %495, %496 : vector<2x10xf32>
    %498 = math.tanh %497 : vector<2x10xf32>
    %c11_319 = arith.constant 11 : index
    %c3_320 = arith.constant 3 : index
    %c0_321 = arith.constant 0 : index
    %c0_322 = arith.constant 0 : index
    %499 = vector.load %arg1[%c11_319, %c3_320, %c0_321, %c0_322] : memref<25x4x2x10xf32, #tpu.memory_space<vmem>>, vector<1x1x2x10xf32>
    %500 = vector.shape_cast %499 : vector<1x1x2x10xf32> to vector<2x10xf32>
    %cst_323 = arith.constant dense<0.000000e+00> : vector<2x10xf32>
    %501 = tpu.matmul %470, %10, %cst_323 {dimension_numbers = #tpu.dot_dimension_numbers<[1], [0], [0], [1], [0, 0, 1, 1], [], []>} : vector<2x10xf32>, vector<10x10xf32>, vector<2x10xf32> -> vector<2x10xf32>
    %502 = arith.addf %500, %501 : vector<2x10xf32>
    %503 = arith.negf %502 : vector<2x10xf32>
    %504 = math.exp %503 : vector<2x10xf32>
    %cst_324 = arith.constant 1.000000e+00 : f32
    %505 = vector.broadcast %cst_324 : f32 to vector<2x10xf32>
    %506 = arith.addf %505, %504 : vector<2x10xf32>
    %507 = arith.divf %505, %506 : vector<2x10xf32>
    %508 = arith.mulf %493, %468 : vector<2x10xf32>
    %509 = arith.mulf %484, %498 : vector<2x10xf32>
    %510 = arith.addf %508, %509 : vector<2x10xf32>
    %511 = math.tanh %510 : vector<2x10xf32>
    %512 = arith.mulf %507, %511 : vector<2x10xf32>
    %513 = arith.truncf %512 : vector<2x10xf32> to vector<2x10xbf16>
    %c11_325 = arith.constant 11 : index
    %c0_326 = arith.constant 0 : index
    %c0_327 = arith.constant 0 : index
    %514 = vector.load %arg3[%c11_325, %c0_326, %c0_327] : memref<25x10x1024xbf16, #tpu.memory_space<vmem>>, vector<1x10x1024xbf16>
    %515 = vector.shape_cast %514 : vector<1x10x1024xbf16> to vector<10x1024xbf16>
    %cst_328 = arith.constant dense<0.000000e+00> : vector<2x1024xf32>
    %516 = tpu.matmul %513, %515, %cst_328 {dimension_numbers = #tpu.dot_dimension_numbers<[1], [0], [0], [1], [0, 0, 1, 1], [], []>} : vector<2x10xbf16>, vector<10x1024xbf16>, vector<2x1024xf32> -> vector<2x1024xf32>
    %517 = arith.addf %475, %516 : vector<2x1024xf32>
    %c12 = arith.constant 12 : index
    %c0_329 = arith.constant 0 : index
    %c0_330 = arith.constant 0 : index
    %c0_331 = arith.constant 0 : index
    %518 = vector.load %arg1[%c12, %c0_329, %c0_330, %c0_331] : memref<25x4x2x10xf32, #tpu.memory_space<vmem>>, vector<1x1x2x10xf32>
    %519 = vector.shape_cast %518 : vector<1x1x2x10xf32> to vector<2x10xf32>
    %cst_332 = arith.constant dense<0.000000e+00> : vector<2x10xf32>
    %520 = tpu.matmul %512, %4, %cst_332 {dimension_numbers = #tpu.dot_dimension_numbers<[1], [0], [0], [1], [0, 0, 1, 1], [], []>} : vector<2x10xf32>, vector<10x10xf32>, vector<2x10xf32> -> vector<2x10xf32>
    %521 = arith.addf %519, %520 : vector<2x10xf32>
    %522 = arith.negf %521 : vector<2x10xf32>
    %523 = math.exp %522 : vector<2x10xf32>
    %cst_333 = arith.constant 1.000000e+00 : f32
    %524 = vector.broadcast %cst_333 : f32 to vector<2x10xf32>
    %525 = arith.addf %524, %523 : vector<2x10xf32>
    %526 = arith.divf %524, %525 : vector<2x10xf32>
    %c12_334 = arith.constant 12 : index
    %c1_335 = arith.constant 1 : index
    %c0_336 = arith.constant 0 : index
    %c0_337 = arith.constant 0 : index
    %527 = vector.load %arg1[%c12_334, %c1_335, %c0_336, %c0_337] : memref<25x4x2x10xf32, #tpu.memory_space<vmem>>, vector<1x1x2x10xf32>
    %528 = vector.shape_cast %527 : vector<1x1x2x10xf32> to vector<2x10xf32>
    %cst_338 = arith.constant dense<0.000000e+00> : vector<2x10xf32>
    %529 = tpu.matmul %512, %6, %cst_338 {dimension_numbers = #tpu.dot_dimension_numbers<[1], [0], [0], [1], [0, 0, 1, 1], [], []>} : vector<2x10xf32>, vector<10x10xf32>, vector<2x10xf32> -> vector<2x10xf32>
    %530 = arith.addf %528, %529 : vector<2x10xf32>
    %531 = arith.negf %530 : vector<2x10xf32>
    %532 = math.exp %531 : vector<2x10xf32>
    %cst_339 = arith.constant 1.000000e+00 : f32
    %533 = vector.broadcast %cst_339 : f32 to vector<2x10xf32>
    %534 = arith.addf %533, %532 : vector<2x10xf32>
    %535 = arith.divf %533, %534 : vector<2x10xf32>
    %c12_340 = arith.constant 12 : index
    %c2_341 = arith.constant 2 : index
    %c0_342 = arith.constant 0 : index
    %c0_343 = arith.constant 0 : index
    %536 = vector.load %arg1[%c12_340, %c2_341, %c0_342, %c0_343] : memref<25x4x2x10xf32, #tpu.memory_space<vmem>>, vector<1x1x2x10xf32>
    %537 = vector.shape_cast %536 : vector<1x1x2x10xf32> to vector<2x10xf32>
    %cst_344 = arith.constant dense<0.000000e+00> : vector<2x10xf32>
    %538 = tpu.matmul %512, %8, %cst_344 {dimension_numbers = #tpu.dot_dimension_numbers<[1], [0], [0], [1], [0, 0, 1, 1], [], []>} : vector<2x10xf32>, vector<10x10xf32>, vector<2x10xf32> -> vector<2x10xf32>
    %539 = arith.addf %537, %538 : vector<2x10xf32>
    %540 = math.tanh %539 : vector<2x10xf32>
    %c12_345 = arith.constant 12 : index
    %c3_346 = arith.constant 3 : index
    %c0_347 = arith.constant 0 : index
    %c0_348 = arith.constant 0 : index
    %541 = vector.load %arg1[%c12_345, %c3_346, %c0_347, %c0_348] : memref<25x4x2x10xf32, #tpu.memory_space<vmem>>, vector<1x1x2x10xf32>
    %542 = vector.shape_cast %541 : vector<1x1x2x10xf32> to vector<2x10xf32>
    %cst_349 = arith.constant dense<0.000000e+00> : vector<2x10xf32>
    %543 = tpu.matmul %512, %10, %cst_349 {dimension_numbers = #tpu.dot_dimension_numbers<[1], [0], [0], [1], [0, 0, 1, 1], [], []>} : vector<2x10xf32>, vector<10x10xf32>, vector<2x10xf32> -> vector<2x10xf32>
    %544 = arith.addf %542, %543 : vector<2x10xf32>
    %545 = arith.negf %544 : vector<2x10xf32>
    %546 = math.exp %545 : vector<2x10xf32>
    %cst_350 = arith.constant 1.000000e+00 : f32
    %547 = vector.broadcast %cst_350 : f32 to vector<2x10xf32>
    %548 = arith.addf %547, %546 : vector<2x10xf32>
    %549 = arith.divf %547, %548 : vector<2x10xf32>
    %550 = arith.mulf %535, %510 : vector<2x10xf32>
    %551 = arith.mulf %526, %540 : vector<2x10xf32>
    %552 = arith.addf %550, %551 : vector<2x10xf32>
    %553 = math.tanh %552 : vector<2x10xf32>
    %554 = arith.mulf %549, %553 : vector<2x10xf32>
    %555 = arith.truncf %554 : vector<2x10xf32> to vector<2x10xbf16>
    %c12_351 = arith.constant 12 : index
    %c0_352 = arith.constant 0 : index
    %c0_353 = arith.constant 0 : index
    %556 = vector.load %arg3[%c12_351, %c0_352, %c0_353] : memref<25x10x1024xbf16, #tpu.memory_space<vmem>>, vector<1x10x1024xbf16>
    %557 = vector.shape_cast %556 : vector<1x10x1024xbf16> to vector<10x1024xbf16>
    %cst_354 = arith.constant dense<0.000000e+00> : vector<2x1024xf32>
    %558 = tpu.matmul %555, %557, %cst_354 {dimension_numbers = #tpu.dot_dimension_numbers<[1], [0], [0], [1], [0, 0, 1, 1], [], []>} : vector<2x10xbf16>, vector<10x1024xbf16>, vector<2x1024xf32> -> vector<2x1024xf32>
    %559 = arith.addf %517, %558 : vector<2x1024xf32>
    %c13 = arith.constant 13 : index
    %c0_355 = arith.constant 0 : index
    %c0_356 = arith.constant 0 : index
    %c0_357 = arith.constant 0 : index
    %560 = vector.load %arg1[%c13, %c0_355, %c0_356, %c0_357] : memref<25x4x2x10xf32, #tpu.memory_space<vmem>>, vector<1x1x2x10xf32>
    %561 = vector.shape_cast %560 : vector<1x1x2x10xf32> to vector<2x10xf32>
    %cst_358 = arith.constant dense<0.000000e+00> : vector<2x10xf32>
    %562 = tpu.matmul %554, %4, %cst_358 {dimension_numbers = #tpu.dot_dimension_numbers<[1], [0], [0], [1], [0, 0, 1, 1], [], []>} : vector<2x10xf32>, vector<10x10xf32>, vector<2x10xf32> -> vector<2x10xf32>
    %563 = arith.addf %561, %562 : vector<2x10xf32>
    %564 = arith.negf %563 : vector<2x10xf32>
    %565 = math.exp %564 : vector<2x10xf32>
    %cst_359 = arith.constant 1.000000e+00 : f32
    %566 = vector.broadcast %cst_359 : f32 to vector<2x10xf32>
    %567 = arith.addf %566, %565 : vector<2x10xf32>
    %568 = arith.divf %566, %567 : vector<2x10xf32>
    %c13_360 = arith.constant 13 : index
    %c1_361 = arith.constant 1 : index
    %c0_362 = arith.constant 0 : index
    %c0_363 = arith.constant 0 : index
    %569 = vector.load %arg1[%c13_360, %c1_361, %c0_362, %c0_363] : memref<25x4x2x10xf32, #tpu.memory_space<vmem>>, vector<1x1x2x10xf32>
    %570 = vector.shape_cast %569 : vector<1x1x2x10xf32> to vector<2x10xf32>
    %cst_364 = arith.constant dense<0.000000e+00> : vector<2x10xf32>
    %571 = tpu.matmul %554, %6, %cst_364 {dimension_numbers = #tpu.dot_dimension_numbers<[1], [0], [0], [1], [0, 0, 1, 1], [], []>} : vector<2x10xf32>, vector<10x10xf32>, vector<2x10xf32> -> vector<2x10xf32>
    %572 = arith.addf %570, %571 : vector<2x10xf32>
    %573 = arith.negf %572 : vector<2x10xf32>
    %574 = math.exp %573 : vector<2x10xf32>
    %cst_365 = arith.constant 1.000000e+00 : f32
    %575 = vector.broadcast %cst_365 : f32 to vector<2x10xf32>
    %576 = arith.addf %575, %574 : vector<2x10xf32>
    %577 = arith.divf %575, %576 : vector<2x10xf32>
    %c13_366 = arith.constant 13 : index
    %c2_367 = arith.constant 2 : index
    %c0_368 = arith.constant 0 : index
    %c0_369 = arith.constant 0 : index
    %578 = vector.load %arg1[%c13_366, %c2_367, %c0_368, %c0_369] : memref<25x4x2x10xf32, #tpu.memory_space<vmem>>, vector<1x1x2x10xf32>
    %579 = vector.shape_cast %578 : vector<1x1x2x10xf32> to vector<2x10xf32>
    %cst_370 = arith.constant dense<0.000000e+00> : vector<2x10xf32>
    %580 = tpu.matmul %554, %8, %cst_370 {dimension_numbers = #tpu.dot_dimension_numbers<[1], [0], [0], [1], [0, 0, 1, 1], [], []>} : vector<2x10xf32>, vector<10x10xf32>, vector<2x10xf32> -> vector<2x10xf32>
    %581 = arith.addf %579, %580 : vector<2x10xf32>
    %582 = math.tanh %581 : vector<2x10xf32>
    %c13_371 = arith.constant 13 : index
    %c3_372 = arith.constant 3 : index
    %c0_373 = arith.constant 0 : index
    %c0_374 = arith.constant 0 : index
    %583 = vector.load %arg1[%c13_371, %c3_372, %c0_373, %c0_374] : memref<25x4x2x10xf32, #tpu.memory_space<vmem>>, vector<1x1x2x10xf32>
    %584 = vector.shape_cast %583 : vector<1x1x2x10xf32> to vector<2x10xf32>
    %cst_375 = arith.constant dense<0.000000e+00> : vector<2x10xf32>
    %585 = tpu.matmul %554, %10, %cst_375 {dimension_numbers = #tpu.dot_dimension_numbers<[1], [0], [0], [1], [0, 0, 1, 1], [], []>} : vector<2x10xf32>, vector<10x10xf32>, vector<2x10xf32> -> vector<2x10xf32>
    %586 = arith.addf %584, %585 : vector<2x10xf32>
    %587 = arith.negf %586 : vector<2x10xf32>
    %588 = math.exp %587 : vector<2x10xf32>
    %cst_376 = arith.constant 1.000000e+00 : f32
    %589 = vector.broadcast %cst_376 : f32 to vector<2x10xf32>
    %590 = arith.addf %589, %588 : vector<2x10xf32>
    %591 = arith.divf %589, %590 : vector<2x10xf32>
    %592 = arith.mulf %577, %552 : vector<2x10xf32>
    %593 = arith.mulf %568, %582 : vector<2x10xf32>
    %594 = arith.addf %592, %593 : vector<2x10xf32>
    %595 = math.tanh %594 : vector<2x10xf32>
    %596 = arith.mulf %591, %595 : vector<2x10xf32>
    %597 = arith.truncf %596 : vector<2x10xf32> to vector<2x10xbf16>
    %c13_377 = arith.constant 13 : index
    %c0_378 = arith.constant 0 : index
    %c0_379 = arith.constant 0 : index
    %598 = vector.load %arg3[%c13_377, %c0_378, %c0_379] : memref<25x10x1024xbf16, #tpu.memory_space<vmem>>, vector<1x10x1024xbf16>
    %599 = vector.shape_cast %598 : vector<1x10x1024xbf16> to vector<10x1024xbf16>
    %cst_380 = arith.constant dense<0.000000e+00> : vector<2x1024xf32>
    %600 = tpu.matmul %597, %599, %cst_380 {dimension_numbers = #tpu.dot_dimension_numbers<[1], [0], [0], [1], [0, 0, 1, 1], [], []>} : vector<2x10xbf16>, vector<10x1024xbf16>, vector<2x1024xf32> -> vector<2x1024xf32>
    %601 = arith.addf %559, %600 : vector<2x1024xf32>
    %c14 = arith.constant 14 : index
    %c0_381 = arith.constant 0 : index
    %c0_382 = arith.constant 0 : index
    %c0_383 = arith.constant 0 : index
    %602 = vector.load %arg1[%c14, %c0_381, %c0_382, %c0_383] : memref<25x4x2x10xf32, #tpu.memory_space<vmem>>, vector<1x1x2x10xf32>
    %603 = vector.shape_cast %602 : vector<1x1x2x10xf32> to vector<2x10xf32>
    %cst_384 = arith.constant dense<0.000000e+00> : vector<2x10xf32>
    %604 = tpu.matmul %596, %4, %cst_384 {dimension_numbers = #tpu.dot_dimension_numbers<[1], [0], [0], [1], [0, 0, 1, 1], [], []>} : vector<2x10xf32>, vector<10x10xf32>, vector<2x10xf32> -> vector<2x10xf32>
    %605 = arith.addf %603, %604 : vector<2x10xf32>
    %606 = arith.negf %605 : vector<2x10xf32>
    %607 = math.exp %606 : vector<2x10xf32>
    %cst_385 = arith.constant 1.000000e+00 : f32
    %608 = vector.broadcast %cst_385 : f32 to vector<2x10xf32>
    %609 = arith.addf %608, %607 : vector<2x10xf32>
    %610 = arith.divf %608, %609 : vector<2x10xf32>
    %c14_386 = arith.constant 14 : index
    %c1_387 = arith.constant 1 : index
    %c0_388 = arith.constant 0 : index
    %c0_389 = arith.constant 0 : index
    %611 = vector.load %arg1[%c14_386, %c1_387, %c0_388, %c0_389] : memref<25x4x2x10xf32, #tpu.memory_space<vmem>>, vector<1x1x2x10xf32>
    %612 = vector.shape_cast %611 : vector<1x1x2x10xf32> to vector<2x10xf32>
    %cst_390 = arith.constant dense<0.000000e+00> : vector<2x10xf32>
    %613 = tpu.matmul %596, %6, %cst_390 {dimension_numbers = #tpu.dot_dimension_numbers<[1], [0], [0], [1], [0, 0, 1, 1], [], []>} : vector<2x10xf32>, vector<10x10xf32>, vector<2x10xf32> -> vector<2x10xf32>
    %614 = arith.addf %612, %613 : vector<2x10xf32>
    %615 = arith.negf %614 : vector<2x10xf32>
    %616 = math.exp %615 : vector<2x10xf32>
    %cst_391 = arith.constant 1.000000e+00 : f32
    %617 = vector.broadcast %cst_391 : f32 to vector<2x10xf32>
    %618 = arith.addf %617, %616 : vector<2x10xf32>
    %619 = arith.divf %617, %618 : vector<2x10xf32>
    %c14_392 = arith.constant 14 : index
    %c2_393 = arith.constant 2 : index
    %c0_394 = arith.constant 0 : index
    %c0_395 = arith.constant 0 : index
    %620 = vector.load %arg1[%c14_392, %c2_393, %c0_394, %c0_395] : memref<25x4x2x10xf32, #tpu.memory_space<vmem>>, vector<1x1x2x10xf32>
    %621 = vector.shape_cast %620 : vector<1x1x2x10xf32> to vector<2x10xf32>
    %cst_396 = arith.constant dense<0.000000e+00> : vector<2x10xf32>
    %622 = tpu.matmul %596, %8, %cst_396 {dimension_numbers = #tpu.dot_dimension_numbers<[1], [0], [0], [1], [0, 0, 1, 1], [], []>} : vector<2x10xf32>, vector<10x10xf32>, vector<2x10xf32> -> vector<2x10xf32>
    %623 = arith.addf %621, %622 : vector<2x10xf32>
    %624 = math.tanh %623 : vector<2x10xf32>
    %c14_397 = arith.constant 14 : index
    %c3_398 = arith.constant 3 : index
    %c0_399 = arith.constant 0 : index
    %c0_400 = arith.constant 0 : index
    %625 = vector.load %arg1[%c14_397, %c3_398, %c0_399, %c0_400] : memref<25x4x2x10xf32, #tpu.memory_space<vmem>>, vector<1x1x2x10xf32>
    %626 = vector.shape_cast %625 : vector<1x1x2x10xf32> to vector<2x10xf32>
    %cst_401 = arith.constant dense<0.000000e+00> : vector<2x10xf32>
    %627 = tpu.matmul %596, %10, %cst_401 {dimension_numbers = #tpu.dot_dimension_numbers<[1], [0], [0], [1], [0, 0, 1, 1], [], []>} : vector<2x10xf32>, vector<10x10xf32>, vector<2x10xf32> -> vector<2x10xf32>
    %628 = arith.addf %626, %627 : vector<2x10xf32>
    %629 = arith.negf %628 : vector<2x10xf32>
    %630 = math.exp %629 : vector<2x10xf32>
    %cst_402 = arith.constant 1.000000e+00 : f32
    %631 = vector.broadcast %cst_402 : f32 to vector<2x10xf32>
    %632 = arith.addf %631, %630 : vector<2x10xf32>
    %633 = arith.divf %631, %632 : vector<2x10xf32>
    %634 = arith.mulf %619, %594 : vector<2x10xf32>
    %635 = arith.mulf %610, %624 : vector<2x10xf32>
    %636 = arith.addf %634, %635 : vector<2x10xf32>
    %637 = math.tanh %636 : vector<2x10xf32>
    %638 = arith.mulf %633, %637 : vector<2x10xf32>
    %639 = arith.truncf %638 : vector<2x10xf32> to vector<2x10xbf16>
    %c14_403 = arith.constant 14 : index
    %c0_404 = arith.constant 0 : index
    %c0_405 = arith.constant 0 : index
    %640 = vector.load %arg3[%c14_403, %c0_404, %c0_405] : memref<25x10x1024xbf16, #tpu.memory_space<vmem>>, vector<1x10x1024xbf16>
    %641 = vector.shape_cast %640 : vector<1x10x1024xbf16> to vector<10x1024xbf16>
    %cst_406 = arith.constant dense<0.000000e+00> : vector<2x1024xf32>
    %642 = tpu.matmul %639, %641, %cst_406 {dimension_numbers = #tpu.dot_dimension_numbers<[1], [0], [0], [1], [0, 0, 1, 1], [], []>} : vector<2x10xbf16>, vector<10x1024xbf16>, vector<2x1024xf32> -> vector<2x1024xf32>
    %643 = arith.addf %601, %642 : vector<2x1024xf32>
    %c15 = arith.constant 15 : index
    %c0_407 = arith.constant 0 : index
    %c0_408 = arith.constant 0 : index
    %c0_409 = arith.constant 0 : index
    %644 = vector.load %arg1[%c15, %c0_407, %c0_408, %c0_409] : memref<25x4x2x10xf32, #tpu.memory_space<vmem>>, vector<1x1x2x10xf32>
    %645 = vector.shape_cast %644 : vector<1x1x2x10xf32> to vector<2x10xf32>
    %cst_410 = arith.constant dense<0.000000e+00> : vector<2x10xf32>
    %646 = tpu.matmul %638, %4, %cst_410 {dimension_numbers = #tpu.dot_dimension_numbers<[1], [0], [0], [1], [0, 0, 1, 1], [], []>} : vector<2x10xf32>, vector<10x10xf32>, vector<2x10xf32> -> vector<2x10xf32>
    %647 = arith.addf %645, %646 : vector<2x10xf32>
    %648 = arith.negf %647 : vector<2x10xf32>
    %649 = math.exp %648 : vector<2x10xf32>
    %cst_411 = arith.constant 1.000000e+00 : f32
    %650 = vector.broadcast %cst_411 : f32 to vector<2x10xf32>
    %651 = arith.addf %650, %649 : vector<2x10xf32>
    %652 = arith.divf %650, %651 : vector<2x10xf32>
    %c15_412 = arith.constant 15 : index
    %c1_413 = arith.constant 1 : index
    %c0_414 = arith.constant 0 : index
    %c0_415 = arith.constant 0 : index
    %653 = vector.load %arg1[%c15_412, %c1_413, %c0_414, %c0_415] : memref<25x4x2x10xf32, #tpu.memory_space<vmem>>, vector<1x1x2x10xf32>
    %654 = vector.shape_cast %653 : vector<1x1x2x10xf32> to vector<2x10xf32>
    %cst_416 = arith.constant dense<0.000000e+00> : vector<2x10xf32>
    %655 = tpu.matmul %638, %6, %cst_416 {dimension_numbers = #tpu.dot_dimension_numbers<[1], [0], [0], [1], [0, 0, 1, 1], [], []>} : vector<2x10xf32>, vector<10x10xf32>, vector<2x10xf32> -> vector<2x10xf32>
    %656 = arith.addf %654, %655 : vector<2x10xf32>
    %657 = arith.negf %656 : vector<2x10xf32>
    %658 = math.exp %657 : vector<2x10xf32>
    %cst_417 = arith.constant 1.000000e+00 : f32
    %659 = vector.broadcast %cst_417 : f32 to vector<2x10xf32>
    %660 = arith.addf %659, %658 : vector<2x10xf32>
    %661 = arith.divf %659, %660 : vector<2x10xf32>
    %c15_418 = arith.constant 15 : index
    %c2_419 = arith.constant 2 : index
    %c0_420 = arith.constant 0 : index
    %c0_421 = arith.constant 0 : index
    %662 = vector.load %arg1[%c15_418, %c2_419, %c0_420, %c0_421] : memref<25x4x2x10xf32, #tpu.memory_space<vmem>>, vector<1x1x2x10xf32>
    %663 = vector.shape_cast %662 : vector<1x1x2x10xf32> to vector<2x10xf32>
    %cst_422 = arith.constant dense<0.000000e+00> : vector<2x10xf32>
    %664 = tpu.matmul %638, %8, %cst_422 {dimension_numbers = #tpu.dot_dimension_numbers<[1], [0], [0], [1], [0, 0, 1, 1], [], []>} : vector<2x10xf32>, vector<10x10xf32>, vector<2x10xf32> -> vector<2x10xf32>
    %665 = arith.addf %663, %664 : vector<2x10xf32>
    %666 = math.tanh %665 : vector<2x10xf32>
    %c15_423 = arith.constant 15 : index
    %c3_424 = arith.constant 3 : index
    %c0_425 = arith.constant 0 : index
    %c0_426 = arith.constant 0 : index
    %667 = vector.load %arg1[%c15_423, %c3_424, %c0_425, %c0_426] : memref<25x4x2x10xf32, #tpu.memory_space<vmem>>, vector<1x1x2x10xf32>
    %668 = vector.shape_cast %667 : vector<1x1x2x10xf32> to vector<2x10xf32>
    %cst_427 = arith.constant dense<0.000000e+00> : vector<2x10xf32>
    %669 = tpu.matmul %638, %10, %cst_427 {dimension_numbers = #tpu.dot_dimension_numbers<[1], [0], [0], [1], [0, 0, 1, 1], [], []>} : vector<2x10xf32>, vector<10x10xf32>, vector<2x10xf32> -> vector<2x10xf32>
    %670 = arith.addf %668, %669 : vector<2x10xf32>
    %671 = arith.negf %670 : vector<2x10xf32>
    %672 = math.exp %671 : vector<2x10xf32>
    %cst_428 = arith.constant 1.000000e+00 : f32
    %673 = vector.broadcast %cst_428 : f32 to vector<2x10xf32>
    %674 = arith.addf %673, %672 : vector<2x10xf32>
    %675 = arith.divf %673, %674 : vector<2x10xf32>
    %676 = arith.mulf %661, %636 : vector<2x10xf32>
    %677 = arith.mulf %652, %666 : vector<2x10xf32>
    %678 = arith.addf %676, %677 : vector<2x10xf32>
    %679 = math.tanh %678 : vector<2x10xf32>
    %680 = arith.mulf %675, %679 : vector<2x10xf32>
    %681 = arith.truncf %680 : vector<2x10xf32> to vector<2x10xbf16>
    %c15_429 = arith.constant 15 : index
    %c0_430 = arith.constant 0 : index
    %c0_431 = arith.constant 0 : index
    %682 = vector.load %arg3[%c15_429, %c0_430, %c0_431] : memref<25x10x1024xbf16, #tpu.memory_space<vmem>>, vector<1x10x1024xbf16>
    %683 = vector.shape_cast %682 : vector<1x10x1024xbf16> to vector<10x1024xbf16>
    %cst_432 = arith.constant dense<0.000000e+00> : vector<2x1024xf32>
    %684 = tpu.matmul %681, %683, %cst_432 {dimension_numbers = #tpu.dot_dimension_numbers<[1], [0], [0], [1], [0, 0, 1, 1], [], []>} : vector<2x10xbf16>, vector<10x1024xbf16>, vector<2x1024xf32> -> vector<2x1024xf32>
    %685 = arith.addf %643, %684 : vector<2x1024xf32>
    %c16 = arith.constant 16 : index
    %c0_433 = arith.constant 0 : index
    %c0_434 = arith.constant 0 : index
    %c0_435 = arith.constant 0 : index
    %686 = vector.load %arg1[%c16, %c0_433, %c0_434, %c0_435] : memref<25x4x2x10xf32, #tpu.memory_space<vmem>>, vector<1x1x2x10xf32>
    %687 = vector.shape_cast %686 : vector<1x1x2x10xf32> to vector<2x10xf32>
    %cst_436 = arith.constant dense<0.000000e+00> : vector<2x10xf32>
    %688 = tpu.matmul %680, %4, %cst_436 {dimension_numbers = #tpu.dot_dimension_numbers<[1], [0], [0], [1], [0, 0, 1, 1], [], []>} : vector<2x10xf32>, vector<10x10xf32>, vector<2x10xf32> -> vector<2x10xf32>
    %689 = arith.addf %687, %688 : vector<2x10xf32>
    %690 = arith.negf %689 : vector<2x10xf32>
    %691 = math.exp %690 : vector<2x10xf32>
    %cst_437 = arith.constant 1.000000e+00 : f32
    %692 = vector.broadcast %cst_437 : f32 to vector<2x10xf32>
    %693 = arith.addf %692, %691 : vector<2x10xf32>
    %694 = arith.divf %692, %693 : vector<2x10xf32>
    %c16_438 = arith.constant 16 : index
    %c1_439 = arith.constant 1 : index
    %c0_440 = arith.constant 0 : index
    %c0_441 = arith.constant 0 : index
    %695 = vector.load %arg1[%c16_438, %c1_439, %c0_440, %c0_441] : memref<25x4x2x10xf32, #tpu.memory_space<vmem>>, vector<1x1x2x10xf32>
    %696 = vector.shape_cast %695 : vector<1x1x2x10xf32> to vector<2x10xf32>
    %cst_442 = arith.constant dense<0.000000e+00> : vector<2x10xf32>
    %697 = tpu.matmul %680, %6, %cst_442 {dimension_numbers = #tpu.dot_dimension_numbers<[1], [0], [0], [1], [0, 0, 1, 1], [], []>} : vector<2x10xf32>, vector<10x10xf32>, vector<2x10xf32> -> vector<2x10xf32>
    %698 = arith.addf %696, %697 : vector<2x10xf32>
    %699 = arith.negf %698 : vector<2x10xf32>
    %700 = math.exp %699 : vector<2x10xf32>
    %cst_443 = arith.constant 1.000000e+00 : f32
    %701 = vector.broadcast %cst_443 : f32 to vector<2x10xf32>
    %702 = arith.addf %701, %700 : vector<2x10xf32>
    %703 = arith.divf %701, %702 : vector<2x10xf32>
    %c16_444 = arith.constant 16 : index
    %c2_445 = arith.constant 2 : index
    %c0_446 = arith.constant 0 : index
    %c0_447 = arith.constant 0 : index
    %704 = vector.load %arg1[%c16_444, %c2_445, %c0_446, %c0_447] : memref<25x4x2x10xf32, #tpu.memory_space<vmem>>, vector<1x1x2x10xf32>
    %705 = vector.shape_cast %704 : vector<1x1x2x10xf32> to vector<2x10xf32>
    %cst_448 = arith.constant dense<0.000000e+00> : vector<2x10xf32>
    %706 = tpu.matmul %680, %8, %cst_448 {dimension_numbers = #tpu.dot_dimension_numbers<[1], [0], [0], [1], [0, 0, 1, 1], [], []>} : vector<2x10xf32>, vector<10x10xf32>, vector<2x10xf32> -> vector<2x10xf32>
    %707 = arith.addf %705, %706 : vector<2x10xf32>
    %708 = math.tanh %707 : vector<2x10xf32>
    %c16_449 = arith.constant 16 : index
    %c3_450 = arith.constant 3 : index
    %c0_451 = arith.constant 0 : index
    %c0_452 = arith.constant 0 : index
    %709 = vector.load %arg1[%c16_449, %c3_450, %c0_451, %c0_452] : memref<25x4x2x10xf32, #tpu.memory_space<vmem>>, vector<1x1x2x10xf32>
    %710 = vector.shape_cast %709 : vector<1x1x2x10xf32> to vector<2x10xf32>
    %cst_453 = arith.constant dense<0.000000e+00> : vector<2x10xf32>
    %711 = tpu.matmul %680, %10, %cst_453 {dimension_numbers = #tpu.dot_dimension_numbers<[1], [0], [0], [1], [0, 0, 1, 1], [], []>} : vector<2x10xf32>, vector<10x10xf32>, vector<2x10xf32> -> vector<2x10xf32>
    %712 = arith.addf %710, %711 : vector<2x10xf32>
    %713 = arith.negf %712 : vector<2x10xf32>
    %714 = math.exp %713 : vector<2x10xf32>
    %cst_454 = arith.constant 1.000000e+00 : f32
    %715 = vector.broadcast %cst_454 : f32 to vector<2x10xf32>
    %716 = arith.addf %715, %714 : vector<2x10xf32>
    %717 = arith.divf %715, %716 : vector<2x10xf32>
    %718 = arith.mulf %703, %678 : vector<2x10xf32>
    %719 = arith.mulf %694, %708 : vector<2x10xf32>
    %720 = arith.addf %718, %719 : vector<2x10xf32>
    %721 = math.tanh %720 : vector<2x10xf32>
    %722 = arith.mulf %717, %721 : vector<2x10xf32>
    %723 = arith.truncf %722 : vector<2x10xf32> to vector<2x10xbf16>
    %c16_455 = arith.constant 16 : index
    %c0_456 = arith.constant 0 : index
    %c0_457 = arith.constant 0 : index
    %724 = vector.load %arg3[%c16_455, %c0_456, %c0_457] : memref<25x10x1024xbf16, #tpu.memory_space<vmem>>, vector<1x10x1024xbf16>
    %725 = vector.shape_cast %724 : vector<1x10x1024xbf16> to vector<10x1024xbf16>
    %cst_458 = arith.constant dense<0.000000e+00> : vector<2x1024xf32>
    %726 = tpu.matmul %723, %725, %cst_458 {dimension_numbers = #tpu.dot_dimension_numbers<[1], [0], [0], [1], [0, 0, 1, 1], [], []>} : vector<2x10xbf16>, vector<10x1024xbf16>, vector<2x1024xf32> -> vector<2x1024xf32>
    %727 = arith.addf %685, %726 : vector<2x1024xf32>
    %c17 = arith.constant 17 : index
    %c0_459 = arith.constant 0 : index
    %c0_460 = arith.constant 0 : index
    %c0_461 = arith.constant 0 : index
    %728 = vector.load %arg1[%c17, %c0_459, %c0_460, %c0_461] : memref<25x4x2x10xf32, #tpu.memory_space<vmem>>, vector<1x1x2x10xf32>
    %729 = vector.shape_cast %728 : vector<1x1x2x10xf32> to vector<2x10xf32>
    %cst_462 = arith.constant dense<0.000000e+00> : vector<2x10xf32>
    %730 = tpu.matmul %722, %4, %cst_462 {dimension_numbers = #tpu.dot_dimension_numbers<[1], [0], [0], [1], [0, 0, 1, 1], [], []>} : vector<2x10xf32>, vector<10x10xf32>, vector<2x10xf32> -> vector<2x10xf32>
    %731 = arith.addf %729, %730 : vector<2x10xf32>
    %732 = arith.negf %731 : vector<2x10xf32>
    %733 = math.exp %732 : vector<2x10xf32>
    %cst_463 = arith.constant 1.000000e+00 : f32
    %734 = vector.broadcast %cst_463 : f32 to vector<2x10xf32>
    %735 = arith.addf %734, %733 : vector<2x10xf32>
    %736 = arith.divf %734, %735 : vector<2x10xf32>
    %c17_464 = arith.constant 17 : index
    %c1_465 = arith.constant 1 : index
    %c0_466 = arith.constant 0 : index
    %c0_467 = arith.constant 0 : index
    %737 = vector.load %arg1[%c17_464, %c1_465, %c0_466, %c0_467] : memref<25x4x2x10xf32, #tpu.memory_space<vmem>>, vector<1x1x2x10xf32>
    %738 = vector.shape_cast %737 : vector<1x1x2x10xf32> to vector<2x10xf32>
    %cst_468 = arith.constant dense<0.000000e+00> : vector<2x10xf32>
    %739 = tpu.matmul %722, %6, %cst_468 {dimension_numbers = #tpu.dot_dimension_numbers<[1], [0], [0], [1], [0, 0, 1, 1], [], []>} : vector<2x10xf32>, vector<10x10xf32>, vector<2x10xf32> -> vector<2x10xf32>
    %740 = arith.addf %738, %739 : vector<2x10xf32>
    %741 = arith.negf %740 : vector<2x10xf32>
    %742 = math.exp %741 : vector<2x10xf32>
    %cst_469 = arith.constant 1.000000e+00 : f32
    %743 = vector.broadcast %cst_469 : f32 to vector<2x10xf32>
    %744 = arith.addf %743, %742 : vector<2x10xf32>
    %745 = arith.divf %743, %744 : vector<2x10xf32>
    %c17_470 = arith.constant 17 : index
    %c2_471 = arith.constant 2 : index
    %c0_472 = arith.constant 0 : index
    %c0_473 = arith.constant 0 : index
    %746 = vector.load %arg1[%c17_470, %c2_471, %c0_472, %c0_473] : memref<25x4x2x10xf32, #tpu.memory_space<vmem>>, vector<1x1x2x10xf32>
    %747 = vector.shape_cast %746 : vector<1x1x2x10xf32> to vector<2x10xf32>
    %cst_474 = arith.constant dense<0.000000e+00> : vector<2x10xf32>
    %748 = tpu.matmul %722, %8, %cst_474 {dimension_numbers = #tpu.dot_dimension_numbers<[1], [0], [0], [1], [0, 0, 1, 1], [], []>} : vector<2x10xf32>, vector<10x10xf32>, vector<2x10xf32> -> vector<2x10xf32>
    %749 = arith.addf %747, %748 : vector<2x10xf32>
    %750 = math.tanh %749 : vector<2x10xf32>
    %c17_475 = arith.constant 17 : index
    %c3_476 = arith.constant 3 : index
    %c0_477 = arith.constant 0 : index
    %c0_478 = arith.constant 0 : index
    %751 = vector.load %arg1[%c17_475, %c3_476, %c0_477, %c0_478] : memref<25x4x2x10xf32, #tpu.memory_space<vmem>>, vector<1x1x2x10xf32>
    %752 = vector.shape_cast %751 : vector<1x1x2x10xf32> to vector<2x10xf32>
    %cst_479 = arith.constant dense<0.000000e+00> : vector<2x10xf32>
    %753 = tpu.matmul %722, %10, %cst_479 {dimension_numbers = #tpu.dot_dimension_numbers<[1], [0], [0], [1], [0, 0, 1, 1], [], []>} : vector<2x10xf32>, vector<10x10xf32>, vector<2x10xf32> -> vector<2x10xf32>
    %754 = arith.addf %752, %753 : vector<2x10xf32>
    %755 = arith.negf %754 : vector<2x10xf32>
    %756 = math.exp %755 : vector<2x10xf32>
    %cst_480 = arith.constant 1.000000e+00 : f32
    %757 = vector.broadcast %cst_480 : f32 to vector<2x10xf32>
    %758 = arith.addf %757, %756 : vector<2x10xf32>
    %759 = arith.divf %757, %758 : vector<2x10xf32>
    %760 = arith.mulf %745, %720 : vector<2x10xf32>
    %761 = arith.mulf %736, %750 : vector<2x10xf32>
    %762 = arith.addf %760, %761 : vector<2x10xf32>
    %763 = math.tanh %762 : vector<2x10xf32>
    %764 = arith.mulf %759, %763 : vector<2x10xf32>
    %765 = arith.truncf %764 : vector<2x10xf32> to vector<2x10xbf16>
    %c17_481 = arith.constant 17 : index
    %c0_482 = arith.constant 0 : index
    %c0_483 = arith.constant 0 : index
    %766 = vector.load %arg3[%c17_481, %c0_482, %c0_483] : memref<25x10x1024xbf16, #tpu.memory_space<vmem>>, vector<1x10x1024xbf16>
    %767 = vector.shape_cast %766 : vector<1x10x1024xbf16> to vector<10x1024xbf16>
    %cst_484 = arith.constant dense<0.000000e+00> : vector<2x1024xf32>
    %768 = tpu.matmul %765, %767, %cst_484 {dimension_numbers = #tpu.dot_dimension_numbers<[1], [0], [0], [1], [0, 0, 1, 1], [], []>} : vector<2x10xbf16>, vector<10x1024xbf16>, vector<2x1024xf32> -> vector<2x1024xf32>
    %769 = arith.addf %727, %768 : vector<2x1024xf32>
    %c18 = arith.constant 18 : index
    %c0_485 = arith.constant 0 : index
    %c0_486 = arith.constant 0 : index
    %c0_487 = arith.constant 0 : index
    %770 = vector.load %arg1[%c18, %c0_485, %c0_486, %c0_487] : memref<25x4x2x10xf32, #tpu.memory_space<vmem>>, vector<1x1x2x10xf32>
    %771 = vector.shape_cast %770 : vector<1x1x2x10xf32> to vector<2x10xf32>
    %cst_488 = arith.constant dense<0.000000e+00> : vector<2x10xf32>
    %772 = tpu.matmul %764, %4, %cst_488 {dimension_numbers = #tpu.dot_dimension_numbers<[1], [0], [0], [1], [0, 0, 1, 1], [], []>} : vector<2x10xf32>, vector<10x10xf32>, vector<2x10xf32> -> vector<2x10xf32>
    %773 = arith.addf %771, %772 : vector<2x10xf32>
    %774 = arith.negf %773 : vector<2x10xf32>
    %775 = math.exp %774 : vector<2x10xf32>
    %cst_489 = arith.constant 1.000000e+00 : f32
    %776 = vector.broadcast %cst_489 : f32 to vector<2x10xf32>
    %777 = arith.addf %776, %775 : vector<2x10xf32>
    %778 = arith.divf %776, %777 : vector<2x10xf32>
    %c18_490 = arith.constant 18 : index
    %c1_491 = arith.constant 1 : index
    %c0_492 = arith.constant 0 : index
    %c0_493 = arith.constant 0 : index
    %779 = vector.load %arg1[%c18_490, %c1_491, %c0_492, %c0_493] : memref<25x4x2x10xf32, #tpu.memory_space<vmem>>, vector<1x1x2x10xf32>
    %780 = vector.shape_cast %779 : vector<1x1x2x10xf32> to vector<2x10xf32>
    %cst_494 = arith.constant dense<0.000000e+00> : vector<2x10xf32>
    %781 = tpu.matmul %764, %6, %cst_494 {dimension_numbers = #tpu.dot_dimension_numbers<[1], [0], [0], [1], [0, 0, 1, 1], [], []>} : vector<2x10xf32>, vector<10x10xf32>, vector<2x10xf32> -> vector<2x10xf32>
    %782 = arith.addf %780, %781 : vector<2x10xf32>
    %783 = arith.negf %782 : vector<2x10xf32>
    %784 = math.exp %783 : vector<2x10xf32>
    %cst_495 = arith.constant 1.000000e+00 : f32
    %785 = vector.broadcast %cst_495 : f32 to vector<2x10xf32>
    %786 = arith.addf %785, %784 : vector<2x10xf32>
    %787 = arith.divf %785, %786 : vector<2x10xf32>
    %c18_496 = arith.constant 18 : index
    %c2_497 = arith.constant 2 : index
    %c0_498 = arith.constant 0 : index
    %c0_499 = arith.constant 0 : index
    %788 = vector.load %arg1[%c18_496, %c2_497, %c0_498, %c0_499] : memref<25x4x2x10xf32, #tpu.memory_space<vmem>>, vector<1x1x2x10xf32>
    %789 = vector.shape_cast %788 : vector<1x1x2x10xf32> to vector<2x10xf32>
    %cst_500 = arith.constant dense<0.000000e+00> : vector<2x10xf32>
    %790 = tpu.matmul %764, %8, %cst_500 {dimension_numbers = #tpu.dot_dimension_numbers<[1], [0], [0], [1], [0, 0, 1, 1], [], []>} : vector<2x10xf32>, vector<10x10xf32>, vector<2x10xf32> -> vector<2x10xf32>
    %791 = arith.addf %789, %790 : vector<2x10xf32>
    %792 = math.tanh %791 : vector<2x10xf32>
    %c18_501 = arith.constant 18 : index
    %c3_502 = arith.constant 3 : index
    %c0_503 = arith.constant 0 : index
    %c0_504 = arith.constant 0 : index
    %793 = vector.load %arg1[%c18_501, %c3_502, %c0_503, %c0_504] : memref<25x4x2x10xf32, #tpu.memory_space<vmem>>, vector<1x1x2x10xf32>
    %794 = vector.shape_cast %793 : vector<1x1x2x10xf32> to vector<2x10xf32>
    %cst_505 = arith.constant dense<0.000000e+00> : vector<2x10xf32>
    %795 = tpu.matmul %764, %10, %cst_505 {dimension_numbers = #tpu.dot_dimension_numbers<[1], [0], [0], [1], [0, 0, 1, 1], [], []>} : vector<2x10xf32>, vector<10x10xf32>, vector<2x10xf32> -> vector<2x10xf32>
    %796 = arith.addf %794, %795 : vector<2x10xf32>
    %797 = arith.negf %796 : vector<2x10xf32>
    %798 = math.exp %797 : vector<2x10xf32>
    %cst_506 = arith.constant 1.000000e+00 : f32
    %799 = vector.broadcast %cst_506 : f32 to vector<2x10xf32>
    %800 = arith.addf %799, %798 : vector<2x10xf32>
    %801 = arith.divf %799, %800 : vector<2x10xf32>
    %802 = arith.mulf %787, %762 : vector<2x10xf32>
    %803 = arith.mulf %778, %792 : vector<2x10xf32>
    %804 = arith.addf %802, %803 : vector<2x10xf32>
    %805 = math.tanh %804 : vector<2x10xf32>
    %806 = arith.mulf %801, %805 : vector<2x10xf32>
    %807 = arith.truncf %806 : vector<2x10xf32> to vector<2x10xbf16>
    %c18_507 = arith.constant 18 : index
    %c0_508 = arith.constant 0 : index
    %c0_509 = arith.constant 0 : index
    %808 = vector.load %arg3[%c18_507, %c0_508, %c0_509] : memref<25x10x1024xbf16, #tpu.memory_space<vmem>>, vector<1x10x1024xbf16>
    %809 = vector.shape_cast %808 : vector<1x10x1024xbf16> to vector<10x1024xbf16>
    %cst_510 = arith.constant dense<0.000000e+00> : vector<2x1024xf32>
    %810 = tpu.matmul %807, %809, %cst_510 {dimension_numbers = #tpu.dot_dimension_numbers<[1], [0], [0], [1], [0, 0, 1, 1], [], []>} : vector<2x10xbf16>, vector<10x1024xbf16>, vector<2x1024xf32> -> vector<2x1024xf32>
    %811 = arith.addf %769, %810 : vector<2x1024xf32>
    %c19 = arith.constant 19 : index
    %c0_511 = arith.constant 0 : index
    %c0_512 = arith.constant 0 : index
    %c0_513 = arith.constant 0 : index
    %812 = vector.load %arg1[%c19, %c0_511, %c0_512, %c0_513] : memref<25x4x2x10xf32, #tpu.memory_space<vmem>>, vector<1x1x2x10xf32>
    %813 = vector.shape_cast %812 : vector<1x1x2x10xf32> to vector<2x10xf32>
    %cst_514 = arith.constant dense<0.000000e+00> : vector<2x10xf32>
    %814 = tpu.matmul %806, %4, %cst_514 {dimension_numbers = #tpu.dot_dimension_numbers<[1], [0], [0], [1], [0, 0, 1, 1], [], []>} : vector<2x10xf32>, vector<10x10xf32>, vector<2x10xf32> -> vector<2x10xf32>
    %815 = arith.addf %813, %814 : vector<2x10xf32>
    %816 = arith.negf %815 : vector<2x10xf32>
    %817 = math.exp %816 : vector<2x10xf32>
    %cst_515 = arith.constant 1.000000e+00 : f32
    %818 = vector.broadcast %cst_515 : f32 to vector<2x10xf32>
    %819 = arith.addf %818, %817 : vector<2x10xf32>
    %820 = arith.divf %818, %819 : vector<2x10xf32>
    %c19_516 = arith.constant 19 : index
    %c1_517 = arith.constant 1 : index
    %c0_518 = arith.constant 0 : index
    %c0_519 = arith.constant 0 : index
    %821 = vector.load %arg1[%c19_516, %c1_517, %c0_518, %c0_519] : memref<25x4x2x10xf32, #tpu.memory_space<vmem>>, vector<1x1x2x10xf32>
    %822 = vector.shape_cast %821 : vector<1x1x2x10xf32> to vector<2x10xf32>
    %cst_520 = arith.constant dense<0.000000e+00> : vector<2x10xf32>
    %823 = tpu.matmul %806, %6, %cst_520 {dimension_numbers = #tpu.dot_dimension_numbers<[1], [0], [0], [1], [0, 0, 1, 1], [], []>} : vector<2x10xf32>, vector<10x10xf32>, vector<2x10xf32> -> vector<2x10xf32>
    %824 = arith.addf %822, %823 : vector<2x10xf32>
    %825 = arith.negf %824 : vector<2x10xf32>
    %826 = math.exp %825 : vector<2x10xf32>
    %cst_521 = arith.constant 1.000000e+00 : f32
    %827 = vector.broadcast %cst_521 : f32 to vector<2x10xf32>
    %828 = arith.addf %827, %826 : vector<2x10xf32>
    %829 = arith.divf %827, %828 : vector<2x10xf32>
    %c19_522 = arith.constant 19 : index
    %c2_523 = arith.constant 2 : index
    %c0_524 = arith.constant 0 : index
    %c0_525 = arith.constant 0 : index
    %830 = vector.load %arg1[%c19_522, %c2_523, %c0_524, %c0_525] : memref<25x4x2x10xf32, #tpu.memory_space<vmem>>, vector<1x1x2x10xf32>
    %831 = vector.shape_cast %830 : vector<1x1x2x10xf32> to vector<2x10xf32>
    %cst_526 = arith.constant dense<0.000000e+00> : vector<2x10xf32>
    %832 = tpu.matmul %806, %8, %cst_526 {dimension_numbers = #tpu.dot_dimension_numbers<[1], [0], [0], [1], [0, 0, 1, 1], [], []>} : vector<2x10xf32>, vector<10x10xf32>, vector<2x10xf32> -> vector<2x10xf32>
    %833 = arith.addf %831, %832 : vector<2x10xf32>
    %834 = math.tanh %833 : vector<2x10xf32>
    %c19_527 = arith.constant 19 : index
    %c3_528 = arith.constant 3 : index
    %c0_529 = arith.constant 0 : index
    %c0_530 = arith.constant 0 : index
    %835 = vector.load %arg1[%c19_527, %c3_528, %c0_529, %c0_530] : memref<25x4x2x10xf32, #tpu.memory_space<vmem>>, vector<1x1x2x10xf32>
    %836 = vector.shape_cast %835 : vector<1x1x2x10xf32> to vector<2x10xf32>
    %cst_531 = arith.constant dense<0.000000e+00> : vector<2x10xf32>
    %837 = tpu.matmul %806, %10, %cst_531 {dimension_numbers = #tpu.dot_dimension_numbers<[1], [0], [0], [1], [0, 0, 1, 1], [], []>} : vector<2x10xf32>, vector<10x10xf32>, vector<2x10xf32> -> vector<2x10xf32>
    %838 = arith.addf %836, %837 : vector<2x10xf32>
    %839 = arith.negf %838 : vector<2x10xf32>
    %840 = math.exp %839 : vector<2x10xf32>
    %cst_532 = arith.constant 1.000000e+00 : f32
    %841 = vector.broadcast %cst_532 : f32 to vector<2x10xf32>
    %842 = arith.addf %841, %840 : vector<2x10xf32>
    %843 = arith.divf %841, %842 : vector<2x10xf32>
    %844 = arith.mulf %829, %804 : vector<2x10xf32>
    %845 = arith.mulf %820, %834 : vector<2x10xf32>
    %846 = arith.addf %844, %845 : vector<2x10xf32>
    %847 = math.tanh %846 : vector<2x10xf32>
    %848 = arith.mulf %843, %847 : vector<2x10xf32>
    %849 = arith.truncf %848 : vector<2x10xf32> to vector<2x10xbf16>
    %c19_533 = arith.constant 19 : index
    %c0_534 = arith.constant 0 : index
    %c0_535 = arith.constant 0 : index
    %850 = vector.load %arg3[%c19_533, %c0_534, %c0_535] : memref<25x10x1024xbf16, #tpu.memory_space<vmem>>, vector<1x10x1024xbf16>
    %851 = vector.shape_cast %850 : vector<1x10x1024xbf16> to vector<10x1024xbf16>
    %cst_536 = arith.constant dense<0.000000e+00> : vector<2x1024xf32>
    %852 = tpu.matmul %849, %851, %cst_536 {dimension_numbers = #tpu.dot_dimension_numbers<[1], [0], [0], [1], [0, 0, 1, 1], [], []>} : vector<2x10xbf16>, vector<10x1024xbf16>, vector<2x1024xf32> -> vector<2x1024xf32>
    %853 = arith.addf %811, %852 : vector<2x1024xf32>
    %c20 = arith.constant 20 : index
    %c0_537 = arith.constant 0 : index
    %c0_538 = arith.constant 0 : index
    %c0_539 = arith.constant 0 : index
    %854 = vector.load %arg1[%c20, %c0_537, %c0_538, %c0_539] : memref<25x4x2x10xf32, #tpu.memory_space<vmem>>, vector<1x1x2x10xf32>
    %855 = vector.shape_cast %854 : vector<1x1x2x10xf32> to vector<2x10xf32>
    %cst_540 = arith.constant dense<0.000000e+00> : vector<2x10xf32>
    %856 = tpu.matmul %848, %4, %cst_540 {dimension_numbers = #tpu.dot_dimension_numbers<[1], [0], [0], [1], [0, 0, 1, 1], [], []>} : vector<2x10xf32>, vector<10x10xf32>, vector<2x10xf32> -> vector<2x10xf32>
    %857 = arith.addf %855, %856 : vector<2x10xf32>
    %858 = arith.negf %857 : vector<2x10xf32>
    %859 = math.exp %858 : vector<2x10xf32>
    %cst_541 = arith.constant 1.000000e+00 : f32
    %860 = vector.broadcast %cst_541 : f32 to vector<2x10xf32>
    %861 = arith.addf %860, %859 : vector<2x10xf32>
    %862 = arith.divf %860, %861 : vector<2x10xf32>
    %c20_542 = arith.constant 20 : index
    %c1_543 = arith.constant 1 : index
    %c0_544 = arith.constant 0 : index
    %c0_545 = arith.constant 0 : index
    %863 = vector.load %arg1[%c20_542, %c1_543, %c0_544, %c0_545] : memref<25x4x2x10xf32, #tpu.memory_space<vmem>>, vector<1x1x2x10xf32>
    %864 = vector.shape_cast %863 : vector<1x1x2x10xf32> to vector<2x10xf32>
    %cst_546 = arith.constant dense<0.000000e+00> : vector<2x10xf32>
    %865 = tpu.matmul %848, %6, %cst_546 {dimension_numbers = #tpu.dot_dimension_numbers<[1], [0], [0], [1], [0, 0, 1, 1], [], []>} : vector<2x10xf32>, vector<10x10xf32>, vector<2x10xf32> -> vector<2x10xf32>
    %866 = arith.addf %864, %865 : vector<2x10xf32>
    %867 = arith.negf %866 : vector<2x10xf32>
    %868 = math.exp %867 : vector<2x10xf32>
    %cst_547 = arith.constant 1.000000e+00 : f32
    %869 = vector.broadcast %cst_547 : f32 to vector<2x10xf32>
    %870 = arith.addf %869, %868 : vector<2x10xf32>
    %871 = arith.divf %869, %870 : vector<2x10xf32>
    %c20_548 = arith.constant 20 : index
    %c2_549 = arith.constant 2 : index
    %c0_550 = arith.constant 0 : index
    %c0_551 = arith.constant 0 : index
    %872 = vector.load %arg1[%c20_548, %c2_549, %c0_550, %c0_551] : memref<25x4x2x10xf32, #tpu.memory_space<vmem>>, vector<1x1x2x10xf32>
    %873 = vector.shape_cast %872 : vector<1x1x2x10xf32> to vector<2x10xf32>
    %cst_552 = arith.constant dense<0.000000e+00> : vector<2x10xf32>
    %874 = tpu.matmul %848, %8, %cst_552 {dimension_numbers = #tpu.dot_dimension_numbers<[1], [0], [0], [1], [0, 0, 1, 1], [], []>} : vector<2x10xf32>, vector<10x10xf32>, vector<2x10xf32> -> vector<2x10xf32>
    %875 = arith.addf %873, %874 : vector<2x10xf32>
    %876 = math.tanh %875 : vector<2x10xf32>
    %c20_553 = arith.constant 20 : index
    %c3_554 = arith.constant 3 : index
    %c0_555 = arith.constant 0 : index
    %c0_556 = arith.constant 0 : index
    %877 = vector.load %arg1[%c20_553, %c3_554, %c0_555, %c0_556] : memref<25x4x2x10xf32, #tpu.memory_space<vmem>>, vector<1x1x2x10xf32>
    %878 = vector.shape_cast %877 : vector<1x1x2x10xf32> to vector<2x10xf32>
    %cst_557 = arith.constant dense<0.000000e+00> : vector<2x10xf32>
    %879 = tpu.matmul %848, %10, %cst_557 {dimension_numbers = #tpu.dot_dimension_numbers<[1], [0], [0], [1], [0, 0, 1, 1], [], []>} : vector<2x10xf32>, vector<10x10xf32>, vector<2x10xf32> -> vector<2x10xf32>
    %880 = arith.addf %878, %879 : vector<2x10xf32>
    %881 = arith.negf %880 : vector<2x10xf32>
    %882 = math.exp %881 : vector<2x10xf32>
    %cst_558 = arith.constant 1.000000e+00 : f32
    %883 = vector.broadcast %cst_558 : f32 to vector<2x10xf32>
    %884 = arith.addf %883, %882 : vector<2x10xf32>
    %885 = arith.divf %883, %884 : vector<2x10xf32>
    %886 = arith.mulf %871, %846 : vector<2x10xf32>
    %887 = arith.mulf %862, %876 : vector<2x10xf32>
    %888 = arith.addf %886, %887 : vector<2x10xf32>
    %889 = math.tanh %888 : vector<2x10xf32>
    %890 = arith.mulf %885, %889 : vector<2x10xf32>
    %891 = arith.truncf %890 : vector<2x10xf32> to vector<2x10xbf16>
    %c20_559 = arith.constant 20 : index
    %c0_560 = arith.constant 0 : index
    %c0_561 = arith.constant 0 : index
    %892 = vector.load %arg3[%c20_559, %c0_560, %c0_561] : memref<25x10x1024xbf16, #tpu.memory_space<vmem>>, vector<1x10x1024xbf16>
    %893 = vector.shape_cast %892 : vector<1x10x1024xbf16> to vector<10x1024xbf16>
    %cst_562 = arith.constant dense<0.000000e+00> : vector<2x1024xf32>
    %894 = tpu.matmul %891, %893, %cst_562 {dimension_numbers = #tpu.dot_dimension_numbers<[1], [0], [0], [1], [0, 0, 1, 1], [], []>} : vector<2x10xbf16>, vector<10x1024xbf16>, vector<2x1024xf32> -> vector<2x1024xf32>
    %895 = arith.addf %853, %894 : vector<2x1024xf32>
    %c21 = arith.constant 21 : index
    %c0_563 = arith.constant 0 : index
    %c0_564 = arith.constant 0 : index
    %c0_565 = arith.constant 0 : index
    %896 = vector.load %arg1[%c21, %c0_563, %c0_564, %c0_565] : memref<25x4x2x10xf32, #tpu.memory_space<vmem>>, vector<1x1x2x10xf32>
    %897 = vector.shape_cast %896 : vector<1x1x2x10xf32> to vector<2x10xf32>
    %cst_566 = arith.constant dense<0.000000e+00> : vector<2x10xf32>
    %898 = tpu.matmul %890, %4, %cst_566 {dimension_numbers = #tpu.dot_dimension_numbers<[1], [0], [0], [1], [0, 0, 1, 1], [], []>} : vector<2x10xf32>, vector<10x10xf32>, vector<2x10xf32> -> vector<2x10xf32>
    %899 = arith.addf %897, %898 : vector<2x10xf32>
    %900 = arith.negf %899 : vector<2x10xf32>
    %901 = math.exp %900 : vector<2x10xf32>
    %cst_567 = arith.constant 1.000000e+00 : f32
    %902 = vector.broadcast %cst_567 : f32 to vector<2x10xf32>
    %903 = arith.addf %902, %901 : vector<2x10xf32>
    %904 = arith.divf %902, %903 : vector<2x10xf32>
    %c21_568 = arith.constant 21 : index
    %c1_569 = arith.constant 1 : index
    %c0_570 = arith.constant 0 : index
    %c0_571 = arith.constant 0 : index
    %905 = vector.load %arg1[%c21_568, %c1_569, %c0_570, %c0_571] : memref<25x4x2x10xf32, #tpu.memory_space<vmem>>, vector<1x1x2x10xf32>
    %906 = vector.shape_cast %905 : vector<1x1x2x10xf32> to vector<2x10xf32>
    %cst_572 = arith.constant dense<0.000000e+00> : vector<2x10xf32>
    %907 = tpu.matmul %890, %6, %cst_572 {dimension_numbers = #tpu.dot_dimension_numbers<[1], [0], [0], [1], [0, 0, 1, 1], [], []>} : vector<2x10xf32>, vector<10x10xf32>, vector<2x10xf32> -> vector<2x10xf32>
    %908 = arith.addf %906, %907 : vector<2x10xf32>
    %909 = arith.negf %908 : vector<2x10xf32>
    %910 = math.exp %909 : vector<2x10xf32>
    %cst_573 = arith.constant 1.000000e+00 : f32
    %911 = vector.broadcast %cst_573 : f32 to vector<2x10xf32>
    %912 = arith.addf %911, %910 : vector<2x10xf32>
    %913 = arith.divf %911, %912 : vector<2x10xf32>
    %c21_574 = arith.constant 21 : index
    %c2_575 = arith.constant 2 : index
    %c0_576 = arith.constant 0 : index
    %c0_577 = arith.constant 0 : index
    %914 = vector.load %arg1[%c21_574, %c2_575, %c0_576, %c0_577] : memref<25x4x2x10xf32, #tpu.memory_space<vmem>>, vector<1x1x2x10xf32>
    %915 = vector.shape_cast %914 : vector<1x1x2x10xf32> to vector<2x10xf32>
    %cst_578 = arith.constant dense<0.000000e+00> : vector<2x10xf32>
    %916 = tpu.matmul %890, %8, %cst_578 {dimension_numbers = #tpu.dot_dimension_numbers<[1], [0], [0], [1], [0, 0, 1, 1], [], []>} : vector<2x10xf32>, vector<10x10xf32>, vector<2x10xf32> -> vector<2x10xf32>
    %917 = arith.addf %915, %916 : vector<2x10xf32>
    %918 = math.tanh %917 : vector<2x10xf32>
    %c21_579 = arith.constant 21 : index
    %c3_580 = arith.constant 3 : index
    %c0_581 = arith.constant 0 : index
    %c0_582 = arith.constant 0 : index
    %919 = vector.load %arg1[%c21_579, %c3_580, %c0_581, %c0_582] : memref<25x4x2x10xf32, #tpu.memory_space<vmem>>, vector<1x1x2x10xf32>
    %920 = vector.shape_cast %919 : vector<1x1x2x10xf32> to vector<2x10xf32>
    %cst_583 = arith.constant dense<0.000000e+00> : vector<2x10xf32>
    %921 = tpu.matmul %890, %10, %cst_583 {dimension_numbers = #tpu.dot_dimension_numbers<[1], [0], [0], [1], [0, 0, 1, 1], [], []>} : vector<2x10xf32>, vector<10x10xf32>, vector<2x10xf32> -> vector<2x10xf32>
    %922 = arith.addf %920, %921 : vector<2x10xf32>
    %923 = arith.negf %922 : vector<2x10xf32>
    %924 = math.exp %923 : vector<2x10xf32>
    %cst_584 = arith.constant 1.000000e+00 : f32
    %925 = vector.broadcast %cst_584 : f32 to vector<2x10xf32>
    %926 = arith.addf %925, %924 : vector<2x10xf32>
    %927 = arith.divf %925, %926 : vector<2x10xf32>
    %928 = arith.mulf %913, %888 : vector<2x10xf32>
    %929 = arith.mulf %904, %918 : vector<2x10xf32>
    %930 = arith.addf %928, %929 : vector<2x10xf32>
    %931 = math.tanh %930 : vector<2x10xf32>
    %932 = arith.mulf %927, %931 : vector<2x10xf32>
    %933 = arith.truncf %932 : vector<2x10xf32> to vector<2x10xbf16>
    %c21_585 = arith.constant 21 : index
    %c0_586 = arith.constant 0 : index
    %c0_587 = arith.constant 0 : index
    %934 = vector.load %arg3[%c21_585, %c0_586, %c0_587] : memref<25x10x1024xbf16, #tpu.memory_space<vmem>>, vector<1x10x1024xbf16>
    %935 = vector.shape_cast %934 : vector<1x10x1024xbf16> to vector<10x1024xbf16>
    %cst_588 = arith.constant dense<0.000000e+00> : vector<2x1024xf32>
    %936 = tpu.matmul %933, %935, %cst_588 {dimension_numbers = #tpu.dot_dimension_numbers<[1], [0], [0], [1], [0, 0, 1, 1], [], []>} : vector<2x10xbf16>, vector<10x1024xbf16>, vector<2x1024xf32> -> vector<2x1024xf32>
    %937 = arith.addf %895, %936 : vector<2x1024xf32>
    %c22 = arith.constant 22 : index
    %c0_589 = arith.constant 0 : index
    %c0_590 = arith.constant 0 : index
    %c0_591 = arith.constant 0 : index
    %938 = vector.load %arg1[%c22, %c0_589, %c0_590, %c0_591] : memref<25x4x2x10xf32, #tpu.memory_space<vmem>>, vector<1x1x2x10xf32>
    %939 = vector.shape_cast %938 : vector<1x1x2x10xf32> to vector<2x10xf32>
    %cst_592 = arith.constant dense<0.000000e+00> : vector<2x10xf32>
    %940 = tpu.matmul %932, %4, %cst_592 {dimension_numbers = #tpu.dot_dimension_numbers<[1], [0], [0], [1], [0, 0, 1, 1], [], []>} : vector<2x10xf32>, vector<10x10xf32>, vector<2x10xf32> -> vector<2x10xf32>
    %941 = arith.addf %939, %940 : vector<2x10xf32>
    %942 = arith.negf %941 : vector<2x10xf32>
    %943 = math.exp %942 : vector<2x10xf32>
    %cst_593 = arith.constant 1.000000e+00 : f32
    %944 = vector.broadcast %cst_593 : f32 to vector<2x10xf32>
    %945 = arith.addf %944, %943 : vector<2x10xf32>
    %946 = arith.divf %944, %945 : vector<2x10xf32>
    %c22_594 = arith.constant 22 : index
    %c1_595 = arith.constant 1 : index
    %c0_596 = arith.constant 0 : index
    %c0_597 = arith.constant 0 : index
    %947 = vector.load %arg1[%c22_594, %c1_595, %c0_596, %c0_597] : memref<25x4x2x10xf32, #tpu.memory_space<vmem>>, vector<1x1x2x10xf32>
    %948 = vector.shape_cast %947 : vector<1x1x2x10xf32> to vector<2x10xf32>
    %cst_598 = arith.constant dense<0.000000e+00> : vector<2x10xf32>
    %949 = tpu.matmul %932, %6, %cst_598 {dimension_numbers = #tpu.dot_dimension_numbers<[1], [0], [0], [1], [0, 0, 1, 1], [], []>} : vector<2x10xf32>, vector<10x10xf32>, vector<2x10xf32> -> vector<2x10xf32>
    %950 = arith.addf %948, %949 : vector<2x10xf32>
    %951 = arith.negf %950 : vector<2x10xf32>
    %952 = math.exp %951 : vector<2x10xf32>
    %cst_599 = arith.constant 1.000000e+00 : f32
    %953 = vector.broadcast %cst_599 : f32 to vector<2x10xf32>
    %954 = arith.addf %953, %952 : vector<2x10xf32>
    %955 = arith.divf %953, %954 : vector<2x10xf32>
    %c22_600 = arith.constant 22 : index
    %c2_601 = arith.constant 2 : index
    %c0_602 = arith.constant 0 : index
    %c0_603 = arith.constant 0 : index
    %956 = vector.load %arg1[%c22_600, %c2_601, %c0_602, %c0_603] : memref<25x4x2x10xf32, #tpu.memory_space<vmem>>, vector<1x1x2x10xf32>
    %957 = vector.shape_cast %956 : vector<1x1x2x10xf32> to vector<2x10xf32>
    %cst_604 = arith.constant dense<0.000000e+00> : vector<2x10xf32>
    %958 = tpu.matmul %932, %8, %cst_604 {dimension_numbers = #tpu.dot_dimension_numbers<[1], [0], [0], [1], [0, 0, 1, 1], [], []>} : vector<2x10xf32>, vector<10x10xf32>, vector<2x10xf32> -> vector<2x10xf32>
    %959 = arith.addf %957, %958 : vector<2x10xf32>
    %960 = math.tanh %959 : vector<2x10xf32>
    %c22_605 = arith.constant 22 : index
    %c3_606 = arith.constant 3 : index
    %c0_607 = arith.constant 0 : index
    %c0_608 = arith.constant 0 : index
    %961 = vector.load %arg1[%c22_605, %c3_606, %c0_607, %c0_608] : memref<25x4x2x10xf32, #tpu.memory_space<vmem>>, vector<1x1x2x10xf32>
    %962 = vector.shape_cast %961 : vector<1x1x2x10xf32> to vector<2x10xf32>
    %cst_609 = arith.constant dense<0.000000e+00> : vector<2x10xf32>
    %963 = tpu.matmul %932, %10, %cst_609 {dimension_numbers = #tpu.dot_dimension_numbers<[1], [0], [0], [1], [0, 0, 1, 1], [], []>} : vector<2x10xf32>, vector<10x10xf32>, vector<2x10xf32> -> vector<2x10xf32>
    %964 = arith.addf %962, %963 : vector<2x10xf32>
    %965 = arith.negf %964 : vector<2x10xf32>
    %966 = math.exp %965 : vector<2x10xf32>
    %cst_610 = arith.constant 1.000000e+00 : f32
    %967 = vector.broadcast %cst_610 : f32 to vector<2x10xf32>
    %968 = arith.addf %967, %966 : vector<2x10xf32>
    %969 = arith.divf %967, %968 : vector<2x10xf32>
    %970 = arith.mulf %955, %930 : vector<2x10xf32>
    %971 = arith.mulf %946, %960 : vector<2x10xf32>
    %972 = arith.addf %970, %971 : vector<2x10xf32>
    %973 = math.tanh %972 : vector<2x10xf32>
    %974 = arith.mulf %969, %973 : vector<2x10xf32>
    %975 = arith.truncf %974 : vector<2x10xf32> to vector<2x10xbf16>
    %c22_611 = arith.constant 22 : index
    %c0_612 = arith.constant 0 : index
    %c0_613 = arith.constant 0 : index
    %976 = vector.load %arg3[%c22_611, %c0_612, %c0_613] : memref<25x10x1024xbf16, #tpu.memory_space<vmem>>, vector<1x10x1024xbf16>
    %977 = vector.shape_cast %976 : vector<1x10x1024xbf16> to vector<10x1024xbf16>
    %cst_614 = arith.constant dense<0.000000e+00> : vector<2x1024xf32>
    %978 = tpu.matmul %975, %977, %cst_614 {dimension_numbers = #tpu.dot_dimension_numbers<[1], [0], [0], [1], [0, 0, 1, 1], [], []>} : vector<2x10xbf16>, vector<10x1024xbf16>, vector<2x1024xf32> -> vector<2x1024xf32>
    %979 = arith.addf %937, %978 : vector<2x1024xf32>
    %c23 = arith.constant 23 : index
    %c0_615 = arith.constant 0 : index
    %c0_616 = arith.constant 0 : index
    %c0_617 = arith.constant 0 : index
    %980 = vector.load %arg1[%c23, %c0_615, %c0_616, %c0_617] : memref<25x4x2x10xf32, #tpu.memory_space<vmem>>, vector<1x1x2x10xf32>
    %981 = vector.shape_cast %980 : vector<1x1x2x10xf32> to vector<2x10xf32>
    %cst_618 = arith.constant dense<0.000000e+00> : vector<2x10xf32>
    %982 = tpu.matmul %974, %4, %cst_618 {dimension_numbers = #tpu.dot_dimension_numbers<[1], [0], [0], [1], [0, 0, 1, 1], [], []>} : vector<2x10xf32>, vector<10x10xf32>, vector<2x10xf32> -> vector<2x10xf32>
    %983 = arith.addf %981, %982 : vector<2x10xf32>
    %984 = arith.negf %983 : vector<2x10xf32>
    %985 = math.exp %984 : vector<2x10xf32>
    %cst_619 = arith.constant 1.000000e+00 : f32
    %986 = vector.broadcast %cst_619 : f32 to vector<2x10xf32>
    %987 = arith.addf %986, %985 : vector<2x10xf32>
    %988 = arith.divf %986, %987 : vector<2x10xf32>
    %c23_620 = arith.constant 23 : index
    %c1_621 = arith.constant 1 : index
    %c0_622 = arith.constant 0 : index
    %c0_623 = arith.constant 0 : index
    %989 = vector.load %arg1[%c23_620, %c1_621, %c0_622, %c0_623] : memref<25x4x2x10xf32, #tpu.memory_space<vmem>>, vector<1x1x2x10xf32>
    %990 = vector.shape_cast %989 : vector<1x1x2x10xf32> to vector<2x10xf32>
    %cst_624 = arith.constant dense<0.000000e+00> : vector<2x10xf32>
    %991 = tpu.matmul %974, %6, %cst_624 {dimension_numbers = #tpu.dot_dimension_numbers<[1], [0], [0], [1], [0, 0, 1, 1], [], []>} : vector<2x10xf32>, vector<10x10xf32>, vector<2x10xf32> -> vector<2x10xf32>
    %992 = arith.addf %990, %991 : vector<2x10xf32>
    %993 = arith.negf %992 : vector<2x10xf32>
    %994 = math.exp %993 : vector<2x10xf32>
    %cst_625 = arith.constant 1.000000e+00 : f32
    %995 = vector.broadcast %cst_625 : f32 to vector<2x10xf32>
    %996 = arith.addf %995, %994 : vector<2x10xf32>
    %997 = arith.divf %995, %996 : vector<2x10xf32>
    %c23_626 = arith.constant 23 : index
    %c2_627 = arith.constant 2 : index
    %c0_628 = arith.constant 0 : index
    %c0_629 = arith.constant 0 : index
    %998 = vector.load %arg1[%c23_626, %c2_627, %c0_628, %c0_629] : memref<25x4x2x10xf32, #tpu.memory_space<vmem>>, vector<1x1x2x10xf32>
    %999 = vector.shape_cast %998 : vector<1x1x2x10xf32> to vector<2x10xf32>
    %cst_630 = arith.constant dense<0.000000e+00> : vector<2x10xf32>
    %1000 = tpu.matmul %974, %8, %cst_630 {dimension_numbers = #tpu.dot_dimension_numbers<[1], [0], [0], [1], [0, 0, 1, 1], [], []>} : vector<2x10xf32>, vector<10x10xf32>, vector<2x10xf32> -> vector<2x10xf32>
    %1001 = arith.addf %999, %1000 : vector<2x10xf32>
    %1002 = math.tanh %1001 : vector<2x10xf32>
    %c23_631 = arith.constant 23 : index
    %c3_632 = arith.constant 3 : index
    %c0_633 = arith.constant 0 : index
    %c0_634 = arith.constant 0 : index
    %1003 = vector.load %arg1[%c23_631, %c3_632, %c0_633, %c0_634] : memref<25x4x2x10xf32, #tpu.memory_space<vmem>>, vector<1x1x2x10xf32>
    %1004 = vector.shape_cast %1003 : vector<1x1x2x10xf32> to vector<2x10xf32>
    %cst_635 = arith.constant dense<0.000000e+00> : vector<2x10xf32>
    %1005 = tpu.matmul %974, %10, %cst_635 {dimension_numbers = #tpu.dot_dimension_numbers<[1], [0], [0], [1], [0, 0, 1, 1], [], []>} : vector<2x10xf32>, vector<10x10xf32>, vector<2x10xf32> -> vector<2x10xf32>
    %1006 = arith.addf %1004, %1005 : vector<2x10xf32>
    %1007 = arith.negf %1006 : vector<2x10xf32>
    %1008 = math.exp %1007 : vector<2x10xf32>
    %cst_636 = arith.constant 1.000000e+00 : f32
    %1009 = vector.broadcast %cst_636 : f32 to vector<2x10xf32>
    %1010 = arith.addf %1009, %1008 : vector<2x10xf32>
    %1011 = arith.divf %1009, %1010 : vector<2x10xf32>
    %1012 = arith.mulf %997, %972 : vector<2x10xf32>
    %1013 = arith.mulf %988, %1002 : vector<2x10xf32>
    %1014 = arith.addf %1012, %1013 : vector<2x10xf32>
    %1015 = math.tanh %1014 : vector<2x10xf32>
    %1016 = arith.mulf %1011, %1015 : vector<2x10xf32>
    %1017 = arith.truncf %1016 : vector<2x10xf32> to vector<2x10xbf16>
    %c23_637 = arith.constant 23 : index
    %c0_638 = arith.constant 0 : index
    %c0_639 = arith.constant 0 : index
    %1018 = vector.load %arg3[%c23_637, %c0_638, %c0_639] : memref<25x10x1024xbf16, #tpu.memory_space<vmem>>, vector<1x10x1024xbf16>
    %1019 = vector.shape_cast %1018 : vector<1x10x1024xbf16> to vector<10x1024xbf16>
    %cst_640 = arith.constant dense<0.000000e+00> : vector<2x1024xf32>
    %1020 = tpu.matmul %1017, %1019, %cst_640 {dimension_numbers = #tpu.dot_dimension_numbers<[1], [0], [0], [1], [0, 0, 1, 1], [], []>} : vector<2x10xbf16>, vector<10x1024xbf16>, vector<2x1024xf32> -> vector<2x1024xf32>
    %1021 = arith.addf %979, %1020 : vector<2x1024xf32>
    %c24 = arith.constant 24 : index
    %c0_641 = arith.constant 0 : index
    %c0_642 = arith.constant 0 : index
    %c0_643 = arith.constant 0 : index
    %1022 = vector.load %arg1[%c24, %c0_641, %c0_642, %c0_643] : memref<25x4x2x10xf32, #tpu.memory_space<vmem>>, vector<1x1x2x10xf32>
    %1023 = vector.shape_cast %1022 : vector<1x1x2x10xf32> to vector<2x10xf32>
    %cst_644 = arith.constant dense<0.000000e+00> : vector<2x10xf32>
    %1024 = tpu.matmul %1016, %4, %cst_644 {dimension_numbers = #tpu.dot_dimension_numbers<[1], [0], [0], [1], [0, 0, 1, 1], [], []>} : vector<2x10xf32>, vector<10x10xf32>, vector<2x10xf32> -> vector<2x10xf32>
    %1025 = arith.addf %1023, %1024 : vector<2x10xf32>
    %1026 = arith.negf %1025 : vector<2x10xf32>
    %1027 = math.exp %1026 : vector<2x10xf32>
    %cst_645 = arith.constant 1.000000e+00 : f32
    %1028 = vector.broadcast %cst_645 : f32 to vector<2x10xf32>
    %1029 = arith.addf %1028, %1027 : vector<2x10xf32>
    %1030 = arith.divf %1028, %1029 : vector<2x10xf32>
    %c24_646 = arith.constant 24 : index
    %c1_647 = arith.constant 1 : index
    %c0_648 = arith.constant 0 : index
    %c0_649 = arith.constant 0 : index
    %1031 = vector.load %arg1[%c24_646, %c1_647, %c0_648, %c0_649] : memref<25x4x2x10xf32, #tpu.memory_space<vmem>>, vector<1x1x2x10xf32>
    %1032 = vector.shape_cast %1031 : vector<1x1x2x10xf32> to vector<2x10xf32>
    %cst_650 = arith.constant dense<0.000000e+00> : vector<2x10xf32>
    %1033 = tpu.matmul %1016, %6, %cst_650 {dimension_numbers = #tpu.dot_dimension_numbers<[1], [0], [0], [1], [0, 0, 1, 1], [], []>} : vector<2x10xf32>, vector<10x10xf32>, vector<2x10xf32> -> vector<2x10xf32>
    %1034 = arith.addf %1032, %1033 : vector<2x10xf32>
    %1035 = arith.negf %1034 : vector<2x10xf32>
    %1036 = math.exp %1035 : vector<2x10xf32>
    %cst_651 = arith.constant 1.000000e+00 : f32
    %1037 = vector.broadcast %cst_651 : f32 to vector<2x10xf32>
    %1038 = arith.addf %1037, %1036 : vector<2x10xf32>
    %1039 = arith.divf %1037, %1038 : vector<2x10xf32>
    %c24_652 = arith.constant 24 : index
    %c2_653 = arith.constant 2 : index
    %c0_654 = arith.constant 0 : index
    %c0_655 = arith.constant 0 : index
    %1040 = vector.load %arg1[%c24_652, %c2_653, %c0_654, %c0_655] : memref<25x4x2x10xf32, #tpu.memory_space<vmem>>, vector<1x1x2x10xf32>
    %1041 = vector.shape_cast %1040 : vector<1x1x2x10xf32> to vector<2x10xf32>
    %cst_656 = arith.constant dense<0.000000e+00> : vector<2x10xf32>
    %1042 = tpu.matmul %1016, %8, %cst_656 {dimension_numbers = #tpu.dot_dimension_numbers<[1], [0], [0], [1], [0, 0, 1, 1], [], []>} : vector<2x10xf32>, vector<10x10xf32>, vector<2x10xf32> -> vector<2x10xf32>
    %1043 = arith.addf %1041, %1042 : vector<2x10xf32>
    %1044 = math.tanh %1043 : vector<2x10xf32>
    %c24_657 = arith.constant 24 : index
    %c3_658 = arith.constant 3 : index
    %c0_659 = arith.constant 0 : index
    %c0_660 = arith.constant 0 : index
    %1045 = vector.load %arg1[%c24_657, %c3_658, %c0_659, %c0_660] : memref<25x4x2x10xf32, #tpu.memory_space<vmem>>, vector<1x1x2x10xf32>
    %1046 = vector.shape_cast %1045 : vector<1x1x2x10xf32> to vector<2x10xf32>
    %cst_661 = arith.constant dense<0.000000e+00> : vector<2x10xf32>
    %1047 = tpu.matmul %1016, %10, %cst_661 {dimension_numbers = #tpu.dot_dimension_numbers<[1], [0], [0], [1], [0, 0, 1, 1], [], []>} : vector<2x10xf32>, vector<10x10xf32>, vector<2x10xf32> -> vector<2x10xf32>
    %1048 = arith.addf %1046, %1047 : vector<2x10xf32>
    %1049 = arith.negf %1048 : vector<2x10xf32>
    %1050 = math.exp %1049 : vector<2x10xf32>
    %cst_662 = arith.constant 1.000000e+00 : f32
    %1051 = vector.broadcast %cst_662 : f32 to vector<2x10xf32>
    %1052 = arith.addf %1051, %1050 : vector<2x10xf32>
    %1053 = arith.divf %1051, %1052 : vector<2x10xf32>
    %1054 = arith.mulf %1039, %1014 : vector<2x10xf32>
    %1055 = arith.mulf %1030, %1044 : vector<2x10xf32>
    %1056 = arith.addf %1054, %1055 : vector<2x10xf32>
    %1057 = math.tanh %1056 : vector<2x10xf32>
    %1058 = arith.mulf %1053, %1057 : vector<2x10xf32>
    %1059 = arith.truncf %1058 : vector<2x10xf32> to vector<2x10xbf16>
    %c24_663 = arith.constant 24 : index
    %c0_664 = arith.constant 0 : index
    %c0_665 = arith.constant 0 : index
    %1060 = vector.load %arg3[%c24_663, %c0_664, %c0_665] : memref<25x10x1024xbf16, #tpu.memory_space<vmem>>, vector<1x10x1024xbf16>
    %1061 = vector.shape_cast %1060 : vector<1x10x1024xbf16> to vector<10x1024xbf16>
    %cst_666 = arith.constant dense<0.000000e+00> : vector<2x1024xf32>
    %1062 = tpu.matmul %1059, %1061, %cst_666 {dimension_numbers = #tpu.dot_dimension_numbers<[1], [0], [0], [1], [0, 0, 1, 1], [], []>} : vector<2x10xbf16>, vector<10x1024xbf16>, vector<2x1024xf32> -> vector<2x1024xf32>
    %1063 = arith.addf %1021, %1062 : vector<2x1024xf32>
    %c0_667 = arith.constant 0 : index
    %c0_668 = arith.constant 0 : index
    %1064 = vector.load %arg8[%c0_667, %c0_668] : memref<2x10xf32, #tpu.memory_space<vmem>>, vector<2x10xf32>
    tpu.vector_store %arg8[%c0_667, %c0_668], %1058 {strides = array<i32>} : memref<2x10xf32, #tpu.memory_space<vmem>>, vector<2x10xf32>,
    %c0_669 = arith.constant 0 : index
    %c0_670 = arith.constant 0 : index
    %1065 = vector.load %arg9[%c0_669, %c0_670] : memref<2x10xf32, #tpu.memory_space<vmem>>, vector<2x10xf32>
    tpu.vector_store %arg9[%c0_669, %c0_670], %1056 {strides = array<i32>} : memref<2x10xf32, #tpu.memory_space<vmem>>, vector<2x10xf32>,
    %c0_671 = arith.constant 0 : index
    %c0_672 = arith.constant 0 : index
    %1066 = vector.load %arg10[%c0_671, %c0_672] : memref<2x1024xf32, #tpu.memory_space<vmem>>, vector<2x1024xf32>
    %1067 = arith.addf %1066, %1063 : vector<2x1024xf32>
    %c0_673 = arith.constant 0 : index
    %c0_674 = arith.constant 0 : index
    %1068 = vector.load %arg10[%c0_673, %c0_674] : memref<2x1024xf32, #tpu.memory_space<vmem>>, vector<2x1024xf32>
    tpu.vector_store %arg10[%c0_673, %c0_674], %1067 {strides = array<i32>} : memref<2x1024xf32, #tpu.memory_space<vmem>>, vector<2x1024xf32>,
    %c7_i32 = arith.constant 7 : i32
    %1069 = arith.cmpi eq, %arg0, %c7_i32 : i32
    %1070 = arith.extui %1069 : i1 to i32
    %c0_i32_675 = arith.constant 0 : i32
    %1071 = arith.cmpi ne, %1070, %c0_i32_675 : i32
    scf.if %1071 {
      %c0_676 = arith.constant 0 : index
      %c0_677 = arith.constant 0 : index
      %1072 = vector.load %arg10[%c0_676, %c0_677] : memref<2x1024xf32, #tpu.memory_space<vmem>>, vector<2x1024xf32>
      %c0_678 = arith.constant 0 : index
      %c0_679 = arith.constant 0 : index
      %1073 = vector.load %arg4[%c0_678, %c0_679] : memref<1x1024xf32, #tpu.memory_space<vmem>>, vector<1x1024xf32>
      %1074 = vector.broadcast %1073 : vector<1x1024xf32> to vector<2x1024xf32>
      %1075 = arith.addf %1072, %1074 : vector<2x1024xf32>
      %1076 = arith.truncf %1075 : vector<2x1024xf32> to vector<2x1024xbf16>
      %c0_680 = arith.constant 0 : index
      %c0_681 = arith.constant 0 : index
      %1077 = vector.load %arg5[%c0_680, %c0_681] : memref<1024x10xbf16, #tpu.memory_space<vmem>>, vector<1024x10xbf16>
      %cst_682 = arith.constant dense<0.000000e+00> : vector<2x10xf32>
      %1078 = tpu.matmul %1076, %1077, %cst_682 {dimension_numbers = #tpu.dot_dimension_numbers<[1], [0], [0], [1], [0, 0, 1, 1], [], []>} : vector<2x1024xbf16>, vector<1024x10xbf16>, vector<2x10xf32> -> vector<2x10xf32>
      %c0_683 = arith.constant 0 : index
      %c0_684 = arith.constant 0 : index
      %1079 = vector.load %arg6[%c0_683, %c0_684] : memref<1x10xf32, #tpu.memory_space<vmem>>, vector<1x10xf32>
      %1080 = vector.broadcast %1079 : vector<1x10xf32> to vector<2x10xf32>
      %1081 = arith.addf %1078, %1080 : vector<2x10xf32>
      %c0_685 = arith.constant 0 : index
      %c0_686 = arith.constant 0 : index
      %1082 = vector.load %arg7[%c0_685, %c0_686] : memref<2x10xf32, #tpu.memory_space<vmem>>, vector<2x10xf32>
      tpu.vector_store %arg7[%c0_685, %c0_686], %1081 {strides = array<i32>} : memref<2x10xf32, #tpu.memory_space<vmem>>, vector<2x10xf32>,
    } else {
    }
    return
  }
  func.func @transform_0(%arg0: i32) -> (i32, i32, i32, i32) {
    %c0_i32 = arith.constant 0 : i32
    %c0_i32_0 = arith.constant 0 : i32
    %c0_i32_1 = arith.constant 0 : i32
    %c0_i32_2 = arith.constant 0 : i32
    return %arg0, %c0_i32, %c0_i32_0, %c0_i32_1 : i32, i32, i32, i32
  }
  func.func @transform_1(%arg0: i32) -> (i32, i32, i32) {
    %c0_i32 = arith.constant 0 : i32
    %c0_i32_0 = arith.constant 0 : i32
    %c0_i32_1 = arith.constant 0 : i32
    %c0_i32_2 = arith.constant 0 : i32
    return %c0_i32, %c0_i32_0, %c0_i32_1 : i32, i32, i32
  }
  func.func @transform_2(%arg0: i32) -> (i32, i32, i32) {
    %c0_i32 = arith.constant 0 : i32
    %c0_i32_0 = arith.constant 0 : i32
    %c0_i32_1 = arith.constant 0 : i32
    return %arg0, %c0_i32, %c0_i32_0 : i32, i32, i32
  }
  func.func @transform_3(%arg0: i32) -> (i32, i32) {
    %c0_i32 = arith.constant 0 : i32
    %c0_i32_0 = arith.constant 0 : i32
    %c0_i32_1 = arith.constant 0 : i32
    return %c0_i32, %c0_i32_0 : i32, i32
  }
  func.func @transform_4(%arg0: i32) -> (i32, i32) {
    %c0_i32 = arith.constant 0 : i32
    %c0_i32_0 = arith.constant 0 : i32
    %c0_i32_1 = arith.constant 0 : i32
    return %c0_i32, %c0_i32_0 : i32, i32
  }
  func.func @transform_5(%arg0: i32) -> (i32, i32) {
    %c0_i32 = arith.constant 0 : i32
    %c0_i32_0 = arith.constant 0 : i32
    %c0_i32_1 = arith.constant 0 : i32
    return %c0_i32, %c0_i32_0 : i32, i32
  }
  func.func @transform_6(%arg0: i32) -> (i32, i32) {
    %c0_i32 = arith.constant 0 : i32
    %c0_i32_0 = arith.constant 0 : i32
    %c0_i32_1 = arith.constant 0 : i32
    return %c0_i32, %c0_i32_0 : i32, i32
  }
}

</mosaic_0001>

<bundles_post_ra>
// kernel: model_forward.1
= control target key start
LH: loop header
LB: loop body
LE: loop exit
PB: predicated region body
PF: predicated region fallthrough
CT: control target
= control target key end

     0   :  { %11 = vsyncpa [#allocation6], 0  ;;  %s17951_s21 = smov 0   ;;  %s21125_s0 = inlined_call_operand.vmem [shape: f32[200,4,2,10], index: 0, kind: input, shape index: {}]   ;;  %s21126_s1 = inlined_call_operand.vmem [shape: f32[4,10,10], index: 1, kind: input, shape index: {}]   ;;  %s21127_s2 = inlined_call_operand.vmem [shape: bf16[200,10,1024], index: 2, kind: input, shape index: {}]   ;;  %s21128_s3 = inlined_call_operand.vmem [shape: f32[1,1024], index: 3, kind: input, shape index: {}]   ;;  %s21129_s4 = inlined_call_operand.vmem [shape: bf16[1024,10], index: 4, kind: input, shape index: {}]   ;;  %s21130_s5 = inlined_call_operand.vmem [shape: f32[1,10], index: 5, kind: input, shape index: {}]   ;;  %s21131_s6 = inlined_call_operand.hbm [shape: f32[2,10], index: 6, kind: output, shape index: {}]  }
   0x1 LB: > { %s17957_s22 = sadd.s32 4294967295, %s17908_s21   ;;  %p15212_p0 = scmp.ge.s32.totalorder %s17908_s21, 1  ;;  %s17908_s21 = sphi %s17951_s21, %s17_s21  }
   0x2   : > { %p222_p1 = scmp.lt.s32.totalorder %s17908_s21, 9 }
   0x4   : > { %p223_p2 = pnand %p15212_p0, %p222_p1 }
   0x6   : > { %226 = sbr.rel (%p223_p2) target bundleno = 7156 (0x1bf4), region = 44 }
   0xb   : > { %s254_s23 = smul.u32 25, %s17957_s22  ;;  %p15217_p4 = scmp.ne.s32.totalorder %s17957_s22, 0 }
   0xd   : > { %p255_p3 = scmp.lt.s32.totalorder %s254_s23, 199  ;;  %272 = sbr.rel (%p15217_p4) target bundleno = 21 (0x15), region = 48 }
   0xf   : > { %s21165_s23 = smov (!%p255_p3, %s254_s23), 199 }
  0x10   : > { %s16260_s24 = sshll.u32 %s21165_s23, 3  ;;  %s16261_s25 = sshll.u32 %s21165_s23, 6 }
  0x11   : > { %s17965_s28 = scalar_lea.vmem %s21125_s0, %s16260_s24  ;;  %s17970_s7 = scalar_lea.vmem %s21127_s2, %s16261_s25 }
  0x12   : > { %vm273_vm0 = vcmask 74752   ;;  %v17910_v0 = vmov 0.0  }
  0x13   : > { %274 = vst.msk [vmem:[#allocation2] sm:$0x3] %vm273_vm0, %v17910_v0  ;;  %275 = vst.msk [vmem:[#allocation3] sm:$0x3] %vm273_vm0, %v17910_v0 }
  0x14   : > { %276 = vst [vmem:[#allocation4] sm:$0xff] %v17910_v0  ;;  %277 = vst [vmem:[#allocation4 + $0x8] sm:$0xff] %v17910_v0 }
  0x15 PF: > { %v17976_v1 = vld [vmem:[%s21126_s1 + $0x8] sm:$0x3]  ;;  %vm296_vm1 = vcmask 1041408   ;;  %v17981_v2 = vld [vmem:[%s21126_s1 + $0x18] sm:$0x3]  ;;  %v21132_v3 = vmov 0.0  }
  0x16   : > { %16650 = vmatprep.subr.mxu0 %v21132_v3  ;;  %16657 = vmatprep.subr.mxu1 %v21132_v3  ;;  %v17988_v4 = vld [vmem:[%s21126_s1] sm:$0xff]  ;;  %v17997_v5 = vld [vmem:[%s21126_s1 + $0x10] sm:$0xff]  ;;  %vm292_vm2 = vcmask 80896   ;;  %vm17912_vm3 = vmmov 0   ;;  %v18010_v7 = vld [vmem:[%s21126_s1 + $0x28] sm:$0x3] }
  0x17   : > { %16651 = vmatpush3.msk.msra.mxu0 %vm296_vm1, %v17976_v1  ;;  %16658 = vmatpush3.msk.msra.mxu1 %vm296_vm1, %v17981_v2  ;;  %v18015_v8 = vld [vmem:[%s21126_s1 + $0x38] sm:$0x3]  ;;  %v18024_v9 = vld [vmem:[%s21126_s1 + $0x20] sm:$0xff]  ;;  %v18033_v10 = vld [vmem:[%s21126_s1 + $0x30] sm:$0xff]  ;;  %vm996_vm4 = vcmask 1044480   ;;  %v21134_v61 = vmov 0  }
  0x18   : > { %16652 = vmatprep.subr.mxu0 %v21132_v3  ;;  %16659 = vmatprep.subr.mxu1 %v21132_v3  ;;  %v291_v11 = vld [vmem:[%s17965_s28] sm:$0x3]  ;;  %v15227_v12 = vld [vmem:[%s17965_s28 + $0x2] sm:$0x3]  ;;  %v15234_v23 = vld [vmem:[%s17965_s28 + $0x6] sm:$0x3] }
  0x19   : > { %16653 = vmatpush3.msra.mxu0 %v17988_v4  ;;  %16654 = vmatprep.mubr.msk.f32.mxu0 %vm17912_vm3, %v21132_v3  ;;  %v15231_v27 = vld [vmem:[%s17965_s28 + $0x4] sm:$0x3]  ;;  %v15254_v48 = vld [vmem:[%s17970_s7 + $0x48] sm:$0xff]  ;;  %v18097_v55 = vld [vmem:[%s17970_s7 + $0x50] sm:$0xff]  ;;  %vm14288_vm5 = vcmask 74752   ;;  %p16190_p5 = scmp.ne.s32.totalorder %s17957_s22, 7 }
  0x1a   : > { %v289_v6 = vld [vmem:[#allocation2] sm:$0x3]  ;;  %16660 = vmatpush3.msra.mxu1 %v17997_v5  ;;  %16661 = vmatprep.mubr.msk.f32.mxu1 %vm17912_vm3, %v21132_v3  ;;  %v290_v36 = vld [vmem:[#allocation3] sm:$0x3]  ;;  %v15258_v50 = vld [vmem:[%s17970_s7 + $0x68] sm:$0x11] }
  0x1b   : > { %16655 = vmatmul.mubr.msk.f32.vlgmr.msra.gmra.mxu0 %vm292_vm2, %v289_v6  ;;  %16662 = vmatmul.mubr.msk.f32.vlgmr.msra.gmra.mxu1 %vm292_vm2, %v289_v6  ;;  %v15253_v46 = vld [vmem:[%s17970_s7 + $0x40] sm:$0xff]  ;;  %v15264_v52 = vcombine.high %v15254_v48, %v15258_v50  ;;  %v15263_v53 = vcombine.low %v15254_v48, %v15258_v50  ;;  %v18100_v56 = vld [vmem:[%s17970_s7 + $0x70] sm:$0x11]  ;;  %v18103_v57 = vld [vmem:[%s17970_s7 + $0x58] sm:$0xff] }
  0x1c   : > { %16664 = vmatprep.subr.mxu0 %v21132_v3  ;;  %16671 = vmatprep.subr.mxu1 %v21132_v3  ;;  %v15257_v47 = vld [vmem:[%s17970_s7 + $0x60] sm:$0x11]  ;;  %v15266_v59 = vcombine.high %v18097_v55, %v18100_v56  ;;  %v15260_v60 = vld [vmem:[%s17970_s7 + $0x78] sm:$0x11]  ;;  %v15265_v63 = vcombine.low %v18097_v55, %v18100_v56  ;;  %v625_v48 = vld [vmem:[%s17970_s7 + $0x8] sm:$0xff] }
  0x1d   : > { %16665 = vmatpush3.msk.msra.mxu0 %vm296_vm1, %v18010_v7  ;;  %16672 = vmatpush3.msk.msra.mxu1 %vm296_vm1, %v18015_v8  ;;  %v15262_v49 = vcombine.high %v15253_v46, %v15257_v47  ;;  %v15261_v51 = vcombine.low %v15253_v46, %v15257_v47  ;;  %v1004_v58 = vsel %vm996_vm4, %v15263_v53, 0  ;;  %v15268_v62 = vcombine.high %v18103_v57, %v15260_v60  ;;  %v628_v47 = vld [vmem:[%s17970_s7 + $0x20] sm:$0x11]  ;;  %v626_v56 = vld [vmem:[%s17970_s7 + $0x10] sm:$0xff] }
  0x1e   : > { %16666 = vmatprep.subr.mxu0 %v21132_v3  ;;  %16673 = vmatprep.subr.mxu1 %v21132_v3  ;;  %v15267_v0 = vcombine.low %v18103_v57, %v15260_v60  ;;  %v630_v57 = vld [vmem:[%s17970_s7 + $0x30] sm:$0x11] }
  0x1f   : > { %16667 = vmatpush3.msra.mxu0 %v18024_v9  ;;  %16668 = vmatprep.mubr.msk.f32.mxu0 %vm17912_vm3, %v21132_v3  ;;  %v998_v54 = vsel %vm996_vm4, %v15261_v51, 0 }
  0x20   : > { %16674 = vmatpush3.msra.mxu1 %v18033_v10  ;;  %16675 = vmatprep.mubr.msk.f32.mxu1 %vm17912_vm3, %v21132_v3  ;;  %v1016_v51 = vsel %vm996_vm4, %v15267_v0, 0 }
  0x21   : > { %16669 = vmatmul.mubr.msk.f32.vlgmr.msra.gmra.mxu0 %vm292_vm2, %v289_v6  ;;  %16676 = vmatmul.mubr.msk.f32.vlgmr.msra.gmra.mxu1 %vm292_vm2, %v289_v6  ;;  %v15238_v6 = vld [vmem:[%s17965_s28 + $0x8] sm:$0x3] }
  0x22   : > { %16678 = vmatprep.subr.mxu0 %v21132_v3  ;;  %16685 = vmatprep.subr.mxu1 %v21132_v3 }
  0x23   : > { %16679 = vmatpush3.msk.msra.mxu0 %vm296_vm1, %v17976_v1  ;;  %16686 = vmatpush3.msk.msra.mxu1 %vm296_vm1, %v17981_v2 }
  0x24   : > { %16680 = vmatprep.subr.mxu0 %v21132_v3  ;;  %16687 = vmatprep.subr.mxu1 %v21132_v3 }
  0x25   : > { %16681 = vmatpush3.msra.mxu0 %v17988_v4  ;;  %16688 = vmatpush3.msra.mxu1 %v17997_v5 }
  0x26   : > { %16682 = vmatprep.mubr.msk.f32.mxu0 %vm17912_vm3, %v21132_v3  ;;  %16689 = vmatprep.mubr.msk.f32.mxu1 %vm17912_vm3, %v21132_v3 }
  0x27   : > { %16692 = vmatprep.subr.mxu0 %v21132_v3  ;;  %16699 = vmatprep.subr.mxu1 %v21132_v3 }
  0xdb   : > { %v366_v13 = vpop.f32.mrf.mxu0  ;;  %v448_v14 = vpop.f32.mrf.mxu1 }
  0xdc   : > { %v370_v15 = vadd.f32 %v366_v13, %v291_v11  ;;  %v452_v16 = vadd.f32 %v15227_v12, %v448_v14  ;;  %v15242_v11 = vld [vmem:[%s17965_s28 + $0xa] sm:$0x3] }
  0xdd   : > { %v16656_v17 = vpop.f32.mrf.mxu0  ;;  %v16663_v18 = vpop.f32.mrf.mxu1 }
  0xde   : > { %v15226_v19 = vmul.f32 -1.442695, %v370_v15  ;;  %v15230_v20 = vmul.f32 -1.442695, %v452_v16 }
  0xe0   : > { %17370 = vpow2.f32 %v15226_v19 }
  0xe1   : > { %17372 = vpow2.f32 %v15230_v20  ;;  %v530_v21 = vpop.f32.mrf.mxu0  ;;  %v607_v22 = vpop.f32.mrf.mxu1 }
  0xe2   : > { %v611_v26 = vadd.f32 %v15234_v23, %v607_v22  ;;  %v534_v29 = vadd.f32 %v15231_v27, %v530_v21 }
  0xe3   : > { %v16670_v24 = vpop.f32.mrf.mxu0  ;;  %v16677_v25 = vpop.f32.mrf.mxu1 }
  0xe4   : > { %v15237_v28 = vmul.f32 -1.442695, %v611_v26  ;;  %v15249_v24 = vld [vmem:[%s17965_s28 + $0xe] sm:$0x3]  ;;  %v15246_v26 = vld [vmem:[%s17965_s28 + $0xc] sm:$0x3] }
  0xe6   : > { %17374 = vpow2.f32 %v15237_v28 }
  0xe7   : > { %17376 = vtanh.f32 %v534_v29 }
  0xed   : > { %v17371_v30 = vpop.eup %17370 }
  0xee   : > { %v17373_v31 = vpop.eup %17372  ;;  %v374_v32 = vadd.f32 1.0, %v17371_v30 }
  0xef   : > { %v456_v33 = vadd.f32 1.0, %v17373_v31 }
  0xf0   : > { %17378 = vrcp.f32 %v374_v32 }
  0xf1   : > { %17380 = vrcp.f32 %v456_v33 }
  0xf3   : > { %v17375_v34 = vpop.eup %17374 }
  0xf4   : > { %v17377_v35 = vpop.eup %17376  ;;  %v615_v38 = vadd.f32 1.0, %v17375_v34 }
  0xf6   : > { %17382 = vrcp.f32 %v615_v38 }
  0xfd   : > { %v17379_v37 = vpop.eup %17378 }
  0xfe   : > { %v17381_v39 = vpop.eup %17380  ;;  %v619_v40 = vmul.f32 %v17379_v37, %v17377_v35 }
  0xff   : > { %v618_v41 = vmul.f32 %v17381_v39, %v290_v36 }
 0x101   : > { %v18065_v42 = vadd.f32 %v619_v40, %v618_v41 }
 0x103   : > { %17384 = vtanh.f32 %v18065_v42  ;;  %v17383_v43 = vpop.eup %17382 }
 0x110   : > { %v17385_v44 = vpop.eup %17384 }
 0x111   : > { %v18068_v45 = vmul.f32 %v17385_v44, %v17383_v43  ;;  %v624_v44 = vld [vmem:[%s17970_s7] sm:$0xff] }
 0x113   : > { %16683 = vmatmul.mubr.msk.f32.vlgmr.msra.gmra.mxu0 %vm292_vm2, %v18068_v45  ;;  %16690 = vmatmul.mubr.msk.f32.vlgmr.msra.gmra.mxu1 %vm292_vm2, %v18068_v45 }
 0x114   : > { %16693 = vmatpush3.msk.msra.mxu0 %vm296_vm1, %v18010_v7  ;;  %16700 = vmatpush3.msk.msra.mxu1 %vm296_vm1, %v18015_v8 }
 0x115   : > { %16694 = vmatprep.subr.mxu0 %v21132_v3  ;;  %16701 = vmatprep.subr.mxu1 %v21132_v3 }
 0x116   : > { %16695 = vmatpush3.msra.mxu0 %v18024_v9  ;;  %16696 = vmatprep.mubr.msk.f32.mxu0 %vm17912_vm3, %v21132_v3 }
 0x117   : > { %16702 = vmatpush3.msra.mxu1 %v18033_v10  ;;  %16703 = vmatprep.mubr.msk.f32.mxu1 %vm17912_vm3, %v21132_v3 }
 0x118   : > { %16697 = vmatmul.mubr.msk.f32.vlgmr.msra.gmra.mxu0 %vm292_vm2, %v18068_v45  ;;  %16704 = vmatmul.mubr.msk.f32.vlgmr.msra.gmra.mxu1 %vm292_vm2, %v18068_v45 }
 0x119   : > { %15269 = vmatprep.subr.msk.bf16.mxu0 %vm996_vm4, %v15262_v49  ;;  %15271 = vmatprep.subr.msk.bf16.mxu1 %vm996_vm4, %v15264_v52  ;;  %v629_v49 = vld [vmem:[%s17970_s7 + $0x28] sm:$0x11]  ;;  %v15278_v52 = vcombine.high %v624_v44, %v628_v47 }
 0x11a   : > { %1036 = vmatpush1.bf16.msra.mxu0 %v998_v54  ;;  %1077 = vmatpush1.bf16.msra.mxu1 %v1004_v58  ;;  %v15280_v53 = vcombine.high %v625_v48, %v629_v49  ;;  %v15277_v54 = vcombine.low %v624_v44, %v628_v47  ;;  %v15279_v55 = vcombine.low %v625_v48, %v629_v49  ;;  %v627_v58 = vld [vmem:[%s17970_s7 + $0x18] sm:$0xff] }
 0x11b   : > { %1053 = vmatprep.mubr.bf16.mxu0 %v21134_v61  ;;  %1094 = vmatprep.mubr.bf16.mxu1 %v21134_v61 }
 0x11c   : > { %15273 = vmatprep.subr.msk.bf16.mxu0 %vm996_vm4, %v15266_v59  ;;  %15275 = vmatprep.subr.msk.bf16.mxu1 %vm996_vm4, %v15268_v62  ;;  %v631_v59 = vld [vmem:[%s17970_s7 + $0x38] sm:$0x11]  ;;  %v1221_v60 = vsel %vm996_vm4, %v15277_v54, 0  ;;  %v1227_v62 = vsel %vm996_vm4, %v15279_v55, 0 }
 0x11d   : > { %v15284_v0 = vcombine.high %v627_v58, %v631_v59 }
 0x1d3   : > { %v703_v12 = vpop.f32.mrf.mxu0  ;;  %v782_v13 = vpop.f32.mrf.mxu1 }
 0x1d4   : > { %v707_v14 = vadd.f32 %v15238_v6, %v703_v12  ;;  %v786_v15 = vadd.f32 %v15242_v11, %v782_v13  ;;  %v15281_v6 = vcombine.low %v626_v56, %v630_v57  ;;  %v15283_v11 = vcombine.low %v627_v58, %v631_v59 }
 0x1d5   : > { %v16684_v16 = vpop.f32.mrf.mxu0  ;;  %v16691_v17 = vpop.f32.mrf.mxu1  ;;  %v623_v12 = vpack.c.bf16 %v18068_v45, %v18068_v45  ;;  %v15308_v45 = vld [vmem:[%s17970_s7 + $0x80] sm:$0xff] }
 0x1d6   : > { %v15241_v18 = vmul.f32 -1.442695, %v707_v14  ;;  %v15245_v19 = vmul.f32 -1.442695, %v786_v15  ;;  %v1233_v13 = vsel %vm996_vm4, %v15281_v6, 0  ;;  %v1239_v14 = vsel %vm996_vm4, %v15283_v11, 0 }
 0x1d7   : > { %v15312_v15 = vld [vmem:[%s17970_s7 + $0xa0] sm:$0x11]  ;;  %v15309_v16 = vld [vmem:[%s17970_s7 + $0x88] sm:$0xff] }
 0x1d8   : > { %17386 = vpow2.f32 %v15241_v18  ;;  %v861_v20 = vpop.f32.mrf.mxu0  ;;  %v935_v21 = vpop.f32.mrf.mxu1  ;;  %v15317_v17 = vcombine.high %v15308_v45, %v15312_v15  ;;  %v15313_v18 = vld [vmem:[%s17970_s7 + $0xa8] sm:$0x11] }
 0x1d9   : > { %17388 = vpow2.f32 %v15245_v19  ;;  %v939_v25 = vadd.f32 %v15249_v24, %v935_v21  ;;  %v865_v28 = vadd.f32 %v15246_v26, %v861_v20  ;;  %v15316_v19 = vcombine.low %v15308_v45, %v15312_v15  ;;  %v18212_v24 = vld [vmem:[%s17970_s7 + $0xb0] sm:$0x11] }
 0x1da   : > { %v16698_v22 = vpop.f32.mrf.mxu0  ;;  %v16705_v23 = vpop.f32.mrf.mxu1  ;;  %v15319_v20 = vcombine.high %v15309_v16, %v15313_v18  ;;  %v15318_v21 = vcombine.low %v15309_v16, %v15313_v18  ;;  %v15293_v15 = vld [vmem:[%s17965_s28 + $0x10] sm:$0x3]  ;;  %v15297_v16 = vld [vmem:[%s17965_s28 + $0x12] sm:$0x3] }
 0x1db   : > { %v15252_v27 = vmul.f32 -1.442695, %v939_v25  ;;  %v1773_v22 = vsel %vm996_vm4, %v15316_v19, 0  ;;  %v18209_v23 = vld [vmem:[%s17970_s7 + $0x90] sm:$0xff]  ;;  %v18215_v25 = vld [vmem:[%s17970_s7 + $0x98] sm:$0xff] }
 0x1dc   : > { %v1779_v26 = vsel %vm996_vm4, %v15318_v21, 0 }
 0x1dd   : > { %17390 = vpow2.f32 %v15252_v27  ;;  %v15321_v27 = vcombine.high %v18209_v23, %v18212_v24 }
 0x1de   : > { %17392 = vtanh.f32 %v865_v28  ;;  %v18222_v28 = vld [vmem:[%s17970_s7 + $0xb8] sm:$0x11] }
 0x1e5   : > { %v17387_v29 = vpop.eup %17386 }
 0x1e6   : > { %v17389_v30 = vpop.eup %17388  ;;  %v711_v31 = vadd.f32 1.0, %v17387_v29  ;;  %v15323_v29 = vcombine.high %v18215_v25, %v18222_v28 }
 0x1e7   : > { %v790_v32 = vadd.f32 1.0, %v17389_v30  ;;  %v15320_v30 = vcombine.low %v18209_v23, %v18212_v24  ;;  %v15351_v23 = vld [vmem:[%s17970_s7 + $0xe0] sm:$0x11]  ;;  %v15348_v24 = vld [vmem:[%s17970_s7 + $0xc8] sm:$0xff] }
 0x1e8   : > { %17394 = vrcp.f32 %v711_v31  ;;  %v15322_v31 = vcombine.low %v18215_v25, %v18222_v28  ;;  %v15352_v28 = vld [vmem:[%s17970_s7 + $0xe8] sm:$0x11] }
 0x1e9   : > { %17396 = vrcp.f32 %v790_v32 }
 0x1ea   : > { %v17391_v33 = vpop.eup %17390 }
 0x1eb   : > { %v17393_v34 = vpop.eup %17392  ;;  %v943_v38 = vadd.f32 1.0, %v17391_v33 }
 0x1ed   : > { %17398 = vrcp.f32 %v943_v38 }
 0x1f5   : > { %v17395_v35 = vpop.eup %17394 }
 0x1f6   : > { %v17397_v36 = vpop.eup %17396  ;;  %v947_v37 = vmul.f32 %v17395_v35, %v17393_v34 }
 0x1f7   : > { %v946_v39 = vmul.f32 %v17397_v36, %v18065_v42  ;;  %v1010_v42 = vsel %vm996_vm4, %v15265_v63, 0  ;;  %v15282_v63 = vcombine.high %v626_v56, %v630_v57 }
 0x1f9   : > { %v18123_v40 = vadd.f32 %v947_v37, %v946_v39 }
 0x1fa   : > { %v17399_v41 = vpop.eup %17398 }
 0x1fb   : > { %17400 = vtanh.f32 %v18123_v40 }
 0x208   : > { %v17401_v43 = vpop.eup %17400 }
 0x209   : > { %v18127_v46 = vmul.f32 %v17401_v43, %v17399_v41 }
 0x20b   : > { %v951_v50 = vpack.c.bf16 %v18127_v46, %v18127_v46 }
 0x20d   : > { %15270 = vmatmul.mubr.msk.bf16.vlgmr.msra.gmra.mxu0 %vm292_vm2, %v951_v50  ;;  %15272 = vmatmul.mubr.msk.bf16.vlgmr.msra.gmra.mxu1 %vm292_vm2, %v951_v50 }
 0x20e   : > { %1118 = vmatpush1.bf16.msra.mxu0 %v1010_v42  ;;  %1159 = vmatpush1.bf16.msra.mxu1 %v1016_v51 }
 0x20f   : > { %1135 = vmatprep.mubr.bf16.mxu0 %v21134_v61  ;;  %1176 = vmatprep.mubr.bf16.mxu1 %v21134_v61 }
 0x210   : > { %15285 = vmatprep.subr.msk.bf16.mxu0 %vm996_vm4, %v15278_v52  ;;  %15287 = vmatprep.subr.msk.bf16.mxu1 %vm996_vm4, %v15280_v53 }
 0x215   : > { %15274 = vmatmul.mubr.msk.bf16.vlgmr.msra.gmra.mxu0 %vm292_vm2, %v951_v50  ;;  %15276 = vmatmul.mubr.msk.bf16.vlgmr.msra.gmra.mxu1 %vm292_vm2, %v951_v50 }
 0x216   : > { %1259 = vmatpush1.bf16.msra.mxu0 %v1221_v60  ;;  %1300 = vmatpush1.bf16.msra.mxu1 %v1227_v62 }
 0x217   : > { %1276 = vmatprep.mubr.bf16.mxu0 %v21134_v61  ;;  %1317 = vmatprep.mubr.bf16.mxu1 %v21134_v61 }
 0x218   : > { %15289 = vmatprep.subr.msk.bf16.mxu0 %vm996_vm4, %v15282_v63  ;;  %15291 = vmatprep.subr.msk.bf16.mxu1 %vm996_vm4, %v15284_v0 }
 0x21d   : > { %15286 = vmatmul.mubr.msk.bf16.vlgmr.msra.gmra.mxu0 %vm292_vm2, %v623_v12  ;;  %15288 = vmatmul.mubr.msk.bf16.vlgmr.msra.gmra.mxu1 %vm292_vm2, %v623_v12 }
 0x21e   : > { %1341 = vmatpush1.bf16.msra.mxu0 %v1233_v13  ;;  %1382 = vmatpush1.bf16.msra.mxu1 %v1239_v14 }
 0x21f   : > { %1358 = vmatprep.mubr.bf16.mxu0 %v21134_v61  ;;  %1399 = vmatprep.mubr.bf16.mxu1 %v21134_v61 }
 0x220   : > { %16706 = vmatprep.subr.mxu0 %v21132_v3  ;;  %16713 = vmatprep.subr.mxu1 %v21132_v3 }
 0x225   : > { %15290 = vmatmul.mubr.msk.bf16.vlgmr.msra.gmra.mxu0 %vm292_vm2, %v623_v12  ;;  %15292 = vmatmul.mubr.msk.bf16.vlgmr.msra.gmra.mxu1 %vm292_vm2, %v623_v12 }
 0x226   : > { %16707 = vmatpush3.msk.msra.mxu0 %vm296_vm1, %v17976_v1  ;;  %16714 = vmatpush3.msk.msra.mxu1 %vm296_vm1, %v17981_v2 }
 0x227   : > { %16708 = vmatprep.subr.mxu0 %v21132_v3  ;;  %16715 = vmatprep.subr.mxu1 %v21132_v3 }
 0x228   : > { %16709 = vmatpush3.msra.mxu0 %v17988_v4  ;;  %16716 = vmatpush3.msra.mxu1 %v17997_v5 }
 0x229   : > { %16710 = vmatprep.mubr.msk.f32.mxu0 %vm17912_vm3, %v21132_v3  ;;  %16717 = vmatprep.mubr.msk.f32.mxu1 %vm17912_vm3, %v21132_v3 }
 0x22a   : > { %16720 = vmatprep.subr.mxu0 %v21132_v3  ;;  %16727 = vmatprep.subr.mxu1 %v21132_v3 }
 0x22d   : > { %16711 = vmatmul.mubr.msk.f32.vlgmr.msra.gmra.mxu0 %vm292_vm2, %v18127_v46  ;;  %16718 = vmatmul.mubr.msk.f32.vlgmr.msra.gmra.mxu1 %vm292_vm2, %v18127_v46 }
 0x22e   : > { %16721 = vmatpush3.msk.msra.mxu0 %vm296_vm1, %v18010_v7  ;;  %16728 = vmatpush3.msk.msra.mxu1 %vm296_vm1, %v18015_v8 }
 0x22f   : > { %16722 = vmatprep.subr.mxu0 %v21132_v3  ;;  %16729 = vmatprep.subr.mxu1 %v21132_v3 }
 0x230   : > { %16723 = vmatpush3.msra.mxu0 %v18024_v9  ;;  %16724 = vmatprep.mubr.msk.f32.mxu0 %vm17912_vm3, %v21132_v3 }
 0x231   : > { %16730 = vmatpush3.msra.mxu1 %v18033_v10  ;;  %16731 = vmatprep.mubr.msk.f32.mxu1 %vm17912_vm3, %v21132_v3 }
 0x232   : > { %16725 = vmatmul.mubr.msk.f32.vlgmr.msra.gmra.mxu0 %vm292_vm2, %v18127_v46  ;;  %16732 = vmatmul.mubr.msk.f32.vlgmr.msra.gmra.mxu1 %vm292_vm2, %v18127_v46 }
 0x233   : > { %1828 = vmatprep.mubr.bf16.mxu0 %v21134_v61  ;;  %1869 = vmatprep.mubr.bf16.mxu1 %v21134_v61 }
 0x234   : > { %15324 = vmatprep.subr.msk.bf16.mxu0 %vm996_vm4, %v15317_v17  ;;  %15326 = vmatprep.subr.msk.bf16.mxu1 %vm996_vm4, %v15319_v20 }
 0x235   : > { %1811 = vmatpush1.bf16.msra.mxu0 %v1773_v22  ;;  %1852 = vmatpush1.bf16.msra.mxu1 %v1779_v26 }
 0x236   : > { %15328 = vmatprep.subr.msk.bf16.mxu0 %vm996_vm4, %v15321_v27  ;;  %15330 = vmatprep.subr.msk.bf16.mxu1 %vm996_vm4, %v15323_v29 }
 0x2cd   : > { %v1055_v32 = vpop.f32.mrf.mxu0  ;;  %v1096_v33 = vpop.f32.mrf.mxu1 }
 0x2cf   : > { %v18232_v34 = vpop.f32.mrf.mxu0  ;;  %v18234_v35 = vpop.f32.mrf.mxu1 }
 0x2d1   : > { %v1059_v36 = vpop.f32.mrf.mxu0  ;;  %v1100_v37 = vpop.f32.mrf.mxu1 }
 0x2d2   : > { %v15304_v37 = vld [vmem:[%s17965_s28 + $0x16] sm:$0x3] }
 0x2d3   : > { %v1060_v38 = vpop.f32.mrf.mxu0  ;;  %v1101_v39 = vpop.f32.mrf.mxu1 }
 0x2d4   : > { %v15301_v39 = vld [vmem:[%s17965_s28 + $0x14] sm:$0x3] }
 0x2d5   : > { %v1137_v41 = vpop.f32.mrf.mxu0  ;;  %v1178_v43 = vpop.f32.mrf.mxu1 }
 0x2d7   : > { %v18236_v44 = vpop.f32.mrf.mxu0  ;;  %v18238_v46 = vpop.f32.mrf.mxu1 }
 0x2d9   : > { %v1141_v47 = vpop.f32.mrf.mxu0  ;;  %v1182_v48 = vpop.f32.mrf.mxu1 }
 0x2db   : > { %v1142_v49 = vpop.f32.mrf.mxu0  ;;  %v1183_v50 = vpop.f32.mrf.mxu1 }
 0x2dd   : > { %v1278_v42 = vpop.f32.mrf.mxu0  ;;  %v1319_v51 = vpop.f32.mrf.mxu1 }
 0x2de   : > { %v18240_v52 = vadd.f32 %v1278_v42, %v1055_v32  ;;  %v18242_v53 = vadd.f32 %v1319_v51, %v1096_v33 }
 0x2df   : > { %v18244_v54 = vpop.f32.mrf.mxu0  ;;  %v18246_v55 = vpop.f32.mrf.mxu1 }
 0x2e1   : > { %v1282_v56 = vpop.f32.mrf.mxu0  ;;  %v1323_v57 = vpop.f32.mrf.mxu1 }
 0x2e3   : > { %v1283_v58 = vpop.f32.mrf.mxu0  ;;  %v1324_v59 = vpop.f32.mrf.mxu1 }
 0x2e5   : > { %v1360_v60 = vpop.f32.mrf.mxu0  ;;  %v1401_v62 = vpop.f32.mrf.mxu1 }
 0x2e6   : > { %v18248_v63 = vadd.f32 %v1360_v60, %v1137_v41  ;;  %v18250_v0 = vadd.f32 %v1401_v62, %v1178_v43 }
 0x2e7   : > { %v18252_v6 = vpop.f32.mrf.mxu0  ;;  %v18254_v11 = vpop.f32.mrf.mxu1 }
 0x2e9   : > { %v1364_v12 = vpop.f32.mrf.mxu0  ;;  %v1405_v13 = vpop.f32.mrf.mxu1 }
 0x2eb   : > { %v1365_v14 = vpop.f32.mrf.mxu0  ;;  %v1406_v45 = vpop.f32.mrf.mxu1 }
 0x2ed   : > { %v1479_v17 = vpop.f32.mrf.mxu0  ;;  %v1558_v18 = vpop.f32.mrf.mxu1 }
 0x2ee   : > { %v1483_v19 = vadd.f32 %v15293_v15, %v1479_v17  ;;  %v1562_v20 = vadd.f32 %v15297_v16, %v1558_v18  ;;  %v1785_v15 = vsel %vm996_vm4, %v15320_v30, 0  ;;  %v1791_v16 = vsel %vm996_vm4, %v15322_v31, 0 }
 0x2ef   : > { %v16712_v21 = vpop.f32.mrf.mxu0  ;;  %v16719_v22 = vpop.f32.mrf.mxu1  ;;  %v15358_v31 = vcombine.high %v15348_v24, %v15352_v28  ;;  %v15357_v17 = vcombine.low %v15348_v24, %v15352_v28 }
 0x2f0   : > { %v15296_v26 = vmul.f32 -1.442695, %v1483_v19  ;;  %v15300_v27 = vmul.f32 -1.442695, %v1562_v20  ;;  %v18319_v19 = vld [vmem:[%s17970_s7 + $0xd0] sm:$0xff]  ;;  %v18325_v21 = vld [vmem:[%s17970_s7 + $0xd8] sm:$0xff] }
 0x2f1   : > { %v18322_v20 = vld [vmem:[%s17970_s7 + $0xf0] sm:$0x11]  ;;  %v2339_v22 = vsel %vm996_vm4, %v15357_v17, 0  ;;  %v15343_v17 = vld [vmem:[%s17965_s28 + $0x1e] sm:$0x3] }
 0x2f2   : > { %17402 = vpow2.f32 %v15296_v26  ;;  %v1637_v29 = vpop.f32.mrf.mxu0  ;;  %v1711_v32 = vpop.f32.mrf.mxu1  ;;  %v15360_v26 = vcombine.high %v18319_v19, %v18322_v20 }
 0x2f3   : > { %17404 = vpow2.f32 %v15300_v27  ;;  %v1715_v38 = vadd.f32 %v15304_v37, %v1711_v32  ;;  %v1641_v43 = vadd.f32 %v15301_v39, %v1637_v29  ;;  %v18332_v27 = vld [vmem:[%s17970_s7 + $0xf8] sm:$0x11]  ;;  %v15359_v32 = vcombine.low %v18319_v19, %v18322_v20  ;;  %v18429_v19 = vld [vmem:[%s17970_s7 + $0x110] sm:$0xff] }
 0x2f4   : > { %v16726_v33 = vpop.f32.mrf.mxu0  ;;  %v16733_v36 = vpop.f32.mrf.mxu1  ;;  %v15362_v29 = vcombine.high %v18325_v21, %v18332_v27  ;;  %v1322_v39 = vadd.f32 %v18246_v55, %v18234_v35  ;;  %v18432_v20 = vld [vmem:[%s17970_s7 + $0x130] sm:$0x11] }
 0x2f5   : > { %v15307_v41 = vmul.f32 -1.442695, %v1715_v38  ;;  %v15361_v33 = vcombine.low %v18325_v21, %v18332_v27  ;;  %v1281_v38 = vadd.f32 %v18244_v54, %v18232_v34  ;;  %v18435_v21 = vld [vmem:[%s17970_s7 + $0x118] sm:$0xff] }
 0x2f7   : > { %17406 = vpow2.f32 %v15307_v41 }
 0x2f8   : > { %17408 = vtanh.f32 %v1641_v43 }
 0x2ff   : > { %v17403_v47 = vpop.eup %17402 }
 0x300   : > { %v17405_v48 = vpop.eup %17404  ;;  %v1487_v49 = vadd.f32 1.0, %v17403_v47 }
 0x301   : > { %v1566_v50 = vadd.f32 1.0, %v17405_v48 }
 0x302   : > { %17410 = vrcp.f32 %v1487_v49 }
 0x303   : > { %17412 = vrcp.f32 %v1566_v50 }
 0x304   : > { %v17407_v42 = vpop.eup %17406 }
 0x305   : > { %v17409_v51 = vpop.eup %17408  ;;  %v1719_v59 = vadd.f32 1.0, %v17407_v42 }
 0x307   : > { %17414 = vrcp.f32 %v1719_v59 }
 0x30f   : > { %v17411_v56 = vpop.eup %17410 }
 0x310   : > { %v17413_v57 = vpop.eup %17412  ;;  %v1723_v58 = vmul.f32 %v17411_v56, %v17409_v51 }
 0x311   : > { %v1722_v60 = vmul.f32 %v17413_v57, %v18123_v40  ;;  %v15347_v40 = vld [vmem:[%s17970_s7 + $0xc0] sm:$0xff] }
 0x312   : > { %v15356_v25 = vcombine.high %v15347_v40, %v15351_v23  ;;  %v15355_v30 = vcombine.low %v15347_v40, %v15351_v23 }
 0x313   : > { %v18261_v62 = vadd.f32 %v1723_v58, %v1722_v60 }
 0x314   : > { %v17415_v12 = vpop.eup %17414  ;;  %v2333_v18 = vsel %vm996_vm4, %v15355_v30, 0 }
 0x315   : > { %17416 = vtanh.f32 %v18261_v62 }
 0x322   : > { %v17417_v13 = vpop.eup %17416 }
 0x323   : > { %v1726_v14 = vmul.f32 %v17417_v13, %v17415_v12  ;;  %v15332_v13 = vld [vmem:[%s17965_s28 + $0x18] sm:$0x3] }
 0x325   : > { %v1727_v45 = vpack.c.bf16 %v1726_v14, %v1726_v14 }
 0x327   : > { %15325 = vmatmul.mubr.msk.bf16.vlgmr.msra.gmra.mxu0 %vm292_vm2, %v1727_v45  ;;  %15327 = vmatmul.mubr.msk.bf16.vlgmr.msra.gmra.mxu1 %vm292_vm2, %v1727_v45 }
 0x328   : > { %1893 = vmatpush1.bf16.msra.mxu0 %v1785_v15  ;;  %1934 = vmatpush1.bf16.msra.mxu1 %v1791_v16 }
 0x329   : > { %1910 = vmatprep.mubr.bf16.mxu0 %v21134_v61  ;;  %1951 = vmatprep.mubr.bf16.mxu1 %v21134_v61 }
 0x32a   : > { %16734 = vmatprep.subr.mxu0 %v21132_v3  ;;  %16741 = vmatprep.subr.mxu1 %v21132_v3 }
 0x32f   : > { %15329 = vmatmul.mubr.msk.bf16.vlgmr.msra.gmra.mxu0 %vm292_vm2, %v1727_v45  ;;  %15331 = vmatmul.mubr.msk.bf16.vlgmr.msra.gmra.mxu1 %vm292_vm2, %v1727_v45 }
 0x330   : > { %16735 = vmatpush3.msk.msra.mxu0 %vm296_vm1, %v17976_v1  ;;  %16742 = vmatpush3.msk.msra.mxu1 %vm296_vm1, %v17981_v2 }
 0x331   : > { %16736 = vmatprep.subr.mxu0 %v21132_v3  ;;  %16743 = vmatprep.subr.mxu1 %v21132_v3 }
 0x332   : > { %16737 = vmatpush3.msra.mxu0 %v17988_v4  ;;  %16744 = vmatpush3.msra.mxu1 %v17997_v5 }
 0x333   : > { %16738 = vmatprep.mubr.msk.f32.mxu0 %vm17912_vm3, %v21132_v3  ;;  %16745 = vmatprep.mubr.msk.f32.mxu1 %vm17912_vm3, %v21132_v3 }
 0x334   : > { %16748 = vmatprep.subr.mxu0 %v21132_v3  ;;  %16755 = vmatprep.subr.mxu1 %v21132_v3 }
 0x337   : > { %16739 = vmatmul.mubr.msk.f32.vlgmr.msra.gmra.mxu0 %vm292_vm2, %v1726_v14  ;;  %16746 = vmatmul.mubr.msk.f32.vlgmr.msra.gmra.mxu1 %vm292_vm2, %v1726_v14 }
 0x338   : > { %16749 = vmatpush3.msk.msra.mxu0 %vm296_vm1, %v18010_v7  ;;  %16756 = vmatpush3.msk.msra.mxu1 %vm296_vm1, %v18015_v8 }
 0x339   : > { %16750 = vmatprep.subr.mxu0 %v21132_v3  ;;  %16757 = vmatprep.subr.mxu1 %v21132_v3 }
 0x33a   : > { %16751 = vmatpush3.msra.mxu0 %v18024_v9  ;;  %16752 = vmatprep.mubr.msk.f32.mxu0 %vm17912_vm3, %v21132_v3 }
 0x33b   : > { %16758 = vmatpush3.msra.mxu1 %v18033_v10  ;;  %16759 = vmatprep.mubr.msk.f32.mxu1 %vm17912_vm3, %v21132_v3 }
 0x33c   : > { %16753 = vmatmul.mubr.msk.f32.vlgmr.msra.gmra.mxu0 %vm292_vm2, %v1726_v14  ;;  %16760 = vmatmul.mubr.msk.f32.vlgmr.msra.gmra.mxu1 %vm292_vm2, %v1726_v14  ;;  %v15336_v14 = vld [vmem:[%s17965_s28 + $0x1a] sm:$0x3] }
 0x33d   : > { %2388 = vmatprep.mubr.bf16.mxu0 %v21134_v61  ;;  %2429 = vmatprep.mubr.bf16.mxu1 %v21134_v61 }
 0x33e   : > { %15363 = vmatprep.subr.msk.bf16.mxu0 %vm996_vm4, %v15356_v25  ;;  %15365 = vmatprep.subr.msk.bf16.mxu1 %vm996_vm4, %v15358_v31 }
 0x33f   : > { %2371 = vmatpush1.bf16.msra.mxu0 %v2333_v18  ;;  %2412 = vmatpush1.bf16.msra.mxu1 %v2339_v22  ;;  %v15340_v22 = vld [vmem:[%s17965_s28 + $0x1c] sm:$0x3] }
 0x340   : > { %15367 = vmatprep.subr.msk.bf16.mxu0 %vm996_vm4, %v15360_v26  ;;  %15369 = vmatprep.subr.msk.bf16.mxu1 %vm996_vm4, %v15362_v29 }
 0x3e7   : > { %v1830_v36 = vpop.f32.mrf.mxu0  ;;  %v1871_v37 = vpop.f32.mrf.mxu1 }
 0x3e8   : > { %v18347_v41 = vadd.f32 %v1830_v36, %v18240_v52  ;;  %v18350_v43 = vadd.f32 %v1871_v37, %v18242_v53 }
 0x3e9   : > { %v1832_v47 = vpop.f32.mrf.mxu0  ;;  %v1873_v48 = vpop.f32.mrf.mxu1 }
 0x3ea   : > { %v18352_v49 = vadd.f32 %v1832_v47, %v1281_v38  ;;  %v18354_v50 = vadd.f32 %v1873_v48, %v1322_v39 }
 0x3eb   : > { %v1834_v42 = vpop.f32.mrf.mxu0  ;;  %v1875_v51 = vpop.f32.mrf.mxu1 }
 0x3ed   : > { %v1835_v34 = vpop.f32.mrf.mxu0  ;;  %v1876_v54 = vpop.f32.mrf.mxu1 }
 0x3ef   : > { %v1912_v56 = vpop.f32.mrf.mxu0  ;;  %v1953_v35 = vpop.f32.mrf.mxu1 }
 0x3f0   : > { %v18357_v52 = vadd.f32 %v1912_v56, %v18248_v63  ;;  %v18360_v53 = vadd.f32 %v1953_v35, %v18250_v0 }
 0x3f1   : > { %v18362_v55 = vpop.f32.mrf.mxu0  ;;  %v18364_v57 = vpop.f32.mrf.mxu1 }
 0x3f3   : > { %v1916_v58 = vpop.f32.mrf.mxu0  ;;  %v1957_v59 = vpop.f32.mrf.mxu1 }
 0x3f5   : > { %v1917_v60 = vpop.f32.mrf.mxu0  ;;  %v1958_v12 = vpop.f32.mrf.mxu1 }
 0x3f7   : > { %v2039_v45 = vpop.f32.mrf.mxu0  ;;  %v2118_v15 = vpop.f32.mrf.mxu1 }
 0x3f8   : > { %v2043_v16 = vadd.f32 %v15332_v13, %v2039_v45  ;;  %v2122_v63 = vadd.f32 %v15336_v14, %v2118_v15  ;;  %v2345_v13 = vsel %vm996_vm4, %v15359_v32, 0  ;;  %v2351_v14 = vsel %vm996_vm4, %v15361_v33, 0  ;;  %v18442_v33 = vld [vmem:[%s17970_s7 + $0x138] sm:$0x11] }
 0x3f9   : > { %v16740_v40 = vpop.f32.mrf.mxu0  ;;  %v16747_v23 = vpop.f32.mrf.mxu1  ;;  %v15399_v32 = vcombine.high %v18429_v19, %v18432_v20  ;;  %v15401_v45 = vcombine.high %v18435_v21, %v18442_v33  ;;  %v15398_v15 = vcombine.low %v18429_v19, %v18432_v20  ;;  %v18508_v19 = vld [vmem:[%s21126_s1 + $0x18] sm:$0x3]  ;;  %v18517_v20 = vld [vmem:[%s21126_s1] sm:$0xff] }
 0x3fa   : > { %v15335_v0 = vmul.f32 -1.442695, %v2043_v16  ;;  %v15339_v24 = vmul.f32 -1.442695, %v2122_v63  ;;  %v15400_v16 = vcombine.low %v18435_v21, %v18442_v33  ;;  %v18523_v21 = vld [vmem:[%s21126_s1 + $0x10] sm:$0xff] }
 0x3fb   : > { %v18537_v33 = vld [vmem:[%s21126_s1 + $0x28] sm:$0x3] }
 0x3fc   : > { %17418 = vpow2.f32 %v15335_v0  ;;  %v2197_v25 = vpop.f32.mrf.mxu0  ;;  %v2271_v28 = vpop.f32.mrf.mxu1 }
 0x3fd   : > { %17420 = vpow2.f32 %v15339_v24  ;;  %v2275_v18 = vadd.f32 %v15343_v17, %v2271_v28  ;;  %v2201_v29 = vadd.f32 %v15340_v22, %v2197_v25 }
 0x3fe   : > { %v16754_v30 = vpop.f32.mrf.mxu0  ;;  %v16761_v31 = vpop.f32.mrf.mxu1 }
 0x3ff   : > { %v15346_v26 = vmul.f32 -1.442695, %v2275_v18 }
 0x401   : > { %17422 = vpow2.f32 %v15346_v26 }
 0x402   : > { %17424 = vtanh.f32 %v2201_v29 }
 0x409   : > { %v17419_v36 = vpop.eup %17418 }
 0x40a   : > { %v17421_v37 = vpop.eup %17420  ;;  %v2047_v38 = vadd.f32 1.0, %v17419_v36 }
 0x40b   : > { %v2126_v39 = vadd.f32 1.0, %v17421_v37 }
 0x40c   : > { %17426 = vrcp.f32 %v2047_v38 }
 0x40d   : > { %17428 = vrcp.f32 %v2126_v39 }
 0x40e   : > { %v17423_v47 = vpop.eup %17422 }
 0x40f   : > { %v17425_v48 = vpop.eup %17424  ;;  %v2279_v54 = vadd.f32 1.0, %v17423_v47  ;;  %v15371_v47 = vld [vmem:[%s17965_s28 + $0x20] sm:$0x3] }
 0x411   : > { %17430 = vrcp.f32 %v2279_v54 }
 0x419   : > { %v17427_v42 = vpop.eup %17426 }
 0x41a   : > { %v17429_v51 = vpop.eup %17428  ;;  %v2283_v34 = vmul.f32 %v17427_v42, %v17425_v48  ;;  %v15375_v48 = vld [vmem:[%s17965_s28 + $0x22] sm:$0x3] }
 0x41b   : > { %v2282_v56 = vmul.f32 %v17429_v51, %v18261_v62 }
 0x41d   : > { %v18371_v35 = vadd.f32 %v2283_v34, %v2282_v56 }
 0x41e   : > { %v17431_v58 = vpop.eup %17430 }
 0x41f   : > { %17432 = vtanh.f32 %v18371_v35 }
 0x42c   : > { %v17433_v59 = vpop.eup %17432 }
 0x42d   : > { %v2286_v60 = vmul.f32 %v17433_v59, %v17431_v58 }
 0x42f   : > { %v2287_v12 = vpack.c.bf16 %v2286_v60, %v2286_v60 }
 0x431   : > { %15364 = vmatmul.mubr.msk.bf16.vlgmr.msra.gmra.mxu0 %vm292_vm2, %v2287_v12  ;;  %15366 = vmatmul.mubr.msk.bf16.vlgmr.msra.gmra.mxu1 %vm292_vm2, %v2287_v12 }
 0x432   : > { %2453 = vmatpush1.bf16.msra.mxu0 %v2345_v13  ;;  %2494 = vmatpush1.bf16.msra.mxu1 %v2351_v14  ;;  %v15382_v14 = vld [vmem:[%s17965_s28 + $0x26] sm:$0x3] }
 0x433   : > { %2470 = vmatprep.mubr.bf16.mxu0 %v21134_v61  ;;  %2511 = vmatprep.mubr.bf16.mxu1 %v21134_v61 }
 0x434   : > { %16762 = vmatprep.subr.mxu0 %v21132_v3  ;;  %16769 = vmatprep.subr.mxu1 %v21132_v3 }
 0x439   : > { %15368 = vmatmul.mubr.msk.bf16.vlgmr.msra.gmra.mxu0 %vm292_vm2, %v2287_v12  ;;  %15370 = vmatmul.mubr.msk.bf16.vlgmr.msra.gmra.mxu1 %vm292_vm2, %v2287_v12 }
 0x43a   : > { %16763 = vmatpush3.msk.msra.mxu0 %vm296_vm1, %v17976_v1  ;;  %16770 = vmatpush3.msk.msra.mxu1 %vm296_vm1, %v17981_v2  ;;  %v15386_v1 = vld [vmem:[%s17970_s7 + $0x100] sm:$0xff] }
 0x43b   : > { %16764 = vmatprep.subr.mxu0 %v21132_v3  ;;  %16771 = vmatprep.subr.mxu1 %v21132_v3  ;;  %v15390_v2 = vld [vmem:[%s17970_s7 + $0x120] sm:$0x11] }
 0x43c   : > { %16765 = vmatpush3.msra.mxu0 %v17988_v4  ;;  %16772 = vmatpush3.msra.mxu1 %v17997_v5  ;;  %v15387_v4 = vld [vmem:[%s17970_s7 + $0x108] sm:$0xff]  ;;  %v15395_v5 = vcombine.high %v15386_v1, %v15390_v2 }
 0x43d   : > { %16766 = vmatprep.mubr.msk.f32.mxu0 %vm17912_vm3, %v21132_v3  ;;  %16773 = vmatprep.mubr.msk.f32.mxu1 %vm17912_vm3, %v21132_v3 }
 0x43e   : > { %16776 = vmatprep.subr.mxu0 %v21132_v3  ;;  %16783 = vmatprep.subr.mxu1 %v21132_v3 }
 0x441   : > { %16767 = vmatmul.mubr.msk.f32.vlgmr.msra.gmra.mxu0 %vm292_vm2, %v2286_v60  ;;  %16774 = vmatmul.mubr.msk.f32.vlgmr.msra.gmra.mxu1 %vm292_vm2, %v2286_v60 }
 0x442   : > { %16777 = vmatpush3.msk.msra.mxu0 %vm296_vm1, %v18010_v7  ;;  %16784 = vmatpush3.msk.msra.mxu1 %vm296_vm1, %v18015_v8  ;;  %v15391_v7 = vld [vmem:[%s17970_s7 + $0x128] sm:$0x11]  ;;  %v15394_v8 = vcombine.low %v15386_v1, %v15390_v2  ;;  %v15379_v2 = vld [vmem:[%s17965_s28 + $0x24] sm:$0x3] }
 0x443   : > { %16778 = vmatprep.subr.mxu0 %v21132_v3  ;;  %16785 = vmatprep.subr.mxu1 %v21132_v3 }
 0x444   : > { %16779 = vmatpush3.msra.mxu0 %v18024_v9  ;;  %16780 = vmatprep.mubr.msk.f32.mxu0 %vm17912_vm3, %v21132_v3  ;;  %v15397_v9 = vcombine.high %v15387_v4, %v15391_v7  ;;  %v2893_v62 = vsel %vm996_vm4, %v15394_v8, 0 }
 0x445   : > { %16786 = vmatpush3.msra.mxu1 %v18033_v10  ;;  %16787 = vmatprep.mubr.msk.f32.mxu1 %vm17912_vm3, %v21132_v3  ;;  %v15396_v10 = vcombine.low %v15387_v4, %v15391_v7 }
 0x446   : > { %16781 = vmatmul.mubr.msk.f32.vlgmr.msra.gmra.mxu0 %vm292_vm2, %v2286_v60  ;;  %16788 = vmatmul.mubr.msk.f32.vlgmr.msra.gmra.mxu1 %vm292_vm2, %v2286_v60 }
 0x447   : > { %2948 = vmatprep.mubr.bf16.mxu0 %v21134_v61  ;;  %2989 = vmatprep.mubr.bf16.mxu1 %v21134_v61  ;;  %v2899_v27 = vsel %vm996_vm4, %v15396_v10, 0 }
 0x448   : > { %15402 = vmatprep.subr.msk.bf16.mxu0 %vm996_vm4, %v15395_v5  ;;  %15404 = vmatprep.subr.msk.bf16.mxu1 %vm996_vm4, %v15397_v9 }
 0x449   : > { %2931 = vmatpush1.bf16.msra.mxu0 %v2893_v62  ;;  %2972 = vmatpush1.bf16.msra.mxu1 %v2899_v27 }
 0x44a   : > { %15406 = vmatprep.subr.msk.bf16.mxu0 %vm996_vm4, %v15399_v32  ;;  %15408 = vmatprep.subr.msk.bf16.mxu1 %vm996_vm4, %v15401_v45 }
 0x4f1   : > { %v2390_v63 = vpop.f32.mrf.mxu0  ;;  %v2431_v40 = vpop.f32.mrf.mxu1 }
 0x4f2   : > { %v18453_v23 = vadd.f32 %v2390_v63, %v18347_v41  ;;  %v18456_v0 = vadd.f32 %v2431_v40, %v18350_v43 }
 0x4f3   : > { %v2392_v24 = vpop.f32.mrf.mxu0  ;;  %v2433_v25 = vpop.f32.mrf.mxu1 }
 0x4f4   : > { %v18459_v28 = vadd.f32 %v2392_v24, %v18352_v49  ;;  %v18462_v30 = vadd.f32 %v2433_v25, %v18354_v50 }
 0x4f5   : > { %v2394_v31 = vpop.f32.mrf.mxu0  ;;  %v2435_v17 = vpop.f32.mrf.mxu1 }
 0x4f7   : > { %v2395_v18 = vpop.f32.mrf.mxu0  ;;  %v2436_v22 = vpop.f32.mrf.mxu1 }
 0x4f9   : > { %v2472_v26 = vpop.f32.mrf.mxu0  ;;  %v2513_v41 = vpop.f32.mrf.mxu1 }
 0x4fa   : > { %v18465_v29 = vadd.f32 %v2472_v26, %v18357_v52  ;;  %v18468_v43 = vadd.f32 %v2513_v41, %v18360_v53  ;;  %v2905_v26 = vsel %vm996_vm4, %v15398_v15, 0  ;;  %v2911_v41 = vsel %vm996_vm4, %v15400_v16, 0  ;;  %v18544_v15 = vld [vmem:[%s21126_s1 + $0x38] sm:$0x3]  ;;  %v18553_v16 = vld [vmem:[%s21126_s1 + $0x20] sm:$0xff] }
 0x4fb   : > { %v18470_v36 = vpop.f32.mrf.mxu0  ;;  %v18472_v49 = vpop.f32.mrf.mxu1 }
 0x4fd   : > { %v2476_v37 = vpop.f32.mrf.mxu0  ;;  %v2517_v50 = vpop.f32.mrf.mxu1 }
 0x4fe   : > { %v18561_v37 = vld [vmem:[%s21126_s1 + $0x30] sm:$0xff]  ;;  %v15425_v50 = vld [vmem:[%s17970_s7 + $0x140] sm:$0xff] }
 0x4ff   : > { %v2477_v38 = vpop.f32.mrf.mxu0  ;;  %v2518_v39 = vpop.f32.mrf.mxu1 }
 0x500   : > { %v15429_v38 = vld [vmem:[%s17970_s7 + $0x160] sm:$0x11]  ;;  %v15426_v39 = vld [vmem:[%s17970_s7 + $0x148] sm:$0xff] }
 0x501   : > { %v2599_v42 = vpop.f32.mrf.mxu0  ;;  %v2678_v51 = vpop.f32.mrf.mxu1 }
 0x502   : > { %v2603_v34 = vadd.f32 %v15371_v47, %v2599_v42  ;;  %v2682_v52 = vadd.f32 %v15375_v48, %v2678_v51  ;;  %v15434_v47 = vcombine.high %v15425_v50, %v15429_v38  ;;  %v15430_v48 = vld [vmem:[%s17970_s7 + $0x168] sm:$0x11]  ;;  %v15433_v42 = vcombine.low %v15425_v50, %v15429_v38 }
 0x503   : > { %v16768_v54 = vpop.f32.mrf.mxu0  ;;  %v16775_v56 = vpop.f32.mrf.mxu1  ;;  %v15436_v51 = vcombine.high %v15426_v39, %v15430_v48 }
 0x504   : > { %v15374_v53 = vmul.f32 -1.442695, %v2603_v34  ;;  %v15378_v58 = vmul.f32 -1.442695, %v2682_v52  ;;  %v15435_v34 = vcombine.low %v15426_v39, %v15430_v48  ;;  %v3453_v52 = vsel %vm996_vm4, %v15433_v42, 0  ;;  %v18577_v54 = vld [vmem:[%s17970_s7 + $0x150] sm:$0xff] }
 0x505   : > { %v18580_v56 = vld [vmem:[%s17970_s7 + $0x170] sm:$0x11] }
 0x506   : > { %17434 = vpow2.f32 %v15374_v53  ;;  %v2757_v59 = vpop.f32.mrf.mxu0  ;;  %v2831_v60 = vpop.f32.mrf.mxu1  ;;  %v18583_v53 = vld [vmem:[%s17970_s7 + $0x158] sm:$0xff] }
 0x507   : > { %17436 = vpow2.f32 %v15378_v58  ;;  %v2835_v1 = vadd.f32 %v15382_v14, %v2831_v60  ;;  %v2761_v5 = vadd.f32 %v15379_v2, %v2757_v59  ;;  %v3459_v58 = vsel %vm996_vm4, %v15435_v34, 0  ;;  %v18590_v60 = vld [vmem:[%s17970_s7 + $0x178] sm:$0x11] }
 0x508   : > { %v16782_v12 = vpop.f32.mrf.mxu0  ;;  %v16789_v13 = vpop.f32.mrf.mxu1  ;;  %v15438_v59 = vcombine.high %v18577_v54, %v18580_v56  ;;  %v15439_v14 = vcombine.low %v18583_v53, %v18590_v60 }
 0x509   : > { %v15385_v4 = vmul.f32 -1.442695, %v2835_v1  ;;  %v15440_v12 = vcombine.high %v18583_v53, %v18590_v60  ;;  %v15437_v13 = vcombine.low %v18577_v54, %v18580_v56  ;;  %v15468_v54 = vld [vmem:[%s17970_s7 + $0x1a0] sm:$0x11]  ;;  %v15465_v56 = vld [vmem:[%s17970_s7 + $0x188] sm:$0xff] }
 0x50a   : > { %v15469_v60 = vld [vmem:[%s17970_s7 + $0x1a8] sm:$0x11] }
 0x50b   : > { %17438 = vpow2.f32 %v15385_v4 }
 0x50c   : > { %17440 = vtanh.f32 %v2761_v5 }
 0x513   : > { %v17435_v7 = vpop.eup %17434 }
 0x514   : > { %v17437_v8 = vpop.eup %17436  ;;  %v2607_v9 = vadd.f32 1.0, %v17435_v7 }
 0x515   : > { %v2686_v10 = vadd.f32 1.0, %v17437_v8 }
 0x516   : > { %17442 = vrcp.f32 %v2607_v9 }
 0x517   : > { %17444 = vrcp.f32 %v2686_v10 }
 0x518   : > { %v17439_v62 = vpop.eup %17438 }
 0x519   : > { %v17441_v27 = vpop.eup %17440  ;;  %v2839_v40 = vadd.f32 1.0, %v17439_v62 }
 0x51b   : > { %17446 = vrcp.f32 %v2839_v40 }
 0x523   : > { %v17443_v32 = vpop.eup %17442 }
 0x524   : > { %v17445_v45 = vpop.eup %17444  ;;  %v2843_v63 = vmul.f32 %v17443_v32, %v17441_v27 }
 0x525   : > { %v2842_v24 = vmul.f32 %v17445_v45, %v18371_v35  ;;  %v18501_v35 = vld [vmem:[%s21126_s1 + $0x8] sm:$0x3] }
 0x527   : > { %v18479_v25 = vadd.f32 %v2843_v63, %v2842_v24 }
 0x528   : > { %v17447_v31 = vpop.eup %17446 }
 0x529   : > { %17448 = vtanh.f32 %v18479_v25 }
 0x536   : > { %v17449_v17 = vpop.eup %17448 }
 0x537   : > { %v2846_v18 = vmul.f32 %v17449_v17, %v17447_v31 }
 0x539   : > { %v2847_v22 = vpack.c.bf16 %v2846_v18, %v2846_v18 }
 0x53b   : > { %15403 = vmatmul.mubr.msk.bf16.vlgmr.msra.gmra.mxu0 %vm292_vm2, %v2847_v22  ;;  %15405 = vmatmul.mubr.msk.bf16.vlgmr.msra.gmra.mxu1 %vm292_vm2, %v2847_v22 }
 0x53c   : > { %3013 = vmatpush1.bf16.msra.mxu0 %v2905_v26  ;;  %3054 = vmatpush1.bf16.msra.mxu1 %v2911_v41  ;;  %v15414_v26 = vld [vmem:[%s17965_s28 + $0x2a] sm:$0x3] }
 0x53d   : > { %3030 = vmatprep.mubr.bf16.mxu0 %v21134_v61  ;;  %3071 = vmatprep.mubr.bf16.mxu1 %v21134_v61 }
 0x53e   : > { %16790 = vmatprep.subr.mxu0 %v21132_v3  ;;  %16797 = vmatprep.subr.mxu1 %v21132_v3 }
 0x543   : > { %15407 = vmatmul.mubr.msk.bf16.vlgmr.msra.gmra.mxu0 %vm292_vm2, %v2847_v22  ;;  %15409 = vmatmul.mubr.msk.bf16.vlgmr.msra.gmra.mxu1 %vm292_vm2, %v2847_v22  ;;  %v15410_v22 = vld [vmem:[%s17965_s28 + $0x28] sm:$0x3] }
 0x544   : > { %16791 = vmatpush3.msk.msra.mxu0 %vm296_vm1, %v18501_v35  ;;  %16798 = vmatpush3.msk.msra.mxu1 %vm296_vm1, %v18508_v19 }
 0x545   : > { %16792 = vmatprep.subr.mxu0 %v21132_v3  ;;  %16799 = vmatprep.subr.mxu1 %v21132_v3 }
 0x546   : > { %16793 = vmatpush3.msra.mxu0 %v18517_v20  ;;  %16800 = vmatpush3.msra.mxu1 %v18523_v21 }
 0x547   : > { %16794 = vmatprep.mubr.msk.f32.mxu0 %vm17912_vm3, %v21132_v3  ;;  %16801 = vmatprep.mubr.msk.f32.mxu1 %vm17912_vm3, %v21132_v3 }
 0x548   : > { %16804 = vmatprep.subr.mxu0 %v21132_v3  ;;  %16811 = vmatprep.subr.mxu1 %v21132_v3 }
 0x54b   : > { %16795 = vmatmul.mubr.msk.f32.vlgmr.msra.gmra.mxu0 %vm292_vm2, %v2846_v18  ;;  %16802 = vmatmul.mubr.msk.f32.vlgmr.msra.gmra.mxu1 %vm292_vm2, %v2846_v18 }
 0x54c   : > { %16805 = vmatpush3.msk.msra.mxu0 %vm296_vm1, %v18537_v33  ;;  %16812 = vmatpush3.msk.msra.mxu1 %vm296_vm1, %v18544_v15 }
 0x54d   : > { %16806 = vmatprep.subr.mxu0 %v21132_v3  ;;  %16813 = vmatprep.subr.mxu1 %v21132_v3 }
 0x54e   : > { %16807 = vmatpush3.msra.mxu0 %v18553_v16  ;;  %16808 = vmatprep.mubr.msk.f32.mxu0 %vm17912_vm3, %v21132_v3 }
 0x54f   : > { %16814 = vmatpush3.msra.mxu1 %v18561_v37  ;;  %16815 = vmatprep.mubr.msk.f32.mxu1 %vm17912_vm3, %v21132_v3 }
 0x550   : > { %16809 = vmatmul.mubr.msk.f32.vlgmr.msra.gmra.mxu0 %vm292_vm2, %v2846_v18  ;;  %16816 = vmatmul.mubr.msk.f32.vlgmr.msra.gmra.mxu1 %vm292_vm2, %v2846_v18 }
 0x551   : > { %3508 = vmatprep.mubr.bf16.mxu0 %v21134_v61  ;;  %3549 = vmatprep.mubr.bf16.mxu1 %v21134_v61 }
 0x552   : > { %15441 = vmatprep.subr.msk.bf16.mxu0 %vm996_vm4, %v15434_v47  ;;  %15443 = vmatprep.subr.msk.bf16.mxu1 %vm996_vm4, %v15436_v51 }
 0x553   : > { %3491 = vmatpush1.bf16.msra.mxu0 %v3453_v52  ;;  %3532 = vmatpush1.bf16.msra.mxu1 %v3459_v58  ;;  %v15421_v58 = vld [vmem:[%s17965_s28 + $0x2e] sm:$0x3] }
 0x554   : > { %15445 = vmatprep.subr.msk.bf16.mxu0 %vm996_vm4, %v15438_v59  ;;  %15447 = vmatprep.subr.msk.bf16.mxu1 %vm996_vm4, %v15440_v12  ;;  %v15418_v12 = vld [vmem:[%s17965_s28 + $0x2c] sm:$0x3] }
 0x5fb   : > { %v2950_v1 = vpop.f32.mrf.mxu0  ;;  %v2991_v2 = vpop.f32.mrf.mxu1 }
 0x5fc   : > { %v18601_v4 = vadd.f32 %v2950_v1, %v18453_v23  ;;  %v18604_v5 = vadd.f32 %v2991_v2, %v18456_v0 }
 0x5fd   : > { %v2952_v7 = vpop.f32.mrf.mxu0  ;;  %v2993_v8 = vpop.f32.mrf.mxu1 }
 0x5fe   : > { %v18607_v9 = vadd.f32 %v2952_v7, %v18459_v28  ;;  %v18610_v10 = vadd.f32 %v2993_v8, %v18462_v30 }
 0x5ff   : > { %v2954_v62 = vpop.f32.mrf.mxu0  ;;  %v2995_v27 = vpop.f32.mrf.mxu1 }
 0x601   : > { %v2955_v32 = vpop.f32.mrf.mxu0  ;;  %v2996_v45 = vpop.f32.mrf.mxu1 }
 0x603   : > { %v3032_v63 = vpop.f32.mrf.mxu0  ;;  %v3073_v23 = vpop.f32.mrf.mxu1 }
 0x604   : > { %v18613_v40 = vadd.f32 %v3032_v63, %v18465_v29  ;;  %v18616_v0 = vadd.f32 %v3073_v23, %v18468_v43 }
 0x605   : > { %v18618_v24 = vpop.f32.mrf.mxu0  ;;  %v18620_v28 = vpop.f32.mrf.mxu1 }
 0x607   : > { %v3036_v31 = vpop.f32.mrf.mxu0  ;;  %v3077_v30 = vpop.f32.mrf.mxu1 }
 0x609   : > { %v3037_v17 = vpop.f32.mrf.mxu0  ;;  %v3078_v18 = vpop.f32.mrf.mxu1 }
 0x60b   : > { %v3159_v41 = vpop.f32.mrf.mxu0  ;;  %v3238_v50 = vpop.f32.mrf.mxu1 }
 0x60c   : > { %v3163_v38 = vadd.f32 %v15410_v22, %v3159_v41  ;;  %v3242_v29 = vadd.f32 %v15414_v26, %v3238_v50 }
 0x60d   : > { %v16796_v39 = vpop.f32.mrf.mxu0  ;;  %v16803_v47 = vpop.f32.mrf.mxu1 }
 0x60e   : > { %v15413_v43 = vmul.f32 -1.442695, %v3163_v38  ;;  %v15417_v48 = vmul.f32 -1.442695, %v3242_v29  ;;  %v3465_v38 = vsel %vm996_vm4, %v15437_v13, 0  ;;  %v3471_v29 = vsel %vm996_vm4, %v15439_v14, 0 }
 0x60f   : > { %v15475_v14 = vcombine.high %v15465_v56, %v15469_v60  ;;  %v15474_v39 = vcombine.low %v15465_v56, %v15469_v60 }
 0x610   : > { %17450 = vpow2.f32 %v15413_v43  ;;  %v3317_v42 = vpop.f32.mrf.mxu0  ;;  %v3391_v51 = vpop.f32.mrf.mxu1  ;;  %v18685_v43 = vld [vmem:[%s17970_s7 + $0x190] sm:$0xff] }
 0x611   : > { %17452 = vpow2.f32 %v15417_v48  ;;  %v3395_v59 = vadd.f32 %v15421_v58, %v3391_v51  ;;  %v3321_v2 = vadd.f32 %v15418_v12, %v3317_v42  ;;  %v18688_v48 = vld [vmem:[%s17970_s7 + $0x1b0] sm:$0x11]  ;;  %v18691_v42 = vld [vmem:[%s17970_s7 + $0x198] sm:$0xff]  ;;  %v4019_v51 = vsel %vm996_vm4, %v15474_v39, 0 }
 0x612   : > { %v16810_v34 = vpop.f32.mrf.mxu0  ;;  %v16817_v52 = vpop.f32.mrf.mxu1 }
 0x613   : > { %v15424_v1 = vmul.f32 -1.442695, %v3395_v59  ;;  %v15477_v34 = vcombine.high %v18685_v43, %v18688_v48  ;;  %v18698_v52 = vld [vmem:[%s17970_s7 + $0x1b8] sm:$0x11]  ;;  %v15476_v59 = vcombine.low %v18685_v43, %v18688_v48  ;;  %v15507_v43 = vld [vmem:[%s17970_s7 + $0x1e0] sm:$0x11] }
 0x614   : > { %v15479_v58 = vcombine.high %v18691_v42, %v18698_v52  ;;  %v15478_v12 = vcombine.low %v18691_v42, %v18698_v52  ;;  %v15504_v48 = vld [vmem:[%s17970_s7 + $0x1c8] sm:$0xff] }
 0x615   : > { %17454 = vpow2.f32 %v15424_v1  ;;  %v15508_v52 = vld [vmem:[%s17970_s7 + $0x1e8] sm:$0x11] }
 0x616   : > { %17456 = vtanh.f32 %v3321_v2 }
 0x61d   : > { %v17451_v7 = vpop.eup %17450 }
 0x61e   : > { %v17453_v8 = vpop.eup %17452  ;;  %v3167_v62 = vadd.f32 1.0, %v17451_v7 }
 0x61f   : > { %v3246_v27 = vadd.f32 1.0, %v17453_v8 }
 0x620   : > { %17458 = vrcp.f32 %v3167_v62 }
 0x621   : > { %17460 = vrcp.f32 %v3246_v27 }
 0x622   : > { %v17455_v32 = vpop.eup %17454 }
 0x623   : > { %v17457_v45 = vpop.eup %17456  ;;  %v3399_v30 = vadd.f32 1.0, %v17455_v32 }
 0x625   : > { %17462 = vrcp.f32 %v3399_v30 }
 0x62d   : > { %v17459_v63 = vpop.eup %17458 }
 0x62e   : > { %v17461_v23 = vpop.eup %17460  ;;  %v3403_v31 = vmul.f32 %v17459_v63, %v17457_v45 }
 0x62f   : > { %v3402_v17 = vmul.f32 %v17461_v23, %v18479_v25  ;;  %v15464_v25 = vld [vmem:[%s17970_s7 + $0x180] sm:$0xff] }
 0x630   : > { %v15473_v53 = vcombine.high %v15464_v25, %v15468_v54  ;;  %v15472_v13 = vcombine.low %v15464_v25, %v15468_v54  ;;  %v15453_v25 = vld [vmem:[%s17965_s28 + $0x32] sm:$0x3] }
 0x631   : > { %v18627_v18 = vadd.f32 %v3403_v31, %v3402_v17 }
 0x632   : > { %v17463_v22 = vpop.eup %17462  ;;  %v4013_v47 = vsel %vm996_vm4, %v15472_v13, 0 }
 0x633   : > { %17464 = vtanh.f32 %v18627_v18 }
 0x640   : > { %v17465_v26 = vpop.eup %17464 }
 0x641   : > { %v3406_v41 = vmul.f32 %v17465_v26, %v17463_v22 }
 0x643   : > { %v3407_v50 = vpack.c.bf16 %v3406_v41, %v3406_v41 }
 0x645   : > { %15442 = vmatmul.mubr.msk.bf16.vlgmr.msra.gmra.mxu0 %vm292_vm2, %v3407_v50  ;;  %15444 = vmatmul.mubr.msk.bf16.vlgmr.msra.gmra.mxu1 %vm292_vm2, %v3407_v50 }
 0x646   : > { %3573 = vmatpush1.bf16.msra.mxu0 %v3465_v38  ;;  %3614 = vmatpush1.bf16.msra.mxu1 %v3471_v29  ;;  %v15449_v29 = vld [vmem:[%s17965_s28 + $0x30] sm:$0x3] }
 0x647   : > { %3590 = vmatprep.mubr.bf16.mxu0 %v21134_v61  ;;  %3631 = vmatprep.mubr.bf16.mxu1 %v21134_v61 }
 0x648   : > { %16818 = vmatprep.subr.mxu0 %v21132_v3  ;;  %16825 = vmatprep.subr.mxu1 %v21132_v3 }
 0x64d   : > { %15446 = vmatmul.mubr.msk.bf16.vlgmr.msra.gmra.mxu0 %vm292_vm2, %v3407_v50  ;;  %15448 = vmatmul.mubr.msk.bf16.vlgmr.msra.gmra.mxu1 %vm292_vm2, %v3407_v50 }
 0x64e   : > { %16819 = vmatpush3.msk.msra.mxu0 %vm296_vm1, %v18501_v35  ;;  %16826 = vmatpush3.msk.msra.mxu1 %vm296_vm1, %v18508_v19 }
 0x64f   : > { %16820 = vmatprep.subr.mxu0 %v21132_v3  ;;  %16827 = vmatprep.subr.mxu1 %v21132_v3 }
 0x650   : > { %16821 = vmatpush3.msra.mxu0 %v18517_v20  ;;  %16828 = vmatpush3.msra.mxu1 %v18523_v21 }
 0x651   : > { %16822 = vmatprep.mubr.msk.f32.mxu0 %vm17912_vm3, %v21132_v3  ;;  %16829 = vmatprep.mubr.msk.f32.mxu1 %vm17912_vm3, %v21132_v3 }
 0x652   : > { %16832 = vmatprep.subr.mxu0 %v21132_v3  ;;  %16839 = vmatprep.subr.mxu1 %v21132_v3 }
 0x655   : > { %16823 = vmatmul.mubr.msk.f32.vlgmr.msra.gmra.mxu0 %vm292_vm2, %v3406_v41  ;;  %16830 = vmatmul.mubr.msk.f32.vlgmr.msra.gmra.mxu1 %vm292_vm2, %v3406_v41 }
 0x656   : > { %16833 = vmatpush3.msk.msra.mxu0 %vm296_vm1, %v18537_v33  ;;  %16840 = vmatpush3.msk.msra.mxu1 %vm296_vm1, %v18544_v15 }
 0x657   : > { %16834 = vmatprep.subr.mxu0 %v21132_v3  ;;  %16841 = vmatprep.subr.mxu1 %v21132_v3 }
 0x658   : > { %16835 = vmatpush3.msra.mxu0 %v18553_v16  ;;  %16836 = vmatprep.mubr.msk.f32.mxu0 %vm17912_vm3, %v21132_v3 }
 0x659   : > { %16842 = vmatpush3.msra.mxu1 %v18561_v37  ;;  %16843 = vmatprep.mubr.msk.f32.mxu1 %vm17912_vm3, %v21132_v3 }
 0x65a   : > { %16837 = vmatmul.mubr.msk.f32.vlgmr.msra.gmra.mxu0 %vm292_vm2, %v3406_v41  ;;  %16844 = vmatmul.mubr.msk.f32.vlgmr.msra.gmra.mxu1 %vm292_vm2, %v3406_v41 }
 0x65b   : > { %4068 = vmatprep.mubr.bf16.mxu0 %v21134_v61  ;;  %4109 = vmatprep.mubr.bf16.mxu1 %v21134_v61 }
 0x65c   : > { %15480 = vmatprep.subr.msk.bf16.mxu0 %vm996_vm4, %v15473_v53  ;;  %15482 = vmatprep.subr.msk.bf16.mxu1 %vm996_vm4, %v15475_v14 }
 0x65d   : > { %4051 = vmatpush1.bf16.msra.mxu0 %v4013_v47  ;;  %4092 = vmatpush1.bf16.msra.mxu1 %v4019_v51 }
 0x65e   : > { %15484 = vmatprep.subr.msk.bf16.mxu0 %vm996_vm4, %v15477_v34  ;;  %15486 = vmatprep.subr.msk.bf16.mxu1 %vm996_vm4, %v15479_v58  ;;  %v15460_v58 = vld [vmem:[%s17965_s28 + $0x36] sm:$0x3] }
 0x705   : > { %v3510_v1 = vpop.f32.mrf.mxu0  ;;  %v3551_v2 = vpop.f32.mrf.mxu1 }
 0x706   : > { %v18709_v7 = vadd.f32 %v3510_v1, %v18601_v4  ;;  %v18712_v8 = vadd.f32 %v3551_v2, %v18604_v5  ;;  %v15457_v2 = vld [vmem:[%s17965_s28 + $0x34] sm:$0x3] }
 0x707   : > { %v3512_v62 = vpop.f32.mrf.mxu0  ;;  %v3553_v27 = vpop.f32.mrf.mxu1 }
 0x708   : > { %v18715_v32 = vadd.f32 %v3512_v62, %v18607_v9  ;;  %v18718_v45 = vadd.f32 %v3553_v27, %v18610_v10 }
 0x709   : > { %v3514_v63 = vpop.f32.mrf.mxu0  ;;  %v3555_v23 = vpop.f32.mrf.mxu1 }
 0x70b   : > { %v3515_v31 = vpop.f32.mrf.mxu0  ;;  %v3556_v30 = vpop.f32.mrf.mxu1 }
 0x70d   : > { %v3592_v17 = vpop.f32.mrf.mxu0  ;;  %v3633_v4 = vpop.f32.mrf.mxu1 }
 0x70e   : > { %v18721_v22 = vadd.f32 %v3592_v17, %v18613_v40  ;;  %v18724_v5 = vadd.f32 %v3633_v4, %v18616_v0 }
 0x70f   : > { %v18726_v26 = vpop.f32.mrf.mxu0  ;;  %v18728_v9 = vpop.f32.mrf.mxu1 }
 0x711   : > { %v3596_v41 = vpop.f32.mrf.mxu0  ;;  %v3637_v10 = vpop.f32.mrf.mxu1 }
 0x713   : > { %v3597_v50 = vpop.f32.mrf.mxu0  ;;  %v3638_v38 = vpop.f32.mrf.mxu1 }
 0x715   : > { %v3719_v54 = vpop.f32.mrf.mxu0  ;;  %v3798_v56 = vpop.f32.mrf.mxu1 }
 0x716   : > { %v3723_v53 = vadd.f32 %v15449_v29, %v3719_v54  ;;  %v3802_v40 = vadd.f32 %v15453_v25, %v3798_v56 }
 0x717   : > { %v16824_v60 = vpop.f32.mrf.mxu0  ;;  %v16831_v13 = vpop.f32.mrf.mxu1 }
 0x718   : > { %v15452_v0 = vmul.f32 -1.442695, %v3723_v53  ;;  %v15456_v14 = vmul.f32 -1.442695, %v3802_v40  ;;  %v4025_v60 = vsel %vm996_vm4, %v15476_v59, 0  ;;  %v4031_v13 = vsel %vm996_vm4, %v15478_v12, 0 }
 0x719   : > { %v15514_v12 = vcombine.high %v15504_v48, %v15508_v52 }
 0x71a   : > { %17466 = vpow2.f32 %v15452_v0  ;;  %v3877_v39 = vpop.f32.mrf.mxu0  ;;  %v3951_v47 = vpop.f32.mrf.mxu1  ;;  %v15513_v0 = vcombine.low %v15504_v48, %v15508_v52  ;;  %v15492_v48 = vld [vmem:[%s17965_s28 + $0x3a] sm:$0x3] }
 0x71b   : > { %17468 = vpow2.f32 %v15456_v14  ;;  %v3955_v1 = vadd.f32 %v15460_v58, %v3951_v47  ;;  %v3881_v27 = vadd.f32 %v15457_v2, %v3877_v39  ;;  %v18793_v39 = vld [vmem:[%s17970_s7 + $0x1d0] sm:$0xff] }
 0x71c   : > { %v16838_v51 = vpop.f32.mrf.mxu0  ;;  %v16845_v34 = vpop.f32.mrf.mxu1  ;;  %v18796_v47 = vld [vmem:[%s17970_s7 + $0x1f0] sm:$0x11] }
 0x71d   : > { %v15463_v62 = vmul.f32 -1.442695, %v3955_v1  ;;  %v18799_v51 = vld [vmem:[%s17970_s7 + $0x1d8] sm:$0xff]  ;;  %v4579_v34 = vsel %vm996_vm4, %v15513_v0, 0  ;;  %v15516_v58 = vcombine.high %v18793_v39, %v18796_v47 }
 0x71e   : > { %v18806_v1 = vld [vmem:[%s17970_s7 + $0x1f8] sm:$0x11] }
 0x71f   : > { %17470 = vpow2.f32 %v15463_v62  ;;  %v15518_v2 = vcombine.high %v18799_v51, %v18806_v1  ;;  %v15515_v62 = vcombine.low %v18793_v39, %v18796_v47  ;;  %v15546_v39 = vld [vmem:[%s17970_s7 + $0x220] sm:$0x11]  ;;  %v15543_v47 = vld [vmem:[%s17970_s7 + $0x208] sm:$0xff] }
 0x720   : > { %17472 = vtanh.f32 %v3881_v27  ;;  %v15517_v27 = vcombine.low %v18799_v51, %v18806_v1  ;;  %v15547_v1 = vld [vmem:[%s17970_s7 + $0x228] sm:$0x11] }
 0x727   : > { %v17467_v63 = vpop.eup %17466 }
 0x728   : > { %v17469_v23 = vpop.eup %17468  ;;  %v3727_v31 = vadd.f32 1.0, %v17467_v63 }
 0x729   : > { %v3806_v30 = vadd.f32 1.0, %v17469_v23 }
 0x72a   : > { %17474 = vrcp.f32 %v3727_v31 }
 0x72b   : > { %17476 = vrcp.f32 %v3806_v30 }
 0x72c   : > { %v17471_v17 = vpop.eup %17470 }
 0x72d   : > { %v17473_v4 = vpop.eup %17472  ;;  %v3959_v38 = vadd.f32 1.0, %v17471_v17 }
 0x72f   : > { %17478 = vrcp.f32 %v3959_v38 }
 0x737   : > { %v17475_v41 = vpop.eup %17474 }
 0x738   : > { %v17477_v10 = vpop.eup %17476  ;;  %v3963_v50 = vmul.f32 %v17475_v41, %v17473_v4 }
 0x739   : > { %v3962_v29 = vmul.f32 %v17477_v10, %v18627_v18  ;;  %v15503_v18 = vld [vmem:[%s17970_s7 + $0x1c0] sm:$0xff] }
 0x73a   : > { %v15512_v42 = vcombine.high %v15503_v18, %v15507_v43  ;;  %v15511_v59 = vcombine.low %v15503_v18, %v15507_v43  ;;  %v15488_v43 = vld [vmem:[%s17965_s28 + $0x38] sm:$0x3] }
 0x73b   : > { %v18735_v25 = vadd.f32 %v3963_v50, %v3962_v29 }
 0x73c   : > { %v17479_v54 = vpop.eup %17478  ;;  %v4573_v14 = vsel %vm996_vm4, %v15511_v59, 0 }
 0x73d   : > { %17480 = vtanh.f32 %v18735_v25 }
 0x74a   : > { %v17481_v56 = vpop.eup %17480 }
 0x74b   : > { %v3966_v53 = vmul.f32 %v17481_v56, %v17479_v54 }
 0x74d   : > { %v3967_v40 = vpack.c.bf16 %v3966_v53, %v3966_v53 }
 0x74f   : > { %15481 = vmatmul.mubr.msk.bf16.vlgmr.msra.gmra.mxu0 %vm292_vm2, %v3967_v40  ;;  %15483 = vmatmul.mubr.msk.bf16.vlgmr.msra.gmra.mxu1 %vm292_vm2, %v3967_v40 }
 0x750   : > { %4133 = vmatpush1.bf16.msra.mxu0 %v4025_v60  ;;  %4174 = vmatpush1.bf16.msra.mxu1 %v4031_v13 }
 0x751   : > { %4150 = vmatprep.mubr.bf16.mxu0 %v21134_v61  ;;  %4191 = vmatprep.mubr.bf16.mxu1 %v21134_v61 }
 0x752   : > { %16846 = vmatprep.subr.mxu0 %v21132_v3  ;;  %16853 = vmatprep.subr.mxu1 %v21132_v3 }
 0x757   : > { %15485 = vmatmul.mubr.msk.bf16.vlgmr.msra.gmra.mxu0 %vm292_vm2, %v3967_v40  ;;  %15487 = vmatmul.mubr.msk.bf16.vlgmr.msra.gmra.mxu1 %vm292_vm2, %v3967_v40 }
 0x758   : > { %16847 = vmatpush3.msk.msra.mxu0 %vm296_vm1, %v18501_v35  ;;  %16854 = vmatpush3.msk.msra.mxu1 %vm296_vm1, %v18508_v19 }
 0x759   : > { %16848 = vmatprep.subr.mxu0 %v21132_v3  ;;  %16855 = vmatprep.subr.mxu1 %v21132_v3 }
 0x75a   : > { %16849 = vmatpush3.msra.mxu0 %v18517_v20  ;;  %16856 = vmatpush3.msra.mxu1 %v18523_v21 }
 0x75b   : > { %16850 = vmatprep.mubr.msk.f32.mxu0 %vm17912_vm3, %v21132_v3  ;;  %16857 = vmatprep.mubr.msk.f32.mxu1 %vm17912_vm3, %v21132_v3 }
 0x75c   : > { %16860 = vmatprep.subr.mxu0 %v21132_v3  ;;  %16867 = vmatprep.subr.mxu1 %v21132_v3 }
 0x75f   : > { %16851 = vmatmul.mubr.msk.f32.vlgmr.msra.gmra.mxu0 %vm292_vm2, %v3966_v53  ;;  %16858 = vmatmul.mubr.msk.f32.vlgmr.msra.gmra.mxu1 %vm292_vm2, %v3966_v53 }
 0x760   : > { %16861 = vmatpush3.msk.msra.mxu0 %vm296_vm1, %v18537_v33  ;;  %16868 = vmatpush3.msk.msra.mxu1 %vm296_vm1, %v18544_v15 }
 0x761   : > { %16862 = vmatprep.subr.mxu0 %v21132_v3  ;;  %16869 = vmatprep.subr.mxu1 %v21132_v3 }
 0x762   : > { %16863 = vmatpush3.msra.mxu0 %v18553_v16  ;;  %16864 = vmatprep.mubr.msk.f32.mxu0 %vm17912_vm3, %v21132_v3 }
 0x763   : > { %16870 = vmatpush3.msra.mxu1 %v18561_v37  ;;  %16871 = vmatprep.mubr.msk.f32.mxu1 %vm17912_vm3, %v21132_v3 }
 0x764   : > { %16865 = vmatmul.mubr.msk.f32.vlgmr.msra.gmra.mxu0 %vm292_vm2, %v3966_v53  ;;  %16872 = vmatmul.mubr.msk.f32.vlgmr.msra.gmra.mxu1 %vm292_vm2, %v3966_v53 }
 0x765   : > { %4628 = vmatprep.mubr.bf16.mxu0 %v21134_v61  ;;  %4669 = vmatprep.mubr.bf16.mxu1 %v21134_v61 }
 0x766   : > { %15519 = vmatprep.subr.msk.bf16.mxu0 %vm996_vm4, %v15512_v42  ;;  %15521 = vmatprep.subr.msk.bf16.mxu1 %vm996_vm4, %v15514_v12 }
 0x767   : > { %4611 = vmatpush1.bf16.msra.mxu0 %v4573_v14  ;;  %4652 = vmatpush1.bf16.msra.mxu1 %v4579_v34 }
 0x768   : > { %15523 = vmatprep.subr.msk.bf16.mxu0 %vm996_vm4, %v15516_v58  ;;  %15525 = vmatprep.subr.msk.bf16.mxu1 %vm996_vm4, %v15518_v2 }
 0x80f   : > { %v4070_v63 = vpop.f32.mrf.mxu0  ;;  %v4111_v23 = vpop.f32.mrf.mxu1 }
 0x810   : > { %v18817_v31 = vadd.f32 %v4070_v63, %v18709_v7  ;;  %v18820_v30 = vadd.f32 %v4111_v23, %v18712_v8  ;;  %v15499_v23 = vld [vmem:[%s17965_s28 + $0x3e] sm:$0x3] }
 0x811   : > { %v4072_v17 = vpop.f32.mrf.mxu0  ;;  %v4113_v4 = vpop.f32.mrf.mxu1 }
 0x812   : > { %v18823_v41 = vadd.f32 %v4072_v17, %v18715_v32  ;;  %v18826_v10 = vadd.f32 %v4113_v4, %v18718_v45  ;;  %v15496_v4 = vld [vmem:[%s17965_s28 + $0x3c] sm:$0x3] }
 0x813   : > { %v4074_v50 = vpop.f32.mrf.mxu0  ;;  %v4115_v38 = vpop.f32.mrf.mxu1 }
 0x815   : > { %v4075_v29 = vpop.f32.mrf.mxu0  ;;  %v4116_v54 = vpop.f32.mrf.mxu1 }
 0x817   : > { %v4152_v56 = vpop.f32.mrf.mxu0  ;;  %v4193_v7 = vpop.f32.mrf.mxu1 }
 0x818   : > { %v18829_v53 = vadd.f32 %v4152_v56, %v18721_v22  ;;  %v18832_v8 = vadd.f32 %v4193_v7, %v18724_v5 }
 0x819   : > { %v18834_v40 = vpop.f32.mrf.mxu0  ;;  %v18836_v32 = vpop.f32.mrf.mxu1 }
 0x81b   : > { %v4156_v60 = vpop.f32.mrf.mxu0  ;;  %v4197_v45 = vpop.f32.mrf.mxu1 }
 0x81d   : > { %v4157_v13 = vpop.f32.mrf.mxu0  ;;  %v4198_v18 = vpop.f32.mrf.mxu1 }
 0x81f   : > { %v4279_v42 = vpop.f32.mrf.mxu0  ;;  %v4358_v52 = vpop.f32.mrf.mxu1 }
 0x820   : > { %v4283_v59 = vadd.f32 %v15488_v43, %v4279_v42  ;;  %v4362_v22 = vadd.f32 %v15492_v48, %v4358_v52 }
 0x821   : > { %v16852_v12 = vpop.f32.mrf.mxu0  ;;  %v16859_v0 = vpop.f32.mrf.mxu1 }
 0x822   : > { %v15491_v5 = vmul.f32 -1.442695, %v4283_v59  ;;  %v15495_v14 = vmul.f32 -1.442695, %v4362_v22 }
 0x824   : > { %17482 = vpow2.f32 %v15491_v5  ;;  %v4437_v34 = vpop.f32.mrf.mxu0  ;;  %v4511_v58 = vpop.f32.mrf.mxu1  ;;  %v4585_v5 = vsel %vm996_vm4, %v15515_v62, 0 }
 0x825   : > { %17484 = vpow2.f32 %v15495_v14  ;;  %v4515_v17 = vadd.f32 %v15499_v23, %v4511_v58  ;;  %v4441_v38 = vadd.f32 %v15496_v4, %v4437_v34  ;;  %v4591_v14 = vsel %vm996_vm4, %v15517_v27, 0  ;;  %v18907_v23 = vld [vmem:[%s17970_s7 + $0x218] sm:$0xff] }
 0x826   : > { %v16866_v2 = vpop.f32.mrf.mxu0  ;;  %v16873_v63 = vpop.f32.mrf.mxu1  ;;  %v15553_v27 = vcombine.high %v15543_v47, %v15547_v1  ;;  %v15552_v34 = vcombine.low %v15543_v47, %v15547_v1  ;;  %v15531_v1 = vld [vmem:[%s17965_s28 + $0x42] sm:$0x3] }
 0x827   : > { %v15502_v50 = vmul.f32 -1.442695, %v4515_v17  ;;  %v18901_v2 = vld [vmem:[%s17970_s7 + $0x210] sm:$0xff] }
 0x828   : > { %v18904_v63 = vld [vmem:[%s17970_s7 + $0x230] sm:$0x11]  ;;  %v5139_v17 = vsel %vm996_vm4, %v15552_v34, 0 }
 0x829   : > { %17486 = vpow2.f32 %v15502_v50  ;;  %v15555_v4 = vcombine.high %v18901_v2, %v18904_v63  ;;  %v18914_v50 = vld [vmem:[%s17970_s7 + $0x238] sm:$0x11] }
 0x82a   : > { %17488 = vtanh.f32 %v4441_v38  ;;  %v15557_v38 = vcombine.high %v18907_v23, %v18914_v50 }
 0x831   : > { %v17483_v29 = vpop.eup %17482 }
 0x832   : > { %v17485_v54 = vpop.eup %17484  ;;  %v4287_v56 = vadd.f32 1.0, %v17483_v29  ;;  %v15554_v29 = vcombine.low %v18901_v2, %v18904_v63  ;;  %v19009_v2 = vld [vmem:[%s17970_s7 + $0x250] sm:$0xff] }
 0x833   : > { %v4366_v7 = vadd.f32 1.0, %v17485_v54  ;;  %v15556_v54 = vcombine.low %v18907_v23, %v18914_v50  ;;  %v19012_v63 = vld [vmem:[%s17970_s7 + $0x270] sm:$0x11]  ;;  %v19015_v23 = vld [vmem:[%s17970_s7 + $0x258] sm:$0xff] }
 0x834   : > { %17490 = vrcp.f32 %v4287_v56 }
 0x835   : > { %17492 = vrcp.f32 %v4366_v7 }
 0x836   : > { %v17487_v60 = vpop.eup %17486 }
 0x837   : > { %v17489_v45 = vpop.eup %17488  ;;  %v4519_v48 = vadd.f32 1.0, %v17487_v60 }
 0x839   : > { %17494 = vrcp.f32 %v4519_v48 }
 0x841   : > { %v17491_v13 = vpop.eup %17490 }
 0x842   : > { %v17493_v18 = vpop.eup %17492  ;;  %v4523_v43 = vmul.f32 %v17491_v13, %v17489_v45 }
 0x843   : > { %v4522_v42 = vmul.f32 %v17493_v18, %v18735_v25  ;;  %v15542_v25 = vld [vmem:[%s17970_s7 + $0x200] sm:$0xff] }
 0x844   : > { %v15551_v51 = vcombine.high %v15542_v25, %v15546_v39  ;;  %v15550_v62 = vcombine.low %v15542_v25, %v15546_v39 }
 0x845   : > { %v18843_v52 = vadd.f32 %v4523_v43, %v4522_v42 }
 0x846   : > { %v17495_v59 = vpop.eup %17494  ;;  %v5133_v58 = vsel %vm996_vm4, %v15550_v62, 0 }
 0x847   : > { %17496 = vtanh.f32 %v18843_v52 }
 0x854   : > { %v17497_v22 = vpop.eup %17496 }
 0x855   : > { %v4526_v12 = vmul.f32 %v17497_v22, %v17495_v59 }
 0x857   : > { %v4527_v0 = vpack.c.bf16 %v4526_v12, %v4526_v12 }
 0x859   : > { %15520 = vmatmul.mubr.msk.bf16.vlgmr.msra.gmra.mxu0 %vm292_vm2, %v4527_v0  ;;  %15522 = vmatmul.mubr.msk.bf16.vlgmr.msra.gmra.mxu1 %vm292_vm2, %v4527_v0 }
 0x85a   : > { %4693 = vmatpush1.bf16.msra.mxu0 %v4585_v5  ;;  %4734 = vmatpush1.bf16.msra.mxu1 %v4591_v14 }
 0x85b   : > { %4710 = vmatprep.mubr.bf16.mxu0 %v21134_v61  ;;  %4751 = vmatprep.mubr.bf16.mxu1 %v21134_v61 }
 0x85c   : > { %16874 = vmatprep.subr.mxu0 %v21132_v3  ;;  %16881 = vmatprep.subr.mxu1 %v21132_v3 }
 0x861   : > { %15524 = vmatmul.mubr.msk.bf16.vlgmr.msra.gmra.mxu0 %vm292_vm2, %v4527_v0  ;;  %15526 = vmatmul.mubr.msk.bf16.vlgmr.msra.gmra.mxu1 %vm292_vm2, %v4527_v0 }
 0x862   : > { %16875 = vmatpush3.msk.msra.mxu0 %vm296_vm1, %v18501_v35  ;;  %16882 = vmatpush3.msk.msra.mxu1 %vm296_vm1, %v18508_v19 }
 0x863   : > { %16876 = vmatprep.subr.mxu0 %v21132_v3  ;;  %16883 = vmatprep.subr.mxu1 %v21132_v3 }
 0x864   : > { %16877 = vmatpush3.msra.mxu0 %v18517_v20  ;;  %16884 = vmatpush3.msra.mxu1 %v18523_v21 }
 0x865   : > { %16878 = vmatprep.mubr.msk.f32.mxu0 %vm17912_vm3, %v21132_v3  ;;  %16885 = vmatprep.mubr.msk.f32.mxu1 %vm17912_vm3, %v21132_v3 }
 0x866   : > { %16888 = vmatprep.subr.mxu0 %v21132_v3  ;;  %16895 = vmatprep.subr.mxu1 %v21132_v3 }
 0x869   : > { %16879 = vmatmul.mubr.msk.f32.vlgmr.msra.gmra.mxu0 %vm292_vm2, %v4526_v12  ;;  %16886 = vmatmul.mubr.msk.f32.vlgmr.msra.gmra.mxu1 %vm292_vm2, %v4526_v12 }
 0x86a   : > { %16889 = vmatpush3.msk.msra.mxu0 %vm296_vm1, %v18537_v33  ;;  %16896 = vmatpush3.msk.msra.mxu1 %vm296_vm1, %v18544_v15 }
 0x86b   : > { %16890 = vmatprep.subr.mxu0 %v21132_v3  ;;  %16897 = vmatprep.subr.mxu1 %v21132_v3 }
 0x86c   : > { %16891 = vmatpush3.msra.mxu0 %v18553_v16  ;;  %16892 = vmatprep.mubr.msk.f32.mxu0 %vm17912_vm3, %v21132_v3 }
 0x86d   : > { %16898 = vmatpush3.msra.mxu1 %v18561_v37  ;;  %16899 = vmatprep.mubr.msk.f32.mxu1 %vm17912_vm3, %v21132_v3 }
 0x86e   : > { %16893 = vmatmul.mubr.msk.f32.vlgmr.msra.gmra.mxu0 %vm292_vm2, %v4526_v12  ;;  %16900 = vmatmul.mubr.msk.f32.vlgmr.msra.gmra.mxu1 %vm292_vm2, %v4526_v12 }
 0x86f   : > { %5188 = vmatprep.mubr.bf16.mxu0 %v21134_v61  ;;  %5229 = vmatprep.mubr.bf16.mxu1 %v21134_v61 }
 0x870   : > { %15558 = vmatprep.subr.msk.bf16.mxu0 %vm996_vm4, %v15551_v51  ;;  %15560 = vmatprep.subr.msk.bf16.mxu1 %vm996_vm4, %v15553_v27  ;;  %v15527_v51 = vld [vmem:[%s17965_s28 + $0x40] sm:$0x3] }
 0x871   : > { %5171 = vmatpush1.bf16.msra.mxu0 %v5133_v58  ;;  %5212 = vmatpush1.bf16.msra.mxu1 %v5139_v17 }
 0x872   : > { %15562 = vmatprep.subr.msk.bf16.mxu0 %vm996_vm4, %v15555_v4  ;;  %15564 = vmatprep.subr.msk.bf16.mxu1 %vm996_vm4, %v15557_v38 }
 0x919   : > { %v4630_v56 = vpop.f32.mrf.mxu0  ;;  %v4671_v7 = vpop.f32.mrf.mxu1 }
 0x91a   : > { %v18925_v60 = vadd.f32 %v4630_v56, %v18817_v31  ;;  %v18928_v45 = vadd.f32 %v4671_v7, %v18820_v30 }
 0x91b   : > { %v4632_v13 = vpop.f32.mrf.mxu0  ;;  %v4673_v18 = vpop.f32.mrf.mxu1 }
 0x91c   : > { %v18931_v43 = vadd.f32 %v4632_v13, %v18823_v41  ;;  %v18934_v48 = vadd.f32 %v4673_v18, %v18826_v10  ;;  %v15538_v18 = vld [vmem:[%s17965_s28 + $0x46] sm:$0x3] }
 0x91d   : > { %v4634_v42 = vpop.f32.mrf.mxu0  ;;  %v4675_v59 = vpop.f32.mrf.mxu1 }
 0x91e   : > { %v15535_v59 = vld [vmem:[%s17965_s28 + $0x44] sm:$0x3] }
 0x91f   : > { %v4635_v22 = vpop.f32.mrf.mxu0  ;;  %v4676_v12 = vpop.f32.mrf.mxu1 }
 0x921   : > { %v4712_v0 = vpop.f32.mrf.mxu0  ;;  %v4753_v31 = vpop.f32.mrf.mxu1 }
 0x922   : > { %v18937_v5 = vadd.f32 %v4712_v0, %v18829_v53  ;;  %v18940_v30 = vadd.f32 %v4753_v31, %v18832_v8 }
 0x923   : > { %v18942_v14 = vpop.f32.mrf.mxu0  ;;  %v18944_v41 = vpop.f32.mrf.mxu1 }
 0x925   : > { %v4716_v25 = vpop.f32.mrf.mxu0  ;;  %v4757_v10 = vpop.f32.mrf.mxu1 }
 0x927   : > { %v4717_v39 = vpop.f32.mrf.mxu0  ;;  %v4758_v47 = vpop.f32.mrf.mxu1 }
 0x929   : > { %v4839_v62 = vpop.f32.mrf.mxu0  ;;  %v4918_v27 = vpop.f32.mrf.mxu1 }
 0x92a   : > { %v4843_v34 = vadd.f32 %v15527_v51, %v4839_v62  ;;  %v4922_v53 = vadd.f32 %v15531_v1, %v4918_v27 }
 0x92b   : > { %v16880_v58 = vpop.f32.mrf.mxu0  ;;  %v16887_v17 = vpop.f32.mrf.mxu1 }
 0x92c   : > { %v15530_v8 = vmul.f32 -1.442695, %v4843_v34  ;;  %v15534_v4 = vmul.f32 -1.442695, %v4922_v53 }
 0x92e   : > { %17498 = vpow2.f32 %v15530_v8  ;;  %v4997_v38 = vpop.f32.mrf.mxu0  ;;  %v5071_v56 = vpop.f32.mrf.mxu1 }
 0x92f   : > { %17500 = vpow2.f32 %v15534_v4  ;;  %v5075_v42 = vadd.f32 %v15538_v18, %v5071_v56  ;;  %v5001_v12 = vadd.f32 %v15535_v59, %v4997_v38  ;;  %v5145_v38 = vsel %vm996_vm4, %v15554_v29, 0 }
 0x930   : > { %v16894_v7 = vpop.f32.mrf.mxu0  ;;  %v16901_v13 = vpop.f32.mrf.mxu1  ;;  %v5151_v56 = vsel %vm996_vm4, %v15556_v54, 0  ;;  %v15594_v29 = vcombine.high %v19009_v2, %v19012_v63  ;;  %v19022_v54 = vld [vmem:[%s17970_s7 + $0x278] sm:$0x11] }
 0x931   : > { %v15541_v22 = vmul.f32 -1.442695, %v5075_v42  ;;  %v15596_v7 = vcombine.high %v19015_v23, %v19022_v54  ;;  %v15593_v13 = vcombine.low %v19009_v2, %v19012_v63  ;;  %v15595_v18 = vcombine.low %v19015_v23, %v19022_v54  ;;  %v19088_v2 = vld [vmem:[%s21126_s1 + $0x18] sm:$0x3]  ;;  %v19097_v63 = vld [vmem:[%s21126_s1] sm:$0xff]  ;;  %v19103_v23 = vld [vmem:[%s21126_s1 + $0x10] sm:$0xff] }
 0x932   : > { %v19117_v54 = vld [vmem:[%s21126_s1 + $0x28] sm:$0x3] }
 0x933   : > { %17502 = vpow2.f32 %v15541_v22 }
 0x934   : > { %17504 = vtanh.f32 %v5001_v12 }
 0x93b   : > { %v17499_v0 = vpop.eup %17498 }
 0x93c   : > { %v17501_v31 = vpop.eup %17500  ;;  %v4847_v25 = vadd.f32 1.0, %v17499_v0 }
 0x93d   : > { %v4926_v10 = vadd.f32 1.0, %v17501_v31 }
 0x93e   : > { %17506 = vrcp.f32 %v4847_v25 }
 0x93f   : > { %17508 = vrcp.f32 %v4926_v10 }
 0x940   : > { %v17503_v39 = vpop.eup %17502 }
 0x941   : > { %v17505_v47 = vpop.eup %17504  ;;  %v5079_v27 = vadd.f32 1.0, %v17503_v39 }
 0x943   : > { %17510 = vrcp.f32 %v5079_v27 }
 0x94b   : > { %v17507_v51 = vpop.eup %17506 }
 0x94c   : > { %v17509_v1 = vpop.eup %17508  ;;  %v5083_v62 = vmul.f32 %v17507_v51, %v17505_v47 }
 0x94d   : > { %v5082_v34 = vmul.f32 %v17509_v1, %v18843_v52 }
 0x94f   : > { %v18951_v53 = vadd.f32 %v5083_v62, %v5082_v34 }
 0x950   : > { %v17511_v58 = vpop.eup %17510 }
 0x951   : > { %17512 = vtanh.f32 %v18951_v53 }
 0x95e   : > { %v17513_v17 = vpop.eup %17512 }
 0x95f   : > { %v5086_v8 = vmul.f32 %v17513_v17, %v17511_v58 }
 0x961   : > { %v5087_v4 = vpack.c.bf16 %v5086_v8, %v5086_v8 }
 0x963   : > { %15559 = vmatmul.mubr.msk.bf16.vlgmr.msra.gmra.mxu0 %vm292_vm2, %v5087_v4  ;;  %15561 = vmatmul.mubr.msk.bf16.vlgmr.msra.gmra.mxu1 %vm292_vm2, %v5087_v4 }
 0x964   : > { %5253 = vmatpush1.bf16.msra.mxu0 %v5145_v38  ;;  %5294 = vmatpush1.bf16.msra.mxu1 %v5151_v56  ;;  %v15570_v38 = vld [vmem:[%s17965_s28 + $0x4a] sm:$0x3] }
 0x965   : > { %5270 = vmatprep.mubr.bf16.mxu0 %v21134_v61  ;;  %5311 = vmatprep.mubr.bf16.mxu1 %v21134_v61 }
 0x966   : > { %16902 = vmatprep.subr.mxu0 %v21132_v3  ;;  %16909 = vmatprep.subr.mxu1 %v21132_v3 }
 0x96b   : > { %15563 = vmatmul.mubr.msk.bf16.vlgmr.msra.gmra.mxu0 %vm292_vm2, %v5087_v4  ;;  %15565 = vmatmul.mubr.msk.bf16.vlgmr.msra.gmra.mxu1 %vm292_vm2, %v5087_v4  ;;  %v15566_v4 = vld [vmem:[%s17965_s28 + $0x48] sm:$0x3] }
 0x96c   : > { %16903 = vmatpush3.msk.msra.mxu0 %vm296_vm1, %v18501_v35  ;;  %16910 = vmatpush3.msk.msra.mxu1 %vm296_vm1, %v18508_v19  ;;  %v15581_v35 = vld [vmem:[%s17970_s7 + $0x240] sm:$0xff] }
 0x96d   : > { %16904 = vmatprep.subr.mxu0 %v21132_v3  ;;  %16911 = vmatprep.subr.mxu1 %v21132_v3  ;;  %v15585_v19 = vld [vmem:[%s17970_s7 + $0x260] sm:$0x11] }
 0x96e   : > { %16905 = vmatpush3.msra.mxu0 %v18517_v20  ;;  %16912 = vmatpush3.msra.mxu1 %v18523_v21  ;;  %v15582_v20 = vld [vmem:[%s17970_s7 + $0x248] sm:$0xff]  ;;  %v15590_v21 = vcombine.high %v15581_v35, %v15585_v19 }
 0x96f   : > { %16906 = vmatprep.mubr.msk.f32.mxu0 %vm17912_vm3, %v21132_v3  ;;  %16913 = vmatprep.mubr.msk.f32.mxu1 %vm17912_vm3, %v21132_v3 }
 0x970   : > { %16916 = vmatprep.subr.mxu0 %v21132_v3  ;;  %16923 = vmatprep.subr.mxu1 %v21132_v3 }
 0x973   : > { %16907 = vmatmul.mubr.msk.f32.vlgmr.msra.gmra.mxu0 %vm292_vm2, %v5086_v8  ;;  %16914 = vmatmul.mubr.msk.f32.vlgmr.msra.gmra.mxu1 %vm292_vm2, %v5086_v8 }
 0x974   : > { %16917 = vmatpush3.msk.msra.mxu0 %vm296_vm1, %v18537_v33  ;;  %16924 = vmatpush3.msk.msra.mxu1 %vm296_vm1, %v18544_v15  ;;  %v15586_v33 = vld [vmem:[%s17970_s7 + $0x268] sm:$0x11]  ;;  %v15589_v15 = vcombine.low %v15581_v35, %v15585_v19 }
 0x975   : > { %16918 = vmatprep.subr.mxu0 %v21132_v3  ;;  %16925 = vmatprep.subr.mxu1 %v21132_v3 }
 0x976   : > { %16919 = vmatpush3.msra.mxu0 %v18553_v16  ;;  %16920 = vmatprep.mubr.msk.f32.mxu0 %vm17912_vm3, %v21132_v3  ;;  %v15592_v16 = vcombine.high %v15582_v20, %v15586_v33  ;;  %v5693_v52 = vsel %vm996_vm4, %v15589_v15, 0 }
 0x977   : > { %16926 = vmatpush3.msra.mxu1 %v18561_v37  ;;  %16927 = vmatprep.mubr.msk.f32.mxu1 %vm17912_vm3, %v21132_v3  ;;  %v15591_v37 = vcombine.low %v15582_v20, %v15586_v33 }
 0x978   : > { %16921 = vmatmul.mubr.msk.f32.vlgmr.msra.gmra.mxu0 %vm292_vm2, %v5086_v8  ;;  %16928 = vmatmul.mubr.msk.f32.vlgmr.msra.gmra.mxu1 %vm292_vm2, %v5086_v8 }
 0x979   : > { %5748 = vmatprep.mubr.bf16.mxu0 %v21134_v61  ;;  %5789 = vmatprep.mubr.bf16.mxu1 %v21134_v61  ;;  %v5699_v50 = vsel %vm996_vm4, %v15591_v37, 0 }
 0x97a   : > { %15597 = vmatprep.subr.msk.bf16.mxu0 %vm996_vm4, %v15590_v21  ;;  %15599 = vmatprep.subr.msk.bf16.mxu1 %vm996_vm4, %v15592_v16 }
 0x97b   : > { %5731 = vmatpush1.bf16.msra.mxu0 %v5693_v52  ;;  %5772 = vmatpush1.bf16.msra.mxu1 %v5699_v50  ;;  %v15577_v50 = vld [vmem:[%s17965_s28 + $0x4e] sm:$0x3] }
 0x97c   : > { %15601 = vmatprep.subr.msk.bf16.mxu0 %vm996_vm4, %v15594_v29  ;;  %15603 = vmatprep.subr.msk.bf16.mxu1 %vm996_vm4, %v15596_v7  ;;  %v15574_v7 = vld [vmem:[%s17965_s28 + $0x4c] sm:$0x3] }
 0xa23   : > { %v5190_v42 = vpop.f32.mrf.mxu0  ;;  %v5231_v59 = vpop.f32.mrf.mxu1 }
 0xa24   : > { %v19033_v22 = vadd.f32 %v5190_v42, %v18925_v60  ;;  %v19036_v12 = vadd.f32 %v5231_v59, %v18928_v45 }
 0xa25   : > { %v5192_v0 = vpop.f32.mrf.mxu0  ;;  %v5233_v31 = vpop.f32.mrf.mxu1 }
 0xa26   : > { %v19039_v25 = vadd.f32 %v5192_v0, %v18931_v43  ;;  %v19042_v10 = vadd.f32 %v5233_v31, %v18934_v48 }
 0xa27   : > { %v5194_v39 = vpop.f32.mrf.mxu0  ;;  %v5235_v47 = vpop.f32.mrf.mxu1 }
 0xa29   : > { %v5195_v51 = vpop.f32.mrf.mxu0  ;;  %v5236_v1 = vpop.f32.mrf.mxu1 }
 0xa2b   : > { %v5272_v62 = vpop.f32.mrf.mxu0  ;;  %v5313_v60 = vpop.f32.mrf.mxu1 }
 0xa2c   : > { %v19045_v27 = vadd.f32 %v5272_v62, %v18937_v5  ;;  %v19048_v45 = vadd.f32 %v5313_v60, %v18940_v30 }
 0xa2d   : > { %v19050_v34 = vpop.f32.mrf.mxu0  ;;  %v19052_v43 = vpop.f32.mrf.mxu1 }
 0xa2f   : > { %v5276_v58 = vpop.f32.mrf.mxu0  ;;  %v5317_v48 = vpop.f32.mrf.mxu1 }
 0xa31   : > { %v5277_v17 = vpop.f32.mrf.mxu0  ;;  %v5318_v8 = vpop.f32.mrf.mxu1 }
 0xa33   : > { %v5399_v56 = vpop.f32.mrf.mxu0  ;;  %v5478_v35 = vpop.f32.mrf.mxu1 }
 0xa34   : > { %v5403_v19 = vadd.f32 %v15566_v4, %v5399_v56  ;;  %v5482_v5 = vadd.f32 %v15570_v38, %v5478_v35 }
 0xa35   : > { %v16908_v20 = vpop.f32.mrf.mxu0  ;;  %v16915_v21 = vpop.f32.mrf.mxu1 }
 0xa36   : > { %v15569_v30 = vmul.f32 -1.442695, %v5403_v19  ;;  %v15573_v33 = vmul.f32 -1.442695, %v5482_v5  ;;  %v5705_v19 = vsel %vm996_vm4, %v15593_v13, 0  ;;  %v5711_v5 = vsel %vm996_vm4, %v15595_v18, 0 }
 0xa37   : > { %v19124_v13 = vld [vmem:[%s21126_s1 + $0x38] sm:$0x3]  ;;  %v19133_v18 = vld [vmem:[%s21126_s1 + $0x20] sm:$0xff]  ;;  %v19141_v20 = vld [vmem:[%s21126_s1 + $0x30] sm:$0xff] }
 0xa38   : > { %17514 = vpow2.f32 %v15569_v30  ;;  %v5557_v15 = vpop.f32.mrf.mxu0  ;;  %v5631_v16 = vpop.f32.mrf.mxu1  ;;  %v15620_v21 = vld [vmem:[%s17970_s7 + $0x280] sm:$0xff] }
 0xa39   : > { %17516 = vpow2.f32 %v15573_v33  ;;  %v5635_v29 = vadd.f32 %v15577_v50, %v5631_v16  ;;  %v5561_v59 = vadd.f32 %v15574_v7, %v5557_v15  ;;  %v15624_v30 = vld [vmem:[%s17970_s7 + $0x2a0] sm:$0x11]  ;;  %v15621_v33 = vld [vmem:[%s17970_s7 + $0x288] sm:$0xff]  ;;  %v19157_v7 = vld [vmem:[%s17970_s7 + $0x290] sm:$0xff] }
 0xa3a   : > { %v16922_v37 = vpop.f32.mrf.mxu0  ;;  %v16929_v52 = vpop.f32.mrf.mxu1  ;;  %v15629_v15 = vcombine.high %v15620_v21, %v15624_v30  ;;  %v15625_v16 = vld [vmem:[%s17970_s7 + $0x2a8] sm:$0x11] }
 0xa3b   : > { %v15580_v42 = vmul.f32 -1.442695, %v5635_v29  ;;  %v15628_v37 = vcombine.low %v15620_v21, %v15624_v30  ;;  %v15631_v52 = vcombine.high %v15621_v33, %v15625_v16  ;;  %v15630_v50 = vcombine.low %v15621_v33, %v15625_v16 }
 0xa3d   : > { %17518 = vpow2.f32 %v15580_v42  ;;  %v6253_v29 = vsel %vm996_vm4, %v15628_v37, 0  ;;  %v19160_v42 = vld [vmem:[%s17970_s7 + $0x2b0] sm:$0x11] }
 0xa3e   : > { %17520 = vtanh.f32 %v5561_v59  ;;  %v19163_v59 = vld [vmem:[%s17970_s7 + $0x298] sm:$0xff] }
 0xa45   : > { %v17515_v0 = vpop.eup %17514 }
 0xa46   : > { %v17517_v31 = vpop.eup %17516  ;;  %v5407_v39 = vadd.f32 1.0, %v17515_v0  ;;  %v6259_v0 = vsel %vm996_vm4, %v15630_v50, 0  ;;  %v15605_v50 = vld [vmem:[%s17965_s28 + $0x50] sm:$0x3] }
 0xa47   : > { %v5486_v47 = vadd.f32 1.0, %v17517_v31  ;;  %v15633_v31 = vcombine.high %v19157_v7, %v19160_v42 }
 0xa48   : > { %17522 = vrcp.f32 %v5407_v39  ;;  %v19170_v39 = vld [vmem:[%s17970_s7 + $0x2b8] sm:$0x11] }
 0xa49   : > { %17524 = vrcp.f32 %v5486_v47  ;;  %v15635_v47 = vcombine.high %v19163_v59, %v19170_v39 }
 0xa4a   : > { %v17519_v51 = vpop.eup %17518 }
 0xa4b   : > { %v17521_v1 = vpop.eup %17520  ;;  %v5639_v48 = vadd.f32 1.0, %v17519_v51  ;;  %v15632_v51 = vcombine.low %v19157_v7, %v19160_v42  ;;  %v15659_v7 = vld [vmem:[%s17970_s7 + $0x2c0] sm:$0xff] }
 0xa4c   : > { %v15663_v42 = vld [vmem:[%s17970_s7 + $0x2e0] sm:$0x11] }
 0xa4d   : > { %17526 = vrcp.f32 %v5639_v48 }
 0xa55   : > { %v17523_v62 = vpop.eup %17522 }
 0xa56   : > { %v17525_v60 = vpop.eup %17524  ;;  %v5643_v58 = vmul.f32 %v17523_v62, %v17521_v1  ;;  %v15634_v1 = vcombine.low %v19163_v59, %v19170_v39  ;;  %v15660_v59 = vld [vmem:[%s17970_s7 + $0x2c8] sm:$0xff]  ;;  %v15668_v39 = vcombine.high %v15659_v7, %v15663_v42 }
 0xa57   : > { %v5642_v17 = vmul.f32 %v17525_v60, %v18951_v53  ;;  %v19081_v53 = vld [vmem:[%s21126_s1 + $0x8] sm:$0x3] }
 0xa59   : > { %v19059_v8 = vadd.f32 %v5643_v58, %v5642_v17 }
 0xa5a   : > { %v17527_v4 = vpop.eup %17526 }
 0xa5b   : > { %17528 = vtanh.f32 %v19059_v8 }
 0xa68   : > { %v17529_v38 = vpop.eup %17528 }
 0xa69   : > { %v5646_v56 = vmul.f32 %v17529_v38, %v17527_v4 }
 0xa6b   : > { %v5647_v35 = vpack.c.bf16 %v5646_v56, %v5646_v56 }
 0xa6d   : > { %15598 = vmatmul.mubr.msk.bf16.vlgmr.msra.gmra.mxu0 %vm292_vm2, %v5647_v35  ;;  %15600 = vmatmul.mubr.msk.bf16.vlgmr.msra.gmra.mxu1 %vm292_vm2, %v5647_v35 }
 0xa6e   : > { %5813 = vmatpush1.bf16.msra.mxu0 %v5705_v19  ;;  %5854 = vmatpush1.bf16.msra.mxu1 %v5711_v5 }
 0xa6f   : > { %5830 = vmatprep.mubr.bf16.mxu0 %v21134_v61  ;;  %5871 = vmatprep.mubr.bf16.mxu1 %v21134_v61 }
 0xa70   : > { %16930 = vmatprep.subr.mxu0 %v21132_v3  ;;  %16937 = vmatprep.subr.mxu1 %v21132_v3 }
 0xa75   : > { %15602 = vmatmul.mubr.msk.bf16.vlgmr.msra.gmra.mxu0 %vm292_vm2, %v5647_v35  ;;  %15604 = vmatmul.mubr.msk.bf16.vlgmr.msra.gmra.mxu1 %vm292_vm2, %v5647_v35 }
 0xa76   : > { %16931 = vmatpush3.msk.msra.mxu0 %vm296_vm1, %v19081_v53  ;;  %16938 = vmatpush3.msk.msra.mxu1 %vm296_vm1, %v19088_v2 }
 0xa77   : > { %16932 = vmatprep.subr.mxu0 %v21132_v3  ;;  %16939 = vmatprep.subr.mxu1 %v21132_v3 }
 0xa78   : > { %16933 = vmatpush3.msra.mxu0 %v19097_v63  ;;  %16940 = vmatpush3.msra.mxu1 %v19103_v23 }
 0xa79   : > { %16934 = vmatprep.mubr.msk.f32.mxu0 %vm17912_vm3, %v21132_v3  ;;  %16941 = vmatprep.mubr.msk.f32.mxu1 %vm17912_vm3, %v21132_v3 }
 0xa7a   : > { %16944 = vmatprep.subr.mxu0 %v21132_v3  ;;  %16951 = vmatprep.subr.mxu1 %v21132_v3 }
 0xa7d   : > { %16935 = vmatmul.mubr.msk.f32.vlgmr.msra.gmra.mxu0 %vm292_vm2, %v5646_v56  ;;  %16942 = vmatmul.mubr.msk.f32.vlgmr.msra.gmra.mxu1 %vm292_vm2, %v5646_v56 }
 0xa7e   : > { %16945 = vmatpush3.msk.msra.mxu0 %vm296_vm1, %v19117_v54  ;;  %16952 = vmatpush3.msk.msra.mxu1 %vm296_vm1, %v19124_v13 }
 0xa7f   : > { %16946 = vmatprep.subr.mxu0 %v21132_v3  ;;  %16953 = vmatprep.subr.mxu1 %v21132_v3 }
 0xa80   : > { %16947 = vmatpush3.msra.mxu0 %v19133_v18  ;;  %16948 = vmatprep.mubr.msk.f32.mxu0 %vm17912_vm3, %v21132_v3 }
 0xa81   : > { %16954 = vmatpush3.msra.mxu1 %v19141_v20  ;;  %16955 = vmatprep.mubr.msk.f32.mxu1 %vm17912_vm3, %v21132_v3 }
 0xa82   : > { %16949 = vmatmul.mubr.msk.f32.vlgmr.msra.gmra.mxu0 %vm292_vm2, %v5646_v56  ;;  %16956 = vmatmul.mubr.msk.f32.vlgmr.msra.gmra.mxu1 %vm292_vm2, %v5646_v56 }
 0xa83   : > { %6308 = vmatprep.mubr.bf16.mxu0 %v21134_v61  ;;  %6349 = vmatprep.mubr.bf16.mxu1 %v21134_v61 }
 0xa84   : > { %15636 = vmatprep.subr.msk.bf16.mxu0 %vm996_vm4, %v15629_v15  ;;  %15638 = vmatprep.subr.msk.bf16.mxu1 %vm996_vm4, %v15631_v52 }
 0xa85   : > { %6291 = vmatpush1.bf16.msra.mxu0 %v6253_v29  ;;  %6332 = vmatpush1.bf16.msra.mxu1 %v6259_v0  ;;  %v15609_v29 = vld [vmem:[%s17965_s28 + $0x52] sm:$0x3] }
 0xa86   : > { %15640 = vmatprep.subr.msk.bf16.mxu0 %vm996_vm4, %v15633_v31  ;;  %15642 = vmatprep.subr.msk.bf16.mxu1 %vm996_vm4, %v15635_v47 }
 0xb2d   : > { %v5750_v62 = vpop.f32.mrf.mxu0  ;;  %v5791_v60 = vpop.f32.mrf.mxu1 }
 0xb2e   : > { %v19181_v58 = vadd.f32 %v5750_v62, %v19033_v22  ;;  %v19184_v48 = vadd.f32 %v5791_v60, %v19036_v12 }
 0xb2f   : > { %v5752_v17 = vpop.f32.mrf.mxu0  ;;  %v5793_v4 = vpop.f32.mrf.mxu1 }
 0xb30   : > { %v19187_v38 = vadd.f32 %v5752_v17, %v19039_v25  ;;  %v19190_v56 = vadd.f32 %v5793_v4, %v19042_v10 }
 0xb31   : > { %v5754_v35 = vpop.f32.mrf.mxu0  ;;  %v5795_v19 = vpop.f32.mrf.mxu1 }
 0xb33   : > { %v5755_v5 = vpop.f32.mrf.mxu0  ;;  %v5796_v21 = vpop.f32.mrf.mxu1 }
 0xb34   : > { %v15616_v21 = vld [vmem:[%s17965_s28 + $0x56] sm:$0x3] }
 0xb35   : > { %v5832_v30 = vpop.f32.mrf.mxu0  ;;  %v5873_v22 = vpop.f32.mrf.mxu1 }
 0xb36   : > { %v19193_v33 = vadd.f32 %v5832_v30, %v19045_v27  ;;  %v19196_v12 = vadd.f32 %v5873_v22, %v19048_v45  ;;  %v15613_v22 = vld [vmem:[%s17965_s28 + $0x54] sm:$0x3] }
 0xb37   : > { %v19198_v15 = vpop.f32.mrf.mxu0  ;;  %v19200_v25 = vpop.f32.mrf.mxu1 }
 0xb39   : > { %v5836_v16 = vpop.f32.mrf.mxu0  ;;  %v5877_v10 = vpop.f32.mrf.mxu1 }
 0xb3b   : > { %v5837_v37 = vpop.f32.mrf.mxu0  ;;  %v5878_v52 = vpop.f32.mrf.mxu1 }
 0xb3d   : > { %v5959_v0 = vpop.f32.mrf.mxu0  ;;  %v6038_v31 = vpop.f32.mrf.mxu1 }
 0xb3e   : > { %v5963_v47 = vadd.f32 %v15605_v50, %v5959_v0  ;;  %v6042_v27 = vadd.f32 %v15609_v29, %v6038_v31 }
 0xb3f   : > { %v16936_v62 = vpop.f32.mrf.mxu0  ;;  %v16943_v60 = vpop.f32.mrf.mxu1 }
 0xb40   : > { %v15608_v45 = vmul.f32 -1.442695, %v5963_v47  ;;  %v15612_v17 = vmul.f32 -1.442695, %v6042_v27 }
 0xb42   : > { %17530 = vpow2.f32 %v15608_v45  ;;  %v6117_v4 = vpop.f32.mrf.mxu0  ;;  %v6191_v35 = vpop.f32.mrf.mxu1 }
 0xb43   : > { %17532 = vpow2.f32 %v15612_v17  ;;  %v6195_v30 = vadd.f32 %v15616_v21, %v6191_v35  ;;  %v6121_v10 = vadd.f32 %v15613_v22, %v6117_v4 }
 0xb44   : > { %v16950_v19 = vpop.f32.mrf.mxu0  ;;  %v16957_v5 = vpop.f32.mrf.mxu1 }
 0xb45   : > { %v15619_v16 = vmul.f32 -1.442695, %v6195_v30  ;;  %v6271_v5 = vsel %vm996_vm4, %v15634_v1, 0  ;;  %v15667_v1 = vcombine.low %v15659_v7, %v15663_v42 }
 0xb47   : > { %17534 = vpow2.f32 %v15619_v16  ;;  %v6813_v22 = vsel %vm996_vm4, %v15667_v1, 0  ;;  %v19265_v16 = vld [vmem:[%s17970_s7 + $0x2d0] sm:$0xff] }
 0xb48   : > { %17536 = vtanh.f32 %v6121_v10  ;;  %v19268_v10 = vld [vmem:[%s17970_s7 + $0x2f0] sm:$0x11] }
 0xb4f   : > { %v17531_v37 = vpop.eup %17530 }
 0xb50   : > { %v17533_v52 = vpop.eup %17532  ;;  %v5967_v3 = vadd.f32 1.0, %v17531_v37  ;;  %v19271_v37 = vld [vmem:[%s17970_s7 + $0x2d8] sm:$0xff] }
 0xb51   : > { %v6046_v50 = vadd.f32 1.0, %v17533_v52 }
 0xb52   : > { %17538 = vrcp.f32 %v5967_v3  ;;  %v6265_v3 = vsel %vm996_vm4, %v15632_v51, 0  ;;  %v15664_v51 = vld [vmem:[%s17970_s7 + $0x2e8] sm:$0x11] }
 0xb53   : > { %17540 = vrcp.f32 %v6046_v50  ;;  %v15670_v21 = vcombine.high %v15660_v59, %v15664_v51  ;;  %v15669_v30 = vcombine.low %v15660_v59, %v15664_v51  ;;  %v15672_v50 = vcombine.high %v19265_v16, %v19268_v10 }
 0xb54   : > { %v17535_v29 = vpop.eup %17534 }
 0xb55   : > { %v17537_v0 = vpop.eup %17536  ;;  %v6199_v62 = vadd.f32 1.0, %v17535_v29  ;;  %v6819_v52 = vsel %vm996_vm4, %v15669_v30, 0  ;;  %v19278_v29 = vld [vmem:[%s17970_s7 + $0x2f8] sm:$0x11] }
 0xb57   : > { %17542 = vrcp.f32 %v6199_v62 }
 0xb5f   : > { %v17539_v31 = vpop.eup %17538 }
 0xb60   : > { %v17541_v47 = vpop.eup %17540  ;;  %v6203_v27 = vmul.f32 %v17539_v31, %v17537_v0  ;;  %v15674_v0 = vcombine.high %v19271_v37, %v19278_v29 }
 0xb61   : > { %v6202_v60 = vmul.f32 %v17541_v47, %v19059_v8  ;;  %v21136_v8 = vmov 0.0  }
 0xb63   : > { %v19207_v45 = vadd.f32 %v6203_v27, %v6202_v60 }
 0xb64   : > { %v17543_v17 = vpop.eup %17542 }
 0xb65   : > { %17544 = vtanh.f32 %v19207_v45 }
 0xb72   : > { %v17545_v4 = vpop.eup %17544 }
 0xb73   : > { %v6206_v35 = vmul.f32 %v17545_v4, %v17543_v17 }
 0xb75   : > { %v6207_v19 = vpack.c.bf16 %v6206_v35, %v6206_v35 }
 0xb77   : > { %15637 = vmatmul.mubr.msk.bf16.vlgmr.msra.gmra.mxu0 %vm292_vm2, %v6207_v19  ;;  %15639 = vmatmul.mubr.msk.bf16.vlgmr.msra.gmra.mxu1 %vm292_vm2, %v6207_v19 }
 0xb78   : > { %6373 = vmatpush1.bf16.msra.mxu0 %v6265_v3  ;;  %6414 = vmatpush1.bf16.msra.mxu1 %v6271_v5 }
 0xb79   : > { %6390 = vmatprep.mubr.bf16.mxu0 %v21134_v61  ;;  %6431 = vmatprep.mubr.bf16.mxu1 %v21134_v61 }
 0xb7a   : > { %16958 = vmatprep.subr.mxu0 %v21136_v8  ;;  %16965 = vmatprep.subr.mxu1 %v21136_v8 }
 0xb7f   : > { %15641 = vmatmul.mubr.msk.bf16.vlgmr.msra.gmra.mxu0 %vm292_vm2, %v6207_v19  ;;  %15643 = vmatmul.mubr.msk.bf16.vlgmr.msra.gmra.mxu1 %vm292_vm2, %v6207_v19 }
 0xb80   : > { %16959 = vmatpush3.msk.msra.mxu0 %vm296_vm1, %v19081_v53  ;;  %16966 = vmatpush3.msk.msra.mxu1 %vm296_vm1, %v19088_v2 }
 0xb81   : > { %16960 = vmatprep.subr.mxu0 %v21136_v8  ;;  %16967 = vmatprep.subr.mxu1 %v21136_v8 }
 0xb82   : > { %16961 = vmatpush3.msra.mxu0 %v19097_v63  ;;  %16968 = vmatpush3.msra.mxu1 %v19103_v23 }
 0xb83   : > { %16962 = vmatprep.mubr.msk.f32.mxu0 %vm17912_vm3, %v21136_v8  ;;  %16969 = vmatprep.mubr.msk.f32.mxu1 %vm17912_vm3, %v21136_v8 }
 0xb84   : > { %16972 = vmatprep.subr.mxu0 %v21136_v8  ;;  %16979 = vmatprep.subr.mxu1 %v21136_v8 }
 0xb87   : > { %16963 = vmatmul.mubr.msk.f32.vlgmr.msra.gmra.mxu0 %vm292_vm2, %v6206_v35  ;;  %16970 = vmatmul.mubr.msk.f32.vlgmr.msra.gmra.mxu1 %vm292_vm2, %v6206_v35 }
 0xb88   : > { %16973 = vmatpush3.msk.msra.mxu0 %vm296_vm1, %v19117_v54  ;;  %16980 = vmatpush3.msk.msra.mxu1 %vm296_vm1, %v19124_v13 }
 0xb89   : > { %16974 = vmatprep.subr.mxu0 %v21136_v8  ;;  %16981 = vmatprep.subr.mxu1 %v21136_v8 }
 0xb8a   : > { %16975 = vmatpush3.msra.mxu0 %v19133_v18  ;;  %16976 = vmatprep.mubr.msk.f32.mxu0 %vm17912_vm3, %v21136_v8 }
 0xb8b   : > { %16982 = vmatpush3.msra.mxu1 %v19141_v20  ;;  %16983 = vmatprep.mubr.msk.f32.mxu1 %vm17912_vm3, %v21136_v8 }
 0xb8c   : > { %16977 = vmatmul.mubr.msk.f32.vlgmr.msra.gmra.mxu0 %vm292_vm2, %v6206_v35  ;;  %16984 = vmatmul.mubr.msk.f32.vlgmr.msra.gmra.mxu1 %vm292_vm2, %v6206_v35 }
 0xb8d   : > { %6868 = vmatprep.mubr.bf16.mxu0 %v21134_v61  ;;  %6909 = vmatprep.mubr.bf16.mxu1 %v21134_v61 }
 0xb8e   : > { %15675 = vmatprep.subr.msk.bf16.mxu0 %vm996_vm4, %v15668_v39  ;;  %15677 = vmatprep.subr.msk.bf16.mxu1 %vm996_vm4, %v15670_v21 }
 0xb8f   : > { %6851 = vmatpush1.bf16.msra.mxu0 %v6813_v22  ;;  %6892 = vmatpush1.bf16.msra.mxu1 %v6819_v52  ;;  %v15644_v52 = vld [vmem:[%s17965_s28 + $0x58] sm:$0x3] }
 0xb90   : > { %15679 = vmatprep.subr.msk.bf16.mxu0 %vm996_vm4, %v15672_v50  ;;  %15681 = vmatprep.subr.msk.bf16.mxu1 %vm996_vm4, %v15674_v0  ;;  %v15648_v50 = vld [vmem:[%s17965_s28 + $0x5a] sm:$0x3] }
 0xc37   : > { %v6310_v27 = vpop.f32.mrf.mxu0  ;;  %v6351_v62 = vpop.f32.mrf.mxu1 }
 0xc38   : > { %v19289_v60 = vadd.f32 %v6310_v27, %v19181_v58  ;;  %v19292_v17 = vadd.f32 %v6351_v62, %v19184_v48 }
 0xc39   : > { %v6312_v4 = vpop.f32.mrf.mxu0  ;;  %v6353_v35 = vpop.f32.mrf.mxu1 }
 0xc3a   : > { %v19295_v19 = vadd.f32 %v6312_v4, %v19187_v38  ;;  %v19298_v3 = vadd.f32 %v6353_v35, %v19190_v56 }
 0xc3b   : > { %v6314_v5 = vpop.f32.mrf.mxu0  ;;  %v6355_v7 = vpop.f32.mrf.mxu1 }
 0xc3d   : > { %v6315_v42 = vpop.f32.mrf.mxu0  ;;  %v6356_v59 = vpop.f32.mrf.mxu1 }
 0xc3f   : > { %v6392_v39 = vpop.f32.mrf.mxu0  ;;  %v6433_v58 = vpop.f32.mrf.mxu1 }
 0xc40   : > { %v19301_v51 = vadd.f32 %v6392_v39, %v19193_v33  ;;  %v19304_v48 = vadd.f32 %v6433_v58, %v19196_v12  ;;  %v15655_v58 = vld [vmem:[%s17965_s28 + $0x5e] sm:$0x3] }
 0xc41   : > { %v19306_v1 = vpop.f32.mrf.mxu0  ;;  %v19308_v38 = vpop.f32.mrf.mxu1 }
 0xc42   : > { %21137 = vst [vmem:[#allocation8_spill] sm:$0xff] %v19308_v38 }
 0xc43   : > { %v6396_v21 = vpop.f32.mrf.mxu0  ;;  %v6437_v56 = vpop.f32.mrf.mxu1 }
 0xc44   : > { %v15652_v56 = vld [vmem:[%s17965_s28 + $0x5c] sm:$0x3] }
 0xc45   : > { %v6397_v30 = vpop.f32.mrf.mxu0  ;;  %v6438_v22 = vpop.f32.mrf.mxu1 }
 0xc47   : > { %v6519_v0 = vpop.f32.mrf.mxu0  ;;  %v6598_v27 = vpop.f32.mrf.mxu1 }
 0xc48   : > { %v6523_v62 = vadd.f32 %v15644_v52, %v6519_v0  ;;  %v6602_v33 = vadd.f32 %v15648_v50, %v6598_v27 }
 0xc49   : > { %v16964_v4 = vpop.f32.mrf.mxu0  ;;  %v16971_v35 = vpop.f32.mrf.mxu1 }
 0xc4a   : > { %v15647_v12 = vmul.f32 -1.442695, %v6523_v62  ;;  %v15651_v5 = vmul.f32 -1.442695, %v6602_v33 }
 0xc4c   : > { %17546 = vpow2.f32 %v15647_v12  ;;  %v6677_v7 = vpop.f32.mrf.mxu0  ;;  %v6751_v42 = vpop.f32.mrf.mxu1 }
 0xc4d   : > { %17548 = vpow2.f32 %v15651_v5  ;;  %v6755_v21 = vadd.f32 %v15655_v58, %v6751_v42  ;;  %v6681_v22 = vadd.f32 %v15652_v56, %v6677_v7  ;;  %v15703_v58 = vld [vmem:[%s17970_s7 + $0x328] sm:$0x11] }
 0xc4e   : > { %v16978_v59 = vpop.f32.mrf.mxu0  ;;  %v16985_v39 = vpop.f32.mrf.mxu1 }
 0xc4f   : > { %v15658_v30 = vmul.f32 -1.442695, %v6755_v21  ;;  %v21139_v59 = vcombine.low %v19271_v37, %v19278_v29  ;;  %v15699_v37 = vld [vmem:[%s17970_s7 + $0x308] sm:$0xff] }
 0xc50   : > { %v15709_v56 = vcombine.high %v15699_v37, %v15703_v58 }
 0xc51   : > { %17550 = vpow2.f32 %v15658_v30  ;;  %v6831_v39 = vsel %vm996_vm4, %v21139_v59, 0  ;;  %v15708_v30 = vcombine.low %v15699_v37, %v15703_v58 }
 0xc52   : > { %17552 = vtanh.f32 %v6681_v22 }
 0xc59   : > { %v17547_v61 = vpop.eup %17546 }
 0xc5a   : > { %v17549_v47 = vpop.eup %17548  ;;  %v6527_v31 = vadd.f32 1.0, %v17547_v61 }
 0xc5b   : > { %v6606_v52 = vadd.f32 1.0, %v17549_v47 }
 0xc5c   : > { %17554 = vrcp.f32 %v6527_v31  ;;  %v21138_v31 = vcombine.low %v19265_v16, %v19268_v10  ;;  %v15698_v16 = vld [vmem:[%s17970_s7 + $0x300] sm:$0xff] }
 0xc5d   : > { %17556 = vrcp.f32 %v6606_v52  ;;  %v15702_v10 = vld [vmem:[%s17970_s7 + $0x320] sm:$0x11]  ;;  %v19373_v52 = vld [vmem:[%s17970_s7 + $0x310] sm:$0xff] }
 0xc5e   : > { %v17551_v50 = vpop.eup %17550  ;;  %v6825_v42 = vsel %vm996_vm4, %v21138_v31, 0  ;;  %v15707_v29 = vcombine.high %v15698_v16, %v15702_v10  ;;  %v15706_v21 = vcombine.low %v15698_v16, %v15702_v10 }
 0xc5f   : > { %v17553_v0 = vpop.eup %17552  ;;  %v6759_v4 = vadd.f32 1.0, %v17551_v50  ;;  %v19376_v50 = vld [vmem:[%s17970_s7 + $0x330] sm:$0x11] }
 0xc60   : > { %v7373_v22 = vsel %vm996_vm4, %v15706_v21, 0 }
 0xc61   : > { %17558 = vrcp.f32 %v6759_v4 }
 0xc69   : > { %v17555_v27 = vpop.eup %17554 }
 0xc6a   : > { %v17557_v62 = vpop.eup %17556  ;;  %v6763_v33 = vmul.f32 %v17555_v27, %v17553_v0  ;;  %v19379_v0 = vld [vmem:[%s17970_s7 + $0x318] sm:$0xff]  ;;  %v7379_v27 = vsel %vm996_vm4, %v15708_v30, 0 }
 0xc6b   : > { %v6762_v35 = vmul.f32 %v17557_v62, %v19207_v45  ;;  %v21140_v45 = vmov 0   ;;  %v15711_v62 = vcombine.high %v19373_v52, %v19376_v50 }
 0xc6d   : > { %v19315_v12 = vadd.f32 %v6763_v33, %v6762_v35  ;;  %v19386_v33 = vld [vmem:[%s17970_s7 + $0x338] sm:$0x11] }
 0xc6e   : > { %v17559_v5 = vpop.eup %17558  ;;  %v15713_v4 = vcombine.high %v19379_v0, %v19386_v33 }
 0xc6f   : > { %17560 = vtanh.f32 %v19315_v12 }
 0xc7c   : > { %v17561_v61 = vpop.eup %17560 }
 0xc7d   : > { %v6766_v7 = vmul.f32 %v17561_v61, %v17559_v5 }
 0xc7f   : > { %v6767_v47 = vpack.c.bf16 %v6766_v7, %v6766_v7 }
 0xc81   : > { %15676 = vmatmul.mubr.msk.bf16.vlgmr.msra.gmra.mxu0 %vm292_vm2, %v6767_v47  ;;  %15678 = vmatmul.mubr.msk.bf16.vlgmr.msra.gmra.mxu1 %vm292_vm2, %v6767_v47 }
 0xc82   : > { %6933 = vmatpush1.bf16.msra.mxu0 %v6825_v42  ;;  %6974 = vmatpush1.bf16.msra.mxu1 %v6831_v39 }
 0xc83   : > { %6950 = vmatprep.mubr.bf16.mxu0 %v21140_v45  ;;  %6991 = vmatprep.mubr.bf16.mxu1 %v21140_v45 }
 0xc84   : > { %16986 = vmatprep.subr.mxu0 %v21136_v8  ;;  %16993 = vmatprep.subr.mxu1 %v21136_v8 }
 0xc89   : > { %15680 = vmatmul.mubr.msk.bf16.vlgmr.msra.gmra.mxu0 %vm292_vm2, %v6767_v47  ;;  %15682 = vmatmul.mubr.msk.bf16.vlgmr.msra.gmra.mxu1 %vm292_vm2, %v6767_v47 }
 0xc8a   : > { %16987 = vmatpush3.msk.msra.mxu0 %vm296_vm1, %v19081_v53  ;;  %16994 = vmatpush3.msk.msra.mxu1 %vm296_vm1, %v19088_v2 }
 0xc8b   : > { %16988 = vmatprep.subr.mxu0 %v21136_v8  ;;  %16995 = vmatprep.subr.mxu1 %v21136_v8 }
 0xc8c   : > { %16989 = vmatpush3.msra.mxu0 %v19097_v63  ;;  %16996 = vmatpush3.msra.mxu1 %v19103_v23 }
 0xc8d   : > { %16990 = vmatprep.mubr.msk.f32.mxu0 %vm17912_vm3, %v21136_v8  ;;  %16997 = vmatprep.mubr.msk.f32.mxu1 %vm17912_vm3, %v21136_v8 }
 0xc8e   : > { %17000 = vmatprep.subr.mxu0 %v21136_v8  ;;  %17007 = vmatprep.subr.mxu1 %v21136_v8 }
 0xc91   : > { %16991 = vmatmul.mubr.msk.f32.vlgmr.msra.gmra.mxu0 %vm292_vm2, %v6766_v7  ;;  %16998 = vmatmul.mubr.msk.f32.vlgmr.msra.gmra.mxu1 %vm292_vm2, %v6766_v7 }
 0xc92   : > { %17001 = vmatpush3.msk.msra.mxu0 %vm296_vm1, %v19117_v54  ;;  %17008 = vmatpush3.msk.msra.mxu1 %vm296_vm1, %v19124_v13 }
 0xc93   : > { %17002 = vmatprep.subr.mxu0 %v21136_v8  ;;  %17009 = vmatprep.subr.mxu1 %v21136_v8 }
 0xc94   : > { %17003 = vmatpush3.msra.mxu0 %v19133_v18  ;;  %17004 = vmatprep.mubr.msk.f32.mxu0 %vm17912_vm3, %v21136_v8 }
 0xc95   : > { %17010 = vmatpush3.msra.mxu1 %v19141_v20  ;;  %17011 = vmatprep.mubr.msk.f32.mxu1 %vm17912_vm3, %v21136_v8 }
 0xc96   : > { %17005 = vmatmul.mubr.msk.f32.vlgmr.msra.gmra.mxu0 %vm292_vm2, %v6766_v7  ;;  %17012 = vmatmul.mubr.msk.f32.vlgmr.msra.gmra.mxu1 %vm292_vm2, %v6766_v7 }
 0xc97   : > { %7428 = vmatprep.mubr.bf16.mxu0 %v21140_v45  ;;  %7469 = vmatprep.mubr.bf16.mxu1 %v21140_v45 }
 0xc98   : > { %15714 = vmatprep.subr.msk.bf16.mxu0 %vm996_vm4, %v15707_v29  ;;  %15716 = vmatprep.subr.msk.bf16.mxu1 %vm996_vm4, %v15709_v56 }
 0xc99   : > { %7411 = vmatpush1.bf16.msra.mxu0 %v7373_v22  ;;  %7452 = vmatpush1.bf16.msra.mxu1 %v7379_v27 }
 0xc9a   : > { %15718 = vmatprep.subr.msk.bf16.mxu0 %vm996_vm4, %v15711_v62  ;;  %15720 = vmatprep.subr.msk.bf16.mxu1 %vm996_vm4, %v15713_v4  ;;  %v15683_v4 = vld [vmem:[%s17965_s28 + $0x60] sm:$0x3] }
 0xd41   : > { %v6870_v61 = vpop.f32.mrf.mxu0  ;;  %v6911_v7 = vpop.f32.mrf.mxu1 }
 0xd42   : > { %v19397_v47 = vadd.f32 %v6870_v61, %v19289_v60  ;;  %v19400_v31 = vadd.f32 %v6911_v7, %v19292_v17  ;;  %v15687_v61 = vld [vmem:[%s17965_s28 + $0x62] sm:$0x3] }
 0xd43   : > { %v6872_v42 = vpop.f32.mrf.mxu0  ;;  %v6913_v59 = vpop.f32.mrf.mxu1 }
 0xd44   : > { %v19403_v39 = vadd.f32 %v6872_v42, %v19295_v19  ;;  %v19406_v16 = vadd.f32 %v6913_v59, %v19298_v3 }
 0xd45   : > { %v6874_v10 = vpop.f32.mrf.mxu0  ;;  %v6915_v37 = vpop.f32.mrf.mxu1 }
 0xd47   : > { %v6875_v29 = vpop.f32.mrf.mxu0  ;;  %v6916_v58 = vpop.f32.mrf.mxu1 }
 0xd49   : > { %v6952_v21 = vpop.f32.mrf.mxu0  ;;  %v6993_v60 = vpop.f32.mrf.mxu1 }
 0xd4a   : > { %v19409_v56 = vadd.f32 %v6952_v21, %v19301_v51  ;;  %v19412_v17 = vadd.f32 %v6993_v60, %v19304_v48 }
 0xd4b   : > { %v19414_v30 = vpop.f32.mrf.mxu0  ;;  %v19416_v19 = vpop.f32.mrf.mxu1 }
 0xd4c   : > { %21141 = vst [vmem:[#allocation9_spill] sm:$0xff] %v19414_v30  ;;  %21142 = vst [vmem:[#allocation10_spill] sm:$0xff] %v19416_v19 }
 0xd4d   : > { %v6956_v22 = vpop.f32.mrf.mxu0  ;;  %v6997_v3 = vpop.f32.mrf.mxu1 }
 0xd4e   : > { %v15694_v3 = vld [vmem:[%s17965_s28 + $0x66] sm:$0x3] }
 0xd4f   : > { %v6957_v27 = vpop.f32.mrf.mxu0  ;;  %v6998_v62 = vpop.f32.mrf.mxu1 }
 0xd50   : > { %v15691_v62 = vld [vmem:[%s17965_s28 + $0x64] sm:$0x3] }
 0xd51   : > { %v7079_v7 = vpop.f32.mrf.mxu0  ;;  %v7158_v42 = vpop.f32.mrf.mxu1 }
 0xd52   : > { %v7083_v59 = vadd.f32 %v15683_v4, %v7079_v7  ;;  %v7162_v51 = vadd.f32 %v15687_v61, %v7158_v42 }
 0xd53   : > { %v16992_v10 = vpop.f32.mrf.mxu0  ;;  %v16999_v37 = vpop.f32.mrf.mxu1 }
 0xd54   : > { %v15686_v48 = vmul.f32 -1.442695, %v7083_v59  ;;  %v15690_v29 = vmul.f32 -1.442695, %v7162_v51 }
 0xd56   : > { %17562 = vpow2.f32 %v15686_v48  ;;  %v7237_v58 = vpop.f32.mrf.mxu0  ;;  %v7311_v21 = vpop.f32.mrf.mxu1 }
 0xd57   : > { %17564 = vpow2.f32 %v15690_v29  ;;  %v7315_v27 = vadd.f32 %v15694_v3, %v7311_v21  ;;  %v7241_v35 = vadd.f32 %v15691_v62, %v7237_v58  ;;  %v21144_v58 = vcombine.low %v19379_v0, %v19386_v33  ;;  %v15742_v33 = vld [vmem:[%s17970_s7 + $0x368] sm:$0x11]  ;;  %v19481_v62 = vld [vmem:[%s17970_s7 + $0x350] sm:$0xff] }
 0xd58   : > { %v17006_v60 = vpop.f32.mrf.mxu0  ;;  %v17013_v22 = vpop.f32.mrf.mxu1 }
 0xd59   : > { %v15697_v5 = vmul.f32 -1.442695, %v7315_v27  ;;  %v7391_v21 = vsel %vm996_vm4, %v21144_v58, 0 }
 0xd5b   : > { %17566 = vpow2.f32 %v15697_v5 }
 0xd5c   : > { %17568 = vtanh.f32 %v7241_v35 }
 0xd63   : > { %v17563_v19 = vpop.eup %17562 }
 0xd64   : > { %v17565_v30 = vpop.eup %17564  ;;  %v7087_v38 = vadd.f32 1.0, %v17563_v19 }
 0xd65   : > { %v7166_v4 = vadd.f32 1.0, %v17565_v30 }
 0xd66   : > { %17570 = vrcp.f32 %v7087_v38  ;;  %v21143_v38 = vcombine.low %v19373_v52, %v19376_v50  ;;  %v15741_v52 = vld [vmem:[%s17970_s7 + $0x360] sm:$0x11]  ;;  %v15738_v50 = vld [vmem:[%s17970_s7 + $0x348] sm:$0xff] }
 0xd67   : > { %17572 = vrcp.f32 %v7166_v4  ;;  %v15748_v22 = vcombine.high %v15738_v50, %v15742_v33  ;;  %v15747_v3 = vcombine.low %v15738_v50, %v15742_v33  ;;  %v19484_v4 = vld [vmem:[%s17970_s7 + $0x370] sm:$0x11] }
 0xd68   : > { %v17567_v61 = vpop.eup %17566  ;;  %v7385_v35 = vsel %vm996_vm4, %v21143_v38, 0 }
 0xd69   : > { %v17569_v7 = vpop.eup %17568  ;;  %v7319_v10 = vadd.f32 1.0, %v17567_v61  ;;  %v19487_v61 = vld [vmem:[%s17970_s7 + $0x358] sm:$0xff] }
 0xd6b   : > { %17574 = vrcp.f32 %v7319_v10 }
 0xd73   : > { %v17571_v42 = vpop.eup %17570 }
 0xd74   : > { %v17573_v59 = vpop.eup %17572  ;;  %v7323_v51 = vmul.f32 %v17571_v42, %v17569_v7  ;;  %v7939_v7 = vsel %vm996_vm4, %v15747_v3, 0  ;;  %v15750_v42 = vcombine.high %v19481_v62, %v19484_v4 }
 0xd75   : > { %v7322_v37 = vmul.f32 %v17573_v59, %v19315_v12  ;;  %v15737_v12 = vld [vmem:[%s17970_s7 + $0x340] sm:$0xff]  ;;  %v19494_v59 = vld [vmem:[%s17970_s7 + $0x378] sm:$0x11] }
 0xd76   : > { %v15746_v0 = vcombine.high %v15737_v12, %v15741_v52  ;;  %v15745_v60 = vcombine.low %v15737_v12, %v15741_v52 }
 0xd77   : > { %v19423_v48 = vadd.f32 %v7323_v51, %v7322_v37  ;;  %v15752_v51 = vcombine.high %v19487_v61, %v19494_v59 }
 0xd78   : > { %v17575_v29 = vpop.eup %17574  ;;  %v7933_v27 = vsel %vm996_vm4, %v15745_v60, 0 }
 0xd79   : > { %17576 = vtanh.f32 %v19423_v48 }
 0xd86   : > { %v17577_v19 = vpop.eup %17576 }
 0xd87   : > { %v7326_v5 = vmul.f32 %v17577_v19, %v17575_v29 }
 0xd89   : > { %v7327_v30 = vpack.c.bf16 %v7326_v5, %v7326_v5 }
 0xd8b   : > { %15715 = vmatmul.mubr.msk.bf16.vlgmr.msra.gmra.mxu0 %vm292_vm2, %v7327_v30  ;;  %15717 = vmatmul.mubr.msk.bf16.vlgmr.msra.gmra.mxu1 %vm292_vm2, %v7327_v30 }
 0xd8c   : > { %7493 = vmatpush1.bf16.msra.mxu0 %v7385_v35  ;;  %7534 = vmatpush1.bf16.msra.mxu1 %v7391_v21 }
 0xd8d   : > { %7510 = vmatprep.mubr.bf16.mxu0 %v21140_v45  ;;  %7551 = vmatprep.mubr.bf16.mxu1 %v21140_v45 }
 0xd8e   : > { %17014 = vmatprep.subr.mxu0 %v21136_v8  ;;  %17021 = vmatprep.subr.mxu1 %v21136_v8 }
 0xd93   : > { %15719 = vmatmul.mubr.msk.bf16.vlgmr.msra.gmra.mxu0 %vm292_vm2, %v7327_v30  ;;  %15721 = vmatmul.mubr.msk.bf16.vlgmr.msra.gmra.mxu1 %vm292_vm2, %v7327_v30 }
 0xd94   : > { %17015 = vmatpush3.msk.msra.mxu0 %vm296_vm1, %v19081_v53  ;;  %17022 = vmatpush3.msk.msra.mxu1 %vm296_vm1, %v19088_v2 }
 0xd95   : > { %17016 = vmatprep.subr.mxu0 %v21136_v8  ;;  %17023 = vmatprep.subr.mxu1 %v21136_v8 }
 0xd96   : > { %17017 = vmatpush3.msra.mxu0 %v19097_v63  ;;  %17024 = vmatpush3.msra.mxu1 %v19103_v23 }
 0xd97   : > { %17018 = vmatprep.mubr.msk.f32.mxu0 %vm17912_vm3, %v21136_v8  ;;  %17025 = vmatprep.mubr.msk.f32.mxu1 %vm17912_vm3, %v21136_v8 }
 0xd98   : > { %17028 = vmatprep.subr.mxu0 %v21136_v8  ;;  %17035 = vmatprep.subr.mxu1 %v21136_v8 }
 0xd9b   : > { %17019 = vmatmul.mubr.msk.f32.vlgmr.msra.gmra.mxu0 %vm292_vm2, %v7326_v5  ;;  %17026 = vmatmul.mubr.msk.f32.vlgmr.msra.gmra.mxu1 %vm292_vm2, %v7326_v5 }
 0xd9c   : > { %17029 = vmatpush3.msk.msra.mxu0 %vm296_vm1, %v19117_v54  ;;  %17036 = vmatpush3.msk.msra.mxu1 %vm296_vm1, %v19124_v13 }
 0xd9d   : > { %17030 = vmatprep.subr.mxu0 %v21136_v8  ;;  %17037 = vmatprep.subr.mxu1 %v21136_v8 }
 0xd9e   : > { %17031 = vmatpush3.msra.mxu0 %v19133_v18  ;;  %17032 = vmatprep.mubr.msk.f32.mxu0 %vm17912_vm3, %v21136_v8 }
 0xd9f   : > { %17038 = vmatpush3.msra.mxu1 %v19141_v20  ;;  %17039 = vmatprep.mubr.msk.f32.mxu1 %vm17912_vm3, %v21136_v8 }
 0xda0   : > { %17033 = vmatmul.mubr.msk.f32.vlgmr.msra.gmra.mxu0 %vm292_vm2, %v7326_v5  ;;  %17040 = vmatmul.mubr.msk.f32.vlgmr.msra.gmra.mxu1 %vm292_vm2, %v7326_v5 }
 0xda1   : > { %7988 = vmatprep.mubr.bf16.mxu0 %v21140_v45  ;;  %8029 = vmatprep.mubr.bf16.mxu1 %v21140_v45 }
 0xda2   : > { %15753 = vmatprep.subr.msk.bf16.mxu0 %vm996_vm4, %v15746_v0  ;;  %15755 = vmatprep.subr.msk.bf16.mxu1 %vm996_vm4, %v15748_v22 }
 0xda3   : > { %7971 = vmatpush1.bf16.msra.mxu0 %v7933_v27  ;;  %8012 = vmatpush1.bf16.msra.mxu1 %v7939_v7 }
 0xda4   : > { %15757 = vmatprep.subr.msk.bf16.mxu0 %vm996_vm4, %v15750_v42  ;;  %15759 = vmatprep.subr.msk.bf16.mxu1 %vm996_vm4, %v15752_v51  ;;  %v15722_v42 = vld [vmem:[%s17965_s28 + $0x68] sm:$0x3]  ;;  %v15726_v51 = vld [vmem:[%s17965_s28 + $0x6a] sm:$0x3] }
 0xe4b   : > { %v7430_v29 = vpop.f32.mrf.mxu0  ;;  %v7471_v19 = vpop.f32.mrf.mxu1 }
 0xe4c   : > { %v19505_v5 = vadd.f32 %v7430_v29, %v19397_v47  ;;  %v19508_v30 = vadd.f32 %v7471_v19, %v19400_v31 }
 0xe4d   : > { %v7432_v38 = vpop.f32.mrf.mxu0  ;;  %v7473_v35 = vpop.f32.mrf.mxu1 }
 0xe4e   : > { %v19511_v58 = vadd.f32 %v7432_v38, %v19403_v39  ;;  %v19514_v21 = vadd.f32 %v7473_v35, %v19406_v16 }
 0xe4f   : > { %v7434_v12 = vpop.f32.mrf.mxu0  ;;  %v7475_v52 = vpop.f32.mrf.mxu1 }
 0xe51   : > { %v7435_v50 = vpop.f32.mrf.mxu0  ;;  %v7476_v0 = vpop.f32.mrf.mxu1 }
 0xe53   : > { %v7512_v33 = vpop.f32.mrf.mxu0  ;;  %v7553_v47 = vpop.f32.mrf.mxu1 }
 0xe54   : > { %v19517_v60 = vadd.f32 %v7512_v33, %v19409_v56  ;;  %v19520_v31 = vadd.f32 %v7553_v47, %v19412_v17 }
 0xe55   : > { %v19522_v22 = vpop.f32.mrf.mxu0  ;;  %v19524_v39 = vpop.f32.mrf.mxu1 }
 0xe56   : > { %21145 = vst [vmem:[#allocation11_spill] sm:$0xff] %v19522_v22  ;;  %21146 = vst [vmem:[#allocation12_spill] sm:$0xff] %v19524_v39 }
 0xe57   : > { %v7516_v3 = vpop.f32.mrf.mxu0  ;;  %v7557_v16 = vpop.f32.mrf.mxu1 }
 0xe58   : > { %v15733_v3 = vld [vmem:[%s17965_s28 + $0x6e] sm:$0x3] }
 0xe59   : > { %v7517_v27 = vpop.f32.mrf.mxu0  ;;  %v7558_v7 = vpop.f32.mrf.mxu1 }
 0xe5a   : > { %v15730_v27 = vld [vmem:[%s17965_s28 + $0x6c] sm:$0x3] }
 0xe5b   : > { %v7639_v29 = vpop.f32.mrf.mxu0  ;;  %v7718_v19 = vpop.f32.mrf.mxu1 }
 0xe5c   : > { %v7643_v38 = vadd.f32 %v15722_v42, %v7639_v29  ;;  %v7722_v56 = vadd.f32 %v15726_v51, %v7718_v19 }
 0xe5d   : > { %v17020_v35 = vpop.f32.mrf.mxu0  ;;  %v17027_v12 = vpop.f32.mrf.mxu1 }
 0xe5e   : > { %v15725_v17 = vmul.f32 -1.442695, %v7643_v38  ;;  %v15729_v52 = vmul.f32 -1.442695, %v7722_v56 }
 0xe60   : > { %17578 = vpow2.f32 %v15725_v17  ;;  %v7797_v50 = vpop.f32.mrf.mxu0  ;;  %v7871_v0 = vpop.f32.mrf.mxu1 }
 0xe61   : > { %17580 = vpow2.f32 %v15729_v52  ;;  %v7875_v16 = vadd.f32 %v15733_v3, %v7871_v0  ;;  %v7801_v37 = vadd.f32 %v15730_v27, %v7797_v50  ;;  %v21148_v0 = vcombine.low %v19487_v61, %v19494_v59  ;;  %v19595_v61 = vld [vmem:[%s17970_s7 + $0x398] sm:$0xff] }
 0xe62   : > { %v17034_v33 = vpop.f32.mrf.mxu0  ;;  %v17041_v47 = vpop.f32.mrf.mxu1  ;;  %v19602_v3 = vld [vmem:[%s17970_s7 + $0x3b8] sm:$0x11] }
 0xe63   : > { %v15736_v7 = vmul.f32 -1.442695, %v7875_v16  ;;  %v7951_v33 = vsel %vm996_vm4, %v21148_v0, 0  ;;  %v15791_v16 = vcombine.high %v19595_v61, %v19602_v3 }
 0xe65   : > { %17582 = vpow2.f32 %v15736_v7  ;;  %v15790_v7 = vcombine.low %v19595_v61, %v19602_v3  ;;  %v19683_v61 = vld [vmem:[%s21126_s1 + $0x10] sm:$0xff]  ;;  %v19697_v3 = vld [vmem:[%s21126_s1 + $0x28] sm:$0x3] }
 0xe66   : > { %17584 = vtanh.f32 %v7801_v37  ;;  %v21147_v37 = vcombine.low %v19481_v62, %v19484_v4  ;;  %v19589_v62 = vld [vmem:[%s17970_s7 + $0x390] sm:$0xff] }
 0xe67   : > { %v19592_v4 = vld [vmem:[%s17970_s7 + $0x3b0] sm:$0x11] }
 0xe68   : > { %v15789_v47 = vcombine.high %v19589_v62, %v19592_v4  ;;  %v15788_v27 = vcombine.low %v19589_v62, %v19592_v4  ;;  %v19668_v62 = vld [vmem:[%s21126_s1 + $0x18] sm:$0x3]  ;;  %v19677_v4 = vld [vmem:[%s21126_s1] sm:$0xff] }
 0xe6d   : > { %v17579_v10 = vpop.eup %17578 }
 0xe6e   : > { %v17581_v39 = vpop.eup %17580  ;;  %v7647_v22 = vadd.f32 1.0, %v17579_v10 }
 0xe6f   : > { %v7726_v42 = vadd.f32 1.0, %v17581_v39 }
 0xe70   : > { %17586 = vrcp.f32 %v7647_v22  ;;  %v7945_v22 = vsel %vm996_vm4, %v21147_v37, 0 }
 0xe71   : > { %17588 = vrcp.f32 %v7726_v42 }
 0xe72   : > { %v17583_v51 = vpop.eup %17582 }
 0xe73   : > { %v17585_v29 = vpop.eup %17584  ;;  %v7879_v35 = vadd.f32 1.0, %v17583_v51 }
 0xe75   : > { %17590 = vrcp.f32 %v7879_v35 }
 0xe7d   : > { %v17587_v19 = vpop.eup %17586 }
 0xe7e   : > { %v17589_v38 = vpop.eup %17588  ;;  %v7883_v56 = vmul.f32 %v17587_v19, %v17585_v29 }
 0xe7f   : > { %v7882_v12 = vmul.f32 %v17589_v38, %v19423_v48 }
 0xe81   : > { %v19531_v17 = vadd.f32 %v7883_v56, %v7882_v12 }
 0xe82   : > { %v17591_v52 = vpop.eup %17590 }
 0xe83   : > { %17592 = vtanh.f32 %v19531_v17 }
 0xe90   : > { %v17593_v10 = vpop.eup %17592 }
 0xe91   : > { %v7886_v50 = vmul.f32 %v17593_v10, %v17591_v52 }
 0xe93   : > { %v7887_v39 = vpack.c.bf16 %v7886_v50, %v7886_v50 }
 0xe95   : > { %15754 = vmatmul.mubr.msk.bf16.vlgmr.msra.gmra.mxu0 %vm292_vm2, %v7887_v39  ;;  %15756 = vmatmul.mubr.msk.bf16.vlgmr.msra.gmra.mxu1 %vm292_vm2, %v7887_v39 }
 0xe96   : > { %8053 = vmatpush1.bf16.msra.mxu0 %v7945_v22  ;;  %8094 = vmatpush1.bf16.msra.mxu1 %v7951_v33 }
 0xe97   : > { %8070 = vmatprep.mubr.bf16.mxu0 %v21140_v45  ;;  %8111 = vmatprep.mubr.bf16.mxu1 %v21140_v45 }
 0xe98   : > { %17042 = vmatprep.subr.mxu0 %v21136_v8  ;;  %17049 = vmatprep.subr.mxu1 %v21136_v8 }
 0xe9d   : > { %15758 = vmatmul.mubr.msk.bf16.vlgmr.msra.gmra.mxu0 %vm292_vm2, %v7887_v39  ;;  %15760 = vmatmul.mubr.msk.bf16.vlgmr.msra.gmra.mxu1 %vm292_vm2, %v7887_v39 }
 0xe9e   : > { %17043 = vmatpush3.msk.msra.mxu0 %vm296_vm1, %v19081_v53  ;;  %17050 = vmatpush3.msk.msra.mxu1 %vm296_vm1, %v19088_v2  ;;  %v15776_v53 = vld [vmem:[%s17970_s7 + $0x380] sm:$0xff] }
 0xe9f   : > { %17044 = vmatprep.subr.mxu0 %v21136_v8  ;;  %17051 = vmatprep.subr.mxu1 %v21136_v8  ;;  %v15780_v2 = vld [vmem:[%s17970_s7 + $0x3a0] sm:$0x11] }
 0xea0   : > { %17045 = vmatpush3.msra.mxu0 %v19097_v63  ;;  %17052 = vmatpush3.msra.mxu1 %v19103_v23  ;;  %v15777_v63 = vld [vmem:[%s17970_s7 + $0x388] sm:$0xff]  ;;  %v15785_v23 = vcombine.high %v15776_v53, %v15780_v2 }
 0xea1   : > { %17046 = vmatprep.mubr.msk.f32.mxu0 %vm17912_vm3, %v21136_v8  ;;  %17053 = vmatprep.mubr.msk.f32.mxu1 %vm17912_vm3, %v21136_v8 }
 0xea2   : > { %17056 = vmatprep.subr.mxu0 %v21136_v8  ;;  %17063 = vmatprep.subr.mxu1 %v21136_v8 }
 0xea5   : > { %17047 = vmatmul.mubr.msk.f32.vlgmr.msra.gmra.mxu0 %vm292_vm2, %v7886_v50  ;;  %17054 = vmatmul.mubr.msk.f32.vlgmr.msra.gmra.mxu1 %vm292_vm2, %v7886_v50 }
 0xea6   : > { %17057 = vmatpush3.msk.msra.mxu0 %vm296_vm1, %v19117_v54  ;;  %17064 = vmatpush3.msk.msra.mxu1 %vm296_vm1, %v19124_v13  ;;  %v15781_v54 = vld [vmem:[%s17970_s7 + $0x3a8] sm:$0x11]  ;;  %v15784_v13 = vcombine.low %v15776_v53, %v15780_v2 }
 0xea7   : > { %17058 = vmatprep.subr.mxu0 %v21136_v8  ;;  %17065 = vmatprep.subr.mxu1 %v21136_v8 }
 0xea8   : > { %17059 = vmatpush3.msra.mxu0 %v19133_v18  ;;  %17060 = vmatprep.mubr.msk.f32.mxu0 %vm17912_vm3, %v21136_v8  ;;  %v15787_v18 = vcombine.high %v15777_v63, %v15781_v54  ;;  %v8493_v48 = vsel %vm996_vm4, %v15784_v13, 0 }
 0xea9   : > { %17066 = vmatpush3.msra.mxu1 %v19141_v20  ;;  %17067 = vmatprep.mubr.msk.f32.mxu1 %vm17912_vm3, %v21136_v8  ;;  %v15786_v20 = vcombine.low %v15777_v63, %v15781_v54  ;;  %v15761_v63 = vld [vmem:[%s17965_s28 + $0x70] sm:$0x3] }
 0xeaa   : > { %17061 = vmatmul.mubr.msk.f32.vlgmr.msra.gmra.mxu0 %vm292_vm2, %v7886_v50  ;;  %17068 = vmatmul.mubr.msk.f32.vlgmr.msra.gmra.mxu1 %vm292_vm2, %v7886_v50 }
 0xeab   : > { %8548 = vmatprep.mubr.bf16.mxu0 %v21140_v45  ;;  %8589 = vmatprep.mubr.bf16.mxu1 %v21140_v45  ;;  %v8499_v59 = vsel %vm996_vm4, %v15786_v20, 0 }
 0xeac   : > { %15792 = vmatprep.subr.msk.bf16.mxu0 %vm996_vm4, %v15785_v23  ;;  %15794 = vmatprep.subr.msk.bf16.mxu1 %vm996_vm4, %v15787_v18  ;;  %v15765_v23 = vld [vmem:[%s17965_s28 + $0x72] sm:$0x3] }
 0xead   : > { %8531 = vmatpush1.bf16.msra.mxu0 %v8493_v48  ;;  %8572 = vmatpush1.bf16.msra.mxu1 %v8499_v59 }
 0xeae   : > { %15796 = vmatprep.subr.msk.bf16.mxu0 %vm996_vm4, %v15789_v47  ;;  %15798 = vmatprep.subr.msk.bf16.mxu1 %vm996_vm4, %v15791_v16 }
 0xf55   : > { %v7990_v42 = vpop.f32.mrf.mxu0  ;;  %v8031_v51 = vpop.f32.mrf.mxu1 }
 0xf56   : > { %v19613_v29 = vadd.f32 %v7990_v42, %v19505_v5  ;;  %v19616_v19 = vadd.f32 %v8031_v51, %v19508_v30 }
 0xf57   : > { %v7992_v38 = vpop.f32.mrf.mxu0  ;;  %v8033_v56 = vpop.f32.mrf.mxu1 }
 0xf58   : > { %v19619_v35 = vadd.f32 %v7992_v38, %v19511_v58  ;;  %v19622_v12 = vadd.f32 %v8033_v56, %v19514_v21  ;;  %v15772_v38 = vld [vmem:[%s17965_s28 + $0x76] sm:$0x3] }
 0xf59   : > { %v7994_v52 = vpop.f32.mrf.mxu0  ;;  %v8035_v10 = vpop.f32.mrf.mxu1 }
 0xf5a   : > { %v15769_v52 = vld [vmem:[%s17965_s28 + $0x74] sm:$0x3] }
 0xf5b   : > { %v7995_v50 = vpop.f32.mrf.mxu0  ;;  %v8036_v39 = vpop.f32.mrf.mxu1 }
 0xf5d   : > { %v8072_v37 = vpop.f32.mrf.mxu0  ;;  %v8113_v5 = vpop.f32.mrf.mxu1 }
 0xf5e   : > { %v19625_v22 = vadd.f32 %v8072_v37, %v19517_v60  ;;  %v19628_v30 = vadd.f32 %v8113_v5, %v19520_v31 }
 0xf5f   : > { %v19630_v0 = vpop.f32.mrf.mxu0  ;;  %v19632_v58 = vpop.f32.mrf.mxu1 }
 0xf61   : > { %v8076_v33 = vpop.f32.mrf.mxu0  ;;  %v8117_v21 = vpop.f32.mrf.mxu1 }
 0xf63   : > { %v8077_v53 = vpop.f32.mrf.mxu0  ;;  %v8118_v2 = vpop.f32.mrf.mxu1 }
 0xf65   : > { %v8199_v54 = vpop.f32.mrf.mxu0  ;;  %v8278_v13 = vpop.f32.mrf.mxu1 }
 0xf66   : > { %v8203_v18 = vadd.f32 %v15761_v63, %v8199_v54  ;;  %v8282_v60 = vadd.f32 %v15765_v23, %v8278_v13 }
 0xf67   : > { %v17048_v20 = vpop.f32.mrf.mxu0  ;;  %v17055_v48 = vpop.f32.mrf.mxu1 }
 0xf68   : > { %v15764_v31 = vmul.f32 -1.442695, %v8203_v18  ;;  %v15768_v59 = vmul.f32 -1.442695, %v8282_v60 }
 0xf6a   : > { %17594 = vpow2.f32 %v15764_v31  ;;  %v8357_v47 = vpop.f32.mrf.mxu0  ;;  %v8431_v16 = vpop.f32.mrf.mxu1 }
 0xf6b   : > { %17596 = vpow2.f32 %v15768_v59  ;;  %v8435_v56 = vadd.f32 %v15772_v38, %v8431_v16  ;;  %v8361_v50 = vadd.f32 %v15769_v52, %v8357_v47  ;;  %v8505_v59 = vsel %vm996_vm4, %v15788_v27, 0  ;;  %v19704_v27 = vld [vmem:[%s21126_s1 + $0x38] sm:$0x3]  ;;  %v19721_v16 = vld [vmem:[%s21126_s1 + $0x30] sm:$0xff]  ;;  %v15816_v38 = vld [vmem:[%s17970_s7 + $0x3c8] sm:$0xff] }
 0xf6c   : > { %v17062_v42 = vpop.f32.mrf.mxu0  ;;  %v17069_v51 = vpop.f32.mrf.mxu1  ;;  %v8511_v47 = vsel %vm996_vm4, %v15790_v7, 0  ;;  %v19713_v7 = vld [vmem:[%s21126_s1 + $0x20] sm:$0xff]  ;;  %v15820_v52 = vld [vmem:[%s17970_s7 + $0x3e8] sm:$0x11] }
 0xf6d   : > { %v15775_v10 = vmul.f32 -1.442695, %v8435_v56  ;;  %v15815_v42 = vld [vmem:[%s17970_s7 + $0x3c0] sm:$0xff] }
 0xf6e   : > { %v15819_v51 = vld [vmem:[%s17970_s7 + $0x3e0] sm:$0x11] }
 0xf6f   : > { %17598 = vpow2.f32 %v15775_v10  ;;  %v15824_v56 = vcombine.high %v15815_v42, %v15819_v51  ;;  %v15823_v10 = vcombine.low %v15815_v42, %v15819_v51 }
 0xf70   : > { %17600 = vtanh.f32 %v8361_v50  ;;  %v15826_v50 = vcombine.high %v15816_v38, %v15820_v52 }
 0xf77   : > { %v17595_v39 = vpop.eup %17594 }
 0xf78   : > { %v17597_v37 = vpop.eup %17596  ;;  %v8207_v5 = vadd.f32 1.0, %v17595_v39  ;;  %v15825_v39 = vcombine.low %v15816_v38, %v15820_v52 }
 0xf79   : > { %v8286_v33 = vadd.f32 1.0, %v17597_v37  ;;  %v9053_v37 = vsel %vm996_vm4, %v15823_v10, 0 }
 0xf7a   : > { %17602 = vrcp.f32 %v8207_v5  ;;  %v19737_v5 = vld [vmem:[%s17970_s7 + $0x3d0] sm:$0xff] }
 0xf7b   : > { %17604 = vrcp.f32 %v8286_v33  ;;  %v19740_v33 = vld [vmem:[%s17970_s7 + $0x3f0] sm:$0x11] }
 0xf7c   : > { %v17599_v21 = vpop.eup %17598 }
 0xf7d   : > { %v17601_v53 = vpop.eup %17600  ;;  %v8439_v54 = vadd.f32 1.0, %v17599_v21  ;;  %v19743_v21 = vld [vmem:[%s17970_s7 + $0x3d8] sm:$0xff] }
 0xf7f   : > { %17606 = vrcp.f32 %v8439_v54 }
 0xf87   : > { %v17603_v2 = vpop.eup %17602 }
 0xf88   : > { %v17605_v63 = vpop.eup %17604  ;;  %v8443_v23 = vmul.f32 %v17603_v2, %v17601_v53  ;;  %v9059_v53 = vsel %vm996_vm4, %v15825_v39, 0  ;;  %v15828_v2 = vcombine.high %v19737_v5, %v19740_v33 }
 0xf89   : > { %v8442_v13 = vmul.f32 %v17605_v63, %v19531_v17  ;;  %v19661_v17 = vld [vmem:[%s21126_s1 + $0x8] sm:$0x3]  ;;  %v19750_v63 = vld [vmem:[%s17970_s7 + $0x3f8] sm:$0x11] }
 0xf8b   : > { %v19639_v18 = vadd.f32 %v8443_v23, %v8442_v13  ;;  %v15830_v23 = vcombine.high %v19743_v21, %v19750_v63  ;;  %v15808_v13 = vld [vmem:[%s17965_s28 + $0x7c] sm:$0x3] }
 0xf8c   : > { %v17607_v60 = vpop.eup %17606 }
 0xf8d   : > { %17608 = vtanh.f32 %v19639_v18 }
 0xf9a   : > { %v17609_v20 = vpop.eup %17608 }
 0xf9b   : > { %v8446_v48 = vmul.f32 %v17609_v20, %v17607_v60 }
 0xf9d   : > { %v8447_v31 = vpack.c.bf16 %v8446_v48, %v8446_v48 }
 0xf9f   : > { %15793 = vmatmul.mubr.msk.bf16.vlgmr.msra.gmra.mxu0 %vm292_vm2, %v8447_v31  ;;  %15795 = vmatmul.mubr.msk.bf16.vlgmr.msra.gmra.mxu1 %vm292_vm2, %v8447_v31 }
 0xfa0   : > { %8613 = vmatpush1.bf16.msra.mxu0 %v8505_v59  ;;  %8654 = vmatpush1.bf16.msra.mxu1 %v8511_v47 }
 0xfa1   : > { %8630 = vmatprep.mubr.bf16.mxu0 %v21140_v45  ;;  %8671 = vmatprep.mubr.bf16.mxu1 %v21140_v45 }
 0xfa2   : > { %17070 = vmatprep.subr.mxu0 %v21136_v8  ;;  %17077 = vmatprep.subr.mxu1 %v21136_v8 }
 0xfa7   : > { %15797 = vmatmul.mubr.msk.bf16.vlgmr.msra.gmra.mxu0 %vm292_vm2, %v8447_v31  ;;  %15799 = vmatmul.mubr.msk.bf16.vlgmr.msra.gmra.mxu1 %vm292_vm2, %v8447_v31 }
 0xfa8   : > { %17071 = vmatpush3.msk.msra.mxu0 %vm296_vm1, %v19661_v17  ;;  %17078 = vmatpush3.msk.msra.mxu1 %vm296_vm1, %v19668_v62 }
 0xfa9   : > { %17072 = vmatprep.subr.mxu0 %v21136_v8  ;;  %17079 = vmatprep.subr.mxu1 %v21136_v8 }
 0xfaa   : > { %17073 = vmatpush3.msra.mxu0 %v19677_v4  ;;  %17080 = vmatpush3.msra.mxu1 %v19683_v61 }
 0xfab   : > { %17074 = vmatprep.mubr.msk.f32.mxu0 %vm17912_vm3, %v21136_v8  ;;  %17081 = vmatprep.mubr.msk.f32.mxu1 %vm17912_vm3, %v21136_v8 }
 0xfac   : > { %17084 = vmatprep.subr.mxu0 %v21136_v8  ;;  %17091 = vmatprep.subr.mxu1 %v21136_v8 }
 0xfaf   : > { %17075 = vmatmul.mubr.msk.f32.vlgmr.msra.gmra.mxu0 %vm292_vm2, %v8446_v48  ;;  %17082 = vmatmul.mubr.msk.f32.vlgmr.msra.gmra.mxu1 %vm292_vm2, %v8446_v48 }
 0xfb0   : > { %17085 = vmatpush3.msk.msra.mxu0 %vm296_vm1, %v19697_v3  ;;  %17092 = vmatpush3.msk.msra.mxu1 %vm296_vm1, %v19704_v27 }
 0xfb1   : > { %17086 = vmatprep.subr.mxu0 %v21136_v8  ;;  %17093 = vmatprep.subr.mxu1 %v21136_v8 }
 0xfb2   : > { %17087 = vmatpush3.msra.mxu0 %v19713_v7  ;;  %17088 = vmatprep.mubr.msk.f32.mxu0 %vm17912_vm3, %v21136_v8 }
 0xfb3   : > { %17094 = vmatpush3.msra.mxu1 %v19721_v16  ;;  %17095 = vmatprep.mubr.msk.f32.mxu1 %vm17912_vm3, %v21136_v8 }
 0xfb4   : > { %17089 = vmatmul.mubr.msk.f32.vlgmr.msra.gmra.mxu0 %vm292_vm2, %v8446_v48  ;;  %17096 = vmatmul.mubr.msk.f32.vlgmr.msra.gmra.mxu1 %vm292_vm2, %v8446_v48 }
 0xfb5   : > { %9108 = vmatprep.mubr.bf16.mxu0 %v21140_v45  ;;  %9149 = vmatprep.mubr.bf16.mxu1 %v21140_v45 }
 0xfb6   : > { %15831 = vmatprep.subr.msk.bf16.mxu0 %vm996_vm4, %v15824_v56  ;;  %15833 = vmatprep.subr.msk.bf16.mxu1 %vm996_vm4, %v15826_v50 }
 0xfb7   : > { %9091 = vmatpush1.bf16.msra.mxu0 %v9053_v37  ;;  %9132 = vmatpush1.bf16.msra.mxu1 %v9059_v53 }
 0xfb8   : > { %15835 = vmatprep.subr.msk.bf16.mxu0 %vm996_vm4, %v15828_v2  ;;  %15837 = vmatprep.subr.msk.bf16.mxu1 %vm996_vm4, %v15830_v23 }
0x105f   : > { %v8550_v60 = vpop.f32.mrf.mxu0  ;;  %v8591_v20 = vpop.f32.mrf.mxu1 }
0x1060   : > { %v19761_v48 = vadd.f32 %v8550_v60, %v19613_v29  ;;  %v19764_v31 = vadd.f32 %v8591_v20, %v19616_v19  ;;  %v15800_v60 = vld [vmem:[%s17965_s28 + $0x78] sm:$0x3]  ;;  %v15804_v20 = vld [vmem:[%s17965_s28 + $0x7a] sm:$0x3] }
0x1061   : > { %v8552_v59 = vpop.f32.mrf.mxu0  ;;  %v8593_v47 = vpop.f32.mrf.mxu1 }
0x1062   : > { %v19767_v42 = vadd.f32 %v8552_v59, %v19619_v35  ;;  %v19770_v51 = vadd.f32 %v8593_v47, %v19622_v12 }
0x1063   : > { %v8554_v38 = vpop.f32.mrf.mxu0  ;;  %v8595_v56 = vpop.f32.mrf.mxu1 }
0x1065   : > { %v8555_v52 = vpop.f32.mrf.mxu0  ;;  %v8596_v10 = vpop.f32.mrf.mxu1 }
0x1067   : > { %v8632_v50 = vpop.f32.mrf.mxu0  ;;  %v8673_v29 = vpop.f32.mrf.mxu1 }
0x1068   : > { %v19773_v39 = vadd.f32 %v8632_v50, %v19625_v22  ;;  %v19776_v19 = vadd.f32 %v8673_v29, %v19628_v30 }
0x1069   : > { %v19778_v37 = vpop.f32.mrf.mxu0  ;;  %v19780_v35 = vpop.f32.mrf.mxu1 }
0x106a   : > { %21149 = vst [vmem:[#allocation13_spill] sm:$0xff] %v19773_v39  ;;  %21150 = vst [vmem:[#allocation14_spill] sm:$0xff] %v19776_v19 }
0x106b   : > { %21151 = vst [vmem:[#allocation15_spill] sm:$0xff] %v19778_v37  ;;  %21152 = vst [vmem:[#allocation16_spill] sm:$0xff] %v19780_v35  ;;  %v8636_v53 = vpop.f32.mrf.mxu0  ;;  %v8677_v12 = vpop.f32.mrf.mxu1 }
0x106d   : > { %v8637_v2 = vpop.f32.mrf.mxu0  ;;  %v8678_v23 = vpop.f32.mrf.mxu1 }
0x106e   : > { %v15811_v2 = vld [vmem:[%s17965_s28 + $0x7e] sm:$0x3] }
0x106f   : > { %v8759_v59 = vpop.f32.mrf.mxu0  ;;  %v8838_v47 = vpop.f32.mrf.mxu1 }
0x1070   : > { %v8763_v38 = vadd.f32 %v15800_v60, %v8759_v59  ;;  %v8842_v22 = vadd.f32 %v15804_v20, %v8838_v47 }
0x1071   : > { %v17076_v56 = vpop.f32.mrf.mxu0  ;;  %v17083_v52 = vpop.f32.mrf.mxu1 }
0x1072   : > { %v15803_v30 = vmul.f32 -1.442695, %v8763_v38  ;;  %v15807_v10 = vmul.f32 -1.442695, %v8842_v22 }
0x1074   : > { %17610 = vpow2.f32 %v15803_v30  ;;  %v8917_v50 = vpop.f32.mrf.mxu0  ;;  %v8991_v29 = vpop.f32.mrf.mxu1 }
0x1075   : > { %17612 = vpow2.f32 %v15807_v10  ;;  %v8995_v23 = vadd.f32 %v15811_v2, %v8991_v29  ;;  %v8921_v19 = vadd.f32 %v15808_v13, %v8917_v50  ;;  %v21154_v10 = vcombine.low %v19743_v21, %v19750_v63  ;;  %v15859_v63 = vld [vmem:[%s17970_s7 + $0x428] sm:$0x11] }
0x1076   : > { %v17090_v53 = vpop.f32.mrf.mxu0  ;;  %v17097_v12 = vpop.f32.mrf.mxu1 }
0x1077   : > { %v15814_v54 = vmul.f32 -1.442695, %v8995_v23  ;;  %v9071_v50 = vsel %vm996_vm4, %v21154_v10, 0  ;;  %v19845_v23 = vld [vmem:[%s17970_s7 + $0x410] sm:$0xff] }
0x1079   : > { %17614 = vpow2.f32 %v15814_v54 }
0x107a   : > { %17616 = vtanh.f32 %v8921_v19  ;;  %v21153_v19 = vcombine.low %v19737_v5, %v19740_v33  ;;  %v15858_v5 = vld [vmem:[%s17970_s7 + $0x420] sm:$0x11]  ;;  %v15855_v33 = vld [vmem:[%s17970_s7 + $0x408] sm:$0xff] }
0x107b   : > { %v15865_v53 = vcombine.high %v15855_v33, %v15859_v63  ;;  %v15864_v12 = vcombine.low %v15855_v33, %v15859_v63  ;;  %v21156_v33 = vld [vmem:[#allocation9_spill] sm:$0xff] }
0x1081   : > { %v17611_v39 = vpop.eup %17610 }
0x1082   : > { %v17613_v35 = vpop.eup %17612  ;;  %v8767_v37 = vadd.f32 1.0, %v17611_v39 }
0x1083   : > { %v8846_v60 = vadd.f32 1.0, %v17613_v35 }
0x1084   : > { %17618 = vrcp.f32 %v8767_v37  ;;  %v9065_v37 = vsel %vm996_vm4, %v21153_v19, 0 }
0x1085   : > { %17620 = vrcp.f32 %v8846_v60  ;;  %v19848_v60 = vld [vmem:[%s17970_s7 + $0x430] sm:$0x11] }
0x1086   : > { %v17615_v20 = vpop.eup %17614 }
0x1087   : > { %v17617_v59 = vpop.eup %17616  ;;  %v8999_v56 = vadd.f32 1.0, %v17615_v20  ;;  %v19851_v20 = vld [vmem:[%s17970_s7 + $0x418] sm:$0xff] }
0x1089   : > { %17622 = vrcp.f32 %v8999_v56  ;;  %v15866_v56 = vcombine.low %v19845_v23, %v19848_v60 }
0x1091   : > { %v17619_v47 = vpop.eup %17618 }
0x1092   : > { %v17621_v38 = vpop.eup %17620  ;;  %v9003_v22 = vmul.f32 %v17619_v47, %v17617_v59  ;;  %v9619_v59 = vsel %vm996_vm4, %v15864_v12, 0  ;;  %v15867_v47 = vcombine.high %v19845_v23, %v19848_v60  ;;  %v21159_v12 = vld [vmem:[#allocation12_spill] sm:$0xff]  ;;  %v15897_v23 = vld [vmem:[%s17970_s7 + $0x460] sm:$0x11]  ;;  %v15894_v60 = vld [vmem:[%s17970_s7 + $0x448] sm:$0xff] }
0x1093   : > { %v9002_v52 = vmul.f32 %v17621_v38, %v19639_v18  ;;  %v15854_v18 = vld [vmem:[%s17970_s7 + $0x400] sm:$0xff]  ;;  %v19858_v38 = vld [vmem:[%s17970_s7 + $0x438] sm:$0x11] }
0x1094   : > { %v15863_v21 = vcombine.high %v15854_v18, %v15858_v5  ;;  %v15862_v29 = vcombine.low %v15854_v18, %v15858_v5 }
0x1095   : > { %v19787_v30 = vadd.f32 %v9003_v22, %v9002_v52  ;;  %v15869_v22 = vcombine.high %v19851_v20, %v19858_v38  ;;  %v15868_v52 = vcombine.low %v19851_v20, %v19858_v38  ;;  %v15898_v38 = vld [vmem:[%s17970_s7 + $0x468] sm:$0x11] }
0x1096   : > { %v17623_v13 = vpop.eup %17622  ;;  %v9613_v2 = vsel %vm996_vm4, %v15862_v29, 0 }
0x1097   : > { %17624 = vtanh.f32 %v19787_v30 }
0x10a4   : > { %v17625_v39 = vpop.eup %17624 }
0x10a5   : > { %v9006_v54 = vmul.f32 %v17625_v39, %v17623_v13  ;;  %v1363_v13 = vadd.f32 %v18252_v6, %v18236_v44  ;;  %v1404_v39 = vadd.f32 %v18254_v11, %v18238_v46 }
0x10a7   : > { %v9007_v35 = vpack.c.bf16 %v9006_v54, %v9006_v54 }
0x10a9   : > { %15832 = vmatmul.mubr.msk.bf16.vlgmr.msra.gmra.mxu0 %vm292_vm2, %v9007_v35  ;;  %15834 = vmatmul.mubr.msk.bf16.vlgmr.msra.gmra.mxu1 %vm292_vm2, %v9007_v35 }
0x10aa   : > { %9173 = vmatpush1.bf16.msra.mxu0 %v9065_v37  ;;  %9214 = vmatpush1.bf16.msra.mxu1 %v9071_v50 }
0x10ab   : > { %9190 = vmatprep.mubr.bf16.mxu0 %v21140_v45  ;;  %9231 = vmatprep.mubr.bf16.mxu1 %v21140_v45 }
0x10ac   : > { %17098 = vmatprep.subr.mxu0 %v21136_v8  ;;  %17105 = vmatprep.subr.mxu1 %v21136_v8 }
0x10b1   : > { %15836 = vmatmul.mubr.msk.bf16.vlgmr.msra.gmra.mxu0 %vm292_vm2, %v9007_v35  ;;  %15838 = vmatmul.mubr.msk.bf16.vlgmr.msra.gmra.mxu1 %vm292_vm2, %v9007_v35  ;;  %v1967_v35 = vadd.f32 %v18364_v57, %v1404_v39  ;;  %v21160_v39 = vld [vmem:[#allocation15_spill] sm:$0xff] }
0x10b2   : > { %17099 = vmatpush3.msk.msra.mxu0 %vm296_vm1, %v19661_v17  ;;  %17106 = vmatpush3.msk.msra.mxu1 %vm296_vm1, %v19668_v62 }
0x10b3   : > { %17100 = vmatprep.subr.mxu0 %v21136_v8  ;;  %17107 = vmatprep.subr.mxu1 %v21136_v8  ;;  %v2527_v37 = vadd.f32 %v18472_v49, %v1967_v35 }
0x10b4   : > { %17101 = vmatpush3.msra.mxu0 %v19677_v4  ;;  %17108 = vmatpush3.msra.mxu1 %v19683_v61 }
0x10b5   : > { %17102 = vmatprep.mubr.msk.f32.mxu0 %vm17912_vm3, %v21136_v8  ;;  %17109 = vmatprep.mubr.msk.f32.mxu1 %vm17912_vm3, %v21136_v8  ;;  %v3087_v50 = vadd.f32 %v18620_v28, %v2527_v37 }
0x10b6   : > { %17112 = vmatprep.subr.mxu0 %v21136_v8  ;;  %17119 = vmatprep.subr.mxu1 %v21136_v8 }
0x10b7   : > { %v3647_v5 = vadd.f32 %v18728_v9, %v3087_v50  ;;  %v21155_v9 = vld [vmem:[#allocation8_spill] sm:$0xff] }
0x10b9   : > { %17103 = vmatmul.mubr.msk.f32.vlgmr.msra.gmra.mxu0 %vm292_vm2, %v9006_v54  ;;  %17110 = vmatmul.mubr.msk.f32.vlgmr.msra.gmra.mxu1 %vm292_vm2, %v9006_v54  ;;  %v4207_v46 = vadd.f32 %v18836_v32, %v3647_v5 }
0x10ba   : > { %17113 = vmatpush3.msk.msra.mxu0 %vm296_vm1, %v19697_v3  ;;  %17120 = vmatpush3.msk.msra.mxu1 %vm296_vm1, %v19704_v27 }
0x10bb   : > { %17114 = vmatprep.subr.mxu0 %v21136_v8  ;;  %17121 = vmatprep.subr.mxu1 %v21136_v8  ;;  %v4767_v11 = vadd.f32 %v18944_v41, %v4207_v46 }
0x10bc   : > { %17115 = vmatpush3.msra.mxu0 %v19713_v7  ;;  %17116 = vmatprep.mubr.msk.f32.mxu0 %vm17912_vm3, %v21136_v8 }
0x10bd   : > { %17122 = vmatpush3.msra.mxu1 %v19721_v16  ;;  %17123 = vmatprep.mubr.msk.f32.mxu1 %vm17912_vm3, %v21136_v8  ;;  %v5327_v57 = vadd.f32 %v19052_v43, %v4767_v11 }
0x10be   : > { %17117 = vmatmul.mubr.msk.f32.vlgmr.msra.gmra.mxu0 %vm292_vm2, %v9006_v54  ;;  %17124 = vmatmul.mubr.msk.f32.vlgmr.msra.gmra.mxu1 %vm292_vm2, %v9006_v54  ;;  %v1965_v54 = vadd.f32 %v18362_v55, %v1363_v13 }
0x10bf   : > { %9668 = vmatprep.mubr.bf16.mxu0 %v21140_v45  ;;  %9709 = vmatprep.mubr.bf16.mxu1 %v21140_v45  ;;  %v5887_v49 = vadd.f32 %v19200_v25, %v5327_v57  ;;  %v15843_v57 = vld [vmem:[%s17965_s28 + $0x82] sm:$0x3] }
0x10c0   : > { %15870 = vmatprep.subr.msk.bf16.mxu0 %vm996_vm4, %v15863_v21  ;;  %15872 = vmatprep.subr.msk.bf16.mxu1 %vm996_vm4, %v15865_v53  ;;  %v2525_v19 = vadd.f32 %v18470_v36, %v1965_v54  ;;  %v21157_v21 = vld [vmem:[#allocation10_spill] sm:$0xff]  ;;  %v21158_v53 = vld [vmem:[#allocation11_spill] sm:$0xff] }
0x10c1   : > { %9651 = vmatpush1.bf16.msra.mxu0 %v9613_v2  ;;  %9692 = vmatpush1.bf16.msra.mxu1 %v9619_v59 }
0x10c2   : > { %15874 = vmatprep.subr.msk.bf16.mxu0 %vm996_vm4, %v15867_v47  ;;  %15876 = vmatprep.subr.msk.bf16.mxu1 %vm996_vm4, %v15869_v22  ;;  %v3085_v10 = vadd.f32 %v18618_v24, %v2525_v19  ;;  %v21162_v19 = vld [vmem:[#allocation13_spill] sm:$0xff] }
0x10c4   : > { %v3645_v18 = vadd.f32 %v18726_v26, %v3085_v10  ;;  %v21163_v10 = vld [vmem:[#allocation14_spill] sm:$0xff] }
0x10c6   : > { %v4205_v44 = vadd.f32 %v18834_v40, %v3645_v18  ;;  %v6447_v40 = vadd.f32 %v21155_v9, %v5887_v49 }
0x10c8   : > { %v4765_v6 = vadd.f32 %v18942_v14, %v4205_v44 }
0x10ca   : > { %v5325_v55 = vadd.f32 %v19050_v34, %v4765_v6 }
0x10cc   : > { %v5885_v36 = vadd.f32 %v19198_v15, %v5325_v55  ;;  %v7007_v15 = vadd.f32 %v21157_v21, %v6447_v40  ;;  %v15839_v55 = vld [vmem:[%s17965_s28 + $0x80] sm:$0x3] }
0x10ce   : > { %v6445_v26 = vadd.f32 %v19306_v1, %v5885_v36  ;;  %v7567_v2 = vadd.f32 %v21159_v12, %v7007_v15  ;;  %v15850_v15 = vld [vmem:[%s17965_s28 + $0x86] sm:$0x3] }
0x10d0   : > { %v7005_v43 = vadd.f32 %v21156_v33, %v6445_v26  ;;  %v8127_v22 = vadd.f32 %v19632_v58, %v7567_v2 }
0x1169   : > { %v9110_v24 = vpop.f32.mrf.mxu0  ;;  %v9151_v28 = vpop.f32.mrf.mxu1 }
0x116a   : > { %v19891_v32 = vadd.f32 %v9110_v24, %v19761_v48  ;;  %v19894_v14 = vadd.f32 %v9151_v28, %v19764_v31  ;;  %v7565_v48 = vadd.f32 %v21158_v53, %v7005_v43 }
0x116b   : > { %v9112_v41 = vpop.f32.mrf.mxu0  ;;  %v9153_v34 = vpop.f32.mrf.mxu1 }
0x116c   : > { %v19899_v25 = vadd.f32 %v9112_v41, %v19767_v42  ;;  %v19902_v63 = vadd.f32 %v9153_v34, %v19770_v51  ;;  %v8125_v47 = vadd.f32 %v19630_v0, %v7565_v48  ;;  %v21161_v51 = vld [vmem:[#allocation16_spill] sm:$0xff] }
0x116d   : > { %v9114_v1 = vpop.f32.mrf.mxu0  ;;  %v9155_v29 = vpop.f32.mrf.mxu1  ;;  %v8687_v35 = vadd.f32 %v21161_v51, %v8127_v22 }
0x116e   : > { %v8685_v54 = vadd.f32 %v21160_v39, %v8125_v47  ;;  %v15847_v29 = vld [vmem:[%s17965_s28 + $0x84] sm:$0x3] }
0x116f   : > { %v9115_v31 = vpop.f32.mrf.mxu0  ;;  %v9156_v59 = vpop.f32.mrf.mxu1 }
0x1171   : > { %v9192_v13 = vpop.f32.mrf.mxu0  ;;  %v9233_v42 = vpop.f32.mrf.mxu1 }
0x1172   : > { %v19911_v37 = vadd.f32 %v9192_v13, %v21162_v19  ;;  %v19914_v50 = vadd.f32 %v9233_v42, %v21163_v10 }
0x1173   : > { %v9194_v18 = vpop.f32.mrf.mxu0  ;;  %v9235_v5 = vpop.f32.mrf.mxu1 }
0x1174   : > { %v19916_v44 = vadd.f32 %v9194_v18, %v8685_v54  ;;  %v19918_v0 = vadd.f32 %v9235_v5, %v8687_v35 }
0x1175   : > { %v9196_v58 = vpop.f32.mrf.mxu0  ;;  %v9237_v46 = vpop.f32.mrf.mxu1 }
0x1176   : > { %v9625_v58 = vsel %vm996_vm4, %v15866_v56, 0  ;;  %v9631_v46 = vsel %vm996_vm4, %v15868_v52, 0  ;;  %v15904_v52 = vcombine.high %v15894_v60, %v15898_v38 }
0x1177   : > { %v9197_v6 = vpop.f32.mrf.mxu0  ;;  %v9238_v11 = vpop.f32.mrf.mxu1 }
0x1178   : > { %v15903_v6 = vcombine.low %v15894_v60, %v15898_v38 }
0x1179   : > { %v9319_v36 = vpop.f32.mrf.mxu0  ;;  %v9398_v49 = vpop.f32.mrf.mxu1 }
0x117a   : > { %v9323_v24 = vadd.f32 %v15839_v55, %v9319_v36  ;;  %v9402_v28 = vadd.f32 %v15843_v57, %v9398_v49  ;;  %v19983_v55 = vld [vmem:[%s17970_s7 + $0x450] sm:$0xff]  ;;  %v19989_v36 = vld [vmem:[%s17970_s7 + $0x458] sm:$0xff]  ;;  %v10179_v49 = vsel %vm996_vm4, %v15903_v6, 0 }
0x117b   : > { %v17104_v26 = vpop.f32.mrf.mxu0  ;;  %v17111_v9 = vpop.f32.mrf.mxu1  ;;  %v19986_v57 = vld [vmem:[%s17970_s7 + $0x470] sm:$0x11] }
0x117c   : > { %v15842_v40 = vmul.f32 -1.442695, %v9323_v24  ;;  %v15846_v41 = vmul.f32 -1.442695, %v9402_v28  ;;  %v15906_v24 = vcombine.high %v19983_v55, %v19986_v57  ;;  %v19996_v28 = vld [vmem:[%s17970_s7 + $0x478] sm:$0x11]  ;;  %v15905_v9 = vcombine.low %v19983_v55, %v19986_v57 }
0x117d   : > { %v15908_v26 = vcombine.high %v19989_v36, %v19996_v28  ;;  %v20093_v55 = vld [vmem:[%s17970_s7 + $0x490] sm:$0xff] }
0x117e   : > { %17626 = vpow2.f32 %v15842_v40  ;;  %v9477_v34 = vpop.f32.mrf.mxu0  ;;  %v9551_v33 = vpop.f32.mrf.mxu1  ;;  %v15907_v40 = vcombine.low %v19989_v36, %v19996_v28  ;;  %v20096_v57 = vld [vmem:[%s17970_s7 + $0x4b0] sm:$0x11]  ;;  %v20099_v36 = vld [vmem:[%s17970_s7 + $0x498] sm:$0xff] }
0x117f   : > { %17628 = vpow2.f32 %v15846_v41  ;;  %v9555_v1 = vadd.f32 %v15850_v15, %v9551_v33  ;;  %v9481_v48 = vadd.f32 %v15847_v29, %v9477_v34 }
0x1180   : > { %v17118_v43 = vpop.f32.mrf.mxu0  ;;  %v17125_v21 = vpop.f32.mrf.mxu1 }
0x1181   : > { %v15853_v53 = vmul.f32 -1.442695, %v9555_v1 }
0x1183   : > { %17630 = vpow2.f32 %v15853_v53 }
0x1184   : > { %17632 = vtanh.f32 %v9481_v48 }
0x118b   : > { %v17627_v12 = vpop.eup %17626 }
0x118c   : > { %v17629_v2 = vpop.eup %17628  ;;  %v9327_v31 = vadd.f32 1.0, %v17627_v12 }
0x118d   : > { %v9406_v59 = vadd.f32 1.0, %v17629_v2 }
0x118e   : > { %17634 = vrcp.f32 %v9327_v31 }
0x118f   : > { %17636 = vrcp.f32 %v9406_v59 }
0x1190   : > { %v17631_v47 = vpop.eup %17630 }
0x1191   : > { %v17633_v22 = vpop.eup %17632  ;;  %v9559_v54 = vadd.f32 1.0, %v17631_v47 }
0x1193   : > { %17638 = vrcp.f32 %v9559_v54 }
0x119b   : > { %v17635_v13 = vpop.eup %17634 }
0x119c   : > { %v17637_v42 = vpop.eup %17636  ;;  %v9563_v39 = vmul.f32 %v17635_v13, %v17633_v22 }
0x119d   : > { %v9562_v51 = vmul.f32 %v17637_v42, %v19787_v30  ;;  %v15893_v30 = vld [vmem:[%s17970_s7 + $0x440] sm:$0xff] }
0x119e   : > { %v15902_v20 = vcombine.high %v15893_v30, %v15897_v23  ;;  %v15901_v56 = vcombine.low %v15893_v30, %v15897_v23 }
0x119f   : > { %v19925_v35 = vadd.f32 %v9563_v39, %v9562_v51  ;;  %v15878_v51 = vld [vmem:[%s17965_s28 + $0x88] sm:$0x3] }
0x11a0   : > { %v17639_v19 = vpop.eup %17638  ;;  %v10173_v11 = vsel %vm996_vm4, %v15901_v56, 0  ;;  %v15886_v56 = vld [vmem:[%s17965_s28 + $0x8c] sm:$0x3] }
0x11a1   : > { %17640 = vtanh.f32 %v19925_v35 }
0x11ae   : > { %v17641_v10 = vpop.eup %17640 }
0x11af   : > { %v9566_v18 = vmul.f32 %v17641_v10, %v17639_v19  ;;  %v15882_v19 = vld [vmem:[%s17965_s28 + $0x8a] sm:$0x3] }
0x11b1   : > { %v9567_v5 = vpack.c.bf16 %v9566_v18, %v9566_v18 }
0x11b3   : > { %15871 = vmatmul.mubr.msk.bf16.vlgmr.msra.gmra.mxu0 %vm292_vm2, %v9567_v5  ;;  %15873 = vmatmul.mubr.msk.bf16.vlgmr.msra.gmra.mxu1 %vm292_vm2, %v9567_v5 }
0x11b4   : > { %9733 = vmatpush1.bf16.msra.mxu0 %v9625_v58  ;;  %9774 = vmatpush1.bf16.msra.mxu1 %v9631_v46 }
0x11b5   : > { %9750 = vmatprep.mubr.bf16.mxu0 %v21140_v45  ;;  %9791 = vmatprep.mubr.bf16.mxu1 %v21140_v45 }
0x11b6   : > { %17126 = vmatprep.subr.mxu0 %v21136_v8  ;;  %17133 = vmatprep.subr.mxu1 %v21136_v8 }
0x11bb   : > { %15875 = vmatmul.mubr.msk.bf16.vlgmr.msra.gmra.mxu0 %vm292_vm2, %v9567_v5  ;;  %15877 = vmatmul.mubr.msk.bf16.vlgmr.msra.gmra.mxu1 %vm292_vm2, %v9567_v5 }
0x11bc   : > { %17127 = vmatpush3.msk.msra.mxu0 %vm296_vm1, %v19661_v17  ;;  %17134 = vmatpush3.msk.msra.mxu1 %vm296_vm1, %v19668_v62 }
0x11bd   : > { %17128 = vmatprep.subr.mxu0 %v21136_v8  ;;  %17135 = vmatprep.subr.mxu1 %v21136_v8 }
0x11be   : > { %17129 = vmatpush3.msra.mxu0 %v19677_v4  ;;  %17136 = vmatpush3.msra.mxu1 %v19683_v61 }
0x11bf   : > { %17130 = vmatprep.mubr.msk.f32.mxu0 %vm17912_vm3, %v21136_v8  ;;  %17137 = vmatprep.mubr.msk.f32.mxu1 %vm17912_vm3, %v21136_v8 }
0x11c0   : > { %17140 = vmatprep.subr.mxu0 %v21136_v8  ;;  %17147 = vmatprep.subr.mxu1 %v21136_v8 }
0x11c3   : > { %17131 = vmatmul.mubr.msk.f32.vlgmr.msra.gmra.mxu0 %vm292_vm2, %v9566_v18  ;;  %17138 = vmatmul.mubr.msk.f32.vlgmr.msra.gmra.mxu1 %vm292_vm2, %v9566_v18 }
0x11c4   : > { %17141 = vmatpush3.msk.msra.mxu0 %vm296_vm1, %v19697_v3  ;;  %17148 = vmatpush3.msk.msra.mxu1 %vm296_vm1, %v19704_v27 }
0x11c5   : > { %17142 = vmatprep.subr.mxu0 %v21136_v8  ;;  %17149 = vmatprep.subr.mxu1 %v21136_v8 }
0x11c6   : > { %17143 = vmatpush3.msra.mxu0 %v19713_v7  ;;  %17144 = vmatprep.mubr.msk.f32.mxu0 %vm17912_vm3, %v21136_v8 }
0x11c7   : > { %17150 = vmatpush3.msra.mxu1 %v19721_v16  ;;  %17151 = vmatprep.mubr.msk.f32.mxu1 %vm17912_vm3, %v21136_v8 }
0x11c8   : > { %17145 = vmatmul.mubr.msk.f32.vlgmr.msra.gmra.mxu0 %vm292_vm2, %v9566_v18  ;;  %17152 = vmatmul.mubr.msk.f32.vlgmr.msra.gmra.mxu1 %vm292_vm2, %v9566_v18 }
0x11c9   : > { %10228 = vmatprep.mubr.bf16.mxu0 %v21140_v45  ;;  %10269 = vmatprep.mubr.bf16.mxu1 %v21140_v45 }
0x11ca   : > { %15909 = vmatprep.subr.msk.bf16.mxu0 %vm996_vm4, %v15902_v20  ;;  %15911 = vmatprep.subr.msk.bf16.mxu1 %vm996_vm4, %v15904_v52  ;;  %v15889_v20 = vld [vmem:[%s17965_s28 + $0x8e] sm:$0x3] }
0x11cb   : > { %10211 = vmatpush1.bf16.msra.mxu0 %v10173_v11  ;;  %10252 = vmatpush1.bf16.msra.mxu1 %v10179_v49 }
0x11cc   : > { %15913 = vmatprep.subr.msk.bf16.mxu0 %vm996_vm4, %v15906_v24  ;;  %15915 = vmatprep.subr.msk.bf16.mxu1 %vm996_vm4, %v15908_v26 }
0x1273   : > { %v9670_v41 = vpop.f32.mrf.mxu0  ;;  %v9711_v34 = vpop.f32.mrf.mxu1 }
0x1274   : > { %v20007_v33 = vadd.f32 %v9670_v41, %v19891_v32  ;;  %v20010_v43 = vadd.f32 %v9711_v34, %v19894_v14 }
0x1275   : > { %v9672_v21 = vpop.f32.mrf.mxu0  ;;  %v9713_v15 = vpop.f32.mrf.mxu1 }
0x1276   : > { %v20013_v1 = vadd.f32 %v9672_v21, %v19899_v25  ;;  %v20016_v29 = vadd.f32 %v9713_v15, %v19902_v63 }
0x1277   : > { %v9674_v53 = vpop.f32.mrf.mxu0  ;;  %v9715_v48 = vpop.f32.mrf.mxu1 }
0x1279   : > { %v9675_v12 = vpop.f32.mrf.mxu0  ;;  %v9716_v2 = vpop.f32.mrf.mxu1 }
0x127b   : > { %v9752_v31 = vpop.f32.mrf.mxu0  ;;  %v9793_v32 = vpop.f32.mrf.mxu1 }
0x127c   : > { %v20019_v59 = vadd.f32 %v9752_v31, %v19911_v37  ;;  %v20022_v14 = vadd.f32 %v9793_v32, %v19914_v50 }
0x127d   : > { %v9754_v47 = vpop.f32.mrf.mxu0  ;;  %v9795_v25 = vpop.f32.mrf.mxu1 }
0x127e   : > { %v20025_v22 = vadd.f32 %v9754_v47, %v19916_v44  ;;  %v20028_v63 = vadd.f32 %v9795_v25, %v19918_v0 }
0x127f   : > { %v9756_v13 = vpop.f32.mrf.mxu0  ;;  %v9797_v42 = vpop.f32.mrf.mxu1 }
0x1280   : > { %v10185_v13 = vsel %vm996_vm4, %v15905_v9, 0  ;;  %v10191_v42 = vsel %vm996_vm4, %v15907_v40, 0  ;;  %v15945_v9 = vcombine.high %v20093_v55, %v20096_v57  ;;  %v20106_v40 = vld [vmem:[%s17970_s7 + $0x4b8] sm:$0x11] }
0x1281   : > { %v9757_v39 = vpop.f32.mrf.mxu0  ;;  %v9798_v54 = vpop.f32.mrf.mxu1 }
0x1282   : > { %v15947_v39 = vcombine.high %v20099_v36, %v20106_v40  ;;  %v15944_v54 = vcombine.low %v20093_v55, %v20096_v57  ;;  %v20174_v55 = vld [vmem:[%s21126_s1 + $0x18] sm:$0x3]  ;;  %v20183_v57 = vld [vmem:[%s21126_s1] sm:$0xff] }
0x1283   : > { %v9879_v37 = vpop.f32.mrf.mxu0  ;;  %v9958_v10 = vpop.f32.mrf.mxu1 }
0x1284   : > { %v9883_v50 = vadd.f32 %v15878_v51, %v9879_v37  ;;  %v9962_v18 = vadd.f32 %v15882_v19, %v9958_v10  ;;  %v15946_v51 = vcombine.low %v20099_v36, %v20106_v40  ;;  %v20189_v36 = vld [vmem:[%s21126_s1 + $0x10] sm:$0xff]  ;;  %v20203_v40 = vld [vmem:[%s21126_s1 + $0x28] sm:$0x3] }
0x1285   : > { %v17132_v5 = vpop.f32.mrf.mxu0  ;;  %v17139_v58 = vpop.f32.mrf.mxu1 }
0x1286   : > { %v15881_v46 = vmul.f32 -1.442695, %v9883_v50  ;;  %v15885_v44 = vmul.f32 -1.442695, %v9962_v18 }
0x1288   : > { %17642 = vpow2.f32 %v15881_v46  ;;  %v10037_v30 = vpop.f32.mrf.mxu0  ;;  %v10111_v0 = vpop.f32.mrf.mxu1 }
0x1289   : > { %17644 = vpow2.f32 %v15885_v44  ;;  %v10115_v38 = vadd.f32 %v15889_v20, %v10111_v0  ;;  %v10041_v6 = vadd.f32 %v15886_v56, %v10037_v30 }
0x128a   : > { %v17146_v23 = vpop.f32.mrf.mxu0  ;;  %v17153_v60 = vpop.f32.mrf.mxu1 }
0x128b   : > { %v15892_v52 = vmul.f32 -1.442695, %v10115_v38 }
0x128d   : > { %17646 = vpow2.f32 %v15892_v52 }
0x128e   : > { %17648 = vtanh.f32 %v10041_v6 }
0x1295   : > { %v17643_v11 = vpop.eup %17642 }
0x1296   : > { %v17645_v49 = vpop.eup %17644  ;;  %v9887_v24 = vadd.f32 1.0, %v17643_v11 }
0x1297   : > { %v9966_v26 = vadd.f32 1.0, %v17645_v49 }
0x1298   : > { %17650 = vrcp.f32 %v9887_v24  ;;  %v15917_v24 = vld [vmem:[%s17965_s28 + $0x90] sm:$0x3] }
0x1299   : > { %17652 = vrcp.f32 %v9966_v26  ;;  %v15921_v26 = vld [vmem:[%s17965_s28 + $0x92] sm:$0x3] }
0x129a   : > { %v17647_v41 = vpop.eup %17646 }
0x129b   : > { %v17649_v34 = vpop.eup %17648  ;;  %v10119_v48 = vadd.f32 1.0, %v17647_v41 }
0x129d   : > { %17654 = vrcp.f32 %v10119_v48 }
0x12a5   : > { %v17651_v21 = vpop.eup %17650 }
0x12a6   : > { %v17653_v15 = vpop.eup %17652  ;;  %v10123_v53 = vmul.f32 %v17651_v21, %v17649_v34 }
0x12a7   : > { %v10122_v12 = vmul.f32 %v17653_v15, %v19925_v35 }
0x12a9   : > { %v20035_v2 = vadd.f32 %v10123_v53, %v10122_v12 }
0x12aa   : > { %v17655_v31 = vpop.eup %17654 }
0x12ab   : > { %17656 = vtanh.f32 %v20035_v2 }
0x12b8   : > { %v17657_v32 = vpop.eup %17656 }
0x12b9   : > { %v10126_v47 = vmul.f32 %v17657_v32, %v17655_v31  ;;  %v15928_v32 = vld [vmem:[%s17965_s28 + $0x96] sm:$0x3] }
0x12bb   : > { %v10127_v25 = vpack.c.bf16 %v10126_v47, %v10126_v47 }
0x12bd   : > { %15910 = vmatmul.mubr.msk.bf16.vlgmr.msra.gmra.mxu0 %vm292_vm2, %v10127_v25  ;;  %15912 = vmatmul.mubr.msk.bf16.vlgmr.msra.gmra.mxu1 %vm292_vm2, %v10127_v25 }
0x12be   : > { %10293 = vmatpush1.bf16.msra.mxu0 %v10185_v13  ;;  %10334 = vmatpush1.bf16.msra.mxu1 %v10191_v42 }
0x12bf   : > { %10310 = vmatprep.mubr.bf16.mxu0 %v21140_v45  ;;  %10351 = vmatprep.mubr.bf16.mxu1 %v21140_v45 }
0x12c0   : > { %17154 = vmatprep.subr.mxu0 %v21136_v8  ;;  %17161 = vmatprep.subr.mxu1 %v21136_v8 }
0x12c5   : > { %15914 = vmatmul.mubr.msk.bf16.vlgmr.msra.gmra.mxu0 %vm292_vm2, %v10127_v25  ;;  %15916 = vmatmul.mubr.msk.bf16.vlgmr.msra.gmra.mxu1 %vm292_vm2, %v10127_v25  ;;  %v15925_v25 = vld [vmem:[%s17965_s28 + $0x94] sm:$0x3] }
0x12c6   : > { %17155 = vmatpush3.msk.msra.mxu0 %vm296_vm1, %v19661_v17  ;;  %17162 = vmatpush3.msk.msra.mxu1 %vm296_vm1, %v19668_v62  ;;  %v15932_v17 = vld [vmem:[%s17970_s7 + $0x480] sm:$0xff] }
0x12c7   : > { %17156 = vmatprep.subr.mxu0 %v21136_v8  ;;  %17163 = vmatprep.subr.mxu1 %v21136_v8  ;;  %v15936_v62 = vld [vmem:[%s17970_s7 + $0x4a0] sm:$0x11] }
0x12c8   : > { %17157 = vmatpush3.msra.mxu0 %v19677_v4  ;;  %17164 = vmatpush3.msra.mxu1 %v19683_v61  ;;  %v15933_v4 = vld [vmem:[%s17970_s7 + $0x488] sm:$0xff]  ;;  %v15941_v61 = vcombine.high %v15932_v17, %v15936_v62 }
0x12c9   : > { %17158 = vmatprep.mubr.msk.f32.mxu0 %vm17912_vm3, %v21136_v8  ;;  %17165 = vmatprep.mubr.msk.f32.mxu1 %vm17912_vm3, %v21136_v8 }
0x12ca   : > { %17168 = vmatprep.subr.mxu0 %v21136_v8  ;;  %17175 = vmatprep.subr.mxu1 %v21136_v8 }
0x12cd   : > { %17159 = vmatmul.mubr.msk.f32.vlgmr.msra.gmra.mxu0 %vm292_vm2, %v10126_v47  ;;  %17166 = vmatmul.mubr.msk.f32.vlgmr.msra.gmra.mxu1 %vm292_vm2, %v10126_v47 }
0x12ce   : > { %17169 = vmatpush3.msk.msra.mxu0 %vm296_vm1, %v19697_v3  ;;  %17176 = vmatpush3.msk.msra.mxu1 %vm296_vm1, %v19704_v27  ;;  %v15937_v3 = vld [vmem:[%s17970_s7 + $0x4a8] sm:$0x11]  ;;  %v15940_v27 = vcombine.low %v15932_v17, %v15936_v62 }
0x12cf   : > { %17170 = vmatprep.subr.mxu0 %v21136_v8  ;;  %17177 = vmatprep.subr.mxu1 %v21136_v8 }
0x12d0   : > { %17171 = vmatpush3.msra.mxu0 %v19713_v7  ;;  %17172 = vmatprep.mubr.msk.f32.mxu0 %vm17912_vm3, %v21136_v8  ;;  %v15943_v7 = vcombine.high %v15933_v4, %v15937_v3  ;;  %v10733_v35 = vsel %vm996_vm4, %v15940_v27, 0 }
0x12d1   : > { %17178 = vmatpush3.msra.mxu1 %v19721_v16  ;;  %17179 = vmatprep.mubr.msk.f32.mxu1 %vm17912_vm3, %v21136_v8  ;;  %v15942_v16 = vcombine.low %v15933_v4, %v15937_v3 }
0x12d2   : > { %17173 = vmatmul.mubr.msk.f32.vlgmr.msra.gmra.mxu0 %vm292_vm2, %v10126_v47  ;;  %17180 = vmatmul.mubr.msk.f32.vlgmr.msra.gmra.mxu1 %vm292_vm2, %v10126_v47 }
0x12d3   : > { %10788 = vmatprep.mubr.bf16.mxu0 %v21140_v45  ;;  %10829 = vmatprep.mubr.bf16.mxu1 %v21140_v45  ;;  %v10739_v28 = vsel %vm996_vm4, %v15942_v16, 0 }
0x12d4   : > { %15948 = vmatprep.subr.msk.bf16.mxu0 %vm996_vm4, %v15941_v61  ;;  %15950 = vmatprep.subr.msk.bf16.mxu1 %vm996_vm4, %v15943_v7 }
0x12d5   : > { %10771 = vmatpush1.bf16.msra.mxu0 %v10733_v35  ;;  %10812 = vmatpush1.bf16.msra.mxu1 %v10739_v28 }
0x12d6   : > { %15952 = vmatprep.subr.msk.bf16.mxu0 %vm996_vm4, %v15945_v9  ;;  %15954 = vmatprep.subr.msk.bf16.mxu1 %vm996_vm4, %v15947_v39 }
0x137d   : > { %v10230_v19 = vpop.f32.mrf.mxu0  ;;  %v10271_v37 = vpop.f32.mrf.mxu1 }
0x137e   : > { %v20117_v10 = vadd.f32 %v10230_v19, %v20007_v33  ;;  %v20120_v50 = vadd.f32 %v10271_v37, %v20010_v43 }
0x137f   : > { %v10232_v18 = vpop.f32.mrf.mxu0  ;;  %v10273_v5 = vpop.f32.mrf.mxu1 }
0x1380   : > { %v20123_v58 = vadd.f32 %v10232_v18, %v20013_v1  ;;  %v20126_v46 = vadd.f32 %v10273_v5, %v20016_v29 }
0x1381   : > { %v10234_v44 = vpop.f32.mrf.mxu0  ;;  %v10275_v30 = vpop.f32.mrf.mxu1 }
0x1382   : > { %v10745_v44 = vsel %vm996_vm4, %v15944_v54, 0  ;;  %v10751_v30 = vsel %vm996_vm4, %v15946_v51, 0  ;;  %v20210_v54 = vld [vmem:[%s21126_s1 + $0x38] sm:$0x3]  ;;  %v20219_v51 = vld [vmem:[%s21126_s1 + $0x20] sm:$0xff] }
0x1383   : > { %v10235_v0 = vpop.f32.mrf.mxu0  ;;  %v10276_v23 = vpop.f32.mrf.mxu1 }
0x1384   : > { %v20227_v0 = vld [vmem:[%s21126_s1 + $0x30] sm:$0xff]  ;;  %v15971_v23 = vld [vmem:[%s17970_s7 + $0x4c0] sm:$0xff] }
0x1385   : > { %v10312_v60 = vpop.f32.mrf.mxu0  ;;  %v10353_v33 = vpop.f32.mrf.mxu1 }
0x1386   : > { %v20129_v20 = vadd.f32 %v10312_v60, %v20019_v59  ;;  %v20132_v43 = vadd.f32 %v10353_v33, %v20022_v14  ;;  %v15975_v60 = vld [vmem:[%s17970_s7 + $0x4e0] sm:$0x11]  ;;  %v15972_v33 = vld [vmem:[%s17970_s7 + $0x4c8] sm:$0xff] }
0x1387   : > { %v10314_v38 = vpop.f32.mrf.mxu0  ;;  %v10355_v1 = vpop.f32.mrf.mxu1 }
0x1388   : > { %v20135_v56 = vadd.f32 %v10314_v38, %v20025_v22  ;;  %v20138_v29 = vadd.f32 %v10355_v1, %v20028_v63  ;;  %v15980_v38 = vcombine.high %v15971_v23, %v15975_v60  ;;  %v15976_v1 = vld [vmem:[%s17970_s7 + $0x4e8] sm:$0x11] }
0x1389   : > { %v10316_v52 = vpop.f32.mrf.mxu0  ;;  %v10357_v6 = vpop.f32.mrf.mxu1 }
0x138a   : > { %v15979_v52 = vcombine.low %v15971_v23, %v15975_v60  ;;  %v15982_v6 = vcombine.high %v15972_v33, %v15976_v1 }
0x138b   : > { %v10317_v11 = vpop.f32.mrf.mxu0  ;;  %v10358_v49 = vpop.f32.mrf.mxu1 }
0x138c   : > { %v15981_v11 = vcombine.low %v15972_v33, %v15976_v1  ;;  %v11293_v49 = vsel %vm996_vm4, %v15979_v52, 0  ;;  %v15964_v52 = vld [vmem:[%s17965_s28 + $0x9c] sm:$0x3] }
0x138d   : > { %v10439_v59 = vpop.f32.mrf.mxu0  ;;  %v10518_v41 = vpop.f32.mrf.mxu1 }
0x138e   : > { %v10443_v14 = vadd.f32 %v15917_v24, %v10439_v59  ;;  %v10522_v34 = vadd.f32 %v15921_v26, %v10518_v41  ;;  %v20243_v24 = vld [vmem:[%s17970_s7 + $0x4d0] sm:$0xff]  ;;  %v20249_v59 = vld [vmem:[%s17970_s7 + $0x4d8] sm:$0xff]  ;;  %v11299_v41 = vsel %vm996_vm4, %v15981_v11, 0 }
0x138f   : > { %v17160_v21 = vpop.f32.mrf.mxu0  ;;  %v17167_v15 = vpop.f32.mrf.mxu1  ;;  %v20246_v26 = vld [vmem:[%s17970_s7 + $0x4f0] sm:$0x11] }
0x1390   : > { %v15920_v53 = vmul.f32 -1.442695, %v10443_v14  ;;  %v15924_v22 = vmul.f32 -1.442695, %v10522_v34  ;;  %v15984_v14 = vcombine.high %v20243_v24, %v20246_v26  ;;  %v20256_v34 = vld [vmem:[%s17970_s7 + $0x4f8] sm:$0x11]  ;;  %v15983_v15 = vcombine.low %v20243_v24, %v20246_v26 }
0x1391   : > { %v15986_v21 = vcombine.high %v20249_v59, %v20256_v34  ;;  %v16014_v24 = vld [vmem:[%s17970_s7 + $0x520] sm:$0x11]  ;;  %v16011_v26 = vld [vmem:[%s17970_s7 + $0x508] sm:$0xff] }
0x1392   : > { %17658 = vpow2.f32 %v15920_v53  ;;  %v10597_v48 = vpop.f32.mrf.mxu0  ;;  %v10671_v63 = vpop.f32.mrf.mxu1  ;;  %v15985_v53 = vcombine.low %v20249_v59, %v20256_v34  ;;  %v16015_v34 = vld [vmem:[%s17970_s7 + $0x528] sm:$0x11] }
0x1393   : > { %17660 = vpow2.f32 %v15924_v22  ;;  %v10675_v47 = vadd.f32 %v15928_v32, %v10671_v63  ;;  %v10601_v42 = vadd.f32 %v15925_v25, %v10597_v48 }
0x1394   : > { %v17174_v12 = vpop.f32.mrf.mxu0  ;;  %v17181_v31 = vpop.f32.mrf.mxu1 }
0x1395   : > { %v15931_v13 = vmul.f32 -1.442695, %v10675_v47 }
0x1397   : > { %17662 = vpow2.f32 %v15931_v13 }
0x1398   : > { %17664 = vtanh.f32 %v10601_v42 }
0x139f   : > { %v17659_v17 = vpop.eup %17658 }
0x13a0   : > { %v17661_v62 = vpop.eup %17660  ;;  %v10447_v4 = vadd.f32 1.0, %v17659_v17 }
0x13a1   : > { %v10526_v61 = vadd.f32 1.0, %v17661_v62 }
0x13a2   : > { %17666 = vrcp.f32 %v10447_v4 }
0x13a3   : > { %17668 = vrcp.f32 %v10526_v61 }
0x13a4   : > { %v17663_v3 = vpop.eup %17662 }
0x13a5   : > { %v17665_v27 = vpop.eup %17664  ;;  %v10679_v28 = vadd.f32 1.0, %v17663_v3 }
0x13a7   : > { %17670 = vrcp.f32 %v10679_v28 }
0x13af   : > { %v17667_v7 = vpop.eup %17666 }
0x13b0   : > { %v17669_v16 = vpop.eup %17668  ;;  %v10683_v35 = vmul.f32 %v17667_v7, %v17665_v27 }
0x13b1   : > { %v10682_v9 = vmul.f32 %v17669_v16, %v20035_v2  ;;  %v20167_v2 = vld [vmem:[%s21126_s1 + $0x8] sm:$0x3] }
0x13b3   : > { %v20145_v39 = vadd.f32 %v10683_v35, %v10682_v9  ;;  %v15956_v9 = vld [vmem:[%s17965_s28 + $0x98] sm:$0x3] }
0x13b4   : > { %v17671_v19 = vpop.eup %17670 }
0x13b5   : > { %17672 = vtanh.f32 %v20145_v39 }
0x13c2   : > { %v17673_v37 = vpop.eup %17672 }
0x13c3   : > { %v10686_v18 = vmul.f32 %v17673_v37, %v17671_v19  ;;  %v15960_v19 = vld [vmem:[%s17965_s28 + $0x9a] sm:$0x3] }
0x13c5   : > { %v10687_v5 = vpack.c.bf16 %v10686_v18, %v10686_v18 }
0x13c7   : > { %15949 = vmatmul.mubr.msk.bf16.vlgmr.msra.gmra.mxu0 %vm292_vm2, %v10687_v5  ;;  %15951 = vmatmul.mubr.msk.bf16.vlgmr.msra.gmra.mxu1 %vm292_vm2, %v10687_v5 }
0x13c8   : > { %10853 = vmatpush1.bf16.msra.mxu0 %v10745_v44  ;;  %10894 = vmatpush1.bf16.msra.mxu1 %v10751_v30 }
0x13c9   : > { %10870 = vmatprep.mubr.bf16.mxu0 %v21140_v45  ;;  %10911 = vmatprep.mubr.bf16.mxu1 %v21140_v45 }
0x13ca   : > { %17182 = vmatprep.subr.mxu0 %v21136_v8  ;;  %17189 = vmatprep.subr.mxu1 %v21136_v8 }
0x13cf   : > { %15953 = vmatmul.mubr.msk.bf16.vlgmr.msra.gmra.mxu0 %vm292_vm2, %v10687_v5  ;;  %15955 = vmatmul.mubr.msk.bf16.vlgmr.msra.gmra.mxu1 %vm292_vm2, %v10687_v5 }
0x13d0   : > { %17183 = vmatpush3.msk.msra.mxu0 %vm296_vm1, %v20167_v2  ;;  %17190 = vmatpush3.msk.msra.mxu1 %vm296_vm1, %v20174_v55 }
0x13d1   : > { %17184 = vmatprep.subr.mxu0 %v21136_v8  ;;  %17191 = vmatprep.subr.mxu1 %v21136_v8 }
0x13d2   : > { %17185 = vmatpush3.msra.mxu0 %v20183_v57  ;;  %17192 = vmatpush3.msra.mxu1 %v20189_v36 }
0x13d3   : > { %17186 = vmatprep.mubr.msk.f32.mxu0 %vm17912_vm3, %v21136_v8  ;;  %17193 = vmatprep.mubr.msk.f32.mxu1 %vm17912_vm3, %v21136_v8 }
0x13d4   : > { %17196 = vmatprep.subr.mxu0 %v21136_v8  ;;  %17203 = vmatprep.subr.mxu1 %v21136_v8 }
0x13d7   : > { %17187 = vmatmul.mubr.msk.f32.vlgmr.msra.gmra.mxu0 %vm292_vm2, %v10686_v18  ;;  %17194 = vmatmul.mubr.msk.f32.vlgmr.msra.gmra.mxu1 %vm292_vm2, %v10686_v18 }
0x13d8   : > { %17197 = vmatpush3.msk.msra.mxu0 %vm296_vm1, %v20203_v40  ;;  %17204 = vmatpush3.msk.msra.mxu1 %vm296_vm1, %v20210_v54 }
0x13d9   : > { %17198 = vmatprep.subr.mxu0 %v21136_v8  ;;  %17205 = vmatprep.subr.mxu1 %v21136_v8 }
0x13da   : > { %17199 = vmatpush3.msra.mxu0 %v20219_v51  ;;  %17200 = vmatprep.mubr.msk.f32.mxu0 %vm17912_vm3, %v21136_v8 }
0x13db   : > { %17206 = vmatpush3.msra.mxu1 %v20227_v0  ;;  %17207 = vmatprep.mubr.msk.f32.mxu1 %vm17912_vm3, %v21136_v8 }
0x13dc   : > { %17201 = vmatmul.mubr.msk.f32.vlgmr.msra.gmra.mxu0 %vm292_vm2, %v10686_v18  ;;  %17208 = vmatmul.mubr.msk.f32.vlgmr.msra.gmra.mxu1 %vm292_vm2, %v10686_v18 }
0x13dd   : > { %11348 = vmatprep.mubr.bf16.mxu0 %v21140_v45  ;;  %11389 = vmatprep.mubr.bf16.mxu1 %v21140_v45 }
0x13de   : > { %15987 = vmatprep.subr.msk.bf16.mxu0 %vm996_vm4, %v15980_v38  ;;  %15989 = vmatprep.subr.msk.bf16.mxu1 %vm996_vm4, %v15982_v6  ;;  %v15967_v38 = vld [vmem:[%s17965_s28 + $0x9e] sm:$0x3] }
0x13df   : > { %11331 = vmatpush1.bf16.msra.mxu0 %v11293_v49  ;;  %11372 = vmatpush1.bf16.msra.mxu1 %v11299_v41 }
0x13e0   : > { %15991 = vmatprep.subr.msk.bf16.mxu0 %vm996_vm4, %v15984_v14  ;;  %15993 = vmatprep.subr.msk.bf16.mxu1 %vm996_vm4, %v15986_v21 }
0x1487   : > { %v10790_v22 = vpop.f32.mrf.mxu0  ;;  %v10831_v48 = vpop.f32.mrf.mxu1 }
0x1488   : > { %v20267_v63 = vadd.f32 %v10790_v22, %v20117_v10  ;;  %v20270_v12 = vadd.f32 %v10831_v48, %v20120_v50 }
0x1489   : > { %v10792_v31 = vpop.f32.mrf.mxu0  ;;  %v10833_v32 = vpop.f32.mrf.mxu1 }
0x148a   : > { %v20273_v47 = vadd.f32 %v10792_v31, %v20123_v58  ;;  %v20276_v25 = vadd.f32 %v10833_v32, %v20126_v46 }
0x148b   : > { %v10794_v13 = vpop.f32.mrf.mxu0  ;;  %v10835_v42 = vpop.f32.mrf.mxu1 }
0x148d   : > { %v10795_v17 = vpop.f32.mrf.mxu0  ;;  %v10836_v62 = vpop.f32.mrf.mxu1 }
0x148f   : > { %v10872_v4 = vpop.f32.mrf.mxu0  ;;  %v10913_v10 = vpop.f32.mrf.mxu1 }
0x1490   : > { %v20279_v61 = vadd.f32 %v10872_v4, %v20129_v20  ;;  %v20282_v50 = vadd.f32 %v10913_v10, %v20132_v43 }
0x1491   : > { %v10874_v3 = vpop.f32.mrf.mxu0  ;;  %v10915_v58 = vpop.f32.mrf.mxu1 }
0x1492   : > { %v20285_v27 = vadd.f32 %v10874_v3, %v20135_v56  ;;  %v20288_v46 = vadd.f32 %v10915_v58, %v20138_v29 }
0x1493   : > { %v10876_v7 = vpop.f32.mrf.mxu0  ;;  %v10917_v16 = vpop.f32.mrf.mxu1 }
0x1494   : > { %v11305_v7 = vsel %vm996_vm4, %v15983_v15, 0  ;;  %v11311_v16 = vsel %vm996_vm4, %v15985_v53, 0  ;;  %v16021_v53 = vcombine.high %v16011_v26, %v16015_v34 }
0x1495   : > { %v10877_v35 = vpop.f32.mrf.mxu0  ;;  %v10918_v28 = vpop.f32.mrf.mxu1 }
0x1496   : > { %v16020_v35 = vcombine.low %v16011_v26, %v16015_v34 }
0x1497   : > { %v10999_v20 = vpop.f32.mrf.mxu0  ;;  %v11078_v37 = vpop.f32.mrf.mxu1 }
0x1498   : > { %v11003_v43 = vadd.f32 %v15956_v9, %v10999_v20  ;;  %v11082_v18 = vadd.f32 %v15960_v19, %v11078_v37  ;;  %v20353_v9 = vld [vmem:[%s17970_s7 + $0x510] sm:$0xff]  ;;  %v20359_v20 = vld [vmem:[%s17970_s7 + $0x518] sm:$0xff]  ;;  %v11859_v37 = vsel %vm996_vm4, %v16020_v35, 0 }
0x1499   : > { %v17188_v5 = vpop.f32.mrf.mxu0  ;;  %v17195_v44 = vpop.f32.mrf.mxu1  ;;  %v20356_v19 = vld [vmem:[%s17970_s7 + $0x530] sm:$0x11] }
0x149a   : > { %v15959_v30 = vmul.f32 -1.442695, %v11003_v43  ;;  %v15963_v56 = vmul.f32 -1.442695, %v11082_v18  ;;  %v16023_v43 = vcombine.high %v20353_v9, %v20356_v19  ;;  %v20366_v18 = vld [vmem:[%s17970_s7 + $0x538] sm:$0x11]  ;;  %v16022_v44 = vcombine.low %v20353_v9, %v20356_v19 }
0x149b   : > { %v16025_v5 = vcombine.high %v20359_v20, %v20366_v18  ;;  %v16053_v9 = vld [vmem:[%s17970_s7 + $0x560] sm:$0x11]  ;;  %v16050_v19 = vld [vmem:[%s17970_s7 + $0x548] sm:$0xff] }
0x149c   : > { %17674 = vpow2.f32 %v15959_v30  ;;  %v11157_v23 = vpop.f32.mrf.mxu0  ;;  %v11231_v29 = vpop.f32.mrf.mxu1  ;;  %v16024_v30 = vcombine.low %v20359_v20, %v20366_v18  ;;  %v16054_v18 = vld [vmem:[%s17970_s7 + $0x568] sm:$0x11] }
0x149d   : > { %17676 = vpow2.f32 %v15963_v56  ;;  %v11235_v1 = vadd.f32 %v15967_v38, %v11231_v29  ;;  %v11161_v11 = vadd.f32 %v15964_v52, %v11157_v23 }
0x149e   : > { %v17202_v60 = vpop.f32.mrf.mxu0  ;;  %v17209_v33 = vpop.f32.mrf.mxu1 }
0x149f   : > { %v15970_v6 = vmul.f32 -1.442695, %v11235_v1 }
0x14a1   : > { %17678 = vpow2.f32 %v15970_v6 }
0x14a2   : > { %17680 = vtanh.f32 %v11161_v11 }
0x14a9   : > { %v17675_v49 = vpop.eup %17674 }
0x14aa   : > { %v17677_v41 = vpop.eup %17676  ;;  %v11007_v14 = vadd.f32 1.0, %v17675_v49 }
0x14ab   : > { %v11086_v21 = vadd.f32 1.0, %v17677_v41 }
0x14ac   : > { %17682 = vrcp.f32 %v11007_v14 }
0x14ad   : > { %17684 = vrcp.f32 %v11086_v21 }
0x14ae   : > { %v17679_v22 = vpop.eup %17678 }
0x14af   : > { %v17681_v48 = vpop.eup %17680  ;;  %v11239_v42 = vadd.f32 1.0, %v17679_v22 }
0x14b1   : > { %17686 = vrcp.f32 %v11239_v42 }
0x14b9   : > { %v17683_v31 = vpop.eup %17682 }
0x14ba   : > { %v17685_v32 = vpop.eup %17684  ;;  %v11243_v13 = vmul.f32 %v17683_v31, %v17681_v48 }
0x14bb   : > { %v11242_v17 = vmul.f32 %v17685_v32, %v20145_v39  ;;  %v16010_v39 = vld [vmem:[%s17970_s7 + $0x500] sm:$0xff] }
0x14bc   : > { %v16019_v59 = vcombine.high %v16010_v39, %v16014_v24  ;;  %v16018_v15 = vcombine.low %v16010_v39, %v16014_v24 }
0x14bd   : > { %v20295_v62 = vadd.f32 %v11243_v13, %v11242_v17  ;;  %v15995_v17 = vld [vmem:[%s17965_s28 + $0xa0] sm:$0x3] }
0x14be   : > { %v17687_v4 = vpop.eup %17686  ;;  %v11853_v28 = vsel %vm996_vm4, %v16018_v15, 0  ;;  %v16003_v15 = vld [vmem:[%s17965_s28 + $0xa4] sm:$0x3] }
0x14bf   : > { %17688 = vtanh.f32 %v20295_v62 }
0x14cc   : > { %v17689_v10 = vpop.eup %17688 }
0x14cd   : > { %v11246_v3 = vmul.f32 %v17689_v10, %v17687_v4  ;;  %v15999_v4 = vld [vmem:[%s17965_s28 + $0xa2] sm:$0x3] }
0x14cf   : > { %v11247_v58 = vpack.c.bf16 %v11246_v3, %v11246_v3 }
0x14d1   : > { %15988 = vmatmul.mubr.msk.bf16.vlgmr.msra.gmra.mxu0 %vm292_vm2, %v11247_v58  ;;  %15990 = vmatmul.mubr.msk.bf16.vlgmr.msra.gmra.mxu1 %vm292_vm2, %v11247_v58 }
0x14d2   : > { %11413 = vmatpush1.bf16.msra.mxu0 %v11305_v7  ;;  %11454 = vmatpush1.bf16.msra.mxu1 %v11311_v16 }
0x14d3   : > { %11430 = vmatprep.mubr.bf16.mxu0 %v21140_v45  ;;  %11471 = vmatprep.mubr.bf16.mxu1 %v21140_v45 }
0x14d4   : > { %17210 = vmatprep.subr.mxu0 %v21136_v8  ;;  %17217 = vmatprep.subr.mxu1 %v21136_v8 }
0x14d9   : > { %15992 = vmatmul.mubr.msk.bf16.vlgmr.msra.gmra.mxu0 %vm292_vm2, %v11247_v58  ;;  %15994 = vmatmul.mubr.msk.bf16.vlgmr.msra.gmra.mxu1 %vm292_vm2, %v11247_v58 }
0x14da   : > { %17211 = vmatpush3.msk.msra.mxu0 %vm296_vm1, %v20167_v2  ;;  %17218 = vmatpush3.msk.msra.mxu1 %vm296_vm1, %v20174_v55 }
0x14db   : > { %17212 = vmatprep.subr.mxu0 %v21136_v8  ;;  %17219 = vmatprep.subr.mxu1 %v21136_v8 }
0x14dc   : > { %17213 = vmatpush3.msra.mxu0 %v20183_v57  ;;  %17220 = vmatpush3.msra.mxu1 %v20189_v36 }
0x14dd   : > { %17214 = vmatprep.mubr.msk.f32.mxu0 %vm17912_vm3, %v21136_v8  ;;  %17221 = vmatprep.mubr.msk.f32.mxu1 %vm17912_vm3, %v21136_v8 }
0x14de   : > { %17224 = vmatprep.subr.mxu0 %v21136_v8  ;;  %17231 = vmatprep.subr.mxu1 %v21136_v8 }
0x14e1   : > { %17215 = vmatmul.mubr.msk.f32.vlgmr.msra.gmra.mxu0 %vm292_vm2, %v11246_v3  ;;  %17222 = vmatmul.mubr.msk.f32.vlgmr.msra.gmra.mxu1 %vm292_vm2, %v11246_v3 }
0x14e2   : > { %17225 = vmatpush3.msk.msra.mxu0 %vm296_vm1, %v20203_v40  ;;  %17232 = vmatpush3.msk.msra.mxu1 %vm296_vm1, %v20210_v54 }
0x14e3   : > { %17226 = vmatprep.subr.mxu0 %v21136_v8  ;;  %17233 = vmatprep.subr.mxu1 %v21136_v8 }
0x14e4   : > { %17227 = vmatpush3.msra.mxu0 %v20219_v51  ;;  %17228 = vmatprep.mubr.msk.f32.mxu0 %vm17912_vm3, %v21136_v8 }
0x14e5   : > { %17234 = vmatpush3.msra.mxu1 %v20227_v0  ;;  %17235 = vmatprep.mubr.msk.f32.mxu1 %vm17912_vm3, %v21136_v8 }
0x14e6   : > { %17229 = vmatmul.mubr.msk.f32.vlgmr.msra.gmra.mxu0 %vm292_vm2, %v11246_v3  ;;  %17236 = vmatmul.mubr.msk.f32.vlgmr.msra.gmra.mxu1 %vm292_vm2, %v11246_v3 }
0x14e7   : > { %11908 = vmatprep.mubr.bf16.mxu0 %v21140_v45  ;;  %11949 = vmatprep.mubr.bf16.mxu1 %v21140_v45 }
0x14e8   : > { %16026 = vmatprep.subr.msk.bf16.mxu0 %vm996_vm4, %v16019_v59  ;;  %16028 = vmatprep.subr.msk.bf16.mxu1 %vm996_vm4, %v16021_v53  ;;  %v16006_v59 = vld [vmem:[%s17965_s28 + $0xa6] sm:$0x3] }
0x14e9   : > { %11891 = vmatpush1.bf16.msra.mxu0 %v11853_v28  ;;  %11932 = vmatpush1.bf16.msra.mxu1 %v11859_v37 }
0x14ea   : > { %16030 = vmatprep.subr.msk.bf16.mxu0 %vm996_vm4, %v16023_v43  ;;  %16032 = vmatprep.subr.msk.bf16.mxu1 %vm996_vm4, %v16025_v5 }
0x1591   : > { %v11350_v56 = vpop.f32.mrf.mxu0  ;;  %v11391_v23 = vpop.f32.mrf.mxu1 }
0x1592   : > { %v20377_v29 = vadd.f32 %v11350_v56, %v20267_v63  ;;  %v20380_v60 = vadd.f32 %v11391_v23, %v20270_v12 }
0x1593   : > { %v11352_v33 = vpop.f32.mrf.mxu0  ;;  %v11393_v38 = vpop.f32.mrf.mxu1 }
0x1594   : > { %v20383_v1 = vadd.f32 %v11352_v33, %v20273_v47  ;;  %v20386_v52 = vadd.f32 %v11393_v38, %v20276_v25 }
0x1595   : > { %v11354_v6 = vpop.f32.mrf.mxu0  ;;  %v11395_v11 = vpop.f32.mrf.mxu1 }
0x1597   : > { %v11355_v49 = vpop.f32.mrf.mxu0  ;;  %v11396_v41 = vpop.f32.mrf.mxu1 }
0x1599   : > { %v11432_v14 = vpop.f32.mrf.mxu0  ;;  %v11473_v63 = vpop.f32.mrf.mxu1 }
0x159a   : > { %v20389_v21 = vadd.f32 %v11432_v14, %v20279_v61  ;;  %v20392_v12 = vadd.f32 %v11473_v63, %v20282_v50 }
0x159b   : > { %v11434_v22 = vpop.f32.mrf.mxu0  ;;  %v11475_v47 = vpop.f32.mrf.mxu1 }
0x159c   : > { %v20395_v48 = vadd.f32 %v11434_v22, %v20285_v27  ;;  %v20398_v25 = vadd.f32 %v11475_v47, %v20288_v46 }
0x159d   : > { %v11436_v31 = vpop.f32.mrf.mxu0  ;;  %v11477_v32 = vpop.f32.mrf.mxu1 }
0x159e   : > { %v11865_v31 = vsel %vm996_vm4, %v16022_v44, 0  ;;  %v11871_v32 = vsel %vm996_vm4, %v16024_v30, 0  ;;  %v16060_v30 = vcombine.high %v16050_v19, %v16054_v18 }
0x159f   : > { %v11437_v13 = vpop.f32.mrf.mxu0  ;;  %v11478_v42 = vpop.f32.mrf.mxu1 }
0x15a0   : > { %v16059_v13 = vcombine.low %v16050_v19, %v16054_v18 }
0x15a1   : > { %v11559_v61 = vpop.f32.mrf.mxu0  ;;  %v11638_v10 = vpop.f32.mrf.mxu1 }
0x15a2   : > { %v11563_v50 = vadd.f32 %v15995_v17, %v11559_v61  ;;  %v11642_v3 = vadd.f32 %v15999_v4, %v11638_v10  ;;  %v20463_v17 = vld [vmem:[%s17970_s7 + $0x550] sm:$0xff]  ;;  %v20469_v61 = vld [vmem:[%s17970_s7 + $0x558] sm:$0xff]  ;;  %v12419_v10 = vsel %vm996_vm4, %v16059_v13, 0 }
0x15a3   : > { %v17216_v58 = vpop.f32.mrf.mxu0  ;;  %v17223_v7 = vpop.f32.mrf.mxu1  ;;  %v20466_v4 = vld [vmem:[%s17970_s7 + $0x570] sm:$0x11] }
0x15a4   : > { %v15998_v16 = vmul.f32 -1.442695, %v11563_v50  ;;  %v16002_v27 = vmul.f32 -1.442695, %v11642_v3  ;;  %v16062_v50 = vcombine.high %v20463_v17, %v20466_v4  ;;  %v20476_v3 = vld [vmem:[%s17970_s7 + $0x578] sm:$0x11]  ;;  %v16061_v7 = vcombine.low %v20463_v17, %v20466_v4 }
0x15a5   : > { %v16064_v58 = vcombine.high %v20469_v61, %v20476_v3  ;;  %v16092_v17 = vld [vmem:[%s17970_s7 + $0x5a0] sm:$0x11]  ;;  %v16089_v4 = vld [vmem:[%s17970_s7 + $0x588] sm:$0xff] }
0x15a6   : > { %17690 = vpow2.f32 %v15998_v16  ;;  %v11717_v39 = vpop.f32.mrf.mxu0  ;;  %v11791_v46 = vpop.f32.mrf.mxu1  ;;  %v16063_v16 = vcombine.low %v20469_v61, %v20476_v3  ;;  %v16093_v3 = vld [vmem:[%s17970_s7 + $0x5a8] sm:$0x11] }
0x15a7   : > { %17692 = vpow2.f32 %v16002_v27  ;;  %v11795_v34 = vadd.f32 %v16006_v59, %v11791_v46  ;;  %v11721_v35 = vadd.f32 %v16003_v15, %v11717_v39 }
0x15a8   : > { %v17230_v24 = vpop.f32.mrf.mxu0  ;;  %v17237_v26 = vpop.f32.mrf.mxu1 }
0x15a9   : > { %v16009_v53 = vmul.f32 -1.442695, %v11795_v34 }
0x15ab   : > { %17694 = vpow2.f32 %v16009_v53 }
0x15ac   : > { %17696 = vtanh.f32 %v11721_v35 }
0x15b3   : > { %v17691_v28 = vpop.eup %17690 }
0x15b4   : > { %v17693_v37 = vpop.eup %17692  ;;  %v11567_v43 = vadd.f32 1.0, %v17691_v28 }
0x15b5   : > { %v11646_v5 = vadd.f32 1.0, %v17693_v37 }
0x15b6   : > { %17698 = vrcp.f32 %v11567_v43 }
0x15b7   : > { %17700 = vrcp.f32 %v11646_v5 }
0x15b8   : > { %v17695_v56 = vpop.eup %17694 }
0x15b9   : > { %v17697_v23 = vpop.eup %17696  ;;  %v11799_v11 = vadd.f32 1.0, %v17695_v56 }
0x15bb   : > { %17702 = vrcp.f32 %v11799_v11 }
0x15c3   : > { %v17699_v33 = vpop.eup %17698 }
0x15c4   : > { %v17701_v38 = vpop.eup %17700  ;;  %v11803_v6 = vmul.f32 %v17699_v33, %v17697_v23 }
0x15c5   : > { %v11802_v49 = vmul.f32 %v17701_v38, %v20295_v62  ;;  %v16049_v62 = vld [vmem:[%s17970_s7 + $0x540] sm:$0xff] }
0x15c6   : > { %v16058_v20 = vcombine.high %v16049_v62, %v16053_v9  ;;  %v16057_v44 = vcombine.low %v16049_v62, %v16053_v9 }
0x15c7   : > { %v20405_v41 = vadd.f32 %v11803_v6, %v11802_v49  ;;  %v16034_v49 = vld [vmem:[%s17965_s28 + $0xa8] sm:$0x3] }
0x15c8   : > { %v17703_v14 = vpop.eup %17702  ;;  %v12413_v42 = vsel %vm996_vm4, %v16057_v44, 0  ;;  %v16042_v44 = vld [vmem:[%s17965_s28 + $0xac] sm:$0x3] }
0x15c9   : > { %17704 = vtanh.f32 %v20405_v41 }
0x15d6   : > { %v17705_v63 = vpop.eup %17704 }
0x15d7   : > { %v11806_v22 = vmul.f32 %v17705_v63, %v17703_v14  ;;  %v16038_v14 = vld [vmem:[%s17965_s28 + $0xaa] sm:$0x3] }
0x15d9   : > { %v11807_v47 = vpack.c.bf16 %v11806_v22, %v11806_v22 }
0x15db   : > { %16027 = vmatmul.mubr.msk.bf16.vlgmr.msra.gmra.mxu0 %vm292_vm2, %v11807_v47  ;;  %16029 = vmatmul.mubr.msk.bf16.vlgmr.msra.gmra.mxu1 %vm292_vm2, %v11807_v47 }
0x15dc   : > { %11973 = vmatpush1.bf16.msra.mxu0 %v11865_v31  ;;  %12014 = vmatpush1.bf16.msra.mxu1 %v11871_v32 }
0x15dd   : > { %11990 = vmatprep.mubr.bf16.mxu0 %v21140_v45  ;;  %12031 = vmatprep.mubr.bf16.mxu1 %v21140_v45 }
0x15de   : > { %17238 = vmatprep.subr.mxu0 %v21136_v8  ;;  %17245 = vmatprep.subr.mxu1 %v21136_v8 }
0x15e3   : > { %16031 = vmatmul.mubr.msk.bf16.vlgmr.msra.gmra.mxu0 %vm292_vm2, %v11807_v47  ;;  %16033 = vmatmul.mubr.msk.bf16.vlgmr.msra.gmra.mxu1 %vm292_vm2, %v11807_v47 }
0x15e4   : > { %17239 = vmatpush3.msk.msra.mxu0 %vm296_vm1, %v20167_v2  ;;  %17246 = vmatpush3.msk.msra.mxu1 %vm296_vm1, %v20174_v55 }
0x15e5   : > { %17240 = vmatprep.subr.mxu0 %v21136_v8  ;;  %17247 = vmatprep.subr.mxu1 %v21136_v8 }
0x15e6   : > { %17241 = vmatpush3.msra.mxu0 %v20183_v57  ;;  %17248 = vmatpush3.msra.mxu1 %v20189_v36 }
0x15e7   : > { %17242 = vmatprep.mubr.msk.f32.mxu0 %vm17912_vm3, %v21136_v8  ;;  %17249 = vmatprep.mubr.msk.f32.mxu1 %vm17912_vm3, %v21136_v8 }
0x15e8   : > { %17252 = vmatprep.subr.mxu0 %v21136_v8  ;;  %17259 = vmatprep.subr.mxu1 %v21136_v8 }
0x15eb   : > { %17243 = vmatmul.mubr.msk.f32.vlgmr.msra.gmra.mxu0 %vm292_vm2, %v11806_v22  ;;  %17250 = vmatmul.mubr.msk.f32.vlgmr.msra.gmra.mxu1 %vm292_vm2, %v11806_v22 }
0x15ec   : > { %17253 = vmatpush3.msk.msra.mxu0 %vm296_vm1, %v20203_v40  ;;  %17260 = vmatpush3.msk.msra.mxu1 %vm296_vm1, %v20210_v54 }
0x15ed   : > { %17254 = vmatprep.subr.mxu0 %v21136_v8  ;;  %17261 = vmatprep.subr.mxu1 %v21136_v8 }
0x15ee   : > { %17255 = vmatpush3.msra.mxu0 %v20219_v51  ;;  %17256 = vmatprep.mubr.msk.f32.mxu0 %vm17912_vm3, %v21136_v8 }
0x15ef   : > { %17262 = vmatpush3.msra.mxu1 %v20227_v0  ;;  %17263 = vmatprep.mubr.msk.f32.mxu1 %vm17912_vm3, %v21136_v8 }
0x15f0   : > { %17257 = vmatmul.mubr.msk.f32.vlgmr.msra.gmra.mxu0 %vm292_vm2, %v11806_v22  ;;  %17264 = vmatmul.mubr.msk.f32.vlgmr.msra.gmra.mxu1 %vm292_vm2, %v11806_v22 }
0x15f1   : > { %12468 = vmatprep.mubr.bf16.mxu0 %v21140_v45  ;;  %12509 = vmatprep.mubr.bf16.mxu1 %v21140_v45 }
0x15f2   : > { %16065 = vmatprep.subr.msk.bf16.mxu0 %vm996_vm4, %v16058_v20  ;;  %16067 = vmatprep.subr.msk.bf16.mxu1 %vm996_vm4, %v16060_v30  ;;  %v16045_v20 = vld [vmem:[%s17965_s28 + $0xae] sm:$0x3] }
0x15f3   : > { %12451 = vmatpush1.bf16.msra.mxu0 %v12413_v42  ;;  %12492 = vmatpush1.bf16.msra.mxu1 %v12419_v10 }
0x15f4   : > { %16069 = vmatprep.subr.msk.bf16.mxu0 %vm996_vm4, %v16062_v50  ;;  %16071 = vmatprep.subr.msk.bf16.mxu1 %vm996_vm4, %v16064_v58 }
0x169b   : > { %v11910_v27 = vpop.f32.mrf.mxu0  ;;  %v11951_v39 = vpop.f32.mrf.mxu1 }
0x169c   : > { %v20487_v46 = vadd.f32 %v11910_v27, %v20377_v29  ;;  %v20490_v24 = vadd.f32 %v11951_v39, %v20380_v60 }
0x169d   : > { %v11912_v26 = vpop.f32.mrf.mxu0  ;;  %v11953_v59 = vpop.f32.mrf.mxu1 }
0x169e   : > { %v20493_v34 = vadd.f32 %v11912_v26, %v20383_v1  ;;  %v20496_v15 = vadd.f32 %v11953_v59, %v20386_v52 }
0x169f   : > { %v11914_v53 = vpop.f32.mrf.mxu0  ;;  %v11955_v35 = vpop.f32.mrf.mxu1 }
0x16a1   : > { %v11915_v28 = vpop.f32.mrf.mxu0  ;;  %v11956_v37 = vpop.f32.mrf.mxu1 }
0x16a3   : > { %v11992_v43 = vpop.f32.mrf.mxu0  ;;  %v12033_v29 = vpop.f32.mrf.mxu1 }
0x16a4   : > { %v20499_v5 = vadd.f32 %v11992_v43, %v20389_v21  ;;  %v20502_v60 = vadd.f32 %v12033_v29, %v20392_v12 }
0x16a5   : > { %v11994_v56 = vpop.f32.mrf.mxu0  ;;  %v12035_v1 = vpop.f32.mrf.mxu1 }
0x16a6   : > { %v20505_v23 = vadd.f32 %v11994_v56, %v20395_v48  ;;  %v20508_v52 = vadd.f32 %v12035_v1, %v20398_v25 }
0x16a7   : > { %v11996_v33 = vpop.f32.mrf.mxu0  ;;  %v12037_v38 = vpop.f32.mrf.mxu1 }
0x16a8   : > { %v12425_v33 = vsel %vm996_vm4, %v16061_v7, 0  ;;  %v12431_v38 = vsel %vm996_vm4, %v16063_v16, 0  ;;  %v16099_v16 = vcombine.high %v16089_v4, %v16093_v3 }
0x16a9   : > { %v11997_v6 = vpop.f32.mrf.mxu0  ;;  %v12038_v11 = vpop.f32.mrf.mxu1 }
0x16aa   : > { %v16098_v6 = vcombine.low %v16089_v4, %v16093_v3 }
0x16ab   : > { %v12119_v21 = vpop.f32.mrf.mxu0  ;;  %v12198_v63 = vpop.f32.mrf.mxu1 }
0x16ac   : > { %v12123_v12 = vadd.f32 %v16034_v49, %v12119_v21  ;;  %v12202_v22 = vadd.f32 %v16038_v14, %v12198_v63  ;;  %v20573_v49 = vld [vmem:[%s17970_s7 + $0x590] sm:$0xff]  ;;  %v20579_v21 = vld [vmem:[%s17970_s7 + $0x598] sm:$0xff]  ;;  %v12979_v63 = vsel %vm996_vm4, %v16098_v6, 0 }
0x16ad   : > { %v17244_v47 = vpop.f32.mrf.mxu0  ;;  %v17251_v31 = vpop.f32.mrf.mxu1  ;;  %v20576_v14 = vld [vmem:[%s17970_s7 + $0x5b0] sm:$0x11] }
0x16ae   : > { %v16037_v32 = vmul.f32 -1.442695, %v12123_v12  ;;  %v16041_v48 = vmul.f32 -1.442695, %v12202_v22  ;;  %v16101_v12 = vcombine.high %v20573_v49, %v20576_v14  ;;  %v20586_v22 = vld [vmem:[%s17970_s7 + $0x5b8] sm:$0x11]  ;;  %v16100_v31 = vcombine.low %v20573_v49, %v20576_v14 }
0x16af   : > { %v16103_v47 = vcombine.high %v20579_v21, %v20586_v22  ;;  %v20683_v49 = vld [vmem:[%s17970_s7 + $0x5d0] sm:$0xff] }
0x16b0   : > { %17706 = vpow2.f32 %v16037_v32  ;;  %v12277_v62 = vpop.f32.mrf.mxu0  ;;  %v12351_v25 = vpop.f32.mrf.mxu1  ;;  %v16102_v32 = vcombine.low %v20579_v21, %v20586_v22  ;;  %v20686_v14 = vld [vmem:[%s17970_s7 + $0x5f0] sm:$0x11]  ;;  %v20689_v21 = vld [vmem:[%s17970_s7 + $0x5d8] sm:$0xff] }
0x16b1   : > { %17708 = vpow2.f32 %v16041_v48  ;;  %v12355_v18 = vadd.f32 %v16045_v20, %v12351_v25  ;;  %v12281_v13 = vadd.f32 %v16042_v44, %v12277_v62 }
0x16b2   : > { %v17258_v9 = vpop.f32.mrf.mxu0  ;;  %v17265_v19 = vpop.f32.mrf.mxu1 }
0x16b3   : > { %v16048_v30 = vmul.f32 -1.442695, %v12355_v18 }
0x16b5   : > { %17710 = vpow2.f32 %v16048_v30 }
0x16b6   : > { %17712 = vtanh.f32 %v12281_v13 }
0x16bd   : > { %v17707_v42 = vpop.eup %17706 }
0x16be   : > { %v17709_v10 = vpop.eup %17708  ;;  %v12127_v50 = vadd.f32 1.0, %v17707_v42 }
0x16bf   : > { %v12206_v58 = vadd.f32 1.0, %v17709_v10 }
0x16c0   : > { %17714 = vrcp.f32 %v12127_v50 }
0x16c1   : > { %17716 = vrcp.f32 %v12206_v58 }
0x16c2   : > { %v17711_v27 = vpop.eup %17710 }
0x16c3   : > { %v17713_v39 = vpop.eup %17712  ;;  %v12359_v35 = vadd.f32 1.0, %v17711_v27 }
0x16c5   : > { %17718 = vrcp.f32 %v12359_v35 }
0x16cd   : > { %v17715_v26 = vpop.eup %17714 }
0x16ce   : > { %v17717_v59 = vpop.eup %17716  ;;  %v12363_v53 = vmul.f32 %v17715_v26, %v17713_v39 }
0x16cf   : > { %v12362_v28 = vmul.f32 %v17717_v59, %v20405_v41  ;;  %v16088_v41 = vld [vmem:[%s17970_s7 + $0x580] sm:$0xff] }
0x16d0   : > { %v16097_v61 = vcombine.high %v16088_v41, %v16092_v17  ;;  %v16096_v7 = vcombine.low %v16088_v41, %v16092_v17 }
0x16d1   : > { %v20515_v37 = vadd.f32 %v12363_v53, %v12362_v28  ;;  %v16073_v28 = vld [vmem:[%s17965_s28 + $0xb0] sm:$0x3] }
0x16d2   : > { %v17719_v43 = vpop.eup %17718  ;;  %v12973_v11 = vsel %vm996_vm4, %v16096_v7, 0  ;;  %v16081_v7 = vld [vmem:[%s17965_s28 + $0xb4] sm:$0x3] }
0x16d3   : > { %17720 = vtanh.f32 %v20515_v37 }
0x16e0   : > { %v17721_v29 = vpop.eup %17720 }
0x16e1   : > { %v12366_v56 = vmul.f32 %v17721_v29, %v17719_v43  ;;  %v16077_v43 = vld [vmem:[%s17965_s28 + $0xb2] sm:$0x3] }
0x16e3   : > { %v12367_v1 = vpack.c.bf16 %v12366_v56, %v12366_v56 }
0x16e5   : > { %16066 = vmatmul.mubr.msk.bf16.vlgmr.msra.gmra.mxu0 %vm292_vm2, %v12367_v1  ;;  %16068 = vmatmul.mubr.msk.bf16.vlgmr.msra.gmra.mxu1 %vm292_vm2, %v12367_v1 }
0x16e6   : > { %12533 = vmatpush1.bf16.msra.mxu0 %v12425_v33  ;;  %12574 = vmatpush1.bf16.msra.mxu1 %v12431_v38 }
0x16e7   : > { %12550 = vmatprep.mubr.bf16.mxu0 %v21140_v45  ;;  %12591 = vmatprep.mubr.bf16.mxu1 %v21140_v45 }
0x16e8   : > { %17266 = vmatprep.subr.mxu0 %v21136_v8  ;;  %17273 = vmatprep.subr.mxu1 %v21136_v8 }
0x16ed   : > { %16070 = vmatmul.mubr.msk.bf16.vlgmr.msra.gmra.mxu0 %vm292_vm2, %v12367_v1  ;;  %16072 = vmatmul.mubr.msk.bf16.vlgmr.msra.gmra.mxu1 %vm292_vm2, %v12367_v1 }
0x16ee   : > { %17267 = vmatpush3.msk.msra.mxu0 %vm296_vm1, %v20167_v2  ;;  %17274 = vmatpush3.msk.msra.mxu1 %vm296_vm1, %v20174_v55 }
0x16ef   : > { %17268 = vmatprep.subr.mxu0 %v21136_v8  ;;  %17275 = vmatprep.subr.mxu1 %v21136_v8 }
0x16f0   : > { %17269 = vmatpush3.msra.mxu0 %v20183_v57  ;;  %17276 = vmatpush3.msra.mxu1 %v20189_v36 }
0x16f1   : > { %17270 = vmatprep.mubr.msk.f32.mxu0 %vm17912_vm3, %v21136_v8  ;;  %17277 = vmatprep.mubr.msk.f32.mxu1 %vm17912_vm3, %v21136_v8 }
0x16f2   : > { %17280 = vmatprep.subr.mxu0 %v21136_v8  ;;  %17287 = vmatprep.subr.mxu1 %v21136_v8 }
0x16f5   : > { %17271 = vmatmul.mubr.msk.f32.vlgmr.msra.gmra.mxu0 %vm292_vm2, %v12366_v56  ;;  %17278 = vmatmul.mubr.msk.f32.vlgmr.msra.gmra.mxu1 %vm292_vm2, %v12366_v56 }
0x16f6   : > { %17281 = vmatpush3.msk.msra.mxu0 %vm296_vm1, %v20203_v40  ;;  %17288 = vmatpush3.msk.msra.mxu1 %vm296_vm1, %v20210_v54 }
0x16f7   : > { %17282 = vmatprep.subr.mxu0 %v21136_v8  ;;  %17289 = vmatprep.subr.mxu1 %v21136_v8 }
0x16f8   : > { %17283 = vmatpush3.msra.mxu0 %v20219_v51  ;;  %17284 = vmatprep.mubr.msk.f32.mxu0 %vm17912_vm3, %v21136_v8 }
0x16f9   : > { %17290 = vmatpush3.msra.mxu1 %v20227_v0  ;;  %17291 = vmatprep.mubr.msk.f32.mxu1 %vm17912_vm3, %v21136_v8 }
0x16fa   : > { %17285 = vmatmul.mubr.msk.f32.vlgmr.msra.gmra.mxu0 %vm292_vm2, %v12366_v56  ;;  %17292 = vmatmul.mubr.msk.f32.vlgmr.msra.gmra.mxu1 %vm292_vm2, %v12366_v56 }
0x16fb   : > { %13028 = vmatprep.mubr.bf16.mxu0 %v21140_v45  ;;  %13069 = vmatprep.mubr.bf16.mxu1 %v21140_v45 }
0x16fc   : > { %16104 = vmatprep.subr.msk.bf16.mxu0 %vm996_vm4, %v16097_v61  ;;  %16106 = vmatprep.subr.msk.bf16.mxu1 %vm996_vm4, %v16099_v16  ;;  %v16084_v61 = vld [vmem:[%s17965_s28 + $0xb6] sm:$0x3] }
0x16fd   : > { %13011 = vmatpush1.bf16.msra.mxu0 %v12973_v11  ;;  %13052 = vmatpush1.bf16.msra.mxu1 %v12979_v63 }
0x16fe   : > { %16108 = vmatprep.subr.msk.bf16.mxu0 %vm996_vm4, %v16101_v12  ;;  %16110 = vmatprep.subr.msk.bf16.mxu1 %vm996_vm4, %v16103_v47 }
0x17a5   : > { %v12470_v48 = vpop.f32.mrf.mxu0  ;;  %v12511_v62 = vpop.f32.mrf.mxu1 }
0x17a6   : > { %v20597_v25 = vadd.f32 %v12470_v48, %v20487_v46  ;;  %v20600_v9 = vadd.f32 %v12511_v62, %v20490_v24 }
0x17a7   : > { %v12472_v19 = vpop.f32.mrf.mxu0  ;;  %v12513_v20 = vpop.f32.mrf.mxu1 }
0x17a8   : > { %v20603_v18 = vadd.f32 %v12472_v19, %v20493_v34  ;;  %v20606_v44 = vadd.f32 %v12513_v20, %v20496_v15 }
0x17a9   : > { %v12474_v30 = vpop.f32.mrf.mxu0  ;;  %v12515_v13 = vpop.f32.mrf.mxu1 }
0x17ab   : > { %v12475_v42 = vpop.f32.mrf.mxu0  ;;  %v12516_v10 = vpop.f32.mrf.mxu1 }
0x17ad   : > { %v12552_v50 = vpop.f32.mrf.mxu0  ;;  %v12593_v46 = vpop.f32.mrf.mxu1 }
0x17ae   : > { %v20609_v58 = vadd.f32 %v12552_v50, %v20499_v5  ;;  %v20612_v24 = vadd.f32 %v12593_v46, %v20502_v60 }
0x17af   : > { %v12554_v27 = vpop.f32.mrf.mxu0  ;;  %v12595_v34 = vpop.f32.mrf.mxu1 }
0x17b0   : > { %v20615_v39 = vadd.f32 %v12554_v27, %v20505_v23  ;;  %v20618_v15 = vadd.f32 %v12595_v34, %v20508_v52 }
0x17b1   : > { %v12556_v26 = vpop.f32.mrf.mxu0  ;;  %v12597_v59 = vpop.f32.mrf.mxu1 }
0x17b2   : > { %v12985_v26 = vsel %vm996_vm4, %v16100_v31, 0  ;;  %v12991_v59 = vsel %vm996_vm4, %v16102_v32, 0  ;;  %v16140_v31 = vcombine.high %v20683_v49, %v20686_v14  ;;  %v20696_v32 = vld [vmem:[%s17970_s7 + $0x5f8] sm:$0x11] }
0x17b3   : > { %v12557_v53 = vpop.f32.mrf.mxu0  ;;  %v12598_v35 = vpop.f32.mrf.mxu1 }
0x17b4   : > { %v16142_v53 = vcombine.high %v20689_v21, %v20696_v32  ;;  %v16139_v35 = vcombine.low %v20683_v49, %v20686_v14  ;;  %v17803_v49 = vld [vmem:[%s21126_s1 + $0x18] sm:$0x3]  ;;  %v17804_v14 = vld [vmem:[%s21126_s1] sm:$0xff] }
0x17b5   : > { %v12679_v5 = vpop.f32.mrf.mxu0  ;;  %v12758_v29 = vpop.f32.mrf.mxu1 }
0x17b6   : > { %v12683_v60 = vadd.f32 %v16073_v28, %v12679_v5  ;;  %v12762_v56 = vadd.f32 %v16077_v43, %v12758_v29  ;;  %v16141_v28 = vcombine.low %v20689_v21, %v20696_v32  ;;  %v17805_v21 = vld [vmem:[%s21126_s1 + $0x10] sm:$0xff]  ;;  %v17806_v32 = vld [vmem:[%s21126_s1 + $0x28] sm:$0x3] }
0x17b7   : > { %v17272_v1 = vpop.f32.mrf.mxu0  ;;  %v17279_v33 = vpop.f32.mrf.mxu1 }
0x17b8   : > { %v16076_v38 = vmul.f32 -1.442695, %v12683_v60  ;;  %v16080_v23 = vmul.f32 -1.442695, %v12762_v56 }
0x17ba   : > { %17722 = vpow2.f32 %v16076_v38  ;;  %v12837_v41 = vpop.f32.mrf.mxu0  ;;  %v12911_v52 = vpop.f32.mrf.mxu1 }
0x17bb   : > { %17724 = vpow2.f32 %v16080_v23  ;;  %v12915_v3 = vadd.f32 %v16084_v61, %v12911_v52  ;;  %v12841_v6 = vadd.f32 %v16081_v7, %v12837_v41 }
0x17bc   : > { %v17286_v17 = vpop.f32.mrf.mxu0  ;;  %v17293_v4 = vpop.f32.mrf.mxu1 }
0x17bd   : > { %v16087_v16 = vmul.f32 -1.442695, %v12915_v3 }
0x17bf   : > { %17726 = vpow2.f32 %v16087_v16 }
0x17c0   : > { %17728 = vtanh.f32 %v12841_v6 }
0x17c7   : > { %v17723_v11 = vpop.eup %17722 }
0x17c8   : > { %v17725_v63 = vpop.eup %17724  ;;  %v12687_v12 = vadd.f32 1.0, %v17723_v11 }
0x17c9   : > { %v12766_v47 = vadd.f32 1.0, %v17725_v63 }
0x17ca   : > { %17730 = vrcp.f32 %v12687_v12  ;;  %v16112_v12 = vld [vmem:[%s17965_s28 + $0xb8] sm:$0x3] }
0x17cb   : > { %17732 = vrcp.f32 %v12766_v47  ;;  %v16116_v47 = vld [vmem:[%s17965_s28 + $0xba] sm:$0x3] }
0x17cc   : > { %v17727_v48 = vpop.eup %17726 }
0x17cd   : > { %v17729_v62 = vpop.eup %17728  ;;  %v12919_v13 = vadd.f32 1.0, %v17727_v48 }
0x17cf   : > { %17734 = vrcp.f32 %v12919_v13 }
0x17d7   : > { %v17731_v19 = vpop.eup %17730 }
0x17d8   : > { %v17733_v20 = vpop.eup %17732  ;;  %v12923_v30 = vmul.f32 %v17731_v19, %v17729_v62 }
0x17d9   : > { %v12922_v42 = vmul.f32 %v17733_v20, %v20515_v37 }
0x17db   : > { %v20625_v10 = vadd.f32 %v12923_v30, %v12922_v42 }
0x17dc   : > { %v17735_v50 = vpop.eup %17734 }
0x17dd   : > { %17736 = vtanh.f32 %v20625_v10 }
0x17ea   : > { %v17737_v46 = vpop.eup %17736 }
0x17eb   : > { %v12926_v27 = vmul.f32 %v17737_v46, %v17735_v50  ;;  %v16123_v46 = vld [vmem:[%s17965_s28 + $0xbe] sm:$0x3] }
0x17ed   : > { %v12927_v34 = vpack.c.bf16 %v12926_v27, %v12926_v27 }
0x17ef   : > { %16105 = vmatmul.mubr.msk.bf16.vlgmr.msra.gmra.mxu0 %vm292_vm2, %v12927_v34  ;;  %16107 = vmatmul.mubr.msk.bf16.vlgmr.msra.gmra.mxu1 %vm292_vm2, %v12927_v34 }
0x17f0   : > { %13093 = vmatpush1.bf16.msra.mxu0 %v12985_v26  ;;  %13134 = vmatpush1.bf16.msra.mxu1 %v12991_v59 }
0x17f1   : > { %13110 = vmatprep.mubr.bf16.mxu0 %v21140_v45  ;;  %13151 = vmatprep.mubr.bf16.mxu1 %v21140_v45 }
0x17f2   : > { %17294 = vmatprep.subr.mxu0 %v21136_v8  ;;  %17301 = vmatprep.subr.mxu1 %v21136_v8 }
0x17f7   : > { %16109 = vmatmul.mubr.msk.bf16.vlgmr.msra.gmra.mxu0 %vm292_vm2, %v12927_v34  ;;  %16111 = vmatmul.mubr.msk.bf16.vlgmr.msra.gmra.mxu1 %vm292_vm2, %v12927_v34  ;;  %v16120_v34 = vld [vmem:[%s17965_s28 + $0xbc] sm:$0x3] }
0x17f8   : > { %17295 = vmatpush3.msk.msra.mxu0 %vm296_vm1, %v20167_v2  ;;  %17302 = vmatpush3.msk.msra.mxu1 %vm296_vm1, %v20174_v55  ;;  %v16127_v2 = vld [vmem:[%s17970_s7 + $0x5c0] sm:$0xff] }
0x17f9   : > { %17296 = vmatprep.subr.mxu0 %v21136_v8  ;;  %17303 = vmatprep.subr.mxu1 %v21136_v8  ;;  %v16131_v55 = vld [vmem:[%s17970_s7 + $0x5e0] sm:$0x11] }
0x17fa   : > { %17297 = vmatpush3.msra.mxu0 %v20183_v57  ;;  %17304 = vmatpush3.msra.mxu1 %v20189_v36  ;;  %v16128_v57 = vld [vmem:[%s17970_s7 + $0x5c8] sm:$0xff]  ;;  %v16136_v36 = vcombine.high %v16127_v2, %v16131_v55 }
0x17fb   : > { %17298 = vmatprep.mubr.msk.f32.mxu0 %vm17912_vm3, %v21136_v8  ;;  %17305 = vmatprep.mubr.msk.f32.mxu1 %vm17912_vm3, %v21136_v8 }
0x17fc   : > { %17308 = vmatprep.subr.mxu0 %v21136_v8  ;;  %17315 = vmatprep.subr.mxu1 %v21136_v8 }
0x17ff   : > { %17299 = vmatmul.mubr.msk.f32.vlgmr.msra.gmra.mxu0 %vm292_vm2, %v12926_v27  ;;  %17306 = vmatmul.mubr.msk.f32.vlgmr.msra.gmra.mxu1 %vm292_vm2, %v12926_v27 }
0x1800   : > { %17309 = vmatpush3.msk.msra.mxu0 %vm296_vm1, %v20203_v40  ;;  %17316 = vmatpush3.msk.msra.mxu1 %vm296_vm1, %v20210_v54  ;;  %v16132_v40 = vld [vmem:[%s17970_s7 + $0x5e8] sm:$0x11]  ;;  %v16135_v54 = vcombine.low %v16127_v2, %v16131_v55 }
0x1801   : > { %17310 = vmatprep.subr.mxu0 %v21136_v8  ;;  %17317 = vmatprep.subr.mxu1 %v21136_v8 }
0x1802   : > { %17311 = vmatpush3.msra.mxu0 %v20219_v51  ;;  %17312 = vmatprep.mubr.msk.f32.mxu0 %vm17912_vm3, %v21136_v8  ;;  %v16138_v51 = vcombine.high %v16128_v57, %v16132_v40  ;;  %v13533_v37 = vsel %vm996_vm4, %v16135_v54, 0 }
0x1803   : > { %17318 = vmatpush3.msra.mxu1 %v20227_v0  ;;  %17319 = vmatprep.mubr.msk.f32.mxu1 %vm17912_vm3, %v21136_v8  ;;  %v16137_v0 = vcombine.low %v16128_v57, %v16132_v40 }
0x1804   : > { %17313 = vmatmul.mubr.msk.f32.vlgmr.msra.gmra.mxu0 %vm292_vm2, %v12926_v27  ;;  %17320 = vmatmul.mubr.msk.f32.vlgmr.msra.gmra.mxu1 %vm292_vm2, %v12926_v27 }
0x1805   : > { %13588 = vmatprep.mubr.bf16.mxu0 %v21140_v45  ;;  %13629 = vmatprep.mubr.bf16.mxu1 %v21140_v45  ;;  %v13539_v22 = vsel %vm996_vm4, %v16137_v0, 0 }
0x1806   : > { %16143 = vmatprep.subr.msk.bf16.mxu0 %vm996_vm4, %v16136_v36  ;;  %16145 = vmatprep.subr.msk.bf16.mxu1 %vm996_vm4, %v16138_v51 }
0x1807   : > { %13571 = vmatpush1.bf16.msra.mxu0 %v13533_v37  ;;  %13612 = vmatpush1.bf16.msra.mxu1 %v13539_v22 }
0x1808   : > { %16147 = vmatprep.subr.msk.bf16.mxu0 %vm996_vm4, %v16140_v31  ;;  %16149 = vmatprep.subr.msk.bf16.mxu1 %vm996_vm4, %v16142_v53 }
0x18af   : > { %v13030_v43 = vpop.f32.mrf.mxu0  ;;  %v13071_v5 = vpop.f32.mrf.mxu1 }
0x18b0   : > { %v20707_v29 = vadd.f32 %v13030_v43, %v20597_v25  ;;  %v20710_v60 = vadd.f32 %v13071_v5, %v20600_v9 }
0x18b1   : > { %v13032_v56 = vpop.f32.mrf.mxu0  ;;  %v13073_v1 = vpop.f32.mrf.mxu1 }
0x18b2   : > { %v20713_v33 = vadd.f32 %v13032_v56, %v20603_v18  ;;  %v20716_v38 = vadd.f32 %v13073_v1, %v20606_v44 }
0x18b3   : > { %v13034_v23 = vpop.f32.mrf.mxu0  ;;  %v13075_v41 = vpop.f32.mrf.mxu1 }
0x18b4   : > { %v13545_v23 = vsel %vm996_vm4, %v16139_v35, 0  ;;  %v13551_v41 = vsel %vm996_vm4, %v16141_v28, 0  ;;  %v17807_v35 = vld [vmem:[%s21126_s1 + $0x38] sm:$0x3]  ;;  %v17808_v28 = vld [vmem:[%s21126_s1 + $0x20] sm:$0xff] }
0x18b5   : > { %v13035_v52 = vpop.f32.mrf.mxu0  ;;  %v13076_v17 = vpop.f32.mrf.mxu1 }
0x18b6   : > { %v17809_v52 = vld [vmem:[%s21126_s1 + $0x30] sm:$0xff]  ;;  %v16166_v17 = vld [vmem:[%s17970_s7 + $0x600] sm:$0xff] }
0x18b7   : > { %v13112_v4 = vpop.f32.mrf.mxu0  ;;  %v13153_v25 = vpop.f32.mrf.mxu1 }
0x18b8   : > { %v20719_v61 = vadd.f32 %v13112_v4, %v20609_v58  ;;  %v20722_v9 = vadd.f32 %v13153_v25, %v20612_v24  ;;  %v16170_v4 = vld [vmem:[%s17970_s7 + $0x620] sm:$0x11]  ;;  %v16167_v25 = vld [vmem:[%s17970_s7 + $0x608] sm:$0xff] }
0x18b9   : > { %v13114_v3 = vpop.f32.mrf.mxu0  ;;  %v13155_v18 = vpop.f32.mrf.mxu1 }
0x18ba   : > { %v20725_v7 = vadd.f32 %v13114_v3, %v20615_v39  ;;  %v20728_v44 = vadd.f32 %v13155_v18, %v20618_v15  ;;  %v16175_v3 = vcombine.high %v16166_v17, %v16170_v4  ;;  %v16171_v18 = vld [vmem:[%s17970_s7 + $0x628] sm:$0x11] }
0x18bb   : > { %v13116_v16 = vpop.f32.mrf.mxu0  ;;  %v13157_v6 = vpop.f32.mrf.mxu1 }
0x18bc   : > { %v16174_v16 = vcombine.low %v16166_v17, %v16170_v4  ;;  %v20807_v6 = vld [vmem:[%s17970_s7 + $0x610] sm:$0xff] }
0x18bd   : > { %v13117_v11 = vpop.f32.mrf.mxu0  ;;  %v13158_v63 = vpop.f32.mrf.mxu1 }
0x18be   : > { %v20810_v11 = vld [vmem:[%s17970_s7 + $0x630] sm:$0x11]  ;;  %v16176_v63 = vcombine.low %v16167_v25, %v16171_v18 }
0x18bf   : > { %v13239_v58 = vpop.f32.mrf.mxu0  ;;  %v13318_v48 = vpop.f32.mrf.mxu1 }
0x18c0   : > { %v13243_v24 = vadd.f32 %v16112_v12, %v13239_v58  ;;  %v13322_v62 = vadd.f32 %v16116_v47, %v13318_v48  ;;  %v16179_v12 = vcombine.high %v20807_v6, %v20810_v11  ;;  %v20815_v47 = vld [vmem:[%s17970_s7 + $0x618] sm:$0xff]  ;;  %v14093_v48 = vsel %vm996_vm4, %v16174_v16, 0 }
0x18c1   : > { %v17300_v19 = vpop.f32.mrf.mxu0  ;;  %v17307_v20 = vpop.f32.mrf.mxu1  ;;  %v20818_v58 = vld [vmem:[%s17970_s7 + $0x638] sm:$0x11] }
0x18c2   : > { %v16115_v30 = vmul.f32 -1.442695, %v13243_v24  ;;  %v16119_v39 = vmul.f32 -1.442695, %v13322_v62  ;;  %v16181_v24 = vcombine.high %v20815_v47, %v20818_v58  ;;  %v14099_v62 = vsel %vm996_vm4, %v16176_v63, 0 }
0x18c3   : > { %v16178_v19 = vcombine.low %v20807_v6, %v20810_v11  ;;  %v16180_v20 = vcombine.low %v20815_v47, %v20818_v58  ;;  %v17914_v6 = vmov 1983009808  }
0x18c4   : > { %17738 = vpow2.f32 %v16115_v30  ;;  %v13397_v13 = vpop.f32.mrf.mxu0  ;;  %v13471_v15 = vpop.f32.mrf.mxu1  ;;  %v14304_v11 = vunpack.c.l.s4 %v17914_v6 }
0x18c5   : > { %17740 = vpow2.f32 %v16119_v39  ;;  %v13475_v27 = vadd.f32 %v16123_v46, %v13471_v15  ;;  %v13401_v59 = vadd.f32 %v16120_v34, %v13397_v13 }
0x18c6   : > { %v17314_v42 = vpop.f32.mrf.mxu0  ;;  %v17321_v50 = vpop.f32.mrf.mxu1  ;;  %v14305_v47 = vunpack.c.0.s8 %v14304_v11 }
0x18c7   : > { %v16126_v26 = vmul.f32 -1.442695, %v13475_v27 }
0x18c9   : > { %17742 = vpow2.f32 %v16126_v26 }
0x18ca   : > { %17744 = vtanh.f32 %v13401_v59 }
0x18d1   : > { %v17739_v2 = vpop.eup %17738 }
0x18d2   : > { %v17741_v55 = vpop.eup %17740  ;;  %v13247_v57 = vadd.f32 1.0, %v17739_v2 }
0x18d3   : > { %v13326_v36 = vadd.f32 1.0, %v17741_v55 }
0x18d4   : > { %17746 = vrcp.f32 %v13247_v57 }
0x18d5   : > { %17748 = vrcp.f32 %v13326_v36 }
0x18d6   : > { %v17743_v40 = vpop.eup %17742 }
0x18d7   : > { %v17745_v54 = vpop.eup %17744  ;;  %v13479_v22 = vadd.f32 1.0, %v17743_v40 }
0x18d9   : > { %17750 = vrcp.f32 %v13479_v22  ;;  %v16151_v22 = vld [vmem:[%s17965_s28 + $0xc0] sm:$0x3] }
0x18e1   : > { %v17747_v51 = vpop.eup %17746 }
0x18e2   : > { %v17749_v0 = vpop.eup %17748  ;;  %v13483_v37 = vmul.f32 %v17747_v51, %v17745_v54 }
0x18e3   : > { %v13482_v31 = vmul.f32 %v17749_v0, %v20625_v10  ;;  %v17802_v10 = vld [vmem:[%s21126_s1 + $0x8] sm:$0x3] }
0x18e5   : > { %v20735_v53 = vadd.f32 %v13483_v37, %v13482_v31  ;;  %v16155_v31 = vld [vmem:[%s17965_s28 + $0xc2] sm:$0x3] }
0x18e6   : > { %v17751_v43 = vpop.eup %17750 }
0x18e7   : > { %17752 = vtanh.f32 %v20735_v53 }
0x18f4   : > { %v17753_v5 = vpop.eup %17752 }
0x18f5   : > { %v13486_v56 = vmul.f32 %v17753_v5, %v17751_v43 }
0x18f7   : > { %v13487_v1 = vpack.c.bf16 %v13486_v56, %v13486_v56 }
0x18f9   : > { %16144 = vmatmul.mubr.msk.bf16.vlgmr.msra.gmra.mxu0 %vm292_vm2, %v13487_v1  ;;  %16146 = vmatmul.mubr.msk.bf16.vlgmr.msra.gmra.mxu1 %vm292_vm2, %v13487_v1 }
0x18fa   : > { %13653 = vmatpush1.bf16.msra.mxu0 %v13545_v23  ;;  %13694 = vmatpush1.bf16.msra.mxu1 %v13551_v41 }
0x18fb   : > { %13670 = vmatprep.mubr.bf16.mxu0 %v21140_v45  ;;  %13711 = vmatprep.mubr.bf16.mxu1 %v21140_v45 }
0x18fc   : > { %17322 = vmatprep.subr.mxu0 %v21136_v8  ;;  %17329 = vmatprep.subr.mxu1 %v21136_v8 }
0x1901   : > { %16148 = vmatmul.mubr.msk.bf16.vlgmr.msra.gmra.mxu0 %vm292_vm2, %v13487_v1  ;;  %16150 = vmatmul.mubr.msk.bf16.vlgmr.msra.gmra.mxu1 %vm292_vm2, %v13487_v1 }
0x1902   : > { %17323 = vmatpush3.msk.msra.mxu0 %vm296_vm1, %v17802_v10  ;;  %17330 = vmatpush3.msk.msra.mxu1 %vm296_vm1, %v17803_v49 }
0x1903   : > { %17324 = vmatprep.subr.mxu0 %v21136_v8  ;;  %17331 = vmatprep.subr.mxu1 %v21136_v8 }
0x1904   : > { %17325 = vmatpush3.msra.mxu0 %v17804_v14  ;;  %17332 = vmatpush3.msra.mxu1 %v17805_v21  ;;  %v16162_v14 = vld [vmem:[%s17965_s28 + $0xc6] sm:$0x3] }
0x1905   : > { %17326 = vmatprep.mubr.msk.f32.mxu0 %vm17912_vm3, %v21136_v8  ;;  %17333 = vmatprep.mubr.msk.f32.mxu1 %vm17912_vm3, %v21136_v8 }
0x1906   : > { %17336 = vmatprep.subr.mxu0 %v21136_v8  ;;  %17343 = vmatprep.subr.mxu1 %v21136_v8 }
0x1909   : > { %17327 = vmatmul.mubr.msk.f32.vlgmr.msra.gmra.mxu0 %vm292_vm2, %v13486_v56  ;;  %17334 = vmatmul.mubr.msk.f32.vlgmr.msra.gmra.mxu1 %vm292_vm2, %v13486_v56 }
0x190a   : > { %17337 = vmatpush3.msk.msra.mxu0 %vm296_vm1, %v17806_v32  ;;  %17344 = vmatpush3.msk.msra.mxu1 %vm296_vm1, %v17807_v35  ;;  %v16159_v32 = vld [vmem:[%s17965_s28 + $0xc4] sm:$0x3] }
0x190b   : > { %17338 = vmatprep.subr.mxu0 %v21136_v8  ;;  %17345 = vmatprep.subr.mxu1 %v21136_v8 }
0x190c   : > { %17339 = vmatpush3.msra.mxu0 %v17808_v28  ;;  %17340 = vmatprep.mubr.msk.f32.mxu0 %vm17912_vm3, %v21136_v8 }
0x190d   : > { %17346 = vmatpush3.msra.mxu1 %v17809_v52  ;;  %17347 = vmatprep.mubr.msk.f32.mxu1 %vm17912_vm3, %v21136_v8  ;;  %v16177_v8 = vcombine.high %v16167_v25, %v16171_v18 }
0x190e   : > { %17341 = vmatmul.mubr.msk.f32.vlgmr.msra.gmra.mxu0 %vm292_vm2, %v13486_v56  ;;  %17348 = vmatmul.mubr.msk.f32.vlgmr.msra.gmra.mxu1 %vm292_vm2, %v13486_v56 }
0x190f   : > { %14148 = vmatprep.mubr.bf16.mxu0 %v21140_v45  ;;  %14189 = vmatprep.mubr.bf16.mxu1 %v21140_v45 }
0x1910   : > { %16182 = vmatprep.subr.msk.bf16.mxu0 %vm996_vm4, %v16175_v3  ;;  %16184 = vmatprep.subr.msk.bf16.mxu1 %vm996_vm4, %v16177_v8 }
0x1911   : > { %14131 = vmatpush1.bf16.msra.mxu0 %v14093_v48  ;;  %14172 = vmatpush1.bf16.msra.mxu1 %v14099_v62 }
0x1912   : > { %16186 = vmatprep.subr.msk.bf16.mxu0 %vm996_vm4, %v16179_v12  ;;  %16188 = vmatprep.subr.msk.bf16.mxu1 %vm996_vm4, %v16181_v24 }
0x19b9   : > { %v13590_v30 = vpop.f32.mrf.mxu0  ;;  %v13631_v39 = vpop.f32.mrf.mxu1 }
0x19ba   : > { %v20833_v13 = vadd.f32 %v13590_v30, %v20707_v29  ;;  %v20836_v15 = vadd.f32 %v13631_v39, %v20710_v60 }
0x19bb   : > { %v13592_v42 = vpop.f32.mrf.mxu0  ;;  %v13633_v50 = vpop.f32.mrf.mxu1 }
0x19bc   : > { %v20839_v46 = vadd.f32 %v13592_v42, %v20713_v33  ;;  %v20842_v27 = vadd.f32 %v13633_v50, %v20716_v38  ;;  %v14105_v50 = vsel %vm996_vm4, %v16178_v19, 0  ;;  %v14306_v19 = vlaneseq }
0x19bd   : > { %v13594_v34 = vpop.f32.mrf.mxu0  ;;  %v13635_v26 = vpop.f32.mrf.mxu1 }
0x19be   : > { %v20877_v58 = vshrl.u32 %v14306_v19, 7 }
0x19bf   : > { %v13595_v59 = vpop.f32.mrf.mxu0  ;;  %v13636_v2 = vpop.f32.mrf.mxu1 }
0x19c0   : > { %v20880_v59 = vsub.s32 %v14305_v47, %v20877_v58 }
0x19c1   : > { %v13672_v55 = vpop.f32.mrf.mxu0  ;;  %v13713_v29 = vpop.f32.mrf.mxu1 }
0x19c2   : > { %v20845_v57 = vadd.f32 %v13672_v55, %v20719_v61  ;;  %v20848_v60 = vadd.f32 %v13713_v29, %v20722_v9 }
0x19c3   : > { %v13674_v36 = vpop.f32.mrf.mxu0  ;;  %v13715_v33 = vpop.f32.mrf.mxu1 }
0x19c4   : > { %v20851_v40 = vadd.f32 %v13674_v36, %v20725_v7  ;;  %v20854_v38 = vadd.f32 %v13715_v33, %v20728_v44 }
0x19c5   : > { %v13676_v54 = vpop.f32.mrf.mxu0  ;;  %v13717_v51 = vpop.f32.mrf.mxu1 }
0x19c7   : > { %v13677_v0 = vpop.f32.mrf.mxu0  ;;  %v13718_v37 = vpop.f32.mrf.mxu1 }
0x19c9   : > { %v13799_v61 = vpop.f32.mrf.mxu0  ;;  %v13878_v43 = vpop.f32.mrf.mxu1 }
0x19ca   : > { %v13803_v9 = vadd.f32 %v16151_v22, %v13799_v61  ;;  %v13882_v5 = vadd.f32 %v16155_v31, %v13878_v43  ;;  %v14291_v43 = vld [vmem:[#allocation4] sm:$0xff] }
0x19cb   : > { %v17328_v56 = vpop.f32.mrf.mxu0  ;;  %v17335_v1 = vpop.f32.mrf.mxu1 }
0x19cc   : > { %v16154_v23 = vmul.f32 -1.442695, %v13803_v9  ;;  %v16158_v7 = vmul.f32 -1.442695, %v13882_v5 }
0x19ce   : > { %17754 = vpow2.f32 %v16154_v23  ;;  %v13957_v41 = vpop.f32.mrf.mxu0  ;;  %v14031_v44 = vpop.f32.mrf.mxu1 }
0x19cf   : > { %17756 = vpow2.f32 %v16158_v7  ;;  %v14035_v21 = vadd.f32 %v16162_v14, %v14031_v44  ;;  %v13961_v28 = vadd.f32 %v16159_v32, %v13957_v41 }
0x19d0   : > { %v17342_v10 = vpop.f32.mrf.mxu0  ;;  %v17349_v49 = vpop.f32.mrf.mxu1 }
0x19d1   : > { %v16165_v35 = vmul.f32 -1.442695, %v14035_v21 }
0x19d3   : > { %17758 = vpow2.f32 %v16165_v35  ;;  %v14292_v35 = vld [vmem:[#allocation4 + $0x8] sm:$0xff] }
0x19d4   : > { %17760 = vtanh.f32 %v13961_v28 }
0x19db   : > { %v17755_v52 = vpop.eup %17754 }
0x19dc   : > { %v17757_v17 = vpop.eup %17756  ;;  %v13807_v4 = vadd.f32 1.0, %v17755_v52 }
0x19dd   : > { %v13886_v25 = vadd.f32 1.0, %v17757_v17 }
0x19de   : > { %17762 = vrcp.f32 %v13807_v4 }
0x19df   : > { %17764 = vrcp.f32 %v13886_v25 }
0x19e0   : > { %v17759_v3 = vpop.eup %17758 }
0x19e1   : > { %v17761_v18 = vpop.eup %17760  ;;  %v14039_v12 = vadd.f32 1.0, %v17759_v3 }
0x19e3   : > { %17766 = vrcp.f32 %v14039_v12 }
0x19eb   : > { %v17763_v16 = vpop.eup %17762 }
0x19ec   : > { %v17765_v8 = vpop.eup %17764  ;;  %v14043_v63 = vmul.f32 %v17763_v16, %v17761_v18 }
0x19ed   : > { %v14042_v48 = vmul.f32 %v17765_v8, %v20735_v53  ;;  %v14111_v53 = vsel %vm996_vm4, %v16180_v20, 0 }
0x19ef   : > { %v14044_v24 = vadd.f32 %v14043_v63, %v14042_v48 }
0x19f0   : > { %v17767_v62 = vpop.eup %17766 }
0x19f1   : > { %17768 = vtanh.f32 %v14044_v24  ;;  %14290 = vst.msk [vmem:[#allocation3] sm:$0x3] %vm14288_vm5, %v14044_v24 }
0x19fe   : > { %v17769_v30 = vpop.eup %17768 }
0x19ff   : > { %v14046_v39 = vmul.f32 %v17769_v30, %v17767_v62 }
0x1a01   : > { %v14047_v42 = vpack.c.bf16 %v14046_v39, %v14046_v39  ;;  %14289 = vst.msk [vmem:[#allocation2] sm:$0x3] %vm14288_vm5, %v14046_v39 }
0x1a03   : > { %16183 = vmatmul.mubr.msk.bf16.vlgmr.msra.gmra.mxu0 %vm292_vm2, %v14047_v42  ;;  %16185 = vmatmul.mubr.msk.bf16.vlgmr.msra.gmra.mxu1 %vm292_vm2, %v14047_v42 }
0x1a04   : > { %14213 = vmatpush1.bf16.msra.mxu0 %v14105_v50  ;;  %14254 = vmatpush1.bf16.msra.mxu1 %v14111_v53 }
0x1a05   : > { %14230 = vmatprep.mubr.bf16.mxu0 %v21140_v45  ;;  %14271 = vmatprep.mubr.bf16.mxu1 %v21140_v45 }
0x1a0b   : > { %16187 = vmatmul.mubr.msk.bf16.vlgmr.msra.gmra.mxu0 %vm292_vm2, %v14047_v42  ;;  %16189 = vmatmul.mubr.msk.bf16.vlgmr.msra.gmra.mxu1 %vm292_vm2, %v14047_v42 }
0x1ac3   : > { %v14150_v20 = vpop.f32.mrf.mxu0  ;;  %v14191_v34 = vpop.f32.mrf.mxu1 }
0x1ac4   : > { %v14280_v55 = vadd.f32 %v14150_v20, %v20833_v13  ;;  %v14282_v45 = vadd.f32 %v14191_v34, %v20836_v15 }
0x1ac5   : > { %v14152_v26 = vpop.f32.mrf.mxu0  ;;  %v14193_v2 = vpop.f32.mrf.mxu1 }
0x1ac6   : > { %v14281_v29 = vadd.f32 %v14152_v26, %v20839_v46  ;;  %v14283_v36 = vadd.f32 %v14193_v2, %v20842_v27 }
0x1ac7   : > { %v14154_v33 = vpop.f32.mrf.mxu0  ;;  %v14195_v54 = vpop.f32.mrf.mxu1 }
0x1ac8   : > { %v14301_v51 = vcombine.low %v14280_v55, %v14281_v29  ;;  %v14302_v0 = vcombine.low %v14282_v45, %v14283_v36 }
0x1ac9   : > { %v14155_v37 = vpop.f32.mrf.mxu0  ;;  %v14196_v22 = vpop.f32.mrf.mxu1 }
0x1aca   : > { %v14309_v31 = vrot.slane %v14301_v51, %v20880_v59  ;;  %v14316_v61 = vrot.slane %v14302_v0, %v20880_v59 }
0x1acb   : > { %v14232_v9 = vpop.f32.mrf.mxu0  ;;  %v14273_v5 = vpop.f32.mrf.mxu1 }
0x1acc   : > { %v14317_v13 = vcombine.low %v14309_v31, %v14316_v61  ;;  %v14284_v15 = vadd.f32 %v14232_v9, %v20845_v57  ;;  %v14286_v27 = vadd.f32 %v14273_v5, %v20848_v60 }
0x1acd   : > { %v14234_v56 = vpop.f32.mrf.mxu0  ;;  %v14275_v46 = vpop.f32.mrf.mxu1 }
0x1ace   : > { %v14337_v1 = vadd.f32 %v14317_v13, %v14291_v43  ;;  %v14285_v23 = vadd.f32 %v14234_v56, %v20851_v40  ;;  %v14287_v7 = vadd.f32 %v14275_v46, %v20854_v38 }
0x1acf   : > { %v14236_v41 = vpop.f32.mrf.mxu0  ;;  %v14277_v44 = vpop.f32.mrf.mxu1 }
0x1ad0   : > { %14339 = vst [vmem:[#allocation4] sm:$0xff] %v14337_v1  ;;  %v14318_v10 = vcombine.low %v14284_v15, %v14285_v23  ;;  %v14319_v49 = vcombine.low %v14286_v27, %v14287_v7 }
0x1ad1   : > { %v14237_v14 = vpop.f32.mrf.mxu0  ;;  %v14278_v21 = vpop.f32.mrf.mxu1 }
0x1ad2   : > { %v14326_v32 = vrot.slane %v14318_v10, %v20880_v59  ;;  %v14333_v57 = vrot.slane %v14319_v49, %v20880_v59 }
0x1ad4   : > { %v14334_v28 = vcombine.low %v14326_v32, %v14333_v57  ;;  %14344 = sbr.rel (%p16190_p5) target bundleno = 7141 (0x1be5), region = 52 }
0x1ad6   : > { %v14338_v52 = vadd.f32 %v14334_v28, %v14292_v35 }
0x1ad8   : > { %14340 = vst [vmem:[#allocation4 + $0x8] sm:$0xff] %v14338_v52 }
0x1ad9   : > { %v17810_v60 = vld [vmem:[%s21129_s4 + $0x78] sm:$0xff]   ;;  %v17814_v4 = vld [vmem:[%s21129_s4 + $0x70] sm:$0xff]   ;;  %v17818_v16 = vld [vmem:[%s21129_s4 + $0x68] sm:$0xff]   ;;  %v14351_v2 = vsub.s32 0, %v20877_v58  ;;  %v14355_v45 = vsub.s32 1, %v20877_v58  ;;  %v14359_v36 = vsub.s32 2, %v20877_v58 }
0x1ada   : > { %v17811_v40 = vld [vmem:[%s21129_s4 + $0xf8] sm:$0xff]   ;;  %16562 = vmatprep.subr.bf16.mxu0 %v17810_v60  ;;  %v17815_v25 = vld [vmem:[%s21129_s4 + $0xf0] sm:$0xff]   ;;  %v17819_v8 = vld [vmem:[%s21129_s4 + $0xe8] sm:$0xff]   ;;  %v14363_v54 = vsub.s32 3, %v20877_v58  ;;  %v14367_v44 = vsub.s32 4, %v20877_v58  ;;  %v14371_v10 = vsub.s32 5, %v20877_v58 }
0x1adb   : > { %v17812_v38 = vld [vmem:[%s21129_s4 + $0x38] sm:$0xff]   ;;  %16584 = vmatprep.subr.bf16.mxu1 %v17811_v40  ;;  %v17816_v3 = vld [vmem:[%s21129_s4 + $0x30] sm:$0xff]   ;;  %v17820_v63 = vld [vmem:[%s21129_s4 + $0x28] sm:$0xff]   ;;  %v14375_v21 = vsub.s32 6, %v20877_v58  ;;  %v14379_v32 = vsub.s32 7, %v20877_v58 }
0x1adc   : > { %v17813_v17 = vld [vmem:[%s21129_s4 + $0xb8] sm:$0xff]   ;;  %16563 = vmatpush3.bf16.msra.mxu0 %v17812_v38  ;;  %v17817_v18 = vld [vmem:[%s21129_s4 + $0xb0] sm:$0xff]   ;;  %v17821_v12 = vld [vmem:[%s21129_s4 + $0xa8] sm:$0xff]  }
0x1add   : > { %16585 = vmatpush3.bf16.msra.mxu1 %v17813_v17  ;;  %16564 = vmatprep.subr.bf16.mxu0 %v17814_v4  ;;  %v17822_v48 = vld [vmem:[%s21129_s4 + $0x60] sm:$0xff]   ;;  %v17826_v39 = vld [vmem:[%s21129_s4 + $0x58] sm:$0xff]   ;;  %v17830_v6 = vld [vmem:[%s21129_s4 + $0x50] sm:$0xff]  }
0x1ade   : > { %16586 = vmatprep.subr.bf16.mxu1 %v17815_v25  ;;  %v17823_v24 = vld [vmem:[%s21129_s4 + $0xe0] sm:$0xff]   ;;  %v17827_v42 = vld [vmem:[%s21129_s4 + $0xd8] sm:$0xff]   ;;  %v17831_v11 = vld [vmem:[%s21129_s4 + $0xd0] sm:$0xff]  }
0x1adf   : > { %v17824_v62 = vld [vmem:[%s21129_s4 + $0x20] sm:$0xff]   ;;  %v17828_v50 = vld [vmem:[%s21129_s4 + $0x18] sm:$0xff]   ;;  %v17832_v19 = vld [vmem:[%s21129_s4 + $0x10] sm:$0xff]  }
0x1ae0   : > { %16565 = vmatpush3.bf16.msra.mxu0 %v17816_v3  ;;  %v17825_v30 = vld [vmem:[%s21129_s4 + $0xa0] sm:$0xff]   ;;  %v17829_v53 = vld [vmem:[%s21129_s4 + $0x98] sm:$0xff]   ;;  %v17833_v47 = vld [vmem:[%s21129_s4 + $0x90] sm:$0xff]  }
0x1ae1   : > { %16587 = vmatpush3.bf16.msra.mxu1 %v17817_v18  ;;  %16566 = vmatprep.subr.bf16.mxu0 %v17818_v16  ;;  %v17834_v20 = vld [vmem:[%s21129_s4 + $0x48] sm:$0xff]   ;;  %v17838_v29 = vld [vmem:[%s21129_s4 + $0x40] sm:$0xff]   ;;  %v17842_v9 = vld [vmem:[%s21129_s4 + $0x178] sm:$0xff]  }
0x1ae2   : > { %16588 = vmatprep.subr.bf16.mxu1 %v17819_v8  ;;  %v17835_v34 = vld [vmem:[%s21129_s4 + $0xc8] sm:$0xff]   ;;  %v17839_v33 = vld [vmem:[%s21129_s4 + $0xc0] sm:$0xff]   ;;  %v17843_v5 = vld [vmem:[%s21129_s4 + $0x1f8] sm:$0xff]  }
0x1ae3   : > { %v17836_v26 = vld [vmem:[%s21129_s4 + $0x8] sm:$0xff]   ;;  %v17840_v51 = vld [vmem:[%s21129_s4] sm:$0xff]   ;;  %v17844_v52 = vld [vmem:[%s21129_s4 + $0x138] sm:$0xff]  }
0x1ae4   : > { %16567 = vmatpush3.bf16.msra.mxu0 %v17820_v63  ;;  %v17837_v55 = vld [vmem:[%s21129_s4 + $0x88] sm:$0xff]   ;;  %v17841_v0 = vld [vmem:[%s21129_s4 + $0x80] sm:$0xff]   ;;  %v17846_v40 = vld [vmem:[%s21129_s4 + $0x170] sm:$0xff]  }
0x1ae5   : > { %16589 = vmatpush3.bf16.msra.mxu1 %v17821_v12  ;;  %16568 = vmatprep.subr.bf16.mxu0 %v17822_v48  ;;  %v14347_v37 = vld [vmem:[%s21128_s3] sm:$0xff]  ;;  %v17845_v4 = vld [vmem:[%s21129_s4 + $0x1b8] sm:$0xff]   ;;  %v17847_v18 = vld [vmem:[%s21129_s4 + $0x1f0] sm:$0xff]  }
0x1ae6   : > { %16590 = vmatprep.subr.bf16.mxu1 %v17823_v24  ;;  %v14352_v22 = vrot.slane %v14347_v37, %v14351_v2  ;;  %v14356_v31 = vrot.slane %v14347_v37, %v14355_v45  ;;  %v14360_v61 = vrot.slane %v14347_v37, %v14359_v36  ;;  %v14364_v43 = vrot.slane %v14347_v37, %v14363_v54  ;;  %v14345_v1 = vld [vmem:[#allocation4] sm:$0xff]  ;;  %v17848_v16 = vld [vmem:[%s21129_s4 + $0x130] sm:$0xff]  }
0x1ae7   : > { %v14368_v38 = vrot.slane %v14347_v37, %v14367_v44  ;;  %v14372_v58 = vrot.slane %v14347_v37, %v14371_v10  ;;  %v14376_v25 = vrot.slane %v14347_v37, %v14375_v21  ;;  %v14380_v3 = vrot.slane %v14347_v37, %v14379_v32  ;;  %v17850_v8 = vld [vmem:[%s21129_s4 + $0x168] sm:$0xff]   ;;  %v17849_v63 = vld [vmem:[%s21129_s4 + $0x1b0] sm:$0xff]  }
0x1ae8   : > { %16569 = vmatpush3.bf16.msra.mxu0 %v17824_v62  ;;  %v14381_v13 = vcombine.low %v14352_v22, %v14356_v31  ;;  %v14382_v15 = vcombine.low %v14360_v61, %v14364_v43  ;;  %v17851_v24 = vld [vmem:[%s21129_s4 + $0x1e8] sm:$0xff]   ;;  %v17864_v36 = vld [vmem:[%s21129_s4 + $0x110] sm:$0xff]  }
0x1ae9   : > { %16591 = vmatpush3.bf16.msra.mxu1 %v17825_v30  ;;  %16570 = vmatprep.subr.bf16.mxu0 %v17826_v39  ;;  %v14398_v12 = vcombine.low %v14368_v38, %v14372_v58  ;;  %v14399_v48 = vcombine.low %v14376_v25, %v14380_v3  ;;  %v17852_v62 = vld [vmem:[%s21129_s4 + $0x128] sm:$0xff]   ;;  %v17854_v30 = vld [vmem:[%s21129_s4 + $0x160] sm:$0xff]  }
0x1aea   : > { %16592 = vmatprep.subr.bf16.mxu1 %v17827_v42  ;;  %v14389_v56 = vrot.slane %v14381_v13, %v20880_v59  ;;  %v14396_v46 = vrot.slane %v14382_v15, %v20880_v59  ;;  %v17853_v39 = vld [vmem:[%s21129_s4 + $0x1a8] sm:$0xff]   ;;  %v17871_v15 = vld [vmem:[%s21129_s4 + $0x1c0] sm:$0xff]  }
0x1aeb   : > { %v14406_v42 = vrot.slane %v14398_v12, %v20880_v59  ;;  %v14346_v2 = vld [vmem:[#allocation4 + $0x8] sm:$0xff] }
0x1aec   : > { %16571 = vmatpush3.bf16.msra.mxu0 %v17828_v50  ;;  %v14397_v27 = vcombine.low %v14389_v56, %v14396_v46  ;;  %v14413_v50 = vrot.slane %v14399_v48, %v20880_v59  ;;  %v17867_v31 = vld [vmem:[%s21129_s4 + $0x1c8] sm:$0xff]   ;;  %v17872_v56 = vld [vmem:[%s21129_s4 + $0x100] sm:$0xff]  }
0x1aed   : > { %16593 = vmatpush3.bf16.msra.mxu1 %v17829_v53  ;;  %16572 = vmatprep.subr.bf16.mxu0 %v17830_v6  ;;  %v17855_v53 = vld [vmem:[%s21129_s4 + $0x1e0] sm:$0xff]   ;;  %v17868_v61 = vld [vmem:[%s21129_s4 + $0x108] sm:$0xff]  }
0x1aee   : > { %16594 = vmatprep.subr.bf16.mxu1 %v17831_v11  ;;  %v14417_v23 = vadd.f32 %v14397_v27, %v14345_v1  ;;  %v17856_v6 = vld [vmem:[%s21129_s4 + $0x120] sm:$0xff]   ;;  %v17858_v11 = vld [vmem:[%s21129_s4 + $0x158] sm:$0xff]  }
0x1aef   : > { %v17873_v46 = vld [vmem:[%s21129_s4 + $0x180] sm:$0xff]  }
0x1af0   : > { %16573 = vmatpush3.bf16.msra.mxu0 %v17832_v19  ;;  %v14428_v7 = vrot.slane %v14417_v23, %v20880_v59  ;;  %v14421_v41 = vcombine.high %v14417_v23, %v14417_v23  ;;  %v17857_v19 = vld [vmem:[%s21129_s4 + $0x1a0] sm:$0xff]  }
0x1af1   : > { %16595 = vmatpush3.bf16.msra.mxu1 %v17833_v47  ;;  %16574 = vmatprep.subr.bf16.mxu0 %v17834_v20  ;;  %v14414_v47 = vcombine.low %v14406_v42, %v14413_v50  ;;  %v17859_v20 = vld [vmem:[%s21129_s4 + $0x1d8] sm:$0xff]  }
0x1af2   : > { %16596 = vmatprep.subr.bf16.mxu1 %v17835_v34  ;;  %v14436_v49 = vcombine.high %v14428_v7, %v14428_v7  ;;  %v14435_v14 = vrot.slane %v14421_v41, %v20880_v59  ;;  %v14463_v57 = vpack.c.bf16 %v14428_v7, %v14428_v7  ;;  %v17860_v34 = vld [vmem:[%s21129_s4 + $0x118] sm:$0xff]  }
0x1af3   : > { %v14418_v45 = vadd.f32 %v14414_v47, %v14346_v2 }
0x1af4   : > { %16575 = vmatpush3.bf16.msra.mxu0 %v17836_v26  ;;  %v14464_v35 = vpack.c.bf16 %v14436_v49, %v14436_v49  ;;  %v14437_v28 = vcombine.high %v14435_v14, %v14435_v14  ;;  %v14465_v60 = vpack.c.bf16 %v14435_v14, %v14435_v14  ;;  %v17862_v26 = vld [vmem:[%s21129_s4 + $0x150] sm:$0xff]  }
0x1af5   : > { %16597 = vmatpush3.bf16.msra.mxu1 %v17837_v55  ;;  %16576 = vmatprep.subr.bf16.mxu0 %v17838_v29  ;;  %v17861_v55 = vld [vmem:[%s21129_s4 + $0x198] sm:$0xff]   ;;  %v17863_v29 = vld [vmem:[%s21129_s4 + $0x1d0] sm:$0xff]   ;;  %v14438_v54 = vcombine.high %v14418_v45, %v14418_v45 }
0x1af6   : > { %16598 = vmatprep.subr.bf16.mxu1 %v17839_v33  ;;  %15022 = vmatprep.mubr.bf16.mxu0 %v14464_v35  ;;  %v14466_v17 = vpack.c.bf16 %v14437_v28, %v14437_v28  ;;  %v14445_v33 = vrot.slane %v14418_v45, %v20880_v59 }
0x1af7   : > { %v14452_v22 = vrot.slane %v14438_v54, %v20880_v59  ;;  %v17869_v59 = vld [vmem:[%s21129_s4 + $0x188] sm:$0xff]  }
0x1af8   : > { %16577 = vmatpush3.bf16.msra.mxu0 %v17840_v51  ;;  %15062 = vmatprep.mubr.bf16.mxu1 %v14466_v17  ;;  %v17866_v51 = vld [vmem:[%s21129_s4 + $0x148] sm:$0xff]   ;;  %v14453_v37 = vcombine.high %v14445_v33, %v14445_v33  ;;  %v14467_v1 = vpack.c.bf16 %v14445_v33, %v14445_v33 }
0x1af9   : > { %16599 = vmatpush3.bf16.msra.mxu1 %v17841_v0  ;;  %16606 = vmatprep.subr.bf16.mxu0 %v17842_v9  ;;  %v17865_v0 = vld [vmem:[%s21129_s4 + $0x190] sm:$0xff]   ;;  %v14454_v9 = vcombine.high %v14452_v22, %v14452_v22  ;;  %v14469_v27 = vpack.c.bf16 %v14452_v22, %v14452_v22 }
0x1afa   : > { %16628 = vmatprep.subr.bf16.mxu1 %v17843_v5  ;;  %v14468_v43 = vpack.c.bf16 %v14453_v37, %v14453_v37  ;;  %v17870_v5 = vld [vmem:[%s21129_s4 + $0x140] sm:$0xff]  }
0x1afb   : > { %15023 = vmatmul.mubr.bf16.vlgmr.msra.gmra.mxu0 %v14463_v57  ;;  %v14470_v13 = vpack.c.bf16 %v14454_v9, %v14454_v9  ;;  %v16191_v57 = vld [vmem:[%s21130_s5] ss:$0 sm:$0xff] }
0x1afc   : > { %16607 = vmatpush3.bf16.msra.mxu0 %v17844_v52  ;;  %15063 = vmatmul.mubr.bf16.vlgmr.msra.gmra.mxu1 %v14465_v60 }
0x1afd   : > { %16608 = vmatprep.subr.bf16.mxu0 %v17846_v40  ;;  %16629 = vmatpush3.bf16.msra.mxu1 %v17845_v4 }
0x1afe   : > { %16630 = vmatprep.subr.bf16.mxu1 %v17847_v18  ;;  %15102 = vmatprep.mubr.bf16.mxu0 %v14468_v43 }
0x1aff   : > { %15142 = vmatprep.mubr.bf16.mxu1 %v14470_v13 }
0x1b00   : > { %16609 = vmatpush3.bf16.msra.mxu0 %v17848_v16 }
0x1b01   : > { %16610 = vmatprep.subr.bf16.mxu0 %v17850_v8  ;;  %16631 = vmatpush3.bf16.msra.mxu1 %v17849_v63 }
0x1b02   : > { %16632 = vmatprep.subr.bf16.mxu1 %v17851_v24 }
0x1b04   : > { %16611 = vmatpush3.bf16.msra.mxu0 %v17852_v62 }
0x1b05   : > { %16612 = vmatprep.subr.bf16.mxu0 %v17854_v30  ;;  %16633 = vmatpush3.bf16.msra.mxu1 %v17853_v39 }
0x1b06   : > { %16634 = vmatprep.subr.bf16.mxu1 %v17855_v53 }
0x1b08   : > { %16613 = vmatpush3.bf16.msra.mxu0 %v17856_v6 }
0x1b09   : > { %16614 = vmatprep.subr.bf16.mxu0 %v17858_v11  ;;  %16635 = vmatpush3.bf16.msra.mxu1 %v17857_v19 }
0x1b0a   : > { %16636 = vmatprep.subr.bf16.mxu1 %v17859_v20 }
0x1b0c   : > { %16615 = vmatpush3.bf16.msra.mxu0 %v17860_v34 }
0x1b0d   : > { %16616 = vmatprep.subr.bf16.mxu0 %v17862_v26  ;;  %16637 = vmatpush3.bf16.msra.mxu1 %v17861_v55 }
0x1b0e   : > { %16638 = vmatprep.subr.bf16.mxu1 %v17863_v29 }
0x1b10   : > { %16617 = vmatpush3.bf16.msra.mxu0 %v17864_v36 }
0x1b11   : > { %16618 = vmatprep.subr.bf16.mxu0 %v17866_v51  ;;  %16639 = vmatpush3.bf16.msra.mxu1 %v17865_v0 }
0x1b12   : > { %16640 = vmatprep.subr.bf16.mxu1 %v17867_v31 }
0x1b14   : > { %16619 = vmatpush3.bf16.msra.mxu0 %v17868_v61 }
0x1b15   : > { %16620 = vmatprep.subr.bf16.mxu0 %v17870_v5  ;;  %16641 = vmatpush3.bf16.msra.mxu1 %v17869_v59 }
0x1b16   : > { %16642 = vmatprep.subr.bf16.mxu1 %v17871_v15 }
0x1b18   : > { %16621 = vmatpush3.bf16.msra.mxu0 %v17872_v56 }
0x1b19   : > { %16643 = vmatpush3.bf16.msra.mxu1 %v17873_v46 }
0x1b1b   : > { %15103 = vmatmul.mubr.bf16.vlgmr.msra.gmra.mxu0 %v14467_v1 }
0x1b1c   : > { %15143 = vmatmul.mubr.bf16.vlgmr.msra.gmra.mxu1 %v14469_v27 }
0x1bbb   : > { %v16578_v23 = vpop.f32.mrf.mxu0 }
0x1bbc   : > { %v16600_v7 = vpop.f32.mrf.mxu1 }
0x1bbd   : > { %v16579_v41 = vpop.f32.mrf.mxu0 }
0x1bbe   : > { %v16601_v44 = vpop.f32.mrf.mxu1  ;;  %v16580_v32 = vadd.f32 %v16579_v41, %v16578_v23 }
0x1bbf   : > { %v16581_v10 = vpop.f32.mrf.mxu0  ;;  %v16602_v28 = vadd.f32 %v16601_v44, %v16600_v7 }
0x1bc0   : > { %v16603_v49 = vpop.f32.mrf.mxu1  ;;  %v15025_v35 = vadd.f32 %v16580_v32, %v16191_v57 }
0x1bc1   : > { %v16582_v14 = vpop.f32.mrf.mxu0 }
0x1bc2   : > { %v16604_v21 = vpop.f32.mrf.mxu1  ;;  %v15065_v38 = vadd.f32 %v16602_v28, %v15025_v35 }
0x1bdb   : > { %v16622_v52 = vpop.f32.mrf.mxu0 }
0x1bdc   : > { %v16644_v60 = vpop.f32.mrf.mxu1 }
0x1bdd   : > { %v16623_v40 = vpop.f32.mrf.mxu0 }
0x1bde   : > { %v16624_v17 = vadd.f32 %v16623_v40, %v16622_v52  ;;  %v16645_v4 = vpop.f32.mrf.mxu1 }
0x1bdf   : > { %v16625_v58 = vpop.f32.mrf.mxu0  ;;  %v16646_v3 = vadd.f32 %v16645_v4, %v16644_v60 }
0x1be0   : > { %v15105_v25 = vadd.f32 %v16624_v17, %v15065_v38  ;;  %v16647_v18 = vpop.f32.mrf.mxu1 }
0x1be1   : > { %v16626_v16 = vpop.f32.mrf.mxu0 }
0x1be2   : > { %v15145_v8 = vadd.f32 %v16646_v3, %v15105_v25  ;;  %v16648_v63 = vpop.f32.mrf.mxu1 }
0x1be4   : > { %15150 = vst.msk [vmem:[#allocation5] sm:$0x3] %vm14288_vm5, %v15145_v8 }
0x1be5 PF: > { %p17354_p6 = scmp.eq.s32.totalorder %s17957_s22, 7  ;;  %s17915_s28 = smov [#allocation5]  }
0x1be6   : > { %s15158_s7 = sshll.u32 %s17915_s28, 4  ;;  %s15159_s7 = int_to_ptr.vmem [resolvable:$true] %s15158_s7 }
0x1be7   : > { %s17874_s26 = scalar_lea.vmem %s15159_s7, 32  ;;  %p17881_p10 = scmp.lt.s32.totalorder %s15159_s7, %s15159_s7 }
0x1be8   : > { %p17875_p7 = scmp.ne.s32.totalorder %s15159_s7, %s17874_s26  ;;  %p17882_p11 = scmp.lt.s32.totalorder %s17874_s26, %s17874_s26 }
0x1bea   : > { %p17876_p8 = pnand %p17875_p7, %p17354_p6  ;;  %p17883_p12 = por %p17882_p11, %p17881_p10 }
0x1bec   : > { %p17877_p9 = pneg %p17876_p8 }
0x1bee   : > { %p17884_p13 = pnand %p17883_p12, %p17877_p9 }
0x1bf0   : > { %17887 = shalt.err (!%p17884_p13)
}
0x1bf1   : > { %17351 = dma.vmem_to_hbm [thread:$0]  (%p17354_p6), %s15159_s7, 32, %s21131_s6, [#allocation6]  }
0x1bf2   : > { %17903 = dma.done.wait (%p17354_p6), [#allocation6], 32  }
0x1bf3   : > { %17905 = vsyncadd (%p17354_p6), [#allocation6], 4294967264 }
0x1bf4 PF: > { %s17_s21 = sadd.s32 1, %s17908_s21  }
0x1bf5   : > { %p14_p0 = scmp.ge.s32.totalorder %s17_s21, 10  }
0x1bf7   :  { %16 = sbr.rel (!%p14_p0) target bundleno = 1 (0x1), region = 208 }
0x1bfc   :  { %15171 = vsyncpa [#allocation6], 1 }
0x1bfd   :  { %15173 = vsyncpa [#allocation6 + $0x1], 1 }

</bundles_post_ra>
